<compile_context>
chip_gen: v5e
topology: v5e:2x2
jax: 0.10.0
libtpu: 0.0.40
codegen_flags: <defaults>
</compile_context>

<pallas_src>
import functools
import math

import jax
import jax.numpy as jnp
from jax.experimental import pallas as pl
from jax.experimental.pallas import tpu as pltpu


# ----------------------------------------------------------------------------
# small in-kernel helpers
# ----------------------------------------------------------------------------
def _round_up(x, m):
    return (x + m - 1) // m * m


def _layer_norm(x, gamma, beta, eps=1e-6):
    # x: (S, D), gamma/beta: (1, D); biased variance, eps=1e-6 exactly as the
    # module's nn.LayerNorm(dim, eps=1e-06).
    mu = jnp.mean(x, axis=-1, keepdims=True)
    var = jnp.mean((x - mu) * (x - mu), axis=-1, keepdims=True)
    return (x - mu) * jax.lax.rsqrt(var + eps) * gamma + beta


def _gelu(x):
    # exact (erf-based) GELU, matching nn.GELU() default.
    return 0.5 * x * (1.0 + jax.lax.erf(x * (1.0 / math.sqrt(2.0))))


# ----------------------------------------------------------------------------
# fused ViT kernel: grid = (batch, depth)
# ----------------------------------------------------------------------------
def vit_fused_kernel(
    patches_ref, base_ref, wemb_ref,
    ln1g_ref, ln1b_ref, wqkv_ref, bqkv_ref, wproj_ref, bproj_ref,
    ln2g_ref, ln2b_ref, wfc1_ref, bfc1_ref, wfc2_ref, bfc2_ref,
    normg_ref, normb_ref,
    o_ref, acc_ref,
    *, n_heads, head_dim, scale, s_real,
):
    layer = pl.program_id(1)
    n_layers = pl.num_programs(1)
    D = n_heads * head_dim

    # --- layer 0: patch embedding (p x p conv == per-patch linear) + cls + pos
    @pl.when(layer == 0)
    def _():
        emb = jnp.dot(patches_ref[0].astype(jnp.bfloat16), wemb_ref[...],
                      preferred_element_type=jnp.float32)
        acc_ref[...] = emb + base_ref[0]          # base = cls/bias/pos, pad rows 0

    x = acc_ref[...]                               # (S_pad, D) f32 residual stream
    S = x.shape[0]

    # --- attention branch -----------------------------------------------------
    xn = _layer_norm(x, ln1g_ref[0], ln1b_ref[0])
    qkv = jnp.dot(xn.astype(jnp.bfloat16), wqkv_ref[0],
                  preferred_element_type=jnp.float32) + bqkv_ref[0]
    qkv16 = qkv.astype(jnp.bfloat16)               # (S, 3D)

    def heads(t):                                  # (S, D) -> (H, S, hd)
        return jnp.transpose(t.reshape(S, n_heads, head_dim), (1, 0, 2))

    q = heads(qkv16[:, 0 * D:1 * D])
    k = heads(qkv16[:, 1 * D:2 * D])
    v = heads(qkv16[:, 2 * D:3 * D])

    s = jnp.einsum("hqd,hkd->hqk", q, k,
                   preferred_element_type=jnp.float32) * scale
    # mask padded key positions (token index >= s_real is padding)
    key_idx = jax.lax.broadcasted_iota(jnp.int32, s.shape, dimension=2)
    s = jnp.where(key_idx < s_real, s, -1e30)
    s = s - jnp.max(s, axis=-1, keepdims=True)
    p = jnp.exp(s)
    denom = jnp.sum(p, axis=-1, keepdims=True)
    p = p * pl.reciprocal(denom, approx=True)      # softmax(dim=-1); attn_drop = identity

    attn = jnp.einsum("hqk,hkd->hqd", p.astype(jnp.bfloat16), v,
                      preferred_element_type=jnp.float32)      # (H, S, hd)
    attn = jnp.transpose(attn, (1, 0, 2)).reshape(S, D)        # transpose(1,2).flatten(2)

    att = jnp.dot(attn.astype(jnp.bfloat16), wproj_ref[0],
                  preferred_element_type=jnp.float32) + bproj_ref[0]
    x = x + att                                    # block_drop = identity (inference)

    # --- MLP branch -------------------------------------------------------------
    xn2 = _layer_norm(x, ln2g_ref[0], ln2b_ref[0])
    h1 = jnp.dot(xn2.astype(jnp.bfloat16), wfc1_ref[0],
                 preferred_element_type=jnp.float32) + bfc1_ref[0]
    h1 = _gelu(h1)
    mlp = jnp.dot(h1.astype(jnp.bfloat16), wfc2_ref[0],
                  preferred_element_type=jnp.float32) + bfc2_ref[0]
    x = x + mlp
    acc_ref[...] = x

    # --- last layer: fold in the final LayerNorm and write the output slab ------
    @pl.when(layer == n_layers - 1)
    def _():
        o_ref[0] = _layer_norm(x, normg_ref[...], normb_ref[...])


# ----------------------------------------------------------------------------
# wrapper: layout glue + single pallas_call
# ----------------------------------------------------------------------------
def vision_transformer_forward(x, params, *, patch_size, n_heads):
    B, C, H, W = x.shape
    p = patch_size
    hp, wp = H // p, W // p
    n_patches = hp * wp

    conv_w, conv_b = params["conv_w"], params["conv_b"]
    D = conv_w.shape[0]
    depth = len(params["blocks"])
    assert D % n_heads == 0
    head_dim = D // n_heads

    S = 1 + n_patches
    # Pad tokens to a sublane multiple (use 128 for large configs where the SxS
    # score matrix becomes the perf-critical lane dim).
    S_pad = _round_up(S, 8)

    # patchify: (B, N, C*p*p), last-dim order (C, p, p) == conv-weight flatten order
    patches = (x.reshape(B, C, hp, p, wp, p)
                 .transpose(0, 2, 4, 1, 3, 5)
                 .reshape(B, n_patches, C * p * p))
    # row 0 = cls slot (zeros), rows >= S = padding (zeros)
    patches = jnp.pad(patches, ((0, 0), (1, S_pad - S), (0, 0)))

    w_emb = conv_w.reshape(D, C * p * p).T.astype(jnp.bfloat16)        # (Cpp, D)

    # additive base: cls token + conv bias + positional embedding (pad rows = 0)
    base = jnp.zeros((1, S_pad, D), jnp.float32)
    base = base.at[0, 0].set(params["cls_token"][0, 0] + params["pos_embed"][0, 0])
    base = base.at[0, 1:S].set(conv_b[None, :] + params["pos_embed"][0, 1:])

    # stack per-block weights over depth -> depth becomes a grid axis
    def stack(name, dtype):
        return jnp.stack([bp[name] for bp in params["blocks"]], 0).astype(dtype)

    ln1g = stack("ln1_g", jnp.float32)
    ln1b = stack("ln1_b", jnp.float32)
    wqkv = stack("w_qkv", jnp.bfloat16)
    bqkv = stack("b_qkv", jnp.float32)
    wproj = stack("w_proj", jnp.bfloat16)
    bproj = stack("b_proj", jnp.float32)
    ln2g = stack("ln2_g", jnp.float32)
    ln2b = stack("ln2_b", jnp.float32)
    wfc1 = stack("w_fc1", jnp.bfloat16)
    bfc1 = stack("b_fc1", jnp.float32)
    wfc2 = stack("w_fc2", jnp.bfloat16)
    bfc2 = stack("b_fc2", jnp.float32)
    normg, normb = params["norm_g"], params["norm_b"]

    def per_batch(shape):      # one batch element per grid step, full trailing dims
        return pl.BlockSpec((1,) + tuple(shape[1:]),
                            lambda b, l: (b,) + (0,) * (len(shape) - 1))

    def per_layer(shape):      # one layer slice per depth grid step
        return pl.BlockSpec((1,) + tuple(shape[1:]),
                            lambda b, l: (l,) + (0,) * (len(shape) - 1))

    def shared(shape):         # constant across the grid (DMA'd once per revisit)
        return pl.BlockSpec(tuple(shape), lambda b, l: (0,) * len(shape))

    in_specs = [
        per_batch(patches.shape),
        shared(base.shape),
        shared(w_emb.shape),
        per_layer(ln1g.shape), per_layer(ln1b.shape),
        per_layer(wqkv.shape), per_layer(bqkv.shape),
        per_layer(wproj.shape), per_layer(bproj.shape),
        per_layer(ln2g.shape), per_layer(ln2b.shape),
        per_layer(wfc1.shape), per_layer(bfc1.shape),
        per_layer(wfc2.shape), per_layer(bfc2.shape),
        shared(normg.shape), shared(normb.shape),
    ]

    kernel = functools.partial(
        vit_fused_kernel,
        n_heads=n_heads, head_dim=head_dim,
        scale=head_dim ** (-0.5), s_real=S)

    out = pl.pallas_call(
        kernel,
        out_shape=jax.ShapeDtypeStruct((B, S_pad, D), jnp.float32),
        grid=(B, depth),
        in_specs=in_specs,
        out_specs=per_batch((B, S_pad, D)),
        scratch_shapes=[pltpu.VMEM((S_pad, D), jnp.float32)],
        compiler_params=pltpu.CompilerParams(
            dimension_semantics=("parallel", "arbitrary"),   # batch across cores (v7x)
            vmem_limit_bytes=64 * 1024 * 1024),
    )(patches, base, w_emb,
      ln1g, ln1b, wqkv, bqkv, wproj, bproj,
      ln2g, ln2b, wfc1, bfc1, wfc2, bfc2,
      normg, normb)

    # drop cls token and sequence padding
    return out[:, 1:S]


# ----------------------------------------------------------------------------
# parameter construction (deterministic, mirrors module __init__ shapes)
# ----------------------------------------------------------------------------
def _xavier_uniform(key, fan_in, fan_out, shape):
    limit = math.sqrt(6.0 / (fan_in + fan_out))
    return jax.random.uniform(key, shape, jnp.float32, minval=-limit, maxval=limit)


def init_vit_params(key, *, img_size, patch_size, n_chan, dim, depth, mlp_ratio):
    n_patches = (img_size // patch_size) ** 2
    keys = iter(jax.random.split(key, 8 + depth * 12))
    params = {}

    # patch embedding conv (kernel=stride=patch_size)
    params["conv_w"] = _xavier_uniform(
        next(keys), n_chan * patch_size * patch_size, dim,
        (dim, n_chan, patch_size, patch_size))
    params["conv_b"] = jax.random.normal(next(keys), (dim,), jnp.float32) * 1e-6

    params["cls_token"] = jnp.zeros((1, 1, dim), jnp.float32)
    params["pos_embed"] = jax.random.normal(
        next(keys), (1, 1 + n_patches, dim), jnp.float32) * 0.02
    # TODO(synk): pos_1d=False (2-D pos embed) and hybr=True branches not implemented
    # (module defaults pos_1d=True, hybr=False are the path implemented here).

    hid = mlp_ratio * dim
    blocks = []
    for _ in range(depth):
        bp = {
            "ln1_g": jnp.ones((1, dim), jnp.float32),
            "ln1_b": jnp.zeros((1, dim), jnp.float32),
            "w_qkv": _xavier_uniform(next(keys), dim, 3 * dim, (dim, 3 * dim)),
            "b_qkv": jax.random.normal(next(keys), (1, 3 * dim), jnp.float32) * 1e-6,
            "w_proj": _xavier_uniform(next(keys), dim, dim, (dim, dim)),
            "b_proj": jax.random.normal(next(keys), (1, dim), jnp.float32) * 1e-6,
            "ln2_g": jnp.ones((1, dim), jnp.float32),
            "ln2_b": jnp.zeros((1, dim), jnp.float32),
            "w_fc1": _xavier_uniform(next(keys), dim, hid, (dim, hid)),
            "b_fc1": jax.random.normal(next(keys), (1, hid), jnp.float32) * 1e-6,
            "w_fc2": _xavier_uniform(next(keys), hid, dim, (hid, dim)),
            "b_fc2": jax.random.normal(next(keys), (1, dim), jnp.float32) * 1e-6,
        }
        blocks.append(bp)
    params["blocks"] = blocks

    params["norm_g"] = jnp.ones((1, dim), jnp.float32)
    params["norm_b"] = jnp.zeros((1, dim), jnp.float32)
    # TODO(synk): self.output Linear (dim -> n_classes) is defined but unused in forward(); omitted.
    return params


# ----------------------------------------------------------------------------
if __name__ == "__main__":
    # small config consistent with the module's structure; D lane-aligned (128),
    # C*p*p = 128 so the patch-embed contraction is also lane-aligned.
    img_size, patch_size = 16, 2
    n_chan, dim, depth, n_heads, mlp_ratio = 32, 128, 3, 4, 4
    batch = 2

    key = jax.random.PRNGKey(0)
    k_param, k_x = jax.random.split(key)
    params = init_vit_params(
        k_param, img_size=img_size, patch_size=patch_size, n_chan=n_chan,
        dim=dim, depth=depth, mlp_ratio=mlp_ratio)

    x = jax.random.normal(k_x, (batch, n_chan, img_size, img_size), jnp.float32)

    fwd = jax.jit(functools.partial(
        vision_transformer_forward, patch_size=patch_size, n_heads=n_heads))
    out = fwd(x, params)
    out = jax.block_until_ready(out)

    n_patches = (img_size // patch_size) ** 2
    assert out.shape == (batch, n_patches, dim), out.shape
    assert bool(jnp.all(jnp.isfinite(out)))
    print("KERNEL_OK")
</pallas_src>

<mosaic_0001>
module attributes {stable_mosaic.version = 11 : i64} {
  func.func @vit_fused_kernel(%arg0: i32, %arg1: i32, %arg2: memref<1x72x128xf32, #tpu.memory_space<vmem>>, %arg3: memref<1x72x128xf32, #tpu.memory_space<vmem>>, %arg4: memref<128x128xbf16, #tpu.memory_space<vmem>>, %arg5: memref<1x1x128xf32, #tpu.memory_space<vmem>>, %arg6: memref<1x1x128xf32, #tpu.memory_space<vmem>>, %arg7: memref<1x128x384xbf16, #tpu.memory_space<vmem>>, %arg8: memref<1x1x384xf32, #tpu.memory_space<vmem>>, %arg9: memref<1x128x128xbf16, #tpu.memory_space<vmem>>, %arg10: memref<1x1x128xf32, #tpu.memory_space<vmem>>, %arg11: memref<1x1x128xf32, #tpu.memory_space<vmem>>, %arg12: memref<1x1x128xf32, #tpu.memory_space<vmem>>, %arg13: memref<1x128x512xbf16, #tpu.memory_space<vmem>>, %arg14: memref<1x1x512xf32, #tpu.memory_space<vmem>>, %arg15: memref<1x512x128xbf16, #tpu.memory_space<vmem>>, %arg16: memref<1x1x128xf32, #tpu.memory_space<vmem>>, %arg17: memref<1x128xf32, #tpu.memory_space<vmem>>, %arg18: memref<1x128xf32, #tpu.memory_space<vmem>>, %arg19: memref<1x72x128xf32, #tpu.memory_space<vmem>>, %arg20: memref<72x128xf32, #tpu.memory_space<vmem>>) attributes {dimension_semantics = [#tpu.dimension_semantics<parallel>, #tpu.dimension_semantics<arbitrary>], iteration_bounds = array<i64: 2, 3>, scalar_prefetch = 0 : i64, scratch_operands = 1 : i64, tpu.core_type = #tpu.core_type<tc>, window_params = [{transform_indices = @transform_0, window_bounds = array<i64: 1, 72, 128>}, {pipeline_mode = #tpu.pipeline_mode<synchronous>, transform_indices = @transform_1, window_bounds = array<i64: 1, 72, 128>}, {pipeline_mode = #tpu.pipeline_mode<synchronous>, transform_indices = @transform_2, window_bounds = array<i64: 128, 128>}, {transform_indices = @transform_3, window_bounds = array<i64: 1, 1, 128>}, {transform_indices = @transform_4, window_bounds = array<i64: 1, 1, 128>}, {transform_indices = @transform_5, window_bounds = array<i64: 1, 128, 384>}, {transform_indices = @transform_6, window_bounds = array<i64: 1, 1, 384>}, {transform_indices = @transform_7, window_bounds = array<i64: 1, 128, 128>}, {transform_indices = @transform_8, window_bounds = array<i64: 1, 1, 128>}, {transform_indices = @transform_9, window_bounds = array<i64: 1, 1, 128>}, {transform_indices = @transform_10, window_bounds = array<i64: 1, 1, 128>}, {transform_indices = @transform_11, window_bounds = array<i64: 1, 128, 512>}, {transform_indices = @transform_12, window_bounds = array<i64: 1, 1, 512>}, {transform_indices = @transform_13, window_bounds = array<i64: 1, 512, 128>}, {transform_indices = @transform_14, window_bounds = array<i64: 1, 1, 128>}, {pipeline_mode = #tpu.pipeline_mode<synchronous>, transform_indices = @transform_15, window_bounds = array<i64: 1, 128>}, {pipeline_mode = #tpu.pipeline_mode<synchronous>, transform_indices = @transform_16, window_bounds = array<i64: 1, 128>}, {transform_indices = @transform_17, window_bounds = array<i64: 1, 72, 128>}]} {
    %c0_i32 = arith.constant 0 : i32
    %0 = arith.cmpi eq, %arg1, %c0_i32 : i32
    %1 = arith.extui %0 : i1 to i32
    %c0_i32_0 = arith.constant 0 : i32
    %2 = arith.cmpi ne, %1, %c0_i32_0 : i32
    scf.if %2 {
      %c0_63 = arith.constant 0 : index
      %c0_64 = arith.constant 0 : index
      %c0_65 = arith.constant 0 : index
      %138 = vector.load %arg2[%c0_63, %c0_64, %c0_65] : memref<1x72x128xf32, #tpu.memory_space<vmem>>, vector<1x72x128xf32>
      %139 = vector.shape_cast %138 : vector<1x72x128xf32> to vector<72x128xf32>
      %140 = arith.truncf %139 : vector<72x128xf32> to vector<72x128xbf16>
      %c0_66 = arith.constant 0 : index
      %c0_67 = arith.constant 0 : index
      %141 = vector.load %arg4[%c0_66, %c0_67] : memref<128x128xbf16, #tpu.memory_space<vmem>>, vector<128x128xbf16>
      %cst_68 = arith.constant dense<0.000000e+00> : vector<72x128xf32>
      %142 = tpu.matmul %140, %141, %cst_68 {dimension_numbers = #tpu.dot_dimension_numbers<[1], [0], [0], [1], [0, 0, 1, 1], [], []>} : vector<72x128xbf16>, vector<128x128xbf16>, vector<72x128xf32> -> vector<72x128xf32>
      %c0_69 = arith.constant 0 : index
      %c0_70 = arith.constant 0 : index
      %c0_71 = arith.constant 0 : index
      %143 = vector.load %arg3[%c0_69, %c0_70, %c0_71] : memref<1x72x128xf32, #tpu.memory_space<vmem>>, vector<1x72x128xf32>
      %144 = vector.shape_cast %143 : vector<1x72x128xf32> to vector<72x128xf32>
      %145 = arith.addf %142, %144 : vector<72x128xf32>
      %c0_72 = arith.constant 0 : index
      %c0_73 = arith.constant 0 : index
      %146 = vector.load %arg20[%c0_72, %c0_73] : memref<72x128xf32, #tpu.memory_space<vmem>>, vector<72x128xf32>
      tpu.vector_store %arg20[%c0_72, %c0_73], %145 {strides = array<i32>} : memref<72x128xf32, #tpu.memory_space<vmem>>, vector<72x128xf32>,
    } else {
    }
    %c0 = arith.constant 0 : index
    %c0_1 = arith.constant 0 : index
    %3 = vector.load %arg20[%c0, %c0_1] : memref<72x128xf32, #tpu.memory_space<vmem>>, vector<72x128xf32>
    %c0_2 = arith.constant 0 : index
    %c0_3 = arith.constant 0 : index
    %c0_4 = arith.constant 0 : index
    %4 = vector.load %arg5[%c0_2, %c0_3, %c0_4] : memref<1x1x128xf32, #tpu.memory_space<vmem>>, vector<1x1x128xf32>
    %5 = vector.shape_cast %4 : vector<1x1x128xf32> to vector<1x128xf32>
    %c0_5 = arith.constant 0 : index
    %c0_6 = arith.constant 0 : index
    %c0_7 = arith.constant 0 : index
    %6 = vector.load %arg6[%c0_5, %c0_6, %c0_7] : memref<1x1x128xf32, #tpu.memory_space<vmem>>, vector<1x1x128xf32>
    %7 = vector.shape_cast %6 : vector<1x1x128xf32> to vector<1x128xf32>
    %cst = arith.constant dense<0.000000e+00> : vector<72xf32>
    %8 = vector.multi_reduction <add>, %3, %cst [1] : vector<72x128xf32> to vector<72xf32>
    %9 = vector.shape_cast %8 : vector<72xf32> to vector<72x1xf32>
    %cst_8 = arith.constant 1.280000e+02 : f32
    %10 = vector.broadcast %cst_8 : f32 to vector<72x1xf32>
    %11 = arith.divf %9, %10 : vector<72x1xf32>
    %12 = vector.broadcast %11 : vector<72x1xf32> to vector<72x128xf32>
    %13 = arith.subf %3, %12 : vector<72x128xf32>
    %14 = vector.broadcast %11 : vector<72x1xf32> to vector<72x128xf32>
    %15 = arith.subf %3, %14 : vector<72x128xf32>
    %16 = arith.mulf %13, %15 : vector<72x128xf32>
    %cst_9 = arith.constant dense<0.000000e+00> : vector<72xf32>
    %17 = vector.multi_reduction <add>, %16, %cst_9 [1] : vector<72x128xf32> to vector<72xf32>
    %18 = vector.shape_cast %17 : vector<72xf32> to vector<72x1xf32>
    %cst_10 = arith.constant 1.280000e+02 : f32
    %19 = vector.broadcast %cst_10 : f32 to vector<72x1xf32>
    %20 = arith.divf %18, %19 : vector<72x1xf32>
    %21 = vector.broadcast %11 : vector<72x1xf32> to vector<72x128xf32>
    %22 = arith.subf %3, %21 : vector<72x128xf32>
    %cst_11 = arith.constant 9.99999997E-7 : f32
    %23 = vector.broadcast %cst_11 : f32 to vector<72x1xf32>
    %24 = arith.addf %20, %23 : vector<72x1xf32>
    %25 = math.rsqrt %24 : vector<72x1xf32>
    %26 = vector.broadcast %25 : vector<72x1xf32> to vector<72x128xf32>
    %27 = arith.mulf %22, %26 : vector<72x128xf32>
    %28 = vector.broadcast %5 : vector<1x128xf32> to vector<72x128xf32>
    %29 = arith.mulf %27, %28 : vector<72x128xf32>
    %30 = vector.broadcast %7 : vector<1x128xf32> to vector<72x128xf32>
    %31 = arith.addf %29, %30 : vector<72x128xf32>
    %32 = arith.truncf %31 : vector<72x128xf32> to vector<72x128xbf16>
    %c0_12 = arith.constant 0 : index
    %c0_13 = arith.constant 0 : index
    %c0_14 = arith.constant 0 : index
    %33 = vector.load %arg7[%c0_12, %c0_13, %c0_14] : memref<1x128x384xbf16, #tpu.memory_space<vmem>>, vector<1x128x384xbf16>
    %34 = vector.shape_cast %33 : vector<1x128x384xbf16> to vector<128x384xbf16>
    %cst_15 = arith.constant dense<0.000000e+00> : vector<72x384xf32>
    %35 = tpu.matmul %32, %34, %cst_15 {dimension_numbers = #tpu.dot_dimension_numbers<[1], [0], [0], [1], [0, 0, 1, 1], [], []>} : vector<72x128xbf16>, vector<128x384xbf16>, vector<72x384xf32> -> vector<72x384xf32>
    %c0_16 = arith.constant 0 : index
    %c0_17 = arith.constant 0 : index
    %c0_18 = arith.constant 0 : index
    %36 = vector.load %arg8[%c0_16, %c0_17, %c0_18] : memref<1x1x384xf32, #tpu.memory_space<vmem>>, vector<1x1x384xf32>
    %37 = vector.shape_cast %36 : vector<1x1x384xf32> to vector<1x384xf32>
    %38 = vector.broadcast %37 : vector<1x384xf32> to vector<72x384xf32>
    %39 = arith.addf %35, %38 : vector<72x384xf32>
    %40 = arith.truncf %39 : vector<72x384xf32> to vector<72x384xbf16>
    %41 = vector.extract_strided_slice %40 {offsets = [0, 0], sizes = [72, 128], strides = [1, 1]} : vector<72x384xbf16> to vector<72x128xbf16>
    %42 = vector.shape_cast %41 : vector<72x128xbf16> to vector<72x4x32xbf16>
    %43 = tpu.transpose %42, [1, 0, 2] : vector<72x4x32xbf16> -> vector<4x72x32xbf16>
    %44 = vector.extract_strided_slice %40 {offsets = [0, 128], sizes = [72, 128], strides = [1, 1]} : vector<72x384xbf16> to vector<72x128xbf16>
    %45 = vector.shape_cast %44 : vector<72x128xbf16> to vector<72x4x32xbf16>
    %46 = tpu.transpose %45, [1, 0, 2] : vector<72x4x32xbf16> -> vector<4x72x32xbf16>
    %47 = vector.extract_strided_slice %40 {offsets = [0, 256], sizes = [72, 128], strides = [1, 1]} : vector<72x384xbf16> to vector<72x128xbf16>
    %48 = vector.shape_cast %47 : vector<72x128xbf16> to vector<72x4x32xbf16>
    %49 = tpu.transpose %48, [1, 0, 2] : vector<72x4x32xbf16> -> vector<4x72x32xbf16>
    "tpu.trace_start"() <{level = 10 : i32, message = "hqd,hkd->hqk"}> : () -> ()
    %cst_19 = arith.constant dense<0.000000e+00> : vector<4x72x72xf32>
    %50 = tpu.matmul %43, %46, %cst_19 {dimension_numbers = #tpu.dot_dimension_numbers<[2], [2], [1], [1], [0, 0, 0, 1, 1, 1], [0], [0]>} : vector<4x72x32xbf16>, vector<4x72x32xbf16>, vector<4x72x72xf32> -> vector<4x72x72xf32>
    "tpu.trace_stop"() : () -> ()
    %cst_20 = arith.constant 0.176776692 : f32
    %51 = vector.broadcast %cst_20 : f32 to vector<4x72x72xf32>
    %52 = arith.mulf %50, %51 : vector<4x72x72xf32>
    %53 = tpu.iota {dimensions = array<i32: 2>} : vector<4x72x72xi32>
    %c65_i32 = arith.constant 65 : i32
    %54 = vector.broadcast %c65_i32 : i32 to vector<4x72x72xi32>
    %55 = arith.cmpi slt, %53, %54 : vector<4x72x72xi32>
    %cst_21 = arith.constant -1.000000e+30 : f32
    %56 = vector.broadcast %cst_21 : f32 to vector<4x72x72xf32>
    %57 = arith.select %55, %52, %56 : vector<4x72x72xi1>, vector<4x72x72xf32>
    %cst_22 = arith.constant dense<0xFF800000> : vector<4x72xf32>
    %58 = vector.multi_reduction <maximumf>, %57, %cst_22 [2] : vector<4x72x72xf32> to vector<4x72xf32>
    %59 = vector.shape_cast %58 : vector<4x72xf32> to vector<4x72x1xf32>
    %60 = vector.broadcast %59 : vector<4x72x1xf32> to vector<4x72x72xf32>
    %61 = arith.subf %57, %60 : vector<4x72x72xf32>
    %62 = math.exp %61 : vector<4x72x72xf32>
    %cst_23 = arith.constant dense<0.000000e+00> : vector<4x72xf32>
    %63 = vector.multi_reduction <add>, %62, %cst_23 [2] : vector<4x72x72xf32> to vector<4x72xf32>
    %64 = vector.shape_cast %63 : vector<4x72xf32> to vector<4x72x1xf32>
    %65 = tpu.reciprocal %64 {approx = true} : vector<4x72x1xf32> -> vector<4x72x1xf32>
    %66 = vector.broadcast %65 : vector<4x72x1xf32> to vector<4x72x72xf32>
    %67 = arith.mulf %62, %66 : vector<4x72x72xf32>
    %68 = arith.truncf %67 : vector<4x72x72xf32> to vector<4x72x72xbf16>
    "tpu.trace_start"() <{level = 10 : i32, message = "hqk,hkd->hqd"}> : () -> ()
    %cst_24 = arith.constant dense<0.000000e+00> : vector<4x72x32xf32>
    %69 = tpu.matmul %68, %49, %cst_24 {dimension_numbers = #tpu.dot_dimension_numbers<[2], [1], [1], [2], [0, 0, 0, 1, 1, 2], [0], [0]>} : vector<4x72x72xbf16>, vector<4x72x32xbf16>, vector<4x72x32xf32> -> vector<4x72x32xf32>
    "tpu.trace_stop"() : () -> ()
    %70 = tpu.transpose %69, [1, 0, 2] : vector<4x72x32xf32> -> vector<72x4x32xf32>
    %71 = vector.shape_cast %70 : vector<72x4x32xf32> to vector<72x128xf32>
    %72 = arith.truncf %71 : vector<72x128xf32> to vector<72x128xbf16>
    %c0_25 = arith.constant 0 : index
    %c0_26 = arith.constant 0 : index
    %c0_27 = arith.constant 0 : index
    %73 = vector.load %arg9[%c0_25, %c0_26, %c0_27] : memref<1x128x128xbf16, #tpu.memory_space<vmem>>, vector<1x128x128xbf16>
    %74 = vector.shape_cast %73 : vector<1x128x128xbf16> to vector<128x128xbf16>
    %cst_28 = arith.constant dense<0.000000e+00> : vector<72x128xf32>
    %75 = tpu.matmul %72, %74, %cst_28 {dimension_numbers = #tpu.dot_dimension_numbers<[1], [0], [0], [1], [0, 0, 1, 1], [], []>} : vector<72x128xbf16>, vector<128x128xbf16>, vector<72x128xf32> -> vector<72x128xf32>
    %c0_29 = arith.constant 0 : index
    %c0_30 = arith.constant 0 : index
    %c0_31 = arith.constant 0 : index
    %76 = vector.load %arg10[%c0_29, %c0_30, %c0_31] : memref<1x1x128xf32, #tpu.memory_space<vmem>>, vector<1x1x128xf32>
    %77 = vector.shape_cast %76 : vector<1x1x128xf32> to vector<1x128xf32>
    %78 = vector.broadcast %77 : vector<1x128xf32> to vector<72x128xf32>
    %79 = arith.addf %75, %78 : vector<72x128xf32>
    %80 = arith.addf %3, %79 : vector<72x128xf32>
    %c0_32 = arith.constant 0 : index
    %c0_33 = arith.constant 0 : index
    %c0_34 = arith.constant 0 : index
    %81 = vector.load %arg11[%c0_32, %c0_33, %c0_34] : memref<1x1x128xf32, #tpu.memory_space<vmem>>, vector<1x1x128xf32>
    %82 = vector.shape_cast %81 : vector<1x1x128xf32> to vector<1x128xf32>
    %c0_35 = arith.constant 0 : index
    %c0_36 = arith.constant 0 : index
    %c0_37 = arith.constant 0 : index
    %83 = vector.load %arg12[%c0_35, %c0_36, %c0_37] : memref<1x1x128xf32, #tpu.memory_space<vmem>>, vector<1x1x128xf32>
    %84 = vector.shape_cast %83 : vector<1x1x128xf32> to vector<1x128xf32>
    %cst_38 = arith.constant dense<0.000000e+00> : vector<72xf32>
    %85 = vector.multi_reduction <add>, %80, %cst_38 [1] : vector<72x128xf32> to vector<72xf32>
    %86 = vector.shape_cast %85 : vector<72xf32> to vector<72x1xf32>
    %cst_39 = arith.constant 1.280000e+02 : f32
    %87 = vector.broadcast %cst_39 : f32 to vector<72x1xf32>
    %88 = arith.divf %86, %87 : vector<72x1xf32>
    %89 = vector.broadcast %88 : vector<72x1xf32> to vector<72x128xf32>
    %90 = arith.subf %80, %89 : vector<72x128xf32>
    %91 = vector.broadcast %88 : vector<72x1xf32> to vector<72x128xf32>
    %92 = arith.subf %80, %91 : vector<72x128xf32>
    %93 = arith.mulf %90, %92 : vector<72x128xf32>
    %cst_40 = arith.constant dense<0.000000e+00> : vector<72xf32>
    %94 = vector.multi_reduction <add>, %93, %cst_40 [1] : vector<72x128xf32> to vector<72xf32>
    %95 = vector.shape_cast %94 : vector<72xf32> to vector<72x1xf32>
    %cst_41 = arith.constant 1.280000e+02 : f32
    %96 = vector.broadcast %cst_41 : f32 to vector<72x1xf32>
    %97 = arith.divf %95, %96 : vector<72x1xf32>
    %98 = vector.broadcast %88 : vector<72x1xf32> to vector<72x128xf32>
    %99 = arith.subf %80, %98 : vector<72x128xf32>
    %cst_42 = arith.constant 9.99999997E-7 : f32
    %100 = vector.broadcast %cst_42 : f32 to vector<72x1xf32>
    %101 = arith.addf %97, %100 : vector<72x1xf32>
    %102 = math.rsqrt %101 : vector<72x1xf32>
    %103 = vector.broadcast %102 : vector<72x1xf32> to vector<72x128xf32>
    %104 = arith.mulf %99, %103 : vector<72x128xf32>
    %105 = vector.broadcast %82 : vector<1x128xf32> to vector<72x128xf32>
    %106 = arith.mulf %104, %105 : vector<72x128xf32>
    %107 = vector.broadcast %84 : vector<1x128xf32> to vector<72x128xf32>
    %108 = arith.addf %106, %107 : vector<72x128xf32>
    %109 = arith.truncf %108 : vector<72x128xf32> to vector<72x128xbf16>
    %c0_43 = arith.constant 0 : index
    %c0_44 = arith.constant 0 : index
    %c0_45 = arith.constant 0 : index
    %110 = vector.load %arg13[%c0_43, %c0_44, %c0_45] : memref<1x128x512xbf16, #tpu.memory_space<vmem>>, vector<1x128x512xbf16>
    %111 = vector.shape_cast %110 : vector<1x128x512xbf16> to vector<128x512xbf16>
    %cst_46 = arith.constant dense<0.000000e+00> : vector<72x512xf32>
    %112 = tpu.matmul %109, %111, %cst_46 {dimension_numbers = #tpu.dot_dimension_numbers<[1], [0], [0], [1], [0, 0, 1, 1], [], []>} : vector<72x128xbf16>, vector<128x512xbf16>, vector<72x512xf32> -> vector<72x512xf32>
    %c0_47 = arith.constant 0 : index
    %c0_48 = arith.constant 0 : index
    %c0_49 = arith.constant 0 : index
    %113 = vector.load %arg14[%c0_47, %c0_48, %c0_49] : memref<1x1x512xf32, #tpu.memory_space<vmem>>, vector<1x1x512xf32>
    %114 = vector.shape_cast %113 : vector<1x1x512xf32> to vector<1x512xf32>
    %115 = vector.broadcast %114 : vector<1x512xf32> to vector<72x512xf32>
    %116 = arith.addf %112, %115 : vector<72x512xf32>
    %cst_50 = arith.constant 5.000000e-01 : f32
    %117 = vector.broadcast %cst_50 : f32 to vector<72x512xf32>
    %118 = arith.mulf %117, %116 : vector<72x512xf32>
    %cst_51 = arith.constant 0.707106769 : f32
    %119 = vector.broadcast %cst_51 : f32 to vector<72x512xf32>
    %120 = arith.mulf %116, %119 : vector<72x512xf32>
    %121 = math.erf %120 : vector<72x512xf32>
    %cst_52 = arith.constant 1.000000e+00 : f32
    %122 = vector.broadcast %cst_52 : f32 to vector<72x512xf32>
    %123 = arith.addf %122, %121 : vector<72x512xf32>
    %124 = arith.mulf %118, %123 : vector<72x512xf32>
    %125 = arith.truncf %124 : vector<72x512xf32> to vector<72x512xbf16>
    %c0_53 = arith.constant 0 : index
    %c0_54 = arith.constant 0 : index
    %c0_55 = arith.constant 0 : index
    %126 = vector.load %arg15[%c0_53, %c0_54, %c0_55] : memref<1x512x128xbf16, #tpu.memory_space<vmem>>, vector<1x512x128xbf16>
    %127 = vector.shape_cast %126 : vector<1x512x128xbf16> to vector<512x128xbf16>
    %cst_56 = arith.constant dense<0.000000e+00> : vector<72x128xf32>
    %128 = tpu.matmul %125, %127, %cst_56 {dimension_numbers = #tpu.dot_dimension_numbers<[1], [0], [0], [1], [0, 0, 1, 1], [], []>} : vector<72x512xbf16>, vector<512x128xbf16>, vector<72x128xf32> -> vector<72x128xf32>
    %c0_57 = arith.constant 0 : index
    %c0_58 = arith.constant 0 : index
    %c0_59 = arith.constant 0 : index
    %129 = vector.load %arg16[%c0_57, %c0_58, %c0_59] : memref<1x1x128xf32, #tpu.memory_space<vmem>>, vector<1x1x128xf32>
    %130 = vector.shape_cast %129 : vector<1x1x128xf32> to vector<1x128xf32>
    %131 = vector.broadcast %130 : vector<1x128xf32> to vector<72x128xf32>
    %132 = arith.addf %128, %131 : vector<72x128xf32>
    %133 = arith.addf %80, %132 : vector<72x128xf32>
    %c0_60 = arith.constant 0 : index
    %c0_61 = arith.constant 0 : index
    %134 = vector.load %arg20[%c0_60, %c0_61] : memref<72x128xf32, #tpu.memory_space<vmem>>, vector<72x128xf32>
    tpu.vector_store %arg20[%c0_60, %c0_61], %133 {strides = array<i32>} : memref<72x128xf32, #tpu.memory_space<vmem>>, vector<72x128xf32>,
    %c2_i32 = arith.constant 2 : i32
    %135 = arith.cmpi eq, %arg1, %c2_i32 : i32
    %136 = arith.extui %135 : i1 to i32
    %c0_i32_62 = arith.constant 0 : i32
    %137 = arith.cmpi ne, %136, %c0_i32_62 : i32
    scf.if %137 {
      %c0_63 = arith.constant 0 : index
      %c0_64 = arith.constant 0 : index
      %138 = vector.load %arg17[%c0_63, %c0_64] : memref<1x128xf32, #tpu.memory_space<vmem>>, vector<1x128xf32>
      %c0_65 = arith.constant 0 : index
      %c0_66 = arith.constant 0 : index
      %139 = vector.load %arg18[%c0_65, %c0_66] : memref<1x128xf32, #tpu.memory_space<vmem>>, vector<1x128xf32>
      %cst_67 = arith.constant dense<0.000000e+00> : vector<72xf32>
      %140 = vector.multi_reduction <add>, %133, %cst_67 [1] : vector<72x128xf32> to vector<72xf32>
      %141 = vector.shape_cast %140 : vector<72xf32> to vector<72x1xf32>
      %cst_68 = arith.constant 1.280000e+02 : f32
      %142 = vector.broadcast %cst_68 : f32 to vector<72x1xf32>
      %143 = arith.divf %141, %142 : vector<72x1xf32>
      %144 = vector.broadcast %143 : vector<72x1xf32> to vector<72x128xf32>
      %145 = arith.subf %133, %144 : vector<72x128xf32>
      %146 = vector.broadcast %143 : vector<72x1xf32> to vector<72x128xf32>
      %147 = arith.subf %133, %146 : vector<72x128xf32>
      %148 = arith.mulf %145, %147 : vector<72x128xf32>
      %cst_69 = arith.constant dense<0.000000e+00> : vector<72xf32>
      %149 = vector.multi_reduction <add>, %148, %cst_69 [1] : vector<72x128xf32> to vector<72xf32>
      %150 = vector.shape_cast %149 : vector<72xf32> to vector<72x1xf32>
      %cst_70 = arith.constant 1.280000e+02 : f32
      %151 = vector.broadcast %cst_70 : f32 to vector<72x1xf32>
      %152 = arith.divf %150, %151 : vector<72x1xf32>
      %153 = vector.broadcast %143 : vector<72x1xf32> to vector<72x128xf32>
      %154 = arith.subf %133, %153 : vector<72x128xf32>
      %cst_71 = arith.constant 9.99999997E-7 : f32
      %155 = vector.broadcast %cst_71 : f32 to vector<72x1xf32>
      %156 = arith.addf %152, %155 : vector<72x1xf32>
      %157 = math.rsqrt %156 : vector<72x1xf32>
      %158 = vector.broadcast %157 : vector<72x1xf32> to vector<72x128xf32>
      %159 = arith.mulf %154, %158 : vector<72x128xf32>
      %160 = vector.broadcast %138 : vector<1x128xf32> to vector<72x128xf32>
      %161 = arith.mulf %159, %160 : vector<72x128xf32>
      %162 = vector.broadcast %139 : vector<1x128xf32> to vector<72x128xf32>
      %163 = arith.addf %161, %162 : vector<72x128xf32>
      %c0_72 = arith.constant 0 : index
      %c0_73 = arith.constant 0 : index
      %c0_74 = arith.constant 0 : index
      %164 = vector.load %arg19[%c0_72, %c0_73, %c0_74] : memref<1x72x128xf32, #tpu.memory_space<vmem>>, vector<1x72x128xf32>
      %165 = vector.shape_cast %164 : vector<1x72x128xf32> to vector<72x128xf32>
      %166 = vector.shape_cast %163 : vector<72x128xf32> to vector<1x72x128xf32>
      tpu.vector_store %arg19[%c0_72, %c0_73, %c0_74], %166 {strides = array<i32>} : memref<1x72x128xf32, #tpu.memory_space<vmem>>, vector<1x72x128xf32>,
    } else {
    }
    return
  }
  func.func @transform_0(%arg0: i32, %arg1: i32) -> (i32, i32, i32) {
    %c0_i32 = arith.constant 0 : i32
    %c0_i32_0 = arith.constant 0 : i32
    %c0_i32_1 = arith.constant 0 : i32
    return %arg0, %c0_i32, %c0_i32_0 : i32, i32, i32
  }
  func.func @transform_1(%arg0: i32, %arg1: i32) -> (i32, i32, i32) {
    %c0_i32 = arith.constant 0 : i32
    %c0_i32_0 = arith.constant 0 : i32
    %c0_i32_1 = arith.constant 0 : i32
    %c0_i32_2 = arith.constant 0 : i32
    return %c0_i32, %c0_i32_0, %c0_i32_1 : i32, i32, i32
  }
  func.func @transform_2(%arg0: i32, %arg1: i32) -> (i32, i32) {
    %c0_i32 = arith.constant 0 : i32
    %c0_i32_0 = arith.constant 0 : i32
    %c0_i32_1 = arith.constant 0 : i32
    return %c0_i32, %c0_i32_0 : i32, i32
  }
  func.func @transform_3(%arg0: i32, %arg1: i32) -> (i32, i32, i32) {
    %c0_i32 = arith.constant 0 : i32
    %c0_i32_0 = arith.constant 0 : i32
    %c0_i32_1 = arith.constant 0 : i32
    return %arg1, %c0_i32, %c0_i32_0 : i32, i32, i32
  }
  func.func @transform_4(%arg0: i32, %arg1: i32) -> (i32, i32, i32) {
    %c0_i32 = arith.constant 0 : i32
    %c0_i32_0 = arith.constant 0 : i32
    %c0_i32_1 = arith.constant 0 : i32
    return %arg1, %c0_i32, %c0_i32_0 : i32, i32, i32
  }
  func.func @transform_5(%arg0: i32, %arg1: i32) -> (i32, i32, i32) {
    %c0_i32 = arith.constant 0 : i32
    %c0_i32_0 = arith.constant 0 : i32
    %c0_i32_1 = arith.constant 0 : i32
    return %arg1, %c0_i32, %c0_i32_0 : i32, i32, i32
  }
  func.func @transform_6(%arg0: i32, %arg1: i32) -> (i32, i32, i32) {
    %c0_i32 = arith.constant 0 : i32
    %c0_i32_0 = arith.constant 0 : i32
    %c0_i32_1 = arith.constant 0 : i32
    return %arg1, %c0_i32, %c0_i32_0 : i32, i32, i32
  }
  func.func @transform_7(%arg0: i32, %arg1: i32) -> (i32, i32, i32) {
    %c0_i32 = arith.constant 0 : i32
    %c0_i32_0 = arith.constant 0 : i32
    %c0_i32_1 = arith.constant 0 : i32
    return %arg1, %c0_i32, %c0_i32_0 : i32, i32, i32
  }
  func.func @transform_8(%arg0: i32, %arg1: i32) -> (i32, i32, i32) {
    %c0_i32 = arith.constant 0 : i32
    %c0_i32_0 = arith.constant 0 : i32
    %c0_i32_1 = arith.constant 0 : i32
    return %arg1, %c0_i32, %c0_i32_0 : i32, i32, i32
  }
  func.func @transform_9(%arg0: i32, %arg1: i32) -> (i32, i32, i32) {
    %c0_i32 = arith.constant 0 : i32
    %c0_i32_0 = arith.constant 0 : i32
    %c0_i32_1 = arith.constant 0 : i32
    return %arg1, %c0_i32, %c0_i32_0 : i32, i32, i32
  }
  func.func @transform_10(%arg0: i32, %arg1: i32) -> (i32, i32, i32) {
    %c0_i32 = arith.constant 0 : i32
    %c0_i32_0 = arith.constant 0 : i32
    %c0_i32_1 = arith.constant 0 : i32
    return %arg1, %c0_i32, %c0_i32_0 : i32, i32, i32
  }
  func.func @transform_11(%arg0: i32, %arg1: i32) -> (i32, i32, i32) {
    %c0_i32 = arith.constant 0 : i32
    %c0_i32_0 = arith.constant 0 : i32
    %c0_i32_1 = arith.constant 0 : i32
    return %arg1, %c0_i32, %c0_i32_0 : i32, i32, i32
  }
  func.func @transform_12(%arg0: i32, %arg1: i32) -> (i32, i32, i32) {
    %c0_i32 = arith.constant 0 : i32
    %c0_i32_0 = arith.constant 0 : i32
    %c0_i32_1 = arith.constant 0 : i32
    return %arg1, %c0_i32, %c0_i32_0 : i32, i32, i32
  }
  func.func @transform_13(%arg0: i32, %arg1: i32) -> (i32, i32, i32) {
    %c0_i32 = arith.constant 0 : i32
    %c0_i32_0 = arith.constant 0 : i32
    %c0_i32_1 = arith.constant 0 : i32
    return %arg1, %c0_i32, %c0_i32_0 : i32, i32, i32
  }
  func.func @transform_14(%arg0: i32, %arg1: i32) -> (i32, i32, i32) {
    %c0_i32 = arith.constant 0 : i32
    %c0_i32_0 = arith.constant 0 : i32
    %c0_i32_1 = arith.constant 0 : i32
    return %arg1, %c0_i32, %c0_i32_0 : i32, i32, i32
  }
  func.func @transform_15(%arg0: i32, %arg1: i32) -> (i32, i32) {
    %c0_i32 = arith.constant 0 : i32
    %c0_i32_0 = arith.constant 0 : i32
    %c0_i32_1 = arith.constant 0 : i32
    return %c0_i32, %c0_i32_0 : i32, i32
  }
  func.func @transform_16(%arg0: i32, %arg1: i32) -> (i32, i32) {
    %c0_i32 = arith.constant 0 : i32
    %c0_i32_0 = arith.constant 0 : i32
    %c0_i32_1 = arith.constant 0 : i32
    return %c0_i32, %c0_i32_0 : i32, i32
  }
  func.func @transform_17(%arg0: i32, %arg1: i32) -> (i32, i32, i32) {
    %c0_i32 = arith.constant 0 : i32
    %c0_i32_0 = arith.constant 0 : i32
    %c0_i32_1 = arith.constant 0 : i32
    return %arg0, %c0_i32, %c0_i32_0 : i32, i32, i32
  }
}

</mosaic_0001>

<bundles_post_ra>
// kernel: vision_transformer_forward.1
= control target key start
LH: loop header
LB: loop body
LE: loop exit
PB: predicated region body
PF: predicated region fallthrough
CT: control target
= control target key end

     0   :  { %s11277_s24 = smov 0   ;;  %s11279_s25 = smov 0   ;;  %s17297_s0 = inlined_call_operand.vmem [shape: f32[2,72,128], index: 0, kind: input, shape index: {}]   ;;  %s17298_s1 = inlined_call_operand.vmem [shape: f32[1,72,128], index: 1, kind: input, shape index: {}]   ;;  %s17299_s2 = inlined_call_operand.vmem [shape: bf16[128,128], index: 2, kind: input, shape index: {}]   ;;  %s17300_s3 = inlined_call_operand.vmem [shape: f32[3,1,128], index: 3, kind: input, shape index: {}]   ;;  %s17301_s4 = inlined_call_operand.vmem [shape: f32[3,1,128], index: 4, kind: input, shape index: {}]   ;;  %s17302_s5 = inlined_call_operand.vmem [shape: bf16[3,128,384], index: 5, kind: input, shape index: {}]   ;;  %s17303_s6 = inlined_call_operand.vmem [shape: f32[3,1,384], index: 6, kind: input, shape index: {}]   ;;  %s17304_s7 = inlined_call_operand.vmem [shape: bf16[3,128,128], index: 7, kind: input, shape index: {}]   ;;  %s17305_s8 = inlined_call_operand.vmem [shape: f32[3,1,128], index: 8, kind: input, shape index: {}]   ;;  %s17306_s9 = inlined_call_operand.vmem [shape: f32[3,1,128], index: 9, kind: input, shape index: {}]   ;;  %s17307_s10 = inlined_call_operand.vmem [shape: f32[3,1,128], index: 10, kind: input, shape index: {}]   ;;  %s17308_s11 = inlined_call_operand.vmem [shape: bf16[3,128,512], index: 11, kind: input, shape index: {}]   ;;  %s17309_s12 = inlined_call_operand.vmem [shape: f32[3,1,512], index: 12, kind: input, shape index: {}]   ;;  %s17310_s13 = inlined_call_operand.vmem [shape: bf16[3,512,128], index: 13, kind: input, shape index: {}]   ;;  %s17311_s14 = inlined_call_operand.vmem [shape: f32[3,1,128], index: 14, kind: input, shape index: {}]   ;;  %s17312_s15 = inlined_call_operand.vmem [shape: f32[1,128], index: 15, kind: input, shape index: {}]   ;;  %s17313_s16 = inlined_call_operand.vmem [shape: f32[1,128], index: 16, kind: input, shape index: {}]   ;;  %s17314_s17 = inlined_call_operand.vmem [shape: f32[2,72,128], index: 17, kind: output, shape index: {}]  }
   0x1   :  { %17439 = sst [smem:[#allocation93_spill]] %s17297_s0  ;;  %s11281_s26 = smov 0  }
   0x2   :  { %17440 = sst [smem:[#allocation94_spill]] %s17298_s1  ;;  %s11283_s27 = smov 0  }
   0x3   :  { %17441 = sst [smem:[#allocation95_spill]] %s17299_s2  ;;  %s11285_s28 = smov 0  }
   0x4   :  { %17442 = sst [smem:[#allocation96_spill]] %s17300_s3 }
   0x5   :  { %17443 = sst [smem:[#allocation97_spill]] %s17301_s4 }
   0x6   :  { %17444 = sst [smem:[#allocation98_spill]] %s17302_s5 }
   0x7   :  { %17445 = sst [smem:[#allocation99_spill]] %s17304_s7 }
   0x8   :  { %17446 = sst [smem:[#allocation100_spill]] %s17312_s15 }
   0x9   :  { %17447 = sst [smem:[#allocation101_spill]] %s17313_s16 }
   0xa LB: > { %17448 = sst [smem:[#allocation3_spill]] %s11163_s24  ;;  %s36_s29 = sadd.s32 1, %s11171_s26  ;;  %s11179_s28 = sphi %s11285_s28, %s27_s28   ;;  %s11175_s27 = sphi %s11283_s27, %s17954_s27   ;;  %s11171_s26 = sphi %s11281_s26, %s17953_s26   ;;  %s11167_s25 = sphi %s11279_s25, %s17952_s25   ;;  %s11163_s24 = sphi %s11277_s24, %s17951_s24  }
   0xb   : > { %17449 = sst [smem:[#allocation4_spill]] %s11171_s26  ;;  %s39_s0 = sadd.s32 1, %s11175_s27 }
   0xc   : > { %17450 = sst [smem:[#allocation5_spill]] %s11175_s27  ;;  %p37_p0 = scmp.ge.s32.totalorder %s36_s29, 3 }
   0xd   : > { %17451 = sst [smem:[#allocation6_spill]] %s11179_s28  ;;  %p10105_p1 = scmp.ge.s32.totalorder %s11179_s28, 1 }
   0xe   : > { %p605_p2 = scmp.lt.s32.totalorder %s11179_s28, 7  ;;  %s17956_s29 = smov (%p37_p0, %s36_s29), 0 }
   0xf   : > { %17452 = sst [smem:[#allocation7_spill]] %s17956_s29  ;;  %s17958_s0 = smov (!%p37_p0, %s39_s0), %s11175_s27 }
  0x10   : > { %p606_p3 = pnand %p10105_p1, %p605_p2  ;;  %p41_p4 = scmp.ge.s32.totalorder %s17958_s0, 2 }
  0x12   : > { %s17960_s0 = smov (%p41_p4, %s17958_s0), 0  ;;  %609 = sbr.rel (%p606_p3) target bundleno = 3321 (0xcf9), region = 88 }
  0x13   : > { %17453 = sst [smem:[#allocation8_spill]] %s17960_s0 }
  0x17   : > { %p703_p5 = scmp.lt.s32.totalorder %s11167_s25, 1  ;;  %p708_p6 = scmp.lt.s32.totalorder %s11163_s24, 2 }
  0x18   : > { %s17456_s27 = sld [smem:[#allocation93_spill]] }
  0x19   : > { %s17962_s25 = smov (!%p703_p5, %s11167_s25), 1  ;;  %s17457_s5 = sld [smem:[#allocation98_spill]] }
  0x1a   : > { %s11311_s30 = scalar_select %p708_p6, %s11163_s24, 2 }
  0x1b   : > { %s10743_s18 = smul.u32 72, %s17962_s25  ;;  %s17458_s7 = sld [smem:[#allocation99_spill]] }
  0x1c   : > { %s10744_s28 = smul.u32 192, %s11311_s30  ;;  %s10612_s15 = sshll.u32 %s11311_s30, 6 }
  0x1d   : > { %s10745_s16 = smul.u32 3, %s11311_s30  ;;  %s10613_s19 = sshll.u32 %s11311_s30, 8 }
  0x1e   : > { %s11324_s26 = scalar_lea.vmem %s17456_s27, %s10743_s18  ;;  %s11361_s21 = scalar_lea.vmem %s17308_s11, %s10613_s19 }
  0x1f   : > { %s11332_s25 = scalar_lea.vmem %s17457_s5, %s10744_s28  ;;  %s11342_s29 = scalar_lea.vmem %s17303_s6, %s10745_s16 }
  0x20   : > { %s11371_s3 = scalar_lea.vmem %s17310_s13, %s10613_s19  ;;  %s753_s28 = scalar_lea.vmem %s17311_s14, %s11311_s30 }
  0x21   : > { %s11337_s20 = scalar_lea.vmem %s17458_s7, %s10612_s15  ;;  %s10112_s15 = sshll.u32 %s11311_s30, 2 }
  0x22   : > { %s11366_s27 = scalar_lea.vmem %s17309_s12, %s10112_s15  ;;  %s11380_s7 = scalar_lea.vmem %s17314_s17, %s10743_s18 }
  0x23   : > { %s17459_s1 = sld [smem:[#allocation3_spill]] }
  0x29   : > { %p10116_p7 = scmp.ne.s32.totalorder %s17459_s1, 0 }
  0x2a   : > { %s17460_s22 = sld [smem:[#allocation95_spill]] (!%p10116_p7) }
  0x2b   : > { %763 = sbr.rel (%p10116_p7) target bundleno = 236 (0xec), region = 92  ;;  %s17461_s2 = sld [smem:[#allocation94_spill]] (!%p10116_p7) }
  0x30   : > { %v10622_v0 = vld [vmem:[%s17460_s22 + $0x38] sm:$0xff]  ;;  %v10621_v1 = vld [vmem:[%s17460_s22 + $0x30] sm:$0xff]  ;;  %v10620_v2 = vld [vmem:[%s17460_s22 + $0x28] sm:$0xff] }
  0x31   : > { %10721 = vmatpush.bf16.msra.mxu3 %v10622_v0  ;;  %10720 = vmatpush.bf16.msra.mxu2 %v10622_v0  ;;  %v10619_v3 = vld [vmem:[%s17460_s22 + $0x20] sm:$0xff]  ;;  %v10618_v4 = vld [vmem:[%s17460_s22 + $0x18] sm:$0xff]  ;;  %v10617_v5 = vld [vmem:[%s17460_s22 + $0x10] sm:$0xff] }
  0x32   : > { %851 = vmatpush.bf16.msra.mxu0 %v10622_v0  ;;  %10719 = vmatpush.bf16.msra.mxu1 %v10622_v0  ;;  %v10616_v6 = vld [vmem:[%s17460_s22 + $0x8] sm:$0xff]  ;;  %v10615_v7 = vld [vmem:[%s17460_s22] sm:$0xff]  ;;  %v770_v8 = vld [vmem:[%s11324_s26 + $0x30] sm:$0xff] }
  0x33   : > { %v771_v9 = vld [vmem:[%s11324_s26 + $0x38] sm:$0xff]  ;;  %v768_v10 = vld [vmem:[%s11324_s26 + $0x20] sm:$0xff]  ;;  %v769_v11 = vld [vmem:[%s11324_s26 + $0x28] sm:$0xff] }
  0x34   : > { %v764_v12 = vld [vmem:[%s11324_s26] sm:$0xff]  ;;  %v765_v13 = vld [vmem:[%s11324_s26 + $0x8] sm:$0xff]  ;;  %v766_v14 = vld [vmem:[%s11324_s26 + $0x10] sm:$0xff]  ;;  %v776_v16 = vpack.c.bf16 %v771_v9, %v770_v8  ;;  %v775_v17 = vpack.c.bf16 %v769_v11, %v768_v10 }
  0x35   : > { %10724 = vmatpush.bf16.msra.mxu3 %v10621_v1  ;;  %10723 = vmatpush.bf16.msra.mxu2 %v10621_v1  ;;  %v767_v15 = vld [vmem:[%s11324_s26 + $0x18] sm:$0xff]  ;;  %v773_v18 = vpack.c.bf16 %v765_v13, %v764_v12  ;;  %v772_v20 = vld [vmem:[%s11324_s26 + $0x40] sm:$0xff]  ;;  %v796_v23 = vld [vmem:[%s17461_s2 + $0x10] sm:$0xff] }
  0x36   : > { %852 = vmatpush.bf16.msra.mxu0 %v10621_v1  ;;  %10722 = vmatpush.bf16.msra.mxu1 %v10621_v1  ;;  %v774_v19 = vpack.c.bf16 %v767_v15, %v766_v14  ;;  %v777_v21 = vpack.c.bf16 %v772_v20, %v772_v20  ;;  %v794_v22 = vld [vmem:[%s17461_s2] sm:$0xff]  ;;  %v800_v28 = vld [vmem:[%s17461_s2 + $0x30] sm:$0xff]  ;;  %v795_v34 = vld [vmem:[%s17461_s2 + $0x8] sm:$0xff] }
  0x37   : > { %v798_v29 = vld [vmem:[%s17461_s2 + $0x20] sm:$0xff]  ;;  %v797_v35 = vld [vmem:[%s17461_s2 + $0x18] sm:$0xff]  ;;  %v799_v41 = vld [vmem:[%s17461_s2 + $0x28] sm:$0xff] }
  0x38   : > { %v801_v40 = vld [vmem:[%s17461_s2 + $0x38] sm:$0xff]  ;;  %v802_v46 = vld [vmem:[%s17461_s2 + $0x40] sm:$0xff] }
  0x39   : > { %10727 = vmatpush.bf16.msra.mxu3 %v10620_v2  ;;  %10726 = vmatpush.bf16.msra.mxu2 %v10620_v2 }
  0x3a   : > { %853 = vmatpush.bf16.msra.mxu0 %v10620_v2  ;;  %10725 = vmatpush.bf16.msra.mxu1 %v10620_v2 }
  0x3d   : > { %10730 = vmatpush.bf16.msra.mxu3 %v10619_v3  ;;  %10729 = vmatpush.bf16.msra.mxu2 %v10619_v3 }
  0x3e   : > { %854 = vmatpush.bf16.msra.mxu0 %v10619_v3  ;;  %10728 = vmatpush.bf16.msra.mxu1 %v10619_v3 }
  0x41   : > { %10733 = vmatpush.bf16.msra.mxu3 %v10618_v4  ;;  %10732 = vmatpush.bf16.msra.mxu2 %v10618_v4 }
  0x42   : > { %855 = vmatpush.bf16.msra.mxu0 %v10618_v4  ;;  %10731 = vmatpush.bf16.msra.mxu1 %v10618_v4 }
  0x45   : > { %10736 = vmatpush.bf16.msra.mxu3 %v10617_v5  ;;  %10735 = vmatpush.bf16.msra.mxu2 %v10617_v5 }
  0x46   : > { %856 = vmatpush.bf16.msra.mxu0 %v10617_v5  ;;  %10734 = vmatpush.bf16.msra.mxu1 %v10617_v5 }
  0x49   : > { %10739 = vmatpush.bf16.msra.mxu3 %v10616_v6  ;;  %10738 = vmatpush.bf16.msra.mxu2 %v10616_v6 }
  0x4a   : > { %857 = vmatpush.bf16.msra.mxu0 %v10616_v6  ;;  %10737 = vmatpush.bf16.msra.mxu1 %v10616_v6 }
  0x4d   : > { %10742 = vmatpush.bf16.msra.mxu3 %v10615_v7  ;;  %10741 = vmatpush.bf16.msra.mxu2 %v10615_v7 }
  0x4e   : > { %858 = vmatpush.bf16.msra.mxu0 %v10615_v7  ;;  %10740 = vmatpush.bf16.msra.mxu1 %v10615_v7 }
  0x50   : > { %874 = vmatmul.bf16.vlgmr.msra.gmra.mxu3 %v776_v16  ;;  %869 = vmatmul.bf16.vlgmr.msra.gmra.mxu2 %v775_v17 }
  0x51   : > { %859 = vmatmul.bf16.vlgmr.msra.gmra.mxu0 %v773_v18  ;;  %864 = vmatmul.bf16.vlgmr.msra.gmra.mxu1 %v774_v19 }
  0x60   : > { %879 = vmatmul.bf16.gmra.mxu3 %v777_v21 }
  0xce   : > { %v860_v24 = vpop.f32.mrf.mxu0  ;;  %v865_v25 = vpop.f32.mrf.mxu1 }
  0xcf   : > { %v861_v26 = vadd.f32 %v860_v24, %v794_v22  ;;  %v866_v27 = vadd.f32 %v865_v25, %v796_v23 }
  0xd1   : > { %884 = vst [vmem:[#allocation2 + $0x30] sm:$0xff] %v861_v26 }
  0xd2   : > { %886 = vst [vmem:[#allocation2 + $0x18] sm:$0xff] %v866_v27 }
  0xd3   : > { %v875_v30 = vpop.f32.mrf.mxu3  ;;  %v870_v31 = vpop.f32.mrf.mxu2 }
  0xd4   : > { %v876_v32 = vadd.f32 %v875_v30, %v800_v28  ;;  %v871_v33 = vadd.f32 %v870_v31, %v798_v29 }
  0xd6   : > { %890 = vst [vmem:[#allocation2 + $0x40] sm:$0xff] %v876_v32  ;;  %v862_v36 = vpop.f32.mrf.mxu0  ;;  %v867_v37 = vpop.f32.mrf.mxu1 }
  0xd7   : > { %888 = vst [vmem:[#allocation2 + $0x20] sm:$0xff] %v871_v33  ;;  %v863_v38 = vadd.f32 %v862_v36, %v795_v34  ;;  %v868_v39 = vadd.f32 %v867_v37, %v797_v35 }
  0xd9   : > { %885 = vst [vmem:[#allocation2] sm:$0xff] %v863_v38 }
  0xda   : > { %887 = vst [vmem:[#allocation2 + $0x10] sm:$0xff] %v868_v39 }
  0xdb   : > { %v877_v42 = vpop.f32.mrf.mxu3  ;;  %v872_v43 = vpop.f32.mrf.mxu2 }
  0xdc   : > { %v878_v44 = vadd.f32 %v877_v42, %v801_v40  ;;  %v873_v45 = vadd.f32 %v872_v43, %v799_v41 }
  0xde   : > { %891 = vst [vmem:[#allocation2 + $0x38] sm:$0xff] %v878_v44 }
  0xdf   : > { %889 = vst [vmem:[#allocation2 + $0x28] sm:$0xff] %v873_v45 }
  0xe3   : > { %v880_v47 = vpop.f32.mrf.mxu3 }
  0xe4   : > { %v881_v48 = vadd.f32 %v880_v47, %v802_v46 }
  0xe6   : > { %892 = vst [vmem:[#allocation2 + $0x8] sm:$0xff] %v881_v48 }
  0xeb   : > { %v882_v49 = vpop.f32.mrf.mxu3 }
  0xec PF: > { %v895_v50 = vld [vmem:[#allocation2 + $0x18] sm:$0xff]  ;;  %v893_v51 = vld [vmem:[#allocation2 + $0x30] sm:$0xff]  ;;  %v897_v52 = vld [vmem:[#allocation2 + $0x20] sm:$0xff]  ;;  %v11181_v57 = vmov 128.0   ;;  %s17463_s23 = sld [smem:[#allocation96_spill]]  ;;  %s11183_s24 = smov 64  }
  0xed   : > { %908 = vadd.xlane.f32.xlu1 %v895_v50  ;;  %904 = vadd.xlane.f32.xlu0 %v893_v51  ;;  %v896_v53 = vld [vmem:[#allocation2 + $0x10] sm:$0xff]  ;;  %v894_v54 = vld [vmem:[#allocation2] sm:$0xff]  ;;  %v898_v55 = vld [vmem:[#allocation2 + $0x28] sm:$0xff]  ;;  %10858 = vrcp.f32 %v11181_v57  ;;  %s17465_s18 = sld [smem:[#allocation97_spill]]  ;;  %s11184_s1 = smov 32  }
  0xee   : > { %912 = vadd.xlane.f32.xlu2 %v897_v52  ;;  %v899_v56 = vld [vmem:[#allocation2 + $0x40] sm:$0xff]  ;;  %v11458_v15 = vld [vmem:[#allocation2 + $0x38] sm:$0xff]  ;;  %v11473_v24 = vld [vmem:[#allocation2 + $0x8] sm:$0xff]  ;;  %s17829_s26 = scalar_lea.vmem %s17305_s8, %s11311_s30  ;;  %s17843_s5 = scalar_lea.vmem %s17307_s10, %s11311_s30 }
  0xef   : > { %v10235_v30 = vld [vmem:[%s11332_s25 + $0xa8] sm:$0xf]  ;;  %v10645_v31 = vld [vmem:[%s11332_s25 + $0xb0] sm:$0xf0]  ;;  %v10644_v32 = vld [vmem:[%s11332_s25 + $0xac] sm:$0xf] }
  0xf0   : > { %v10236_v33 = vor.u32 %v10645_v31, %v10235_v30  ;;  %v10237_v34 = vld [vmem:[%s11332_s25 + $0xb4] sm:$0xf0]  ;;  %v10243_v35 = vld [vmem:[%s11332_s25 + $0xb0] sm:$0xf]  ;;  %v10646_v36 = vld [vmem:[%s11332_s25 + $0xb8] sm:$0xf0] }
  0xf1   : > { %v10240_v37 = vor.u32 %v10644_v32, %v10237_v34  ;;  %v10244_v38 = vor.u32 %v10646_v36, %v10243_v35  ;;  %v10223_v39 = vld [vmem:[%s11332_s25 + $0x90] sm:$0xf]  ;;  %v10642_v40 = vld [vmem:[%s11332_s25 + $0x98] sm:$0xf0]  ;;  %v10641_v41 = vld [vmem:[%s11332_s25 + $0x94] sm:$0xf] }
  0xf2   : > { %1288 = vmatpush.bf16.msra.mxu0 %v10236_v33  ;;  %v10224_v42 = vor.u32 %v10642_v40, %v10223_v39  ;;  %v10225_v43 = vld [vmem:[%s11332_s25 + $0x9c] sm:$0xf0]  ;;  %v10231_v44 = vld [vmem:[%s11332_s25 + $0x98] sm:$0xf]  ;;  %v10643_v45 = vld [vmem:[%s11332_s25 + $0xa0] sm:$0xf0]  ;;  %s17464_s19 = scalar_lea.vmem %s17463_s23, %s11311_s30  ;;  %s17840_s23 = scalar_lea.vmem %s17306_s9, %s11311_s30 }
  0xf3   : > { %v10859_v58 = vpop.eup %10858  ;;  %1321 = vmatpush.bf16.msra.mxu1 %v10240_v37  ;;  %1354 = vmatpush.bf16.msra.mxu2 %v10244_v38  ;;  %v10228_v46 = vor.u32 %v10641_v41, %v10225_v43  ;;  %v10232_v47 = vor.u32 %v10643_v45, %v10231_v44  ;;  %v10211_v48 = vld [vmem:[%s11332_s25 + $0x78] sm:$0xf]  ;;  %v10639_v49 = vld [vmem:[%s11332_s25 + $0x80] sm:$0xf0]  ;;  %v10199_v57 = vld [vmem:[%s11332_s25 + $0x60] sm:$0xf]  ;;  %s17466_s4 = scalar_lea.vmem %s17465_s18, %s11311_s30 }
  0xf4   : > { %v923_v59 = vmul.f32 128.0, %v10859_v58  ;;  %vm927_vm0 = vweird.f32 %v10859_v58  ;;  %v10163_v30 = vld [vmem:[%s11332_s25 + $0x18] sm:$0xf]  ;;  %v10627_v31 = vld [vmem:[%s11332_s25 + $0x20] sm:$0xf0]  ;;  %s17946_s30 = sld [smem:[#allocation3_spill]] }
  0xf5   : > { %910 = vadd.xlane.f32.xlu1 %v896_v53  ;;  %906 = vadd.xlane.f32.xlu0 %v894_v54  ;;  %v10626_v32 = vld [vmem:[%s11332_s25 + $0x1c] sm:$0xf]  ;;  %v10164_v34 = vor.u32 %v10627_v31, %v10163_v30  ;;  %v10165_v35 = vld [vmem:[%s11332_s25 + $0x24] sm:$0xf0]  ;;  %v10171_v36 = vld [vmem:[%s11332_s25 + $0x20] sm:$0xf] }
  0xf6   : > { %914 = vadd.xlane.f32.xlu2 %v898_v55  ;;  %v924_v60 = vsub.f32 1.0, %v923_v59  ;;  %1289 = vmatpush.bf16.msra.mxu0 %v10224_v42  ;;  %v10635_v59 = vld [vmem:[%s11332_s25 + $0x64] sm:$0xf]  ;;  %v10628_v37 = vld [vmem:[%s11332_s25 + $0x28] sm:$0xf0]  ;;  %v10168_v39 = vor.u32 %v10626_v32, %v10165_v35 }
  0xf7   : > { %1322 = vmatpush.bf16.msra.mxu1 %v10228_v46  ;;  %1355 = vmatpush.bf16.msra.mxu2 %v10232_v47  ;;  %v10172_v40 = vor.u32 %v10628_v37, %v10171_v36  ;;  %v10151_v42 = vld [vmem:[%s11332_s25] sm:$0xf]  ;;  %v10624_v43 = vld [vmem:[%s11332_s25 + $0x8] sm:$0xf0]  ;;  %v10623_v45 = vld [vmem:[%s11332_s25 + $0x4] sm:$0xf] }
  0xf8   : > { %v925_v61 = vmul.f32 %v10859_v58, %v924_v60  ;;  %v10152_v44 = vor.u32 %v10624_v43, %v10151_v42  ;;  %v10153_v46 = vld [vmem:[%s11332_s25 + $0xc] sm:$0xf0]  ;;  %v10159_v47 = vld [vmem:[%s11332_s25 + $0x8] sm:$0xf]  ;;  %v11569_v35 = vld [vmem:[%s17464_s19] ss:$0 sm:$0xff] }
  0xfa   : > { %v926_v62 = vadd.f32 %v10859_v58, %v925_v61  ;;  %v10201_v61 = vld [vmem:[%s11332_s25 + $0x6c] sm:$0xf0]  ;;  %p10609_p8 = scmp.ne.s32.totalorder %s17946_s30, 2 }
  0xfb   : > { %s17948_s18 = sld [smem:[#allocation100_spill]] (!%p10609_p8) }
  0xfc   : > { %v11443_v63 = vsel %vm927_vm0, %v10859_v58, %v926_v62  ;;  %v10636_v58 = vld [vmem:[%s11332_s25 + $0x68] sm:$0xf0]  ;;  %v10207_v62 = vld [vmem:[%s11332_s25 + $0x68] sm:$0xf] }
  0xfd   : > { %17462 = vst [vmem:[#allocation9_spill] sm:$0xff] %v11443_v63  ;;  %v10200_v60 = vor.u32 %v10636_v58, %v10199_v57 }
  0xfe   : > { %916 = vadd.xlane.f32.xlu2 %v899_v56 }
 0x160   : > { %v909_v0 = vpop.xlane.xlu1 %908  ;;  %v905_v1 = vpop.xlane.xlu0 %904 }
 0x161   : > { %v929_v2 = vmul.f32 %v11443_v63, %v905_v1  ;;  %v913_v3 = vpop.xlane.xlu2 %912  ;;  %v931_v14 = vmul.f32 %v11443_v63, %v909_v0  ;;  %v10637_v0 = vld [vmem:[%s11332_s25 + $0x70] sm:$0xf0]  ;;  %v10204_v1 = vor.u32 %v10635_v59, %v10201_v61 }
 0x162   : > { %v933_v23 = vmul.f32 %v11443_v63, %v913_v3  ;;  %v10187_v3 = vld [vmem:[%s11332_s25 + $0x48] sm:$0xf] }
 0x163   : > { %v11446_v4 = vsub.f32 %v893_v51, %v929_v2  ;;  %v11467_v19 = vsub.f32 %v895_v50, %v931_v14  ;;  %v10638_v50 = vld [vmem:[%s11332_s25 + $0x7c] sm:$0xf]  ;;  %v10212_v51 = vor.u32 %v10639_v49, %v10211_v48  ;;  %v10208_v2 = vor.u32 %v10637_v0, %v10207_v62  ;;  %v10625_v49 = vld [vmem:[%s11332_s25 + $0x10] sm:$0xf0] }
 0x164   : > { %v11480_v27 = vsub.f32 %v897_v52, %v933_v23  ;;  %v10213_v52 = vld [vmem:[%s11332_s25 + $0x84] sm:$0xf0]  ;;  %v10183_v23 = vld [vmem:[%s11332_s25 + $0x38] sm:$0xf]  ;;  %v10156_v48 = vor.u32 %v10623_v45, %v10153_v46 }
 0x165   : > { %v947_v5 = vmul.f32 %v11446_v4, %v11446_v4  ;;  %v949_v25 = vmul.f32 %v11467_v19, %v11467_v19  ;;  %1290 = vmatpush.bf16.msra.mxu0 %v10212_v51 }
 0x166   : > { %v951_v29 = vmul.f32 %v11480_v27, %v11480_v27 }
 0x167   : > { %956 = vadd.xlane.f32.xlu0 %v947_v5  ;;  %v10633_v5 = vld [vmem:[%s11332_s25 + $0x50] sm:$0xf0] }
 0x168   : > { %v911_v6 = vpop.xlane.xlu1 %910  ;;  %v907_v7 = vpop.xlane.xlu0 %906 }
 0x169   : > { %v932_v8 = vmul.f32 %v11443_v63, %v911_v6  ;;  %v930_v9 = vmul.f32 %v11443_v63, %v907_v7  ;;  %v915_v10 = vpop.xlane.xlu2 %914  ;;  %1291 = vmatpush.bf16.msra.mxu0 %v10200_v60  ;;  %v10632_v6 = vld [vmem:[%s11332_s25 + $0x4c] sm:$0xf]  ;;  %v10188_v7 = vor.u32 %v10633_v5, %v10187_v3 }
 0x16a   : > { %v934_v13 = vmul.f32 %v11443_v63, %v915_v10  ;;  %v10634_v10 = vld [vmem:[%s11332_s25 + $0x58] sm:$0xf0] }
 0x16b   : > { %v11452_v11 = vsub.f32 %v896_v53, %v932_v8  ;;  %v11454_v12 = vsub.f32 %v894_v54, %v930_v9  ;;  %v10219_v53 = vld [vmem:[%s11332_s25 + $0x80] sm:$0xf]  ;;  %v10640_v54 = vld [vmem:[%s11332_s25 + $0x88] sm:$0xf0]  ;;  %v10189_v8 = vld [vmem:[%s11332_s25 + $0x54] sm:$0xf0] }
 0x16c   : > { %v11465_v18 = vsub.f32 %v898_v55, %v934_v13  ;;  %v10216_v55 = vor.u32 %v10638_v50, %v10213_v52  ;;  %v10195_v9 = vld [vmem:[%s11332_s25 + $0x50] sm:$0xf]  ;;  %v10192_v13 = vor.u32 %v10632_v6, %v10189_v8  ;;  %v10160_v50 = vor.u32 %v10625_v49, %v10159_v47 }
 0x16d   : > { %v950_v16 = vmul.f32 %v11452_v11, %v11452_v11  ;;  %v948_v17 = vmul.f32 %v11454_v12, %v11454_v12  ;;  %v10196_v14 = vor.u32 %v10634_v10, %v10195_v9  ;;  %1292 = vmatpush.bf16.msra.mxu0 %v10188_v7 }
 0x16e   : > { %v952_v21 = vmul.f32 %v11465_v18, %v11465_v18  ;;  %1323 = vmatpush.bf16.msra.mxu1 %v10216_v55 }
 0x16f   : > { %962 = vadd.xlane.f32.xlu2 %v950_v16  ;;  %918 = vadd.xlane.f32.xlu0 %v11458_v15  ;;  %v10175_v16 = vld [vmem:[%s11332_s25 + $0x30] sm:$0xf] }
 0x170   : > { %958 = vadd.xlane.f32.xlu1 %v948_v17  ;;  %v10630_v17 = vld [vmem:[%s11332_s25 + $0x38] sm:$0xf0] }
 0x171   : > { %v917_v20 = vpop.xlane.xlu2 %916 }
 0x172   : > { %v935_v22 = vmul.f32 %v11443_v63, %v917_v20  ;;  %1324 = vmatpush.bf16.msra.mxu1 %v10204_v1  ;;  %v10629_v20 = vld [vmem:[%s11332_s25 + $0x34] sm:$0xf] }
 0x174   : > { %v11478_v26 = vsub.f32 %v899_v56, %v935_v22  ;;  %v10220_v56 = vor.u32 %v10640_v54, %v10219_v53  ;;  %v10177_v22 = vld [vmem:[%s11332_s25 + $0x3c] sm:$0xf0] }
 0x176   : > { %v953_v28 = vmul.f32 %v11478_v26, %v11478_v26  ;;  %1356 = vmatpush.bf16.msra.mxu2 %v10220_v56  ;;  %1325 = vmatpush.bf16.msra.mxu1 %v10192_v13 }
 0x177   : > { %966 = vadd.xlane.f32.xlu2 %v952_v21  ;;  %920 = vadd.xlane.f32.xlu0 %v11473_v24  ;;  %v10176_v21 = vor.u32 %v10630_v17, %v10175_v16 }
 0x178   : > { %960 = vadd.xlane.f32.xlu1 %v949_v25  ;;  %v10631_v25 = vld [vmem:[%s11332_s25 + $0x40] sm:$0xf0] }
 0x179   : > { %1293 = vmatpush.bf16.msra.mxu0 %v10176_v21 }
 0x17a   : > { %1357 = vmatpush.bf16.msra.mxu2 %v10208_v2 }
 0x17d   : > { %1294 = vmatpush.bf16.msra.mxu0 %v10164_v34 }
 0x17e   : > { %1358 = vmatpush.bf16.msra.mxu2 %v10196_v14 }
 0x17f   : > { %968 = vadd.xlane.f32.xlu0 %v953_v28  ;;  %v10180_v28 = vor.u32 %v10629_v20, %v10177_v22 }
 0x180   : > { %964 = vadd.xlane.f32.xlu1 %v951_v29  ;;  %v10184_v29 = vor.u32 %v10631_v25, %v10183_v23 }
 0x181   : > { %1326 = vmatpush.bf16.msra.mxu1 %v10180_v28  ;;  %1295 = vmatpush.bf16.msra.mxu0 %v10152_v44 }
 0x182   : > { %1359 = vmatpush.bf16.msra.mxu2 %v10184_v29 }
 0x185   : > { %1327 = vmatpush.bf16.msra.mxu1 %v10168_v39 }
 0x186   : > { %1360 = vmatpush.bf16.msra.mxu2 %v10172_v40 }
 0x189   : > { %1328 = vmatpush.bf16.msra.mxu1 %v10156_v48 }
 0x18a   : > { %1361 = vmatpush.bf16.msra.mxu2 %v10160_v50 }
 0x1da   : > { %v957_v33 = vpop.xlane.xlu0 %956 }
 0x1db   : > { %v974_v38 = vmul.f32 %v957_v33, %v11443_v63 }
 0x1dd   : > { %v983_v41 = vadd.f32 1e-06, %v974_v38 }
 0x1df   : > { %10860 = vrsqrt.f32 %v983_v41  ;;  %vm998_vm2 = vweird.f32 %v983_v41 }
 0x1e2   : > { %v963_v51 = vpop.xlane.xlu2 %962  ;;  %v919_v52 = vpop.xlane.xlu0 %918 }
 0x1e3   : > { %v977_v53 = vmul.f32 %v963_v51, %v11443_v63  ;;  %v959_v54 = vpop.xlane.xlu1 %958  ;;  %v936_v55 = vmul.f32 %v11443_v63, %v919_v52 }
 0x1e4   : > { %v975_v56 = vmul.f32 %v959_v54, %v11443_v63 }
 0x1e5   : > { %v10861_v57 = vpop.eup %10860  ;;  %v11538_v58 = vadd.f32 1e-06, %v977_v53  ;;  %v11541_v59 = vsub.f32 %v11458_v15, %v936_v55 }
 0x1e6   : > { %v993_v60 = vmul.f32 %v10861_v57, %v983_v41  ;;  %v984_v61 = vadd.f32 1e-06, %v975_v56  ;;  %vm999_vm1 = vweird.f32 %v10861_v57 }
 0x1e7   : > { %10862 = vrsqrt.f32 %v11538_v58  ;;  %v954_v62 = vmul.f32 %v11541_v59, %v11541_v59  ;;  %vm1000_vm3 = vmor %vm998_vm2, %vm999_vm1  ;;  %vm1028_vm9 = vweird.f32 %v11538_v58 }
 0x1e8   : > { %v994_v0 = vmul.f32 %v10861_v57, %v993_v60  ;;  %10864 = vrsqrt.f32 %v984_v61  ;;  %vm1008_vm4 = vweird.f32 %v984_v61 }
 0x1e9   : > { %970 = vadd.xlane.f32.xlu1 %v954_v62 }
 0x1ea   : > { %v995_v1 = vmul.f32 0.5, %v994_v0  ;;  %v921_v2 = vpop.xlane.xlu0 %920  ;;  %v967_v3 = vpop.xlane.xlu2 %966 }
 0x1eb   : > { %v961_v5 = vpop.xlane.xlu1 %960  ;;  %v937_v6 = vmul.f32 %v11443_v63, %v921_v2  ;;  %v979_v13 = vmul.f32 %v967_v3, %v11443_v63 }
 0x1ec   : > { %v996_v7 = vsub.f32 1.5, %v995_v1  ;;  %v976_v15 = vmul.f32 %v961_v5, %v11443_v63 }
 0x1ed   : > { %v11548_v8 = vpop.eup %10862  ;;  %v11551_v9 = vsub.f32 %v11473_v24, %v937_v6  ;;  %v11558_v24 = vadd.f32 1e-06, %v979_v13 }
 0x1ee   : > { %v10865_v10 = vpop.eup %10864  ;;  %v985_v14 = vadd.f32 1e-06, %v976_v15  ;;  %v997_v16 = vmul.f32 %v10861_v57, %v996_v7  ;;  %v1023_v17 = vmul.f32 %v11548_v8, %v11538_v58  ;;  %vm1029_vm10 = vweird.f32 %v11548_v8 }
 0x1ef   : > { %v1003_v20 = vmul.f32 %v10865_v10, %v984_v61  ;;  %v955_v22 = vmul.f32 %v11551_v9, %v11551_v9  ;;  %vm1009_vm5 = vweird.f32 %v10865_v10  ;;  %vm1030_vm12 = vmor %vm1028_vm9, %vm1029_vm10  ;;  %vm1048_vm15 = vweird.f32 %v11558_v24 }
 0x1f0   : > { %10866 = vrsqrt.f32 %v985_v14  ;;  %v1001_v23 = vsel %vm1000_vm3, %v10861_v57, %v997_v16  ;;  %v1024_v25 = vmul.f32 %v11548_v8, %v1023_v17  ;;  %vm1010_vm6 = vmor %vm1008_vm4, %vm1009_vm5  ;;  %vm1018_vm7 = vweird.f32 %v985_v14 }
 0x1f1   : > { %v1004_v21 = vmul.f32 %v10865_v10, %v1003_v20  ;;  %972 = vadd.xlane.f32.xlu2 %v955_v22  ;;  %10868 = vrsqrt.f32 %v11558_v24  ;;  %v1082_v34 = vmul.f32 %v1001_v23, %v11446_v4  ;;  %v11578_v4 = vld [vmem:[%s17466_s4] ss:$0 sm:$0xff] }
 0x1f2   : > { %v1025_v36 = vmul.f32 0.5, %v1024_v25  ;;  %v969_v23 = vpop.xlane.xlu0 %968 }
 0x1f3   : > { %v1005_v28 = vmul.f32 0.5, %v1004_v21  ;;  %v965_v29 = vpop.xlane.xlu1 %964  ;;  %v1094_v42 = vmul.f32 %v11569_v35, %v1082_v34  ;;  %v980_v25 = vmul.f32 %v969_v23, %v11443_v63 }
 0x1f4   : > { %v978_v30 = vmul.f32 %v965_v29, %v11443_v63  ;;  %v1026_v43 = vsub.f32 1.5, %v1025_v36 }
 0x1f5   : > { %v1006_v31 = vsub.f32 1.5, %v1005_v28  ;;  %v1106_v49 = vadd.f32 %v11578_v4, %v1094_v42  ;;  %v989_v28 = vadd.f32 1e-06, %v980_v25 }
 0x1f6   : > { %v10867_v32 = vpop.eup %10866  ;;  %v987_v33 = vadd.f32 1e-06, %v978_v30  ;;  %v1027_v51 = vmul.f32 %v11548_v8, %v1026_v43 }
 0x1f7   : > { %v1007_v37 = vmul.f32 %v10865_v10, %v1006_v31  ;;  %v1013_v38 = vmul.f32 %v10867_v32, %v985_v14  ;;  %vm1019_vm8 = vweird.f32 %v10867_v32  ;;  %v10869_v45 = vpop.eup %10868  ;;  %vm1058_vm3 = vweird.f32 %v989_v28 }
 0x1f8   : > { %10870 = vrsqrt.f32 %v987_v33  ;;  %vm11583_vm11 = vmor %vm1018_vm7, %vm1019_vm8  ;;  %v1043_v52 = vmul.f32 %v10869_v45, %v11558_v24  ;;  %v1031_v58 = vsel %vm1030_vm12, %v11548_v8, %v1027_v51  ;;  %vm1038_vm13 = vweird.f32 %v987_v33 }
 0x1f9   : > { %v1011_v39 = vsel %vm1010_vm6, %v10865_v10, %v1007_v37  ;;  %v1014_v40 = vmul.f32 %v10867_v32, %v1013_v38  ;;  %v1085_v0 = vmul.f32 %v1031_v58, %v11452_v11  ;;  %vm1049_vm0 = vweird.f32 %v10869_v45  ;;  %v1152_v58 = vld [vmem:[%s11342_s29] sm:$0x7]  ;;  %s11182_s29 = smov 96  }
 0x1fa   : > { %v1083_v41 = vmul.f32 %v1011_v39, %v11454_v12  ;;  %v1044_v60 = vmul.f32 %v10869_v45, %v1043_v52  ;;  %vm1050_vm2 = vmor %vm1048_vm15, %vm1049_vm0  ;;  %10872 = vrsqrt.f32 %v989_v28  ;;  %vm1587_vm12 = vcmask 1047556  }
 0x1fb   : > { %v1015_v44 = vmul.f32 0.5, %v1014_v40  ;;  %v1097_v5 = vmul.f32 %v11569_v35, %v1085_v0  ;;  %vm5086_vm15 = vcmask 588800  }
 0x1fc   : > { %v1095_v46 = vmul.f32 %v11569_v35, %v1083_v41  ;;  %v1045_v1 = vmul.f32 0.5, %v1044_v60 }
 0x1fd   : > { %v1016_v12 = vsub.f32 1.5, %v1015_v44 }
 0x1fe   : > { %v10871_v47 = vpop.eup %10870  ;;  %v1107_v50 = vadd.f32 %v11578_v4, %v1095_v46  ;;  %v1046_v6 = vsub.f32 1.5, %v1045_v1 }
 0x1ff   : > { %v1017_v53 = vmul.f32 %v10867_v32, %v1016_v12  ;;  %v1033_v54 = vmul.f32 %v10871_v47, %v987_v33  ;;  %vm1039_vm14 = vweird.f32 %v10871_v47 }
 0x200   : > { %v1115_v55 = vpack.c.bf16 %v1107_v50, %v1106_v49  ;;  %vm1040_vm1 = vmor %vm1038_vm13, %vm1039_vm14  ;;  %v1047_v8 = vmul.f32 %v10869_v45, %v1046_v6  ;;  %vm4674_vm13 = vcmask 261120   ;;  %vm5575_vm14 = vcmask 1043456  }
 0x201   : > { %v1021_v56 = vsel %vm11583_vm11, %v10867_v32, %v1017_v53  ;;  %v1034_v57 = vmul.f32 %v10871_v47, %v1033_v54 }
 0x202   : > { %1296 = vmatmul.bf16.vlgmr.msra.gmra.mxu0 %v1115_v55  ;;  %1329 = vmatmul.bf16.vlgmr.msra.gmra.mxu1 %v1115_v55  ;;  %v1084_v61 = vmul.f32 %v1021_v56, %v11467_v19  ;;  %v1109_v19 = vadd.f32 %v11578_v4, %v1097_v5  ;;  %v1051_v13 = vsel %vm1050_vm2, %v10869_v45, %v1047_v8  ;;  %vm7006_vm2 = vcmask 785408  }
 0x203   : > { %1362 = vmatmul.bf16.vlgmr.msra.gmra.mxu2 %v1115_v55  ;;  %v1035_v62 = vmul.f32 0.5, %v1034_v57  ;;  %v1087_v16 = vmul.f32 %v1051_v13, %v11465_v18 }
 0x204   : > { %v1096_v2 = vmul.f32 %v11569_v35, %v1084_v61  ;;  %v11619_v61 = vperm.slane %v1152_v58, 1 }
 0x205   : > { %v1036_v3 = vsub.f32 1.5, %v1035_v62  ;;  %v1099_v20 = vmul.f32 %v11569_v35, %v1087_v16 }
 0x206   : > { %v1108_v7 = vadd.f32 %v11578_v4, %v1096_v2 }
 0x207   : > { %v1037_v15 = vmul.f32 %v10871_v47, %v1036_v3  ;;  %v1111_v22 = vadd.f32 %v11578_v4, %v1099_v20 }
 0x208   : > { %v1116_v11 = vpack.c.bf16 %v1109_v19, %v1108_v7 }
 0x209   : > { %v1041_v10 = vsel %vm1040_vm1, %v10871_v47, %v1037_v15  ;;  %v11627_v15 = vperm.slane %v1152_v58, 2  ;;  %vm6996_vm1 = vcmask 523264  }
 0x20a   : > { %v1086_v14 = vmul.f32 %v1041_v10, %v11480_v27  ;;  %v10873_v27 = vpop.eup %10872 }
 0x20b   : > { %v1053_v29 = vmul.f32 %v10873_v27, %v989_v28  ;;  %vm1059_vm4 = vweird.f32 %v10873_v27 }
 0x20c   : > { %v1098_v17 = vmul.f32 %v11569_v35, %v1086_v14  ;;  %vm1060_vm5 = vmor %vm1058_vm3, %vm1059_vm4 }
 0x20d   : > { %v1054_v18 = vmul.f32 %v10873_v27, %v1053_v29 }
 0x20e   : > { %v1110_v21 = vadd.f32 %v11578_v4, %v1098_v17 }
 0x20f   : > { %v1055_v33 = vmul.f32 0.5, %v1054_v18 }
 0x210   : > { %v1117_v24 = vpack.c.bf16 %v1111_v22, %v1110_v21 }
 0x211   : > { %v1056_v34 = vsub.f32 1.5, %v1055_v33 }
 0x212   : > { %1301 = vmatmul.bf16.gmra.mxu0 %v1116_v11  ;;  %1334 = vmatmul.bf16.gmra.mxu1 %v1116_v11 }
 0x213   : > { %1367 = vmatmul.bf16.gmra.mxu2 %v1116_v11  ;;  %v1057_v39 = vmul.f32 %v10873_v27, %v1056_v34 }
 0x215   : > { %v1061_v43 = vsel %vm1060_vm5, %v10873_v27, %v1057_v39 }
 0x216   : > { %v1088_v46 = vmul.f32 %v1061_v43, %v11478_v26 }
 0x218   : > { %v1100_v51 = vmul.f32 %v11569_v35, %v1088_v46 }
 0x21a   : > { %v1112_v55 = vadd.f32 %v11578_v4, %v1100_v51 }
 0x222   : > { %1306 = vmatmul.bf16.gmra.mxu0 %v1117_v24  ;;  %1339 = vmatmul.bf16.gmra.mxu1 %v1117_v24 }
 0x223   : > { %1372 = vmatmul.bf16.gmra.mxu2 %v1117_v24 }
 0x25c   : > { %v971_v30 = vpop.xlane.xlu1 %970 }
 0x25d   : > { %v981_v31 = vmul.f32 %v971_v30, %v11443_v63 }
 0x25f   : > { %v990_v32 = vadd.f32 1e-06, %v981_v31 }
 0x261   : > { %10874 = vrsqrt.f32 %v990_v32  ;;  %vm1068_vm7 = vweird.f32 %v990_v32 }
 0x264   : > { %v973_v36 = vpop.xlane.xlu2 %972 }
 0x265   : > { %v982_v38 = vmul.f32 %v973_v36, %v11443_v63 }
 0x267   : > { %v10875_v37 = vpop.eup %10874  ;;  %v991_v41 = vadd.f32 1e-06, %v982_v38 }
 0x268   : > { %v1063_v40 = vmul.f32 %v10875_v37, %v990_v32  ;;  %vm1069_vm6 = vweird.f32 %v10875_v37 }
 0x269   : > { %10876 = vrsqrt.f32 %v991_v41  ;;  %vm1070_vm8 = vmor %vm1068_vm7, %vm1069_vm6  ;;  %vm1078_vm9 = vweird.f32 %v991_v41 }
 0x26a   : > { %v1064_v42 = vmul.f32 %v10875_v37, %v1063_v40 }
 0x26c   : > { %v1065_v44 = vmul.f32 0.5, %v1064_v42 }
 0x26e   : > { %v1066_v45 = vsub.f32 1.5, %v1065_v44 }
 0x26f   : > { %v10877_v47 = vpop.eup %10876 }
 0x270   : > { %v1067_v12 = vmul.f32 %v10875_v37, %v1066_v45  ;;  %v1073_v49 = vmul.f32 %v10877_v47, %v991_v41  ;;  %vm1079_vm10 = vweird.f32 %v10877_v47 }
 0x271   : > { %vm1080_vm11 = vmor %vm1078_vm9, %vm1079_vm10 }
 0x272   : > { %v1071_v48 = vsel %vm1070_vm8, %v10875_v37, %v1067_v12  ;;  %v1074_v52 = vmul.f32 %v10877_v47, %v1073_v49 }
 0x273   : > { %v1089_v50 = vmul.f32 %v1071_v48, %v11541_v59  ;;  %v11617_v59 = vperm.slane %v1152_v58, 0 }
 0x274   : > { %v1075_v54 = vmul.f32 0.5, %v1074_v52 }
 0x275   : > { %v1101_v53 = vmul.f32 %v11569_v35, %v1089_v50 }
 0x276   : > { %v1076_v26 = vsub.f32 1.5, %v1075_v54 }
 0x277   : > { %v1113_v56 = vadd.f32 %v11578_v4, %v1101_v53 }
 0x278   : > { %v1077_v60 = vmul.f32 %v10877_v47, %v1076_v26 }
 0x279   : > { %v1118_v57 = vpack.c.bf16 %v1113_v56, %v1112_v55 }
 0x27a   : > { %v1081_v62 = vsel %vm1080_vm11, %v10877_v47, %v1077_v60 }
 0x27b   : > { %1311 = vmatmul.bf16.gmra.mxu0 %v1118_v57  ;;  %1344 = vmatmul.bf16.gmra.mxu1 %v1118_v57  ;;  %v1090_v0 = vmul.f32 %v1081_v62, %v11551_v9 }
 0x27c   : > { %1377 = vmatmul.bf16.gmra.mxu2 %v1118_v57 }
 0x27d   : > { %v1102_v6 = vmul.f32 %v11569_v35, %v1090_v0 }
 0x27f   : > { %v1297_v1 = vpop.f32.mrf.mxu0  ;;  %v1330_v2 = vpop.f32.mrf.mxu1  ;;  %v1114_v19 = vadd.f32 %v11578_v4, %v1102_v6 }
 0x280   : > { %v1298_v3 = vadd.f32 %v1297_v1, %v11617_v59  ;;  %v1331_v5 = vadd.f32 %v1330_v2, %v11619_v61 }
 0x281   : > { %v1119_v13 = vpack.c.bf16 %v1114_v19, %v1114_v19 }
 0x282   : > { %v11625_v7 = vpack.c.bf16 %v1331_v5, %v1298_v3 }
 0x286   : > { %v1363_v8 = vpop.f32.mrf.mxu2 }
 0x287   : > { %v11631_v11 = vadd.f32 %v1363_v8, %v11627_v15  ;;  %v11633_v10 = vpop.f32.mrf.mxu0  ;;  %v11635_v9 = vpop.f32.mrf.mxu1 }
 0x288   : > { %v1300_v2 = vadd.f32 %v11633_v10, %v11617_v59  ;;  %v1333_v3 = vadd.f32 %v11635_v9, %v11619_v61 }
 0x28a   : > { %v11726_v5 = vpack.c.bf16 %v1333_v3, %v1300_v2 }
 0x28b   : > { %1316 = vmatmul.bf16.gmra.mxu0 %v1119_v13  ;;  %1349 = vmatmul.bf16.gmra.mxu1 %v1119_v13 }
 0x28c   : > { %1382 = vmatmul.bf16.gmra.mxu2 %v1119_v13 }
 0x28e   : > { %v11637_v14 = vpop.f32.mrf.mxu2 }
 0x28f   : > { %v1302_v35 = vpop.f32.mrf.mxu0  ;;  %v1335_v16 = vpop.f32.mrf.mxu1 }
 0x290   : > { %v1303_v17 = vadd.f32 %v1302_v35, %v11617_v59  ;;  %v1336_v4 = vadd.f32 %v1335_v16, %v11619_v61 }
 0x292   : > { %v11641_v20 = vpack.c.bf16 %v1336_v4, %v1303_v17  ;;  %v17323_v17 = vrot.slane %v11726_v5, 4  ;;  %v1366_v4 = vadd.f32 %v11637_v14, %v11627_v15 }
 0x294   : > { %v11795_v14 = vshrl.u32 %v17323_v17, 16 }
 0x296   : > { %v1368_v21 = vpop.f32.mrf.mxu2 }
 0x297   : > { %v11644_v22 = vadd.f32 %v1368_v21, %v11627_v15  ;;  %v1304_v24 = vpop.f32.mrf.mxu0  ;;  %v1337_v23 = vpop.f32.mrf.mxu1 }
 0x298   : > { %v1305_v60 = vadd.f32 %v1304_v24, %v11617_v59  ;;  %v1338_v62 = vadd.f32 %v1337_v23, %v11619_v61  ;;  %v11785_v23 = vpack.c.bf16 %v11631_v11, %v11631_v11  ;;  %v17322_v11 = vrot.slane %v11641_v20, 4 }
 0x299   : > { %v11768_v13 = vpack.c.bf16 %v11644_v22, %v11644_v22 }
 0x29a   : > { %v11708_v1 = vpack.c.bf16 %v1338_v62, %v1305_v60  ;;  %17471 = vst [vmem:[#allocation12_spill] sm:$0xff] %v11785_v23 }
 0x29b   : > { %17469 = vst [vmem:[#allocation10_spill] sm:$0xff] %v11768_v13 }
 0x29e   : > { %v11646_v25 = vpop.f32.mrf.mxu2 }
 0x29f   : > { %v1307_v28 = vpop.f32.mrf.mxu0  ;;  %v1340_v27 = vpop.f32.mrf.mxu1  ;;  %v1371_v35 = vadd.f32 %v11646_v25, %v11627_v15  ;;  %v11798_v25 = vpack.c.bf16 %v1366_v4, %v1366_v4 }
 0x2a0   : > { %v1308_v29 = vadd.f32 %v1307_v28, %v11617_v59  ;;  %v1341_v18 = vadd.f32 %v1340_v27, %v11619_v61  ;;  %v11185_v28 = vmov 1983009808  }
 0x2a1   : > { %v11781_v22 = vpack.c.bf16 %v1371_v35, %v1371_v35  ;;  %v1578_v27 = vunpack.c.l.s4 %v11185_v28  ;;  %17472 = vst [vmem:[#allocation13_spill] sm:$0xff] %v11798_v25 }
 0x2a2   : > { %v11650_v30 = vpack.c.bf16 %v1341_v18, %v1308_v29 }
 0x2a3   : > { %17470 = vst [vmem:[#allocation11_spill] sm:$0xff] %v11781_v22 }
 0x2a4   : > { %1422 = vrot.lane.b32.xlu0 %v11650_v30, %s11182_s29  ;;  %1440 = vrot.lane.b32.xlu1 %v11650_v30, %s11183_s24 }
 0x2a6   : > { %v1373_v31 = vpop.f32.mrf.mxu2 }
 0x2a7   : > { %v11657_v32 = vadd.f32 %v1373_v31, %v11627_v15  ;;  %v1309_v33 = vpop.f32.mrf.mxu0  ;;  %v1342_v34 = vpop.f32.mrf.mxu1 }
 0x2a8   : > { %v1310_v36 = vadd.f32 %v1309_v33, %v11617_v59  ;;  %v1343_v37 = vadd.f32 %v1342_v34, %v11619_v61 }
 0x2a9   : > { %v11762_v10 = vpack.c.bf16 %v11657_v32, %v11657_v32 }
 0x2aa   : > { %v11661_v38 = vpack.c.bf16 %v1343_v37, %v1310_v36  ;;  %v2499_v36 = vrot.slane %v11650_v30, 4 }
 0x2ac   : > { %1424 = vrot.lane.b32.xlu2 %v11661_v38, %s11182_s29  ;;  %v2500_v29 = vrot.slane %v11661_v38, 4  ;;  %v1531_v34 = vshrl.u32 %v11661_v38, 16  ;;  %v2582_v60 = vshrl.u32 %v2499_v36, 16 }
 0x2ae   : > { %v11665_v39 = vpop.f32.mrf.mxu2 }
 0x2af   : > { %v1376_v8 = vadd.f32 %v11665_v39, %v11627_v15  ;;  %v17325_v39 = vrot.slane %v11708_v1, 4 }
 0x2b1   : > { %v11764_v9 = vpack.c.bf16 %v1376_v8, %v1376_v8 }
 0x2f8   : > { %v1312_v40 = vpop.f32.mrf.mxu0  ;;  %v1345_v41 = vpop.f32.mrf.mxu1 }
 0x2f9   : > { %v1313_v42 = vadd.f32 %v1312_v40, %v11617_v59  ;;  %v1346_v43 = vadd.f32 %v1345_v41, %v11619_v61  ;;  %v17321_v40 = vrot.slane %v11625_v7, 4  ;;  %v11809_v41 = vunpack.c.0.s8 %v1578_v27 }
 0x2fb   : > { %v11669_v44 = vpack.c.bf16 %v1346_v43, %v1313_v42  ;;  %v2594_v42 = vshrl.u32 %v2500_v29, 16 }
 0x2fd   : > { %1462 = vrot.lane.b32.xlu2 %v11669_v44, %s11184_s1  ;;  %1444 = vrot.lane.b32.xlu1 %v11669_v44, %s11183_s24 }
 0x2fe   : > { %1426 = vrot.lane.b32.xlu0 %v11669_v44, %s11182_s29 }
 0x2ff   : > { %v1378_v45 = vpop.f32.mrf.mxu2 }
 0x300   : > { %v1314_v46 = vpop.f32.mrf.mxu0  ;;  %v1347_v12 = vpop.f32.mrf.mxu1 }
 0x301   : > { %v1315_v47 = vadd.f32 %v1314_v46, %v11617_v59  ;;  %v1348_v48 = vadd.f32 %v1347_v12, %v11619_v61 }
 0x303   : > { %v11679_v49 = vpack.c.bf16 %v1348_v48, %v1315_v47  ;;  %v11814_v47 = vshrl.u32 %v17322_v11, 16 }
 0x305   : > { %1428 = vrot.lane.b32.xlu2 %v11679_v49, %s11182_s29  ;;  %1464 = vrot.lane.b32.xlu1 %v11679_v49, %s11184_s1 }
 0x306   : > { %1446 = vrot.lane.b32.xlu0 %v11679_v49, %s11183_s24  ;;  %v1425_v16 = vpop.permute.xlu2 %1424 }
 0x307   : > { %v1380_v50 = vpop.f32.mrf.mxu2  ;;  %v2509_v21 = vrot.slane %v1425_v16, 4  ;;  %v1532_v18 = vshrl.u32 %v1425_v16, 16  ;;  %v1530_v43 = vpack.i.b16 %v1425_v16, %v11661_v38 }
 0x308   : > { %v1317_v51 = vpop.f32.mrf.mxu0  ;;  %v1350_v52 = vpop.f32.mrf.mxu1 }
 0x309   : > { %v1318_v53 = vadd.f32 %v1317_v51, %v11617_v59  ;;  %v1351_v54 = vadd.f32 %v1350_v52, %v11619_v61  ;;  %v1379_v59 = vadd.f32 %v1378_v45, %v11627_v15  ;;  %v1381_v61 = vadd.f32 %v1380_v50, %v11627_v15 }
 0x30a   : > { %v2595_v31 = vshrl.u32 %v2509_v21, 16  ;;  %v1533_v46 = vpack.i.b16 %v1532_v18, %v1531_v34  ;;  %v2593_v12 = vpack.i.b16 %v2509_v21, %v2500_v29  ;;  %v1519_v51 = vshrl.u32 %v11650_v30, 16 }
 0x30b   : > { %v11689_v55 = vpack.c.bf16 %v1351_v54, %v1318_v53  ;;  %v11742_v6 = vpack.c.bf16 %v1379_v59, %v1379_v59  ;;  %v11744_v19 = vpack.c.bf16 %v1381_v61, %v1381_v61  ;;  %v2502_v54 = vrot.slane %v11679_v49, 4 }
 0x30c   : > { %v2596_v50 = vpack.i.b16 %v2595_v31, %v2594_v42  ;;  %v11834_v2 = vperm.slane %v1533_v46, %v11809_v41  ;;  %v11837_v3 = vperm.slane %v2593_v12, %v11809_v41  ;;  %v1555_v21 = vshrl.u32 %v11679_v49, 16 }
 0x30d   : > { %1458 = vrot.lane.b32.xlu2 %v11650_v30, %s11184_s1  ;;  %1460 = vrot.lane.b32.xlu1 %v11661_v38, %s11184_s1  ;;  %v17324_v29 = vrot.slane %v11689_v55, 4 }
 0x30e   : > { %1430 = vrot.lane.b32.xlu0 %v11689_v55, %s11182_s29  ;;  %v11845_v35 = vperm.slane %v2596_v50, %v11809_v41 }
 0x30f   : > { %v1383_v56 = vpop.f32.mrf.mxu2 }
 0x310   : > { %v11698_v26 = vadd.f32 %v1383_v56, %v11627_v15  ;;  %v1319_v57 = vpop.f32.mrf.mxu0  ;;  %v1352_v58 = vpop.f32.mrf.mxu1  ;;  %v17326_v56 = vrot.slane %v11669_v44, 4 }
 0x311   : > { %v11827_v57 = vshrl.u32 %v17321_v40, 16  ;;  %v11830_v58 = vperm.slane %v1530_v43, %v11809_v41 }
 0x312   : > { %v11854_v27 = vshrl.u32 %v17326_v56, 16 }
 0x315   : > { %1466 = vrot.lane.b32.xlu2 %v11689_v55, %s11184_s1  ;;  %1448 = vrot.lane.b32.xlu1 %v11689_v55, %s11183_s24 }
 0x316   : > { %1442 = vrot.lane.b32.xlu0 %v11661_v38, %s11183_s24  ;;  %v1423_v24 = vpop.permute.xlu0 %1422  ;;  %v11823_v38 = vshrl.u32 %v17325_v39, 16  ;;  %v1441_v59 = vpop.permute.xlu1 %1440 }
 0x317   : > { %v1385_v0 = vpop.f32.mrf.mxu2  ;;  %v2508_v32 = vrot.slane %v1423_v24, 4  ;;  %v1520_v45 = vshrl.u32 %v1423_v24, 16  ;;  %v1518_v62 = vpack.i.b16 %v1423_v24, %v11650_v30  ;;  %v2618_v24 = vshrl.u32 %v2502_v54, 16 }
 0x318   : > { %v2517_v31 = vrot.slane %v1441_v59, 4 }
 0x319   : > { %v2583_v52 = vshrl.u32 %v2508_v32, 16  ;;  %v1521_v0 = vpack.i.b16 %v1520_v45, %v1519_v51  ;;  %v2581_v61 = vpack.i.b16 %v2508_v32, %v2499_v36  ;;  %v1789_v32 = vperm.slane %v1518_v62, %v11809_v41 }
 0x31a   : > { %v11874_v51 = vpack.c.bf16 %v11698_v26, %v11698_v26  ;;  %v11878_v62 = vshrl.u32 %v17324_v29, 16  ;;  %v11186_v26 = vmov 1934713408  }
 0x31b   : > { %v2584_v30 = vpack.i.b16 %v2583_v52, %v2582_v60  ;;  %v11860_v34 = vperm.slane %v1521_v0, %v11809_v41  ;;  %v11865_v43 = vperm.slane %v2581_v61, %v11809_v41  ;;  %v1525_v52 = vshrl.u32 %v1441_v59, 16 }
 0x31c   : > { %17473 = vst [vmem:[#allocation14_spill] sm:$0xff] %v11874_v51  ;;  %v2588_v0 = vshrl.u32 %v2517_v31, 16  ;;  %v1797_v61 = vrot.slane %v1789_v32, 4  ;;  %v1592_v11 = vunpack.c.l.s4 %v11186_v26 }
 0x31d   : > { %1420 = vrot.lane.b32.xlu2 %v11708_v1, %s11182_s29  ;;  %1436 = vrot.lane.b32.xlu1 %v11641_v20, %s11183_s24  ;;  %v11869_v12 = vperm.slane %v2584_v30, %v11809_v41  ;;  %v1823_v4 = vrot.slane %v11860_v34, 4  ;;  %v2859_v30 = vrot.slane %v11865_v43, 4 }
 0x31e   : > { %1418 = vrot.lane.b32.xlu0 %v11641_v20, %s11182_s29  ;;  %v11900_v46 = vunpack.c.0.s8 %v1592_v11 }
 0x31f   : > { %v2885_v33 = vrot.slane %v11869_v12, 4 }
 0x325   : > { %1454 = vrot.lane.b32.xlu2 %v11641_v20, %s11184_s1  ;;  %1456 = vrot.lane.b32.xlu1 %v11708_v1, %s11184_s1 }
 0x326   : > { %1438 = vrot.lane.b32.xlu0 %v11708_v1, %s11183_s24 }
 0x32d   : > { %1416 = vrot.lane.b32.xlu2 %v11726_v5, %s11182_s29  ;;  %1432 = vrot.lane.b32.xlu1 %v11625_v7, %s11183_s24 }
 0x32e   : > { %1414 = vrot.lane.b32.xlu0 %v11625_v7, %s11182_s29 }
 0x335   : > { %1450 = vrot.lane.b32.xlu2 %v11625_v7, %s11184_s1  ;;  %1452 = vrot.lane.b32.xlu1 %v11726_v5, %s11184_s1 }
 0x336   : > { %1434 = vrot.lane.b32.xlu0 %v11726_v5, %s11183_s24 }
 0x33d   : > { %3580 = vrot.lane.b32.xlu2 %v11744_v19, %s11182_s29  ;;  %3578 = vrot.lane.b32.xlu1 %v11742_v6, %s11182_s29 }
 0x33e   : > { %3596 = vrot.lane.b32.xlu0 %v11742_v6, %s11183_s24 }
 0x345   : > { %3616 = vrot.lane.b32.xlu2 %v11744_v19, %s11184_s1  ;;  %3598 = vrot.lane.b32.xlu1 %v11744_v19, %s11183_s24 }
 0x346   : > { %3614 = vrot.lane.b32.xlu0 %v11742_v6, %s11184_s1 }
 0x34d   : > { %3574 = vrot.lane.b32.xlu2 %v11762_v10, %s11182_s29  ;;  %3612 = vrot.lane.b32.xlu1 %v11764_v9, %s11184_s1 }
 0x34e   : > { %3570 = vrot.lane.b32.xlu0 %v11768_v13, %s11182_s29 }
 0x355   : > { %3576 = vrot.lane.b32.xlu2 %v11764_v9, %s11182_s29  ;;  %3572 = vrot.lane.b32.xlu1 %v11781_v22, %s11182_s29 }
 0x356   : > { %3588 = vrot.lane.b32.xlu0 %v11768_v13, %s11183_s24 }
 0x357   : > { %v11805_v37 = vpop.permute.xlu2 %1462 }
 0x35d   : > { %3592 = vrot.lane.b32.xlu2 %v11762_v10, %s11183_s24  ;;  %3590 = vrot.lane.b32.xlu1 %v11781_v22, %s11183_s24 }
 0x35e   : > { %3606 = vrot.lane.b32.xlu0 %v11768_v13, %s11184_s1 }
 0x35f   : > { %v1429_v28 = vpop.permute.xlu2 %1428 }
 0x360   : > { %v2511_v45 = vrot.slane %v1429_v28, 4  ;;  %v1556_v60 = vshrl.u32 %v1429_v28, 16  ;;  %v1554_v40 = vpack.i.b16 %v1429_v28, %v11679_v49  ;;  %v2528_v28 = vrot.slane %v11805_v37, 4 }
 0x362   : > { %v2619_v48 = vshrl.u32 %v2511_v45, 16  ;;  %v1557_v42 = vpack.i.b16 %v1556_v60, %v1555_v21  ;;  %v2617_v36 = vpack.i.b16 %v2511_v45, %v2502_v54  ;;  %v11898_v39 = vperm.slane %v1554_v40, %v11809_v41 }
 0x363   : > { %v1550_v45 = vshrl.u32 %v11805_v37, 16 }
 0x364   : > { %v2620_v8 = vpack.i.b16 %v2619_v48, %v2618_v24  ;;  %v11912_v40 = vperm.slane %v2617_v36, %v11809_v41 }
 0x365   : > { %3594 = vrot.lane.b32.xlu2 %v11764_v9, %s11183_s24  ;;  %3608 = vrot.lane.b32.xlu1 %v11781_v22, %s11184_s1 }
 0x366   : > { %3568 = vrot.lane.b32.xlu0 %v11798_v25, %s11182_s29 }
 0x367   : > { %v1459_v18 = vpop.permute.xlu2 %1458 }
 0x368   : > { %v1524_v15 = vpack.i.b16 %v1459_v18, %v1441_v59  ;;  %v1526_v26 = vshrl.u32 %v1459_v18, 16  ;;  %v2526_v29 = vrot.slane %v1459_v18, 4  ;;  %v11906_v59 = vshrl.u32 %v2528_v28, 16 }
 0x369   : > { %v11909_v18 = vperm.slane %v1557_v42, %v11809_v41 }
 0x36a   : > { %v1527_v49 = vpack.i.b16 %v1526_v26, %v1525_v52  ;;  %v1794_v53 = vperm.slane %v1524_v15, %v11809_v41  ;;  %v2587_v21 = vpack.i.b16 %v2526_v29, %v2517_v31  ;;  %v2589_v54 = vshrl.u32 %v2526_v29, 16 }
 0x36b   : > { %v11918_v31 = vperm.slane %v2620_v8, %v11809_v41 }
 0x36c   : > { %v1795_v48 = vrot.slane %v1794_v53, 4  ;;  %v1798_v11 = vsel %vm1587_vm12, %v1794_v53, %v1797_v61  ;;  %v1820_v24 = vperm.slane %v1527_v49, %v11809_v41  ;;  %v2590_v15 = vpack.i.b16 %v2589_v54, %v2588_v0 }
 0x36d   : > { %v1806_v52 = vperm.slane %v1798_v11, %v11900_v46  ;;  %v2856_v60 = vperm.slane %v2587_v21, %v11809_v41  ;;  %3610 = vrot.lane.b32.xlu2 %v11762_v10, %s11184_s1  ;;  %3584 = vrot.lane.b32.xlu1 %v11785_v23, %s11183_s24 }
 0x36e   : > { %v1796_v53 = vsel %vm1587_vm12, %v1795_v48, %v1789_v32  ;;  %v1821_v36 = vrot.slane %v1820_v24, 4  ;;  %v1824_v42 = vsel %vm1587_vm12, %v1820_v24, %v1823_v4  ;;  %v2882_v0 = vperm.slane %v2590_v15, %v11809_v41  ;;  %3586 = vrot.lane.b32.xlu0 %v11798_v25, %s11183_s24 }
 0x36f   : > { %v11932_v8 = vperm.slane %v1796_v53, %v11900_v46  ;;  %v11934_v61 = vrot.slane %v1806_v52, 4  ;;  %v1832_v49 = vperm.slane %v1824_v42, %v11900_v46  ;;  %v2857_v26 = vrot.slane %v2856_v60, 4  ;;  %v11951_v52 = vpop.permute.xlu2 %1466  ;;  %v1445_v53 = vpop.permute.xlu1 %1444 }
 0x370   : > { %v1822_v21 = vsel %vm1587_vm12, %v1821_v36, %v11860_v34  ;;  %v2860_v32 = vsel %vm1587_vm12, %v2856_v60, %v2859_v30  ;;  %v2883_v54 = vrot.slane %v2882_v0, 4  ;;  %v2886_v4 = vsel %vm1587_vm12, %v2882_v0, %v2885_v33 }
 0x371   : > { %17474 = vst [vmem:[#allocation15_spill] sm:$0xff] %v11932_v8  ;;  %v1807_v48 = vrot.slane %v11932_v8, 4  ;;  %v11944_v11 = vsel %vm1587_vm12, 0, %v11934_v61  ;;  %v11947_v24 = vperm.slane %v1822_v21, %v11900_v46  ;;  %v11949_v15 = vrot.slane %v1832_v49, 4 }
 0x372   : > { %17475 = vst [vmem:[#allocation16_spill] sm:$0xff] %v11934_v61  ;;  %v2858_v30 = vsel %vm1587_vm12, %v2857_v26, %v11865_v43  ;;  %v2868_v33 = vperm.slane %v2860_v32, %v11900_v46  ;;  %v2884_v60 = vsel %vm1587_vm12, %v2883_v54, %v11869_v12  ;;  %v2894_v12 = vperm.slane %v2886_v4, %v11900_v46  ;;  %v1427_v32 = vpop.permute.xlu0 %1426 }
 0x373   : > { %17476 = vst [vmem:[#allocation17_spill] sm:$0xff] %v11944_v11  ;;  %v11963_v0 = vsel %vm1587_vm12, 0, %v11949_v15  ;;  %v11966_v49 = vperm.slane %v2858_v30, %v11900_v46  ;;  %v11969_v21 = vsel %vm1587_vm12, 0, %v1807_v48  ;;  %v11978_v50 = vperm.slane %v2884_v60, %v11900_v46 }
 0x374   : > { %17477 = vst [vmem:[#allocation18_spill] sm:$0xff] %v11947_v24  ;;  %v11972_v26 = vrot.slane %v2868_v33, 4  ;;  %v1548_v30 = vpack.i.b16 %v11805_v37, %v1445_v53  ;;  %v1549_v33 = vshrl.u32 %v1445_v53, 16  ;;  %v2519_v43 = vrot.slane %v1445_v53, 4 }
 0x375   : > { %17478 = vst [vmem:[#allocation19_spill] sm:$0xff] %v11949_v15  ;;  %3566 = vrot.lane.b32.xlu2 %v11785_v23, %s11182_s29  ;;  %3602 = vrot.lane.b32.xlu1 %v11785_v23, %s11184_s1  ;;  %v1542_v42 = vpack.i.b16 %v1427_v32, %v11669_v44  ;;  %v11996_v36 = vrot.slane %v2894_v12, 4  ;;  %v1544_v16 = vshrl.u32 %v1427_v32, 16  ;;  %v17485_v12 = vrot.slane %v11951_v52, 4 }
 0x376   : > { %17479 = vst [vmem:[#allocation20_spill] sm:$0xff] %v11963_v0  ;;  %v11988_v4 = vsel %vm1587_vm12, 0, %v11972_v26  ;;  %3604 = vrot.lane.b32.xlu0 %v11798_v25, %s11184_s1  ;;  %v1898_v54 = vperm.slane %v1548_v30, %v11809_v41  ;;  %v1551_v48 = vpack.i.b16 %v1550_v45, %v1549_v33  ;;  %v2611_v34 = vpack.i.b16 %v2528_v28, %v2519_v43 }
 0x377   : > { %17480 = vst [vmem:[#allocation21_spill] sm:$0xff] %v11966_v49  ;;  %v2612_v29 = vshrl.u32 %v2519_v43, 16  ;;  %v1893_v63 = vperm.slane %v1542_v42, %v11809_v41  ;;  %v2510_v0 = vrot.slane %v1427_v32, 4  ;;  %v12007_v45 = vshrl.u32 %v17485_v12, 16  ;;  %v1421_v53 = vpop.permute.xlu2 %1420 }
 0x378   : > { %17481 = vst [vmem:[#allocation22_spill] sm:$0xff] %v11969_v21  ;;  %v1899_v56 = vrot.slane %v1898_v54, 4  ;;  %v1924_v60 = vperm.slane %v1551_v48, %v11809_v41  ;;  %v2960_v30 = vperm.slane %v2611_v34, %v11809_v41  ;;  %v17486_v37 = vshrl.u32 %v11669_v44, 16 }
 0x379   : > { %17482 = vst [vmem:[#allocation23_spill] sm:$0xff] %v11972_v26  ;;  %v2614_v17 = vpack.i.b16 %v11906_v59, %v2612_v29  ;;  %v1901_v33 = vrot.slane %v1893_v63, 4  ;;  %v17488_v32 = vrot.slane %v11669_v44, 4  ;;  %v2607_v11 = vshrl.u32 %v2510_v0, 16 }
 0x37a   : > { %17483 = vst [vmem:[#allocation24_spill] sm:$0xff] %v11988_v4  ;;  %v1545_v28 = vpack.i.b16 %v1544_v16, %v17486_v37  ;;  %v1900_v43 = vsel %vm1587_vm12, %v1899_v56, %v1893_v63  ;;  %v1925_v15 = vrot.slane %v1924_v60, 4  ;;  %v2961_v42 = vrot.slane %v2960_v30, 4 }
 0x37b   : > { %17484 = vst [vmem:[#allocation25_spill] sm:$0xff] %v11996_v36  ;;  %v2986_v48 = vperm.slane %v2614_v17, %v11809_v41  ;;  %v12014_v59 = vperm.slane %v1900_v43, %v11900_v46  ;;  %v1902_v29 = vsel %vm1587_vm12, %v1898_v54, %v1901_v33  ;;  %v2605_v12 = vpack.i.b16 %v2510_v0, %v17488_v32 }
 0x37c   : > { %v1919_v34 = vperm.slane %v1545_v28, %v11809_v41  ;;  %v12026_v63 = vsel %vm1587_vm12, 0, %v11996_v36  ;;  %v1910_v56 = vperm.slane %v1902_v29, %v11900_v46  ;;  %v1508_v16 = vshrl.u32 %v1421_v53, 16 }
 0x37d   : > { %17487 = vst [vmem:[#allocation26_spill] sm:$0xff] %v12014_v59  ;;  %3618 = vrot.lane.b32.xlu2 %v11874_v51, %s11184_s1  ;;  %3582 = vrot.lane.b32.xlu1 %v11874_v51, %s11182_s29  ;;  %v2987_v17 = vrot.slane %v2986_v48, 4  ;;  %v2608_v54 = vpack.i.b16 %v2607_v11, %v11854_v27  ;;  %v2955_v37 = vperm.slane %v2605_v12, %v11809_v41  ;;  %v1911_v28 = vrot.slane %v12014_v59, 4 }
 0x37e   : > { %17489 = vst [vmem:[#allocation27_spill] sm:$0xff] %v12026_v63  ;;  %3600 = vrot.lane.b32.xlu0 %v11874_v51, %s11183_s24  ;;  %v1926_v44 = vsel %vm1587_vm12, %v1925_v15, %v1919_v34  ;;  %v1927_v0 = vrot.slane %v1919_v34, 4  ;;  %v12035_v43 = vrot.slane %v1910_v56, 4  ;;  %v1506_v29 = vpack.i.b16 %v1421_v53, %v11708_v1 }
 0x37f   : > { %v12038_v33 = vperm.slane %v1926_v44, %v11900_v46  ;;  %v2962_v51 = vsel %vm1587_vm12, %v2961_v42, %v2955_v37  ;;  %v2963_v21 = vrot.slane %v2955_v37, 4  ;;  %v2981_v15 = vperm.slane %v2608_v54, %v11809_v41  ;;  %v1465_v44 = vpop.permute.xlu1 %1464 }
 0x380   : > { %17490 = vst [vmem:[#allocation28_spill] sm:$0xff] %v12035_v43  ;;  %v1928_v32 = vsel %vm1587_vm12, %v1924_v60, %v1927_v0  ;;  %v12046_v27 = vsel %vm1587_vm12, 0, %v12035_v43  ;;  %v17493_v12 = vshrl.u32 %v11708_v1, 16  ;;  %v12054_v60 = vperm.slane %v2962_v51, %v11900_v46 }
 0x381   : > { %17491 = vst [vmem:[#allocation29_spill] sm:$0xff] %v12038_v33  ;;  %v1936_v11 = vperm.slane %v1928_v32, %v11900_v46  ;;  %v1937_v34 = vrot.slane %v12038_v33, 4  ;;  %v2964_v59 = vsel %vm1587_vm12, %v2960_v30, %v2963_v21  ;;  %v2988_v42 = vsel %vm1587_vm12, %v2987_v17, %v2981_v15 }
 0x382   : > { %17492 = vst [vmem:[#allocation30_spill] sm:$0xff] %v12046_v27  ;;  %v1509_v56 = vpack.i.b16 %v1508_v16, %v17493_v12  ;;  %v2989_v0 = vrot.slane %v2981_v15, 4  ;;  %v12059_v37 = vsel %vm1587_vm12, 0, %v1911_v28  ;;  %v2972_v33 = vperm.slane %v2964_v59, %v11900_v46  ;;  %v1447_v15 = vpop.permute.xlu0 %1446 }
 0x383   : > { %17494 = vst [vmem:[#allocation31_spill] sm:$0xff] %v12059_v37  ;;  %v12061_v32 = vrot.slane %v1936_v11, 4  ;;  %v12067_v21 = vperm.slane %v2988_v42, %v11900_v46  ;;  %v12070_v51 = vperm.slane %v1506_v29, %v11809_v41  ;;  %v2507_v59 = vrot.slane %v1421_v53, 4 }
 0x384   : > { %v2990_v12 = vsel %vm1587_vm12, %v2986_v48, %v2989_v0  ;;  %v12076_v17 = vrot.slane %v2972_v33, 4  ;;  %v12079_v28 = vperm.slane %v1509_v56, %v11809_v41  ;;  %v12082_v11 = vsel %vm1587_vm12, 0, %v1937_v34  ;;  %v12095_v48 = vpop.permute.xlu2 %1454 }
 0x385   : > { %17495 = vst [vmem:[#allocation32_spill] sm:$0xff] %v12061_v32  ;;  %v12074_v30 = vsel %vm1587_vm12, 0, %v12061_v32  ;;  %v2998_v29 = vperm.slane %v2990_v12, %v11900_v46  ;;  %v17498_v33 = vrot.slane %v11708_v1, 4  ;;  %v2571_v56 = vshrl.u32 %v2507_v59, 16 }
 0x386   : > { %17496 = vst [vmem:[#allocation33_spill] sm:$0xff] %v12074_v30  ;;  %v12093_v53 = vsel %vm1587_vm12, 0, %v12076_v17  ;;  %v1562_v34 = vshrl.u32 %v1465_v44, 16  ;;  %v1560_v32 = vpack.i.b16 %v1465_v44, %v1447_v15  ;;  %v1561_v0 = vshrl.u32 %v1447_v15, 16 }
 0x387   : > { %17497 = vst [vmem:[#allocation34_spill] sm:$0xff] %v12082_v11  ;;  %v2569_v54 = vpack.i.b16 %v2507_v59, %v17498_v33  ;;  %v2529_v11 = vrot.slane %v1465_v44, 4  ;;  %v2520_v16 = vrot.slane %v1447_v15, 4  ;;  %v12101_v30 = vrot.slane %v2998_v29, 4  ;;  %v12107_v61 = vpop.permute.xlu1 %1460 }
 0x388   : > { %v2572_v1 = vpack.i.b16 %v2571_v56, %v11823_v38  ;;  %v1950_v33 = vperm.slane %v1560_v32, %v11809_v41  ;;  %v1563_v37 = vpack.i.b16 %v1562_v34, %v1561_v0  ;;  %v17343_v8 = vrot.slane %v12095_v48, 4 }
 0x389   : > { %v12099_v12 = vperm.slane %v2569_v54, %v11809_v41  ;;  %v2625_v59 = vshrl.u32 %v2529_v11, 16  ;;  %v2623_v44 = vpack.i.b16 %v2529_v11, %v2520_v16  ;;  %v17499_v54 = vrot.slane %v11898_v39, 4 }
 0x38a   : > { %v1951_v42 = vrot.slane %v1950_v33, 4  ;;  %v2624_v29 = vshrl.u32 %v2520_v16, 16  ;;  %v1976_v56 = vperm.slane %v1563_v37, %v11809_v41  ;;  %v12118_v0 = vperm.slane %v2572_v1, %v11809_v41 }
 0x38b   : > { %v1954_v15 = vsel %vm1587_vm12, %v1950_v33, %v17499_v54  ;;  %v3012_v11 = vperm.slane %v2623_v44, %v11809_v41  ;;  %v17503_v43 = vrot.slane %v11912_v40, 4  ;;  %v17511_v24 = vshrl.u32 %v11689_v55, 16 }
 0x38c   : > { %v1962_v32 = vperm.slane %v1954_v15, %v11900_v46  ;;  %v1952_v34 = vsel %vm1587_vm12, %v1951_v42, %v11898_v39  ;;  %v2626_v27 = vpack.i.b16 %v2625_v59, %v2624_v29  ;;  %v1977_v38 = vrot.slane %v1976_v56, 4 }
 0x38d   : > { %v12124_v16 = vperm.slane %v1952_v34, %v11900_v46  ;;  %v17502_v15 = vrot.slane %v11909_v18, 4  ;;  %v3013_v1 = vrot.slane %v3012_v11, 4  ;;  %v3016_v39 = vsel %vm1587_vm12, %v3012_v11, %v17503_v43  ;;  %v1431_v11 = vpop.permute.xlu0 %1430 }
 0x38e   : > { %v12126_v54 = vrot.slane %v1962_v32, 4  ;;  %v3038_v42 = vperm.slane %v2626_v27, %v11809_v41  ;;  %v1978_v32 = vsel %vm1587_vm12, %v1977_v38, %v11909_v18  ;;  %v12153_v27 = vshrl.u32 %v17343_v8, 16  ;;  %v1417_v8 = vpop.permute.xlu2 %1416 }
 0x38f   : > { %17500 = vst [vmem:[#allocation35_spill] sm:$0xff] %v12124_v16  ;;  %v1980_v37 = vsel %vm1587_vm12, %v1976_v56, %v17502_v15  ;;  %v1963_v59 = vrot.slane %v12124_v16, 4  ;;  %v3024_v56 = vperm.slane %v3016_v39, %v11900_v46  ;;  %v12145_v34 = vperm.slane %v1978_v32, %v11900_v46 }
 0x390   : > { %17501 = vst [vmem:[#allocation36_spill] sm:$0xff] %v12126_v54  ;;  %v1988_v44 = vperm.slane %v1980_v37, %v11900_v46  ;;  %v12139_v29 = vsel %vm1587_vm12, 0, %v12126_v54  ;;  %v3014_v43 = vsel %vm1587_vm12, %v3013_v1, %v11912_v40  ;;  %v3039_v18 = vrot.slane %v3038_v42, 4 }
 0x391   : > { %17504 = vst [vmem:[#allocation37_spill] sm:$0xff] %v12139_v29  ;;  %v12156_v33 = vrot.slane %v3024_v56, 4  ;;  %v12160_v39 = vsel %vm1587_vm12, 0, %v1963_v59  ;;  %v17509_v1 = vrot.slane %v11918_v31, 4  ;;  %v12173_v38 = vperm.slane %v3014_v43, %v11900_v46 }
 0x392   : > { %17505 = vst [vmem:[#allocation38_spill] sm:$0xff] %v12145_v34  ;;  %v12147_v15 = vrot.slane %v1988_v44, 4  ;;  %v17510_v59 = vrot.slane %v12107_v61, 4  ;;  %v1566_v56 = vpack.i.b16 %v1431_v11, %v11689_v55  ;;  %v1568_v37 = vshrl.u32 %v1431_v11, 16 }
 0x393   : > { %17507 = vst [vmem:[#allocation40_spill] sm:$0xff] %v12160_v39  ;;  %v3042_v32 = vsel %vm1587_vm12, %v3038_v42, %v17509_v1  ;;  %v12181_v40 = vsel %vm1587_vm12, 0, %v12156_v33  ;;  %v3040_v42 = vsel %vm1587_vm12, %v3039_v18, %v11918_v31  ;;  %v1482_v43 = vpack.i.b16 %v1417_v8, %v11726_v5 }
 0x394   : > { %17506 = vst [vmem:[#allocation39_spill] sm:$0xff] %v12147_v15  ;;  %v12164_v44 = vsel %vm1587_vm12, 0, %v12147_v15  ;;  %v12177_v39 = vshrl.u32 %v17510_v59, 16  ;;  %v1449_v15 = vpop.permute.xlu1 %1448  ;;  %v3050_v1 = vperm.slane %v3042_v32, %v11900_v46  ;;  %v1484_v29 = vshrl.u32 %v1417_v8, 16 }
 0x395   : > { %17508 = vst [vmem:[#allocation41_spill] sm:$0xff] %v12164_v44  ;;  %v2512_v44 = vrot.slane %v1431_v11, 4  ;;  %v1997_v59 = vperm.slane %v1566_v56, %v11809_v41  ;;  %v2505_v16 = vrot.slane %v1417_v8, 4  ;;  %v1572_v34 = vpack.i.b16 %v11951_v52, %v1449_v15  ;;  %v12218_v22 = vpop.permute.xlu0 %1442 }
 0x396   : > { %v12188_v54 = vrot.slane %v3050_v1, 4  ;;  %v1569_v25 = vpack.i.b16 %v1568_v37, %v17511_v24  ;;  %v17512_v31 = vrot.slane %v11689_v55, 4  ;;  %v17513_v23 = vshrl.u32 %v11726_v5, 16 }
 0x397   : > { %v2631_v32 = vshrl.u32 %v2512_v44, 16  ;;  %v12204_v8 = vperm.slane %v1482_v43, %v11809_v41  ;;  %v17514_v56 = vrot.slane %v11726_v5, 4  ;;  %v12209_v24 = vperm.slane %v3040_v42, %v11900_v46 }
 0x398   : > { %v2629_v18 = vpack.i.b16 %v2512_v44, %v17512_v31  ;;  %v1485_v11 = vpack.i.b16 %v1484_v29, %v17513_v23  ;;  %v12201_v1 = vsel %vm1587_vm12, 0, %v12188_v54  ;;  %v2023_v55 = vperm.slane %v1569_v25, %v11809_v41 }
 0x399   : > { %v2545_v13 = vpack.i.b16 %v2505_v16, %v17514_v56  ;;  %v2632_v37 = vpack.i.b16 %v2631_v32, %v11878_v62  ;;  %v2005_v44 = vrot.slane %v1997_v59, 4  ;;  %v2547_v43 = vshrl.u32 %v2505_v16, 16 }
 0x39a   : > { %v3059_v23 = vperm.slane %v2629_v18, %v11809_v41  ;;  %v12216_v31 = vperm.slane %v1485_v11, %v11809_v41  ;;  %v1573_v25 = vshrl.u32 %v1449_v15, 16  ;;  %v2031_v62 = vrot.slane %v2023_v55, 4 }
 0x39b   : > { %v12223_v56 = vperm.slane %v2545_v13, %v11809_v41  ;;  %v2548_v18 = vpack.i.b16 %v2547_v43, %v11795_v14  ;;  %v2002_v29 = vperm.slane %v1572_v34, %v11809_v41  ;;  %v3085_v11 = vperm.slane %v2632_v37, %v11809_v41 }
 0x39c   : > { %v3067_v32 = vrot.slane %v3059_v23, 4  ;;  %v17515_v16 = vshrl.u32 %v11951_v52, 16  ;;  %v2521_v36 = vrot.slane %v1449_v15, 4  ;;  %v1536_v5 = vpack.i.b16 %v12107_v61, %v12218_v22 }
 0x39d   : > { %v2003_v13 = vrot.slane %v2002_v29, 4  ;;  %v2006_v4 = vsel %vm1587_vm12, %v2002_v29, %v2005_v44  ;;  %v1537_v26 = vshrl.u32 %v12218_v22, 16  ;;  %v17516_v37 = vrot.slane %v11951_v52, 4 }
 0x39e   : > { %v1575_v63 = vpack.i.b16 %v17515_v16, %v1573_v25  ;;  %v2014_v14 = vperm.slane %v2006_v4, %v11900_v46  ;;  %v2636_v49 = vshrl.u32 %v2521_v36, 16  ;;  %v12241_v25 = vperm.slane %v2548_v18, %v11809_v41 }
 0x39f   : > { %v2635_v43 = vpack.i.b16 %v17516_v37, %v2521_v36  ;;  %v2004_v16 = vsel %vm1587_vm12, %v2003_v13, %v1997_v59  ;;  %v1846_v42 = vperm.slane %v1536_v5, %v11809_v41  ;;  %v3093_v15 = vrot.slane %v3085_v11, 4 }
 0x3a0   : > { %v2028_v34 = vperm.slane %v1575_v63, %v11809_v41  ;;  %v12246_v29 = vperm.slane %v2004_v16, %v11900_v46  ;;  %v12248_v44 = vrot.slane %v2014_v14, 4  ;;  %v2638_v36 = vpack.i.b16 %v12007_v45, %v2636_v49 }
 0x3a1   : > { %v3064_v37 = vperm.slane %v2635_v43, %v11809_v41  ;;  %v1847_v18 = vrot.slane %v1846_v42, 4  ;;  %v17520_v13 = vshrl.u32 %v12107_v61, 16  ;;  %v17522_v49 = vrot.slane %v11830_v58, 4 }
 0x3a2   : > { %17517 = vst [vmem:[#allocation42_spill] sm:$0xff] %v12246_v29  ;;  %v2029_v4 = vrot.slane %v2028_v34, 4  ;;  %v2032_v63 = vsel %vm1587_vm12, %v2028_v34, %v2031_v62  ;;  %v12256_v59 = vsel %vm1587_vm12, 0, %v12248_v44  ;;  %v2015_v16 = vrot.slane %v12246_v29, 4 }
 0x3a3   : > { %17518 = vst [vmem:[#allocation43_spill] sm:$0xff] %v12248_v44  ;;  %v2040_v52 = vperm.slane %v2032_v63, %v11900_v46  ;;  %v1539_v14 = vpack.i.b16 %v17520_v13, %v1537_v26  ;;  %v3065_v34 = vrot.slane %v3064_v37, 4  ;;  %v1850_v45 = vsel %vm1587_vm12, %v1846_v42, %v17522_v49  ;;  %v1437_v49 = vpop.permute.xlu1 %1436 }
 0x3a4   : > { %17519 = vst [vmem:[#allocation44_spill] sm:$0xff] %v12256_v59  ;;  %v2030_v5 = vsel %vm1587_vm12, %v2029_v4, %v2023_v55  ;;  %v3068_v63 = vsel %vm1587_vm12, %v3064_v37, %v3067_v32  ;;  %v3090_v44 = vperm.slane %v2638_v36, %v11809_v41  ;;  %v1848_v55 = vsel %vm1587_vm12, %v1847_v18, %v11830_v58 }
 0x3a5   : > { %v12262_v62 = vrot.slane %v2040_v52, 4  ;;  %v12268_v43 = vperm.slane %v2030_v5, %v11900_v46  ;;  %v3066_v52 = vsel %vm1587_vm12, %v3065_v34, %v3059_v23  ;;  %v3076_v13 = vperm.slane %v3068_v63, %v11900_v46 }
 0x3a6   : > { %v12283_v5 = vperm.slane %v3066_v52, %v11900_v46  ;;  %v3091_v32 = vrot.slane %v3090_v44, 4  ;;  %v3094_v36 = vsel %vm1587_vm12, %v3090_v44, %v3093_v15  ;;  %v12290_v18 = vperm.slane %v1848_v55, %v11900_v46 }
 0x3a7   : > { %17521 = vst [vmem:[#allocation45_spill] sm:$0xff] %v12262_v62  ;;  %v12280_v42 = vsel %vm1587_vm12, 0, %v12262_v62  ;;  %v12286_v37 = vrot.slane %v3076_v13, 4  ;;  %v3102_v58 = vperm.slane %v3094_v36, %v11900_v46  ;;  %v1858_v23 = vperm.slane %v1850_v45, %v11900_v46 }
 0x3a8   : > { %17523 = vst [vmem:[#allocation46_spill] sm:$0xff] %v12268_v43  ;;  %v12294_v34 = vsel %vm1587_vm12, 0, %v2015_v16  ;;  %v1872_v63 = vperm.slane %v1539_v14, %v11809_v41  ;;  %v2518_v52 = vrot.slane %v12218_v22, 4  ;;  %v3092_v44 = vsel %vm1587_vm12, %v3091_v32, %v3085_v11  ;;  %v12330_v22 = vpop.permute.xlu2 %1450 }
 0x3a9   : > { %17524 = vst [vmem:[#allocation47_spill] sm:$0xff] %v12280_v42  ;;  %v12301_v13 = vrot.slane %v3102_v58, 4  ;;  %v1859_v55 = vrot.slane %v12290_v18, 4  ;;  %v12306_v45 = vsel %vm1587_vm12, 0, %v12286_v37  ;;  %v12308_v16 = vrot.slane %v1858_v23, 4 }
 0x3aa   : > { %17525 = vst [vmem:[#allocation48_spill] sm:$0xff] %v12290_v18  ;;  %v1873_v36 = vrot.slane %v1872_v63, 4  ;;  %v17528_v4 = vrot.slane %v11834_v2, 4  ;;  %v17529_v58 = vrot.slane %v12107_v61, 4  ;;  %v12322_v23 = vperm.slane %v3092_v44, %v11900_v46 }
 0x3ab   : > { %17526 = vst [vmem:[#allocation49_spill] sm:$0xff] %v12294_v34  ;;  %v12316_v11 = vsel %vm1587_vm12, 0, %v12301_v13  ;;  %v12326_v26 = vsel %vm1587_vm12, 0, %v12308_v16  ;;  %v17534_v42 = vrot.slane %v11837_v3, 4  ;;  %v2515_v29 = vrot.slane %v1437_v49, 4 }
 0x3ac   : > { %17527 = vst [vmem:[#allocation50_spill] sm:$0xff] %v12308_v16  ;;  %v1876_v14 = vsel %vm1587_vm12, %v1872_v63, %v17528_v4  ;;  %v2599_v15 = vpack.i.b16 %v17529_v58, %v2518_v52  ;;  %v1874_v4 = vsel %vm1587_vm12, %v1873_v36, %v11834_v2  ;;  %v2600_v63 = vshrl.u32 %v2518_v52, 16 }
 0x3ad   : > { %v1884_v32 = vperm.slane %v1876_v14, %v11900_v46  ;;  %17530 = vst [vmem:[#allocation51_spill] sm:$0xff] %v12326_v26  ;;  %v12334_v14 = vsel %vm1587_vm12, 0, %v1859_v55  ;;  %v12341_v62 = vperm.slane %v1874_v4, %v11900_v46  ;;  %v1500_v2 = vpack.i.b16 %v12095_v48, %v1437_v49 }
 0x3ae   : > { %17531 = vst [vmem:[#allocation52_spill] sm:$0xff] %v12334_v14  ;;  %v2908_v44 = vperm.slane %v2599_v15, %v11809_v41  ;;  %v2602_v59 = vpack.i.b16 %v12177_v39, %v2600_v63  ;;  %v1501_v52 = vshrl.u32 %v1437_v49, 16  ;;  %v17537_v43 = vrot.slane %v11845_v35, 4 }
 0x3af   : > { %v12336_v61 = vrot.slane %v1884_v32, 4  ;;  %17533 = vst [vmem:[#allocation54_spill] sm:$0xff] %v12341_v62  ;;  %v1690_v34 = vperm.slane %v1500_v2, %v11809_v41  ;;  %v17540_v2 = vrot.slane %v12095_v48, 4  ;;  %v17541_v26 = vrot.slane %v12330_v22, 4 }
 0x3b0   : > { %v2909_v36 = vrot.slane %v2908_v44, 4  ;;  %v2912_v55 = vsel %vm1587_vm12, %v2908_v44, %v17534_v42  ;;  %v2934_v58 = vperm.slane %v2602_v59, %v11809_v41 }
 0x3b1   : > { %17532 = vst [vmem:[#allocation53_spill] sm:$0xff] %v12336_v61  ;;  %v12352_v15 = vsel %vm1587_vm12, 0, %v12336_v61  ;;  %v2920_v4 = vperm.slane %v2912_v55, %v11900_v46  ;;  %v2563_v49 = vpack.i.b16 %v17540_v2, %v2515_v29  ;;  %v1419_v61 = vpop.permute.xlu0 %1418 }
 0x3b2   : > { %17535 = vst [vmem:[#allocation55_spill] sm:$0xff] %v12352_v15  ;;  %v2910_v63 = vsel %vm1587_vm12, %v2909_v36, %v11837_v3  ;;  %v2935_v32 = vrot.slane %v2934_v58, 4  ;;  %v2938_v55 = vsel %vm1587_vm12, %v2934_v58, %v17537_v43  ;;  %v17539_v3 = vshrl.u32 %v12095_v48, 16  ;;  %v3581_v15 = vpop.permute.xlu2 %3580 }
 0x3b3   : > { %v12361_v44 = vrot.slane %v2920_v4, 4  ;;  %v12367_v59 = vperm.slane %v2910_v63, %v11900_v46  ;;  %v2946_v39 = vperm.slane %v2938_v55, %v11900_v46  ;;  %v12379_v43 = vshrl.u32 %v17541_v26, 16 }
 0x3b4   : > { %v1503_v36 = vpack.i.b16 %v17539_v3, %v1501_v52  ;;  %v2936_v42 = vsel %vm1587_vm12, %v2935_v32, %v11845_v35  ;;  %v2564_v58 = vshrl.u32 %v2515_v29, 16  ;;  %v1691_v52 = vrot.slane %v1690_v34, 4 }
 0x3b5   : > { %17536 = vst [vmem:[#allocation56_spill] sm:$0xff] %v12361_v44  ;;  %v12383_v63 = vsel %vm1587_vm12, 0, %v12361_v44  ;;  %v12385_v55 = vrot.slane %v2946_v39, 4  ;;  %v2752_v2 = vperm.slane %v2563_v49, %v11809_v41  ;;  %v1494_v35 = vpack.i.b16 %v1419_v61, %v11641_v20 }
 0x3b6   : > { %17538 = vst [vmem:[#allocation57_spill] sm:$0xff] %v12367_v59  ;;  %v1716_v48 = vperm.slane %v1503_v36, %v11809_v41  ;;  %v2566_v3 = vpack.i.b16 %v12153_v27, %v2564_v58  ;;  %v1496_v32 = vshrl.u32 %v1419_v61, 16  ;;  %v12393_v29 = vperm.slane %v2936_v42, %v11900_v46 }
 0x3b7   : > { %17542 = vst [vmem:[#allocation58_spill] sm:$0xff] %v12383_v63  ;;  %v12397_v4 = vsel %vm1587_vm12, 0, %v12385_v55  ;;  %v2506_v39 = vrot.slane %v1419_v61, 4  ;;  %v17544_v49 = vshrl.u32 %v11641_v20, 16  ;;  %v2753_v16 = vrot.slane %v2752_v2, 4  ;;  %v1457_v63 = vpop.permute.xlu1 %1456 }
 0x3b8   : > { %17543 = vst [vmem:[#allocation59_spill] sm:$0xff] %v12385_v55  ;;  %v1717_v14 = vrot.slane %v1716_v48, 4  ;;  %v2778_v27 = vperm.slane %v2566_v3, %v11809_v41  ;;  %v1685_v26 = vperm.slane %v1494_v35, %v11809_v41  ;;  %v17545_v42 = vrot.slane %v11641_v20, 4 }
 0x3b9   : > { %v1497_v58 = vpack.i.b16 %v1496_v32, %v17544_v49  ;;  %v2559_v62 = vshrl.u32 %v2506_v39, 16  ;;  %v3706_v44 = vpack.i.b16 %v3581_v15, %v11744_v19  ;;  %v3708_v36 = vshrl.u32 %v3581_v15, 16 }
 0x3ba   : > { %v2557_v18 = vpack.i.b16 %v2506_v39, %v17545_v42  ;;  %v1692_v3 = vsel %vm1587_vm12, %v1691_v52, %v1685_v26  ;;  %v1693_v59 = vrot.slane %v1685_v26, 4  ;;  %v2779_v35 = vrot.slane %v2778_v27, 4 }
 0x3bb   : > { %v1711_v61 = vperm.slane %v1497_v58, %v11809_v41  ;;  %v2560_v32 = vpack.i.b16 %v2559_v62, %v11814_v47  ;;  %v12413_v20 = vperm.slane %v1692_v3, %v11900_v46 }
 0x3bc   : > { %v2747_v49 = vperm.slane %v2557_v18, %v11809_v41  ;;  %v1694_v58 = vsel %vm1587_vm12, %v1690_v34, %v1693_v59 }
 0x3bd   : > { %17546 = vst [vmem:[#allocation60_spill] sm:$0xff] %v12413_v20  ;;  %v1718_v39 = vsel %vm1587_vm12, %v1717_v14, %v1711_v61  ;;  %v1719_v42 = vrot.slane %v1711_v61, 4  ;;  %v1702_v26 = vperm.slane %v1694_v58, %v11900_v46  ;;  %v1703_v47 = vrot.slane %v12413_v20, 4 }
 0x3be   : > { %v12418_v55 = vperm.slane %v1718_v39, %v11900_v46  ;;  %v2754_v15 = vsel %vm1587_vm12, %v2753_v16, %v2747_v49  ;;  %v2755_v52 = vrot.slane %v2747_v49, 4  ;;  %v2773_v59 = vperm.slane %v2560_v32, %v11809_v41 }
 0x3bf   : > { %v1720_v62 = vsel %vm1587_vm12, %v1716_v48, %v1719_v42  ;;  %v12425_v18 = vperm.slane %v2754_v15, %v11900_v46  ;;  %v12431_v3 = vrot.slane %v1702_v26, 4  ;;  %v17549_v49 = vshrl.u32 %v11744_v19, 16 }
 0x3c0   : > { %17547 = vst [vmem:[#allocation61_spill] sm:$0xff] %v12418_v55  ;;  %v1728_v14 = vperm.slane %v1720_v62, %v11900_v46  ;;  %v1729_v61 = vrot.slane %v12418_v55, 4  ;;  %v2756_v34 = vsel %vm1587_vm12, %v2752_v2, %v2755_v52  ;;  %v12437_v48 = vperm.slane %v3706_v44, %v11809_v41  ;;  %v1439_v44 = vpop.permute.xlu0 %1438 }
 0x3c1   : > { %17548 = vst [vmem:[#allocation62_spill] sm:$0xff] %v12431_v3  ;;  %v2764_v16 = vperm.slane %v2756_v34, %v11900_v46  ;;  %v3709_v39 = vpack.i.b16 %v3708_v36, %v17549_v49  ;;  %v2780_v58 = vsel %vm1587_vm12, %v2779_v35, %v2773_v59  ;;  %v2781_v15 = vrot.slane %v2773_v59, 4 }
 0x3c2   : > { %v12439_v42 = vrot.slane %v1728_v14, 4  ;;  %v1514_v62 = vshrl.u32 %v1457_v63, 16  ;;  %v12443_v2 = vsel %vm1587_vm12, 0, %v1703_v47  ;;  %v12447_v32 = vsel %vm1587_vm12, 0, %v12431_v3 }
 0x3c3   : > { %17551 = vst [vmem:[#allocation64_spill] sm:$0xff] %v12443_v2  ;;  %v12449_v52 = vrot.slane %v2764_v16, 4  ;;  %v12452_v19 = vperm.slane %v2780_v58, %v11900_v46  ;;  %v12455_v36 = vsel %vm1587_vm12, 0, %v1729_v61  ;;  %v2782_v47 = vsel %vm1587_vm12, %v2778_v27, %v2781_v15  ;;  %v1433_v61 = vpop.permute.xlu1 %1432 }
 0x3c4   : > { %17550 = vst [vmem:[#allocation63_spill] sm:$0xff] %v12439_v42  ;;  %v12459_v35 = vsel %vm1587_vm12, 0, %v12439_v42  ;;  %v12470_v16 = vperm.slane %v3709_v39, %v11809_v41  ;;  %v2790_v58 = vperm.slane %v2782_v47, %v11900_v46  ;;  %v1512_v26 = vpack.i.b16 %v1457_v63, %v1439_v44  ;;  %v12479_v47 = vpop.permute.xlu2 %3616 }
 0x3c5   : > { %17552 = vst [vmem:[#allocation65_spill] sm:$0xff] %v12447_v32  ;;  %v12466_v34 = vsel %vm1587_vm12, 0, %v12449_v52  ;;  %v1513_v14 = vshrl.u32 %v1439_v44, 16  ;;  %v2516_v42 = vrot.slane %v1439_v44, 4  ;;  %v1476_v59 = vpack.i.b16 %v12330_v22, %v1433_v61 }
 0x3c6   : > { %17553 = vst [vmem:[#allocation66_spill] sm:$0xff] %v12449_v52  ;;  %v1742_v32 = vperm.slane %v1512_v26, %v11809_v41  ;;  %v1477_v39 = vshrl.u32 %v1433_v61, 16  ;;  %v17558_v15 = vrot.slane %v12070_v51, 4  ;;  %v17559_v20 = vshrl.u32 %v12330_v22, 16 }
 0x3c7   : > { %17554 = vst [vmem:[#allocation67_spill] sm:$0xff] %v12455_v36  ;;  %v2525_v36 = vrot.slane %v1457_v63, 4  ;;  %v1515_v3 = vpack.i.b16 %v1514_v62, %v1513_v14  ;;  %v12481_v63 = vrot.slane %v2790_v58, 4  ;;  %v1585_v14 = vperm.slane %v1476_v59, %v11809_v41 }
 0x3c8   : > { %17555 = vst [vmem:[#allocation68_spill] sm:$0xff] %v12459_v35  ;;  %v2576_v35 = vshrl.u32 %v2516_v42, 16  ;;  %v1743_v27 = vrot.slane %v1742_v32, 4  ;;  %v1746_v44 = vsel %vm1587_vm12, %v1742_v32, %v17558_v15  ;;  %v1479_v26 = vpack.i.b16 %v17559_v20, %v1477_v39 }
 0x3c9   : > { %17556 = vst [vmem:[#allocation69_spill] sm:$0xff] %v12466_v34  ;;  %v2577_v55 = vshrl.u32 %v2525_v36, 16  ;;  %v2575_v49 = vpack.i.b16 %v2525_v36, %v2516_v42  ;;  %v1754_v34 = vperm.slane %v1746_v44, %v11900_v46  ;;  %v1768_v52 = vperm.slane %v1515_v3, %v11809_v41 }
 0x3ca   : > { %17557 = vst [vmem:[#allocation70_spill] sm:$0xff] %v12481_v63  ;;  %v1744_v42 = vsel %vm1587_vm12, %v1743_v27, %v12070_v51  ;;  %v2513_v58 = vrot.slane %v1433_v61, 4  ;;  %v17560_v20 = vrot.slane %v12079_v28, 4  ;;  %v1612_v61 = vperm.slane %v1479_v26, %v11809_v41 }
 0x3cb   : > { %v2578_v2 = vpack.i.b16 %v2577_v55, %v2576_v35  ;;  %v2804_v62 = vperm.slane %v2575_v49, %v11809_v41  ;;  %v1750_v32 = vperm.slane %v1744_v42, %v11900_v46  ;;  %v1757_v15 = vrot.slane %v1754_v34, 4 }
 0x3cc   : > { %v1769_v63 = vrot.slane %v1768_v52, 4  ;;  %v1772_v39 = vsel %vm1587_vm12, %v1768_v52, %v17560_v20  ;;  %v17561_v35 = vrot.slane %v12099_v12, 4  ;;  %v1613_v36 = vrot.slane %v1612_v61, 4 }
 0x3cd   : > { %v1780_v55 = vperm.slane %v1772_v39, %v11900_v46  ;;  %v2805_v3 = vrot.slane %v2804_v62, 4  ;;  %v2830_v49 = vperm.slane %v2578_v2, %v11809_v41  ;;  %v1755_v27 = vrot.slane %v1750_v32, 4 }
 0x3ce   : > { %v2808_v51 = vsel %vm1587_vm12, %v2804_v62, %v17561_v35  ;;  %v1770_v59 = vsel %vm1587_vm12, %v1769_v63, %v12079_v28  ;;  %v12507_v34 = vsel %vm1587_vm12, %v1757_v15, %v1750_v32  ;;  %v12511_v52 = vsel %vm1587_vm12, 0, %v1757_v15 }
 0x3cf   : > { %17562 = vst [vmem:[#allocation71_spill] sm:$0xff] %v12507_v34  ;;  %v12514_v44 = vperm.slane %v1770_v59, %v11900_v46  ;;  %v12516_v42 = vrot.slane %v1780_v55, 4  ;;  %v2806_v2 = vsel %vm1587_vm12, %v2805_v3, %v12099_v12  ;;  %v2816_v62 = vperm.slane %v2808_v51, %v11900_v46  ;;  %v1415_v3 = vpop.permute.xlu0 %1414 }
 0x3d0   : > { %17563 = vst [vmem:[#allocation72_spill] sm:$0xff] %v12511_v52  ;;  %v2831_v20 = vrot.slane %v2830_v49, 4  ;;  %v1586_v28 = vrot.slane %v1585_v14, 4  ;;  %v17566_v63 = vrot.slane %v12330_v22, 4  ;;  %v12529_v39 = vperm.slane %v2806_v2, %v11900_v46  ;;  %v3575_v22 = vpop.permute.xlu2 %3574 }
 0x3d1   : > { %17564 = vst [vmem:[#allocation73_spill] sm:$0xff] %v12514_v44  ;;  %v1781_v26 = vrot.slane %v12514_v44, 4  ;;  %v12526_v15 = vsel %vm1587_vm12, 0, %v12516_v42  ;;  %v17568_v55 = vrot.slane %v12118_v0, 4  ;;  %v12535_v35 = vsel %vm1587_vm12, 0, %v1755_v27 }
 0x3d2   : > { %17565 = vst [vmem:[#allocation74_spill] sm:$0xff] %v12516_v42  ;;  %v2539_v32 = vpack.i.b16 %v17566_v63, %v2513_v58  ;;  %v12538_v51 = vrot.slane %v2816_v62, 4  ;;  %v2832_v59 = vsel %vm1587_vm12, %v2831_v20, %v12118_v0  ;;  %v2540_v34 = vshrl.u32 %v2513_v58, 16 }
 0x3d3   : > { %17567 = vst [vmem:[#allocation75_spill] sm:$0xff] %v12526_v15  ;;  %v2834_v12 = vsel %vm1587_vm12, %v2830_v49, %v17568_v55  ;;  %v12543_v63 = vperm.slane %v2832_v59, %v11900_v46  ;;  %v1470_v27 = vpack.i.b16 %v1415_v3, %v11625_v7  ;;  %v1472_v42 = vshrl.u32 %v1415_v3, 16 }
 0x3d4   : > { %17569 = vst [vmem:[#allocation76_spill] sm:$0xff] %v12535_v35  ;;  %v2842_v2 = vperm.slane %v2834_v12, %v11900_v46  ;;  %v2648_v55 = vperm.slane %v2539_v32, %v11809_v41  ;;  %v12550_v62 = vsel %vm1587_vm12, 0, %v1781_v26  ;;  %v2542_v59 = vpack.i.b16 %v12379_v43, %v2540_v34 }
 0x3d5   : > { %17570 = vst [vmem:[#allocation77_spill] sm:$0xff] %v12538_v51  ;;  %v12558_v58 = vsel %vm1587_vm12, 0, %v12538_v51  ;;  %v17574_v12 = vshrl.u32 %v11625_v7, 16  ;;  %v1580_v49 = vperm.slane %v1470_v27, %v11809_v41  ;;  %v2504_v15 = vrot.slane %v1415_v3, 4 }
 0x3d6   : > { %17571 = vst [vmem:[#allocation78_spill] sm:$0xff] %v12543_v63  ;;  %v12553_v20 = vrot.slane %v2842_v2, 4  ;;  %v2649_v2 = vrot.slane %v2648_v55, 4  ;;  %v3672_v0 = vshrl.u32 %v3575_v22, 16  ;;  %v2674_v43 = vperm.slane %v2542_v59, %v11809_v41 }
 0x3d7   : > { %17572 = vst [vmem:[#allocation79_spill] sm:$0xff] %v12550_v62  ;;  %v1473_v32 = vpack.i.b16 %v1472_v42, %v17574_v12  ;;  %v1588_v34 = vsel %vm1587_vm12, %v1586_v28, %v1580_v49  ;;  %v1589_v62 = vrot.slane %v1580_v49, 4  ;;  %v17575_v27 = vrot.slane %v11625_v7, 4 }
 0x3d8   : > { %17573 = vst [vmem:[#allocation80_spill] sm:$0xff] %v12553_v20  ;;  %v12566_v26 = vsel %vm1587_vm12, 0, %v12553_v20  ;;  %v1594_v42 = vperm.slane %v1588_v34, %v11900_v46  ;;  %v2535_v12 = vshrl.u32 %v2504_v15, 16  ;;  %v3670_v44 = vpack.i.b16 %v3575_v22, %v11762_v10 }
 0x3d9   : > { %v1607_v52 = vperm.slane %v1473_v32, %v11809_v41  ;;  %v2533_v3 = vpack.i.b16 %v2504_v15, %v17575_v27  ;;  %v1590_v35 = vsel %vm1587_vm12, %v1585_v14, %v1589_v62  ;;  %v17576_v59 = vshrl.u32 %v11762_v10, 16 }
 0x3da   : > { %v1598_v28 = vperm.slane %v1590_v35, %v11900_v46  ;;  %v1599_v49 = vrot.slane %v1594_v42, 4  ;;  %v2536_v7 = vpack.i.b16 %v2535_v12, %v11827_v57  ;;  %v2675_v34 = vrot.slane %v2674_v43, 4 }
 0x3db   : > { %v1614_v20 = vsel %vm1587_vm12, %v1613_v36, %v1607_v52  ;;  %v1615_v51 = vrot.slane %v1607_v52, 4  ;;  %v3673_v63 = vpack.i.b16 %v3672_v0, %v17576_v59  ;;  %v2643_v14 = vperm.slane %v2533_v3, %v11809_v41 }
 0x3dc   : > { %v12581_v32 = vperm.slane %v1614_v20, %v11900_v46  ;;  %v1601_v52 = vrot.slane %v1598_v28, 4  ;;  %v12590_v35 = vperm.slane %v3670_v44, %v11809_v41  ;;  %v2669_v20 = vperm.slane %v2536_v7, %v11809_v41 }
 0x3dd   : > { %v1616_v22 = vsel %vm1587_vm12, %v1612_v61, %v1615_v51  ;;  %v2650_v0 = vsel %vm1587_vm12, %v2649_v2, %v2643_v14  ;;  %v2651_v57 = vrot.slane %v2643_v14, 4  ;;  %v1600_v27 = vsel %vm1587_vm12, 0, %v1599_v49 }
 0x3de   : > { %17577 = vst [vmem:[#allocation81_spill] sm:$0xff] %v12581_v32  ;;  %v1624_v10 = vperm.slane %v1616_v22, %v11900_v46  ;;  %v1625_v62 = vrot.slane %v12581_v32, 4  ;;  %v1602_v61 = vsel %vm1587_vm12, 0, %v1601_v52  ;;  %v12600_v3 = vperm.slane %v3673_v63, %v11809_v41  ;;  %v1453_v63 = vpop.permute.xlu1 %1452 }
 0x3df   : > { %v2050_v12 = vrot.slane %v1602_v61, 4  ;;  %v2652_v44 = vsel %vm1587_vm12, %v2648_v55, %v2651_v57  ;;  %v12604_v59 = vperm.slane %v2650_v0, %v11900_v46  ;;  %v2676_v2 = vsel %vm1587_vm12, %v2675_v34, %v2669_v20 }
 0x3e0   : > { %v12597_v51 = vrot.slane %v1624_v10, 4  ;;  %v2660_v49 = vperm.slane %v2652_v44, %v11900_v46  ;;  %v2677_v7 = vrot.slane %v2669_v20, 4  ;;  %v12613_v22 = vperm.slane %v2676_v2, %v11900_v46 }
 0x3e1   : > { %v12616_v14 = vsel %vm1587_vm12, 0, %v1625_v62  ;;  %v12619_v55 = vsel %vm1587_vm12, %v1601_v52, %v1594_v42  ;;  %v2661_v10 = vrot.slane %v12604_v59, 4  ;;  %v12624_v0 = vsel %vm1587_vm12, %v2050_v12, %v1600_v27 }
 0x3e2   : > { %17578 = vst [vmem:[#allocation82_spill] sm:$0xff] %v12597_v51  ;;  %v12609_v28 = vsel %vm1587_vm12, 0, %v12597_v51  ;;  %v12627_v20 = vrot.slane %v2660_v49, 4  ;;  %v2678_v61 = vsel %vm1587_vm12, %v2674_v43, %v2677_v7  ;;  %v2523_v2 = vrot.slane %v1453_v63, 4  ;;  %v1435_v7 = vpop.permute.xlu0 %1434 }
 0x3e3   : > { %17579 = vst [vmem:[#allocation83_spill] sm:$0xff] %v12609_v28  ;;  %v2686_v44 = vperm.slane %v2678_v61, %v11900_v46  ;;  %v17582_v42 = vrot.slane %v12283_v5, 4  ;;  %v3103_v12 = vrot.slane %v12322_v23, 4  ;;  %v17583_v49 = vrot.slane %v12306_v45, 4 }
 0x3e4   : > { %17580 = vst [vmem:[#allocation84_spill] sm:$0xff] %v12616_v14  ;;  %v12637_v34 = vsel %vm1587_vm12, 0, %v12627_v20  ;;  %v12645_v61 = vsel %vm1587_vm12, 0, %v2661_v10  ;;  %v1490_v62 = vshrl.u32 %v1453_v63, 16  ;;  %v3430_v45 = vsel %vm1587_vm12, %v12301_v13, %v12322_v23 }
 0x3e5   : > { %17581 = vst [vmem:[#allocation85_spill] sm:$0xff] %v12619_v55  ;;  %v3078_v52 = vsel %vm1587_vm12, 0, %v17582_v42  ;;  %v12647_v57 = vrot.slane %v2686_v44, 4  ;;  %v3411_v42 = vsel %vm1587_vm12, %v12286_v37, %v12283_v5  ;;  %v3104_v27 = vsel %vm1587_vm12, 0, %v3103_v12  ;;  %v12665_v37 = vpop.permute.xlu2 %3576 }
 0x3e6   : > { %v3417_v43 = vsel %vm1587_vm12, %v17583_v49, %v3078_v52  ;;  %v2553_v44 = vshrl.u32 %v2523_v2, 16  ;;  %v17584_v52 = vrot.slane %v12316_v11, 4  ;;  %v1488_v5 = vpack.i.b16 %v1453_v63, %v1435_v7 }
 0x3e7   : > { %v3421_v15 = vperm.slane %v3417_v43, %v11809_v41  ;;  %v12660_v10 = vsel %vm1587_vm12, 0, %v12647_v57  ;;  %v3415_v12 = vperm.slane %v3411_v42, %v11809_v41  ;;  %v1489_v28 = vshrl.u32 %v1435_v7, 16 }
 0x3e8   : > { %v3436_v49 = vsel %vm1587_vm12, %v17584_v52, %v3104_v27  ;;  %v3434_v23 = vperm.slane %v3430_v45, %v11809_v41  ;;  %v1638_v14 = vperm.slane %v1488_v5, %v11809_v41  ;;  %v2514_v55 = vrot.slane %v1435_v7, 4 }
 0x3e9   : > { %v3422_v36 = vrot.slane %v3421_v15, 4  ;;  %v3440_v43 = vperm.slane %v3436_v49, %v11809_v41  ;;  %v1491_v27 = vpack.i.b16 %v1490_v62, %v1489_v28  ;;  %v3682_v63 = vpack.i.b16 %v12665_v37, %v11764_v9 }
 0x3ea   : > { %v1639_v52 = vrot.slane %v1638_v14, 4  ;;  %v17585_v15 = vrot.slane %v12204_v8, 4  ;;  %v2551_v49 = vpack.i.b16 %v2523_v2, %v2514_v55  ;;  %v3684_v13 = vshrl.u32 %v12665_v37, 16  ;;  %v12687_v2 = vpop.permute.xlu1 %3578 }
 0x3eb   : > { %v3423_v11 = vsel %vm1587_vm12, %v3422_v36, %v3415_v12  ;;  %v3441_v51 = vrot.slane %v3440_v43, 4  ;;  %v1664_v36 = vperm.slane %v1491_v27, %v11809_v41  ;;  %v2552_v5 = vshrl.u32 %v2514_v55, 16 }
 0x3ec   : > { %v1642_v42 = vsel %vm1587_vm12, %v1638_v14, %v17585_v15  ;;  %v3427_v28 = vperm.slane %v3423_v11, %v11900_v46  ;;  %v1640_v12 = vsel %vm1587_vm12, %v1639_v52, %v12204_v8  ;;  %v2700_v14 = vperm.slane %v2551_v49, %v11809_v41 }
 0x3ed   : > { %v3442_v45 = vsel %vm1587_vm12, %v3441_v51, %v3434_v23  ;;  %v1650_v7 = vperm.slane %v1642_v42, %v11900_v46  ;;  %v1646_v37 = vperm.slane %v1640_v12, %v11900_v46  ;;  %v1665_v43 = vrot.slane %v1664_v36, 4 }
 0x3ee   : > { %v3446_v62 = vperm.slane %v3442_v45, %v11900_v46  ;;  %v17586_v23 = vrot.slane %v12216_v31, 4  ;;  %v2554_v15 = vpack.i.b16 %v2553_v44, %v2552_v5  ;;  %v2701_v42 = vrot.slane %v2700_v14, 4 }
 0x3ef   : > { %v1653_v51 = vrot.slane %v1650_v7, 4  ;;  %v1651_v45 = vrot.slane %v1646_v37, 4  ;;  %v1666_v52 = vsel %vm1587_vm12, %v1665_v43, %v12216_v31  ;;  %v3694_v49 = vpack.i.b16 %v12687_v2, %v11742_v6 }
 0x3f0   : > { %v1668_v27 = vsel %vm1587_vm12, %v1664_v36, %v17586_v23  ;;  %v3547_v55 = vpack.i.b16 %v3446_v62, %v3427_v28  ;;  %v12702_v12 = vperm.slane %v1666_v52, %v11900_v46  ;;  %v3548_v23 = vshrl.u32 %v3427_v28, 16 }
 0x3f1   : > { %v1676_v11 = vperm.slane %v1668_v27, %v11900_v46  ;;  %v12695_v8 = vsel %vm1587_vm12, 0, %v1653_v51  ;;  %v12707_v44 = vsel %vm1587_vm12, %v1653_v51, %v1646_v37  ;;  %v2702_v5 = vsel %vm1587_vm12, %v2701_v42, %v12223_v56 }
 0x3f2   : > { %17587 = vst [vmem:[#allocation86_spill] sm:$0xff] %v12695_v8  ;;  %v4668_v7 = vunpack.c.l.b16 %v3547_v55  ;;  %v17591_v27 = vrot.slane %v12223_v56, 4  ;;  %v2726_v43 = vperm.slane %v2554_v15, %v11809_v41  ;;  %v12716_v55 = vsel %vm1587_vm12, 0, %v1651_v45 }
 0x3f3   : > { %17588 = vst [vmem:[#allocation87_spill] sm:$0xff] %v12702_v12  ;;  %v12704_v36 = vrot.slane %v1676_v11, 4  ;;  %v1677_v51 = vrot.slane %v12702_v12, 4  ;;  %v17594_v56 = vrot.slane %v12241_v25, 4  ;;  %v3428_v12 = vrot.slane %v3427_v28, 4 }
 0x3f4   : > { %17590 = vst [vmem:[#allocation89_spill] sm:$0xff] %v12707_v44  ;;  %v2704_v31 = vsel %vm1587_vm12, %v2700_v14, %v17591_v27  ;;  %v4673_v32 = vpack.c.b16 %v4668_v7, %v4668_v7  ;;  %v2727_v52 = vrot.slane %v2726_v43, 4  ;;  %v12731_v7 = vperm.slane %v2702_v5, %v11900_v46 }
 0x3f5   : > { %17589 = vst [vmem:[#allocation88_spill] sm:$0xff] %v12704_v36  ;;  %v12720_v11 = vsel %vm1587_vm12, 0, %v12704_v36  ;;  %v2712_v42 = vperm.slane %v2704_v31, %v11900_v46  ;;  %v2730_v14 = vsel %vm1587_vm12, %v2726_v43, %v17594_v56  ;;  %v3549_v36 = vshrl.u32 %v3446_v62, 16 }
 0x3f6   : > { %17592 = vst [vmem:[#allocation90_spill] sm:$0xff] %v12716_v55  ;;  %v4703_v15 = vsel %vm4674_vm13, %v4673_v32, 0  ;;  %v2738_v27 = vperm.slane %v2730_v14, %v11900_v46  ;;  %v2728_v31 = vsel %vm1587_vm12, %v2727_v52, %v12241_v25  ;;  %v3447_v32 = vrot.slane %v3446_v62, 4 }
 0x3f7   : > { %17593 = vst [vmem:[#allocation91_spill] sm:$0xff] %v12720_v11  ;;  %4708 = vmatpush.bf16.xpose.msra.mxu3 %v4703_v15  ;;  %v12734_v37 = vrot.slane %v2712_v42, 4  ;;  %v12739_v8 = vperm.slane %v2728_v31, %v11900_v46  ;;  %v17595_v56 = vshrl.u32 %v11764_v9, 16  ;;  %v3550_v42 = vpack.i.b16 %v3549_v36, %v3548_v23 }
 0x3f8   : > { %v12741_v43 = vrot.slane %v2738_v27, 4  ;;  %v3429_v15 = vsel %vm1587_vm12, 0, %v3428_v12  ;;  %v12751_v25 = vperm.slane %v3682_v63, %v11809_v41  ;;  %v12754_v28 = vsel %vm1587_vm12, 0, %v1677_v51 }
 0x3f9   : > { %v3685_v5 = vpack.i.b16 %v3684_v13, %v17595_v56  ;;  %v12747_v14 = vsel %vm1587_vm12, 0, %v12734_v37  ;;  %17596 = vst [vmem:[#allocation92_spill] sm:$0xff] %v12754_v28  ;;  %v3448_v9 = vsel %vm1587_vm12, 0, %v3447_v32  ;;  %v4760_v23 = vunpack.c.l.b16 %v3550_v42 }
 0x3fa   : > { %v12759_v62 = vsel %vm1587_vm12, 0, %v12741_v43  ;;  %v3553_v12 = vpack.i.b16 %v3448_v9, %v3429_v15  ;;  %v3554_v27 = vshrl.u32 %v3429_v15, 16  ;;  %v3555_v63 = vshrl.u32 %v3448_v9, 16 }
 0x3fb   : > { %v12765_v31 = vperm.slane %v3685_v5, %v11809_v41  ;;  %v3696_v51 = vshrl.u32 %v12687_v2, 16  ;;  %v4765_v45 = vpack.c.b16 %v4760_v23, %v4760_v23  ;;  %v17597_v13 = vshrl.u32 %v11742_v6, 16 }
 0x3fc   : > { %v4851_v52 = vunpack.c.l.b16 %v3553_v12  ;;  %v3556_v32 = vpack.i.b16 %v3555_v63, %v3554_v27  ;;  %v12773_v42 = vperm.slane %v3694_v49, %v11809_v41  ;;  %v17598_v15 = vrot.slane %v12054_v60, 4 }
 0x3fd   : > { %v3697_v28 = vpack.i.b16 %v3696_v51, %v17597_v13  ;;  %v4794_v9 = vsel %vm4674_vm13, %v4765_v45, 0  ;;  %v17599_v23 = vrot.slane %v12067_v21, 4  ;;  %v3002_v49 = vsel %vm1587_vm12, 0, %v12101_v30 }
 0x3fe   : > { %v2974_v5 = vsel %vm1587_vm12, 0, %v17598_v15  ;;  %v4856_v2 = vpack.c.b16 %v4851_v52, %v4851_v52  ;;  %4799 = vmatpush.bf16.xpose.msrb.mxu0 %v4794_v9  ;;  %v4942_v27 = vunpack.c.l.b16 %v3556_v32  ;;  %v3051_v13 = vrot.slane %v12209_v24, 4 }
 0x3ff   : > { %v3000_v12 = vsel %vm1587_vm12, 0, %v17599_v23  ;;  %v12784_v6 = vperm.slane %v3697_v28, %v11809_v41  ;;  %v17600_v45 = vrot.slane %v12173_v38, 4  ;;  %v3335_v51 = vsel %vm1587_vm12, %v12076_v17, %v12054_v60 }
 0x400   : > { %v4885_v63 = vsel %vm4674_vm13, %v4856_v2, 0  ;;  %v17601_v32 = vrot.slane %v12093_v53, 4  ;;  %v4947_v15 = vpack.c.b16 %v4942_v27, %v4942_v27  ;;  %v3354_v2 = vsel %vm1587_vm12, %v12101_v30, %v12067_v21  ;;  %v3599_v30 = vpop.permute.xlu1 %3598 }
 0x401   : > { %v3026_v52 = vsel %vm1587_vm12, 0, %v17600_v45  ;;  %4890 = vmatpush.bf16.xpose.msrb.mxu1 %v4885_v63  ;;  %v3052_v45 = vsel %vm1587_vm12, 0, %v3051_v13  ;;  %v3359_v56 = vrot.slane %v3002_v49, 4  ;;  %v3373_v60 = vsel %vm1587_vm12, %v12156_v33, %v12173_v38  ;;  %v12820_v38 = vpop.permute.xlu0 %3596 }
 0x402   : > { %v3341_v28 = vsel %vm1587_vm12, %v17601_v32, %v2974_v5  ;;  %v4976_v17 = vsel %vm4674_vm13, %v4947_v15, 0  ;;  %v3339_v53 = vperm.slane %v3335_v51, %v11809_v41  ;;  %v17602_v5 = vrot.slane %v12181_v40, 4 }
 0x403   : > { %v3345_v36 = vperm.slane %v3341_v28, %v11809_v41  ;;  %v3392_v21 = vsel %vm1587_vm12, %v12188_v54, %v12209_v24  ;;  %4981 = vmatpush.bf16.xpose.msrb.mxu2 %v4976_v17  ;;  %v3358_v49 = vperm.slane %v3354_v2, %v11809_v41  ;;  %v3360_v63 = vsel %vm1587_vm12, %v3359_v56, %v3000_v12 }
 0x404   : > { %v3379_v27 = vsel %vm1587_vm12, %v17602_v5, %v3026_v52  ;;  %v3364_v51 = vperm.slane %v3360_v63, %v11809_v41  ;;  %v3377_v40 = vperm.slane %v3373_v60, %v11809_v41  ;;  %v3396_v52 = vperm.slane %v3392_v21, %v11809_v41 }
 0x405   : > { %v3346_v13 = vrot.slane %v3345_v36, 4  ;;  %v3383_v33 = vperm.slane %v3379_v27, %v11809_v41  ;;  %v17603_v32 = vrot.slane %v12201_v1, 4  ;;  %v3712_v56 = vpack.i.b16 %v12479_v47, %v3599_v30 }
 0x406   : > { %v3365_v15 = vrot.slane %v3364_v51, 4  ;;  %v3713_v17 = vshrl.u32 %v3599_v30, 16  ;;  %v17604_v51 = vshrl.u32 %v12479_v47, 16 }
 0x407   : > { %v3398_v54 = vsel %vm1587_vm12, %v17603_v32, %v3052_v45  ;;  %v3347_v24 = vsel %vm1587_vm12, %v3346_v13, %v3339_v53  ;;  %v3384_v36 = vrot.slane %v3383_v33, 4  ;;  %v4101_v1 = vperm.slane %v3712_v56, %v11809_v41 }
 0x408   : > { %v3402_v28 = vperm.slane %v3398_v54, %v11809_v41  ;;  %v3351_v12 = vperm.slane %v3347_v24, %v11900_v46  ;;  %v3366_v53 = vsel %vm1587_vm12, %v3365_v15, %v3358_v49  ;;  %v3715_v30 = vpack.i.b16 %v17604_v51, %v3713_v17 }
 0x409   : > { %v3385_v60 = vsel %vm1587_vm12, %v3384_v36, %v3377_v40  ;;  %v3370_v63 = vperm.slane %v3366_v53, %v11900_v46  ;;  %v4102_v32 = vrot.slane %v4101_v1, 4 }
 0x40a   : > { %v3403_v5 = vrot.slane %v3402_v28, 4  ;;  %v3389_v27 = vperm.slane %v3385_v60, %v11900_v46  ;;  %v3524_v21 = vshrl.u32 %v3351_v12, 16  ;;  %v3352_v13 = vrot.slane %v3351_v12, 4 }
 0x40b   : > { %v3523_v28 = vpack.i.b16 %v3370_v63, %v3351_v12  ;;  %v3525_v49 = vshrl.u32 %v3370_v63, 16  ;;  %v3371_v56 = vrot.slane %v3370_v63, 4 }
 0x40c   : > { %v3404_v33 = vsel %vm1587_vm12, %v3403_v5, %v3396_v52  ;;  %v3536_v54 = vshrl.u32 %v3389_v27, 16  ;;  %v3353_v24 = vsel %vm1587_vm12, 0, %v3352_v13  ;;  %v3390_v36 = vrot.slane %v3389_v27, 4 }
 0x40d   : > { %v3408_v40 = vperm.slane %v3404_v33, %v11900_v46  ;;  %v3530_v15 = vshrl.u32 %v3353_v24, 16  ;;  %v4666_v52 = vunpack.c.l.b16 %v3523_v28  ;;  %v3526_v5 = vpack.i.b16 %v3525_v49, %v3524_v21  ;;  %v12849_v49 = vpop.permute.xlu2 %3592 }
 0x40e   : > { %v3391_v53 = vsel %vm1587_vm12, 0, %v3390_v36  ;;  %v3372_v47 = vsel %vm1587_vm12, 0, %v3371_v56 }
 0x40f   : > { %v3535_v60 = vpack.i.b16 %v3408_v40, %v3389_v27  ;;  %v3537_v11 = vshrl.u32 %v3408_v40, 16  ;;  %v3409_v23 = vrot.slane %v3408_v40, 4  ;;  %v3542_v17 = vshrl.u32 %v3391_v53, 16 }
 0x410   : > { %v3529_v13 = vpack.i.b16 %v3372_v47, %v3353_v24  ;;  %v4758_v2 = vunpack.c.l.b16 %v3526_v5  ;;  %v3531_v45 = vshrl.u32 %v3372_v47, 16  ;;  %v4103_v40 = vsel %vm1587_vm12, %v4102_v32, %v12437_v48 }
 0x411   : > { %v4667_v51 = vunpack.c.l.b16 %v3535_v60  ;;  %v3538_v33 = vpack.i.b16 %v3537_v11, %v3536_v54  ;;  %v3410_v9 = vsel %vm1587_vm12, 0, %v3409_v23  ;;  %v17605_v11 = vrot.slane %v12437_v48, 4 }
 0x412   : > { %v3541_v12 = vpack.i.b16 %v3410_v9, %v3391_v53  ;;  %v3543_v63 = vshrl.u32 %v3410_v9, 16  ;;  %v4849_v44 = vunpack.c.l.b16 %v3529_v13  ;;  %v3532_v21 = vpack.i.b16 %v3531_v45, %v3530_v15 }
 0x413   : > { %v4672_v55 = vpack.c.b16 %v4667_v51, %v4666_v52  ;;  %v4759_v27 = vunpack.c.l.b16 %v3538_v33  ;;  %v4105_v23 = vsel %vm1587_vm12, %v4101_v1, %v17605_v11  ;;  %v4109_v9 = vperm.slane %v4103_v40, %v11900_v46  ;;  %v17607_v51 = vld [vmem:[#allocation21_spill] sm:$0xff] }
 0x414   : > { %v4850_v36 = vunpack.c.l.b16 %v3541_v12  ;;  %v3544_v28 = vpack.i.b16 %v3543_v63, %v3542_v17  ;;  %v4113_v56 = vperm.slane %v4105_v23, %v11900_v46  ;;  %v4940_v53 = vunpack.c.l.b16 %v3532_v21 }
 0x415   : > { %v4700_v54 = vsel %vm4674_vm13, %v4672_v55, 0  ;;  %v4764_v24 = vpack.c.b16 %v4759_v27, %v4758_v2  ;;  %v4127_v45 = vperm.slane %v3715_v30, %v11809_v41  ;;  %v4114_v48 = vrot.slane %v4109_v9, 4 }
 0x416   : > { %4709 = vmatpush.bf16.xpose.msra.mxu3 %v4700_v54  ;;  %v4855_v60 = vpack.c.b16 %v4850_v36, %v4849_v44  ;;  %v4941_v32 = vunpack.c.l.b16 %v3544_v28  ;;  %v4116_v5 = vrot.slane %v4113_v56, 4  ;;  %v17606_v47 = vrot.slane %v12470_v16, 4  ;;  %v17610_v54 = vld [vmem:[#allocation23_spill] sm:$0xff] }
 0x417   : > { %v4791_v15 = vsel %vm4674_vm13, %v4764_v24, 0  ;;  %v4128_v1 = vrot.slane %v4127_v45, 4  ;;  %v17608_v33 = vrot.slane %v17607_v51, 4  ;;  %v17609_v12 = vrot.slane %v11978_v50, 4 }
 0x418   : > { %4800 = vmatpush.bf16.xpose.msrb.mxu0 %v4791_v15  ;;  %v4882_v55 = vsel %vm4674_vm13, %v4855_v60, 0  ;;  %v4946_v2 = vpack.c.b16 %v4941_v32, %v4940_v53  ;;  %v4131_v17 = vsel %vm1587_vm12, %v4127_v45, %v17606_v47  ;;  %v12866_v30 = vsel %vm1587_vm12, %v4116_v5, %v4109_v9  ;;  %v17611_v9 = vld [vmem:[#allocation57_spill] sm:$0xff]  ;;  %v17613_v53 = vld [vmem:[#allocation24_spill] sm:$0xff] }
 0x419   : > { %4891 = vmatpush.bf16.xpose.msrb.mxu1 %v4882_v55  ;;  %v4139_v44 = vperm.slane %v4131_v17, %v11900_v46  ;;  %v2870_v13 = vsel %vm1587_vm12, 0, %v17608_v33  ;;  %v2896_v63 = vsel %vm1587_vm12, 0, %v17609_v12  ;;  %v12876_v40 = vsel %vm1587_vm12, 0, %v4114_v48  ;;  %v17615_v45 = vld [vmem:[#allocation25_spill] sm:$0xff]  ;;  %v17616_v48 = vld [vmem:[#allocation27_spill] sm:$0xff]  ;;  %v17618_v33 = vld [vmem:[#allocation56_spill] sm:$0xff]  ;;  %v3615_v12 = vpop.permute.xlu0 %3614 }
 0x41a   : > { %v4973_v27 = vsel %vm4674_vm13, %v4946_v2, 0  ;;  %v12879_v36 = vsel %vm1587_vm12, 0, %v4116_v5  ;;  %v4129_v21 = vsel %vm1587_vm12, %v4128_v1, %v12470_v16  ;;  %v2947_v23 = vrot.slane %v12393_v29, 4 }
 0x41b   : > { %4982 = vmatpush.bf16.xpose.msrb.mxu2 %v4973_v27  ;;  %v12884_v28 = vperm.slane %v4129_v21, %v11900_v46  ;;  %v12886_v11 = vrot.slane %v4139_v44, 4  ;;  %v3259_v24 = vsel %vm1587_vm12, %v17610_v54, %v17607_v51  ;;  %v17612_v56 = vrot.slane %v17611_v9, 4  ;;  %v17619_v54 = vld [vmem:[#allocation58_spill] sm:$0xff] }
 0x41c   : > { %v17614_v32 = vrot.slane %v17613_v53, 4  ;;  %v3278_v15 = vsel %vm1587_vm12, %v17615_v45, %v11978_v50  ;;  %v17617_v5 = vrot.slane %v17616_v48, 4  ;;  %v2948_v47 = vsel %vm1587_vm12, 0, %v2947_v23 }
 0x41d   : > { %v2922_v60 = vsel %vm1587_vm12, 0, %v17612_v56  ;;  %v12906_v2 = vsel %vm1587_vm12, 0, %v12886_v11  ;;  %v4140_v44 = vrot.slane %v12884_v28, 4  ;;  %v3263_v51 = vperm.slane %v3259_v24, %v11809_v41  ;;  %v17621_v24 = vld [vmem:[#allocation59_spill] sm:$0xff] }
 0x41e   : > { %v3265_v16 = vsel %vm1587_vm12, %v17614_v32, %v2870_v13  ;;  %v3284_v55 = vsel %vm1587_vm12, %v17617_v5, %v2896_v63  ;;  %v3297_v13 = vsel %vm1587_vm12, %v17618_v33, %v17611_v9  ;;  %v3282_v21 = vperm.slane %v3278_v15, %v11809_v41 }
 0x41f   : > { %v3269_v17 = vperm.slane %v3265_v16, %v11809_v41  ;;  %v3288_v50 = vperm.slane %v3284_v55, %v11809_v41  ;;  %v17620_v23 = vrot.slane %v17619_v54, 4  ;;  %v3316_v16 = vsel %vm1587_vm12, %v17621_v24, %v12393_v29 }
 0x420   : > { %v17622_v45 = vrot.slane %v12397_v4, 4  ;;  %v3301_v5 = vperm.slane %v3297_v13, %v11809_v41  ;;  %v3700_v55 = vpack.i.b16 %v3615_v12, %v12820_v38  ;;  %v3702_v33 = vshrl.u32 %v3615_v12, 16 }
 0x421   : > { %v3270_v27 = vrot.slane %v3269_v17, 4  ;;  %v3303_v56 = vsel %vm1587_vm12, %v17620_v23, %v2922_v60  ;;  %v3289_v53 = vrot.slane %v3288_v50, 4  ;;  %v3320_v4 = vperm.slane %v3316_v16, %v11809_v41 }
 0x422   : > { %v3307_v32 = vperm.slane %v3303_v56, %v11809_v41  ;;  %v3322_v9 = vsel %vm1587_vm12, %v17622_v45, %v2948_v47  ;;  %v4049_v47 = vperm.slane %v3700_v55, %v11809_v41  ;;  %v17624_v16 = vrot.slane %v12773_v42, 4 }
 0x423   : > { %v3271_v48 = vsel %vm1587_vm12, %v3270_v27, %v3263_v51  ;;  %v3326_v15 = vperm.slane %v3322_v9, %v11809_v41  ;;  %v3290_v17 = vsel %vm1587_vm12, %v3289_v53, %v3282_v21  ;;  %v12939_v51 = vsel %vm1587_vm12, 0, %v4140_v44 }
 0x424   : > { %v3275_v60 = vperm.slane %v3271_v48, %v11900_v46  ;;  %v3308_v50 = vrot.slane %v3307_v32, 4  ;;  %v3294_v29 = vperm.slane %v3290_v17, %v11900_v46  ;;  %v17623_v27 = vshrl.u32 %v12820_v38, 16 }
 0x425   : > { %v3327_v54 = vrot.slane %v3326_v15, 4  ;;  %v4050_v32 = vrot.slane %v4049_v47, 4  ;;  %v4053_v45 = vsel %vm1587_vm12, %v4049_v47, %v17624_v16  ;;  %v17627_v52 = vrot.slane %v12751_v25, 4 }
 0x426   : > { %v3309_v13 = vsel %vm1587_vm12, %v3308_v50, %v3301_v5  ;;  %v3703_v23 = vpack.i.b16 %v3702_v33, %v17623_v27  ;;  %v3500_v56 = vshrl.u32 %v3275_v60, 16  ;;  %v3499_v53 = vpack.i.b16 %v3294_v29, %v3275_v60 }
 0x427   : > { %v3313_v21 = vperm.slane %v3309_v13, %v11900_v46  ;;  %v3328_v12 = vsel %vm1587_vm12, %v3327_v54, %v3320_v4  ;;  %v3501_v9 = vshrl.u32 %v3294_v29, 16  ;;  %v4051_v38 = vsel %vm1587_vm12, %v4050_v32, %v12773_v42  ;;  %v3595_v54 = vpop.permute.xlu2 %3594 }
 0x428   : > { %v3332_v24 = vperm.slane %v3328_v12, %v11900_v46  ;;  %v4075_v44 = vperm.slane %v3703_v23, %v11809_v41  ;;  %v4664_v48 = vunpack.c.l.b16 %v3499_v53  ;;  %v4061_v5 = vperm.slane %v4053_v45, %v11900_v46 }
 0x429   : > { %v3276_v15 = vrot.slane %v3275_v60, 4  ;;  %v4057_v17 = vperm.slane %v4051_v38, %v11900_v46  ;;  %v17625_v33 = vrot.slane %v12784_v6, 4  ;;  %v3512_v27 = vshrl.u32 %v3313_v21, 16 }
 0x42a   : > { %v3511_v55 = vpack.i.b16 %v3332_v24, %v3313_v21  ;;  %v4076_v50 = vrot.slane %v4075_v44, 4  ;;  %v4064_v47 = vrot.slane %v4061_v5, 4  ;;  %v3513_v23 = vshrl.u32 %v3332_v24, 16 }
 0x42b   : > { %v4079_v4 = vsel %vm1587_vm12, %v4075_v44, %v17625_v33  ;;  %v4062_v53 = vrot.slane %v4057_v17, 4  ;;  %v3502_v60 = vpack.i.b16 %v3501_v9, %v3500_v56  ;;  %v3689_v44 = vshrl.u32 %v3595_v54, 16 }
 0x42c   : > { %v4087_v13 = vperm.slane %v4079_v4, %v11900_v46  ;;  %v4665_v12 = vunpack.c.l.b16 %v3511_v55  ;;  %v4077_v42 = vsel %vm1587_vm12, %v4076_v50, %v12784_v6  ;;  %v12967_v45 = vsel %vm1587_vm12, %v4064_v47, %v4057_v17 }
 0x42d   : > { %v12962_v32 = vperm.slane %v4077_v42, %v11900_v46  ;;  %v12970_v5 = vsel %vm1587_vm12, 0, %v4064_v47  ;;  %v3514_v33 = vpack.i.b16 %v3513_v23, %v3512_v27  ;;  %v3277_v55 = vsel %vm1587_vm12, 0, %v3276_v15  ;;  %v3613_v47 = vpop.permute.xlu1 %3612 }
 0x42e   : > { %v12964_v16 = vrot.slane %v4087_v13, 4  ;;  %v4671_v38 = vpack.c.b16 %v4665_v12, %v4664_v48  ;;  %v12974_v4 = vsel %vm1587_vm12, 0, %v4062_v53  ;;  %v3295_v9 = vrot.slane %v3294_v29, 4 }
 0x42f   : > { %v4088_v6 = vrot.slane %v12962_v32, 4  ;;  %v4756_v50 = vunpack.c.l.b16 %v3502_v60  ;;  %v4757_v48 = vunpack.c.l.b16 %v3514_v33  ;;  %v3314_v13 = vrot.slane %v3313_v21, 4 }
 0x430   : > { %v12979_v56 = vsel %vm1587_vm12, 0, %v12964_v16  ;;  %v4697_v17 = vsel %vm4674_vm13, %v4671_v38, 0  ;;  %v3296_v15 = vsel %vm1587_vm12, 0, %v3295_v9  ;;  %v3333_v23 = vrot.slane %v3332_v24, 4 }
 0x431   : > { %4710 = vmatpush.bf16.xpose.msra.mxu3 %v4697_v17  ;;  %v3506_v12 = vshrl.u32 %v3277_v55, 16  ;;  %v4763_v53 = vpack.c.b16 %v4757_v48, %v4756_v50  ;;  %v3315_v42 = vsel %vm1587_vm12, 0, %v3314_v13  ;;  %v3505_v63 = vpack.i.b16 %v3296_v15, %v3277_v55 }
 0x432   : > { %v3507_v1 = vshrl.u32 %v3296_v15, 16  ;;  %v3334_v38 = vsel %vm1587_vm12, 0, %v3333_v23  ;;  %v3688_v60 = vpack.i.b16 %v3613_v47, %v3595_v54  ;;  %v3690_v33 = vshrl.u32 %v3613_v47, 16 }
 0x433   : > { %v12988_v21 = vsel %vm1587_vm12, 0, %v4088_v6  ;;  %v4788_v17 = vsel %vm4674_vm13, %v4763_v53, 0  ;;  %v3517_v27 = vpack.i.b16 %v3334_v38, %v3315_v42  ;;  %v3518_v24 = vshrl.u32 %v3315_v42, 16 }
 0x434   : > { %v3508_v9 = vpack.i.b16 %v3507_v1, %v3506_v12  ;;  %4801 = vmatpush.bf16.xpose.msrb.mxu0 %v4788_v17  ;;  %v3519_v50 = vshrl.u32 %v3334_v38, 16  ;;  %v3691_v48 = vpack.i.b16 %v3690_v33, %v3689_v44  ;;  %v3997_v55 = vperm.slane %v3688_v60, %v11809_v41 }
 0x435   : > { %v4847_v13 = vunpack.c.l.b16 %v3505_v63  ;;  %v4848_v15 = vunpack.c.l.b16 %v3517_v27  ;;  %v17626_v23 = vrot.slane %v12425_v18, 4  ;;  %v17628_v42 = vrot.slane %v12452_v19, 4  ;;  %v17629_v27 = vld [vmem:[#allocation70_spill] sm:$0xff] }
 0x436   : > { %v4938_v29 = vunpack.c.l.b16 %v3508_v9  ;;  %v3520_v47 = vpack.i.b16 %v3519_v50, %v3518_v24  ;;  %v3998_v6 = vrot.slane %v3997_v55, 4  ;;  %v4001_v53 = vsel %vm1587_vm12, %v3997_v55, %v17627_v52 }
 0x437   : > { %v2766_v54 = vsel %vm1587_vm12, 0, %v17626_v23  ;;  %v4023_v1 = vperm.slane %v3691_v48, %v11809_v41  ;;  %v4854_v12 = vpack.c.b16 %v4848_v15, %v4847_v13  ;;  %v4009_v44 = vperm.slane %v4001_v53, %v11900_v46  ;;  %v17631_v23 = vld [vmem:[#allocation66_spill] sm:$0xff] }
 0x438   : > { %v2792_v63 = vsel %vm1587_vm12, 0, %v17628_v42  ;;  %v2794_v38 = vsel %vm1587_vm12, 0, %v17629_v27  ;;  %v4939_v60 = vunpack.c.l.b16 %v3520_v47  ;;  %v3999_v33 = vsel %vm1587_vm12, %v3998_v6, %v12751_v25  ;;  %v17632_v47 = vld [vmem:[#allocation69_spill] sm:$0xff] }
 0x439   : > { %v4024_v17 = vrot.slane %v4023_v1, 4  ;;  %v17630_v9 = vrot.slane %v12765_v31, 4  ;;  %v4879_v24 = vsel %vm4674_vm13, %v4854_v12, 0  ;;  %v4005_v50 = vperm.slane %v3999_v33, %v11900_v46  ;;  %v17638_v33 = vld [vmem:[#allocation78_spill] sm:$0xff] }
 0x43a   : > { %v4012_v48 = vrot.slane %v4009_v44, 4  ;;  %4892 = vmatpush.bf16.xpose.msrb.mxu1 %v4879_v24  ;;  %v4945_v13 = vpack.c.b16 %v4939_v60, %v4938_v29  ;;  %v3183_v25 = vsel %vm1587_vm12, %v17631_v23, %v12425_v18  ;;  %v17633_v6 = vrot.slane %v17632_v47, 4 }
 0x43b   : > { %v4027_v52 = vsel %vm1587_vm12, %v4023_v1, %v17630_v9  ;;  %v4025_v15 = vsel %vm1587_vm12, %v4024_v17, %v12765_v31  ;;  %v4010_v1 = vrot.slane %v4005_v50, 4  ;;  %v17637_v18 = vrot.slane %v12529_v39, 4 }
 0x43c   : > { %v4035_v55 = vperm.slane %v4027_v52, %v11900_v46  ;;  %v3189_v53 = vsel %vm1587_vm12, %v17633_v6, %v2766_v54  ;;  %v13022_v12 = vsel %vm1587_vm12, 0, %v4012_v48  ;;  %v13025_v44 = vperm.slane %v4025_v15, %v11900_v46 }
 0x43d   : > { %17634 = vst [vmem:[#allocation21_spill] sm:$0xff] %v13022_v12  ;;  %v4970_v29 = vsel %vm4674_vm13, %v4945_v13, 0  ;;  %v13031_v31 = vsel %vm1587_vm12, %v4012_v48, %v4005_v50  ;;  %v2818_v60 = vsel %vm1587_vm12, 0, %v17637_v18  ;;  %v17639_v54 = vrot.slane %v17638_v33, 4  ;;  %v3571_v18 = vpop.permute.xlu0 %3570 }
 0x43e   : > { %17635 = vst [vmem:[#allocation23_spill] sm:$0xff] %v13025_v44  ;;  %v13027_v42 = vrot.slane %v4035_v55, 4  ;;  %4983 = vmatpush.bf16.xpose.msrb.mxu2 %v4970_v29  ;;  %v4036_v9 = vrot.slane %v13025_v44, 4  ;;  %v3193_v50 = vperm.slane %v3189_v53, %v11809_v41  ;;  %v13047_v48 = vsel %vm1587_vm12, 0, %v4010_v1  ;;  %v17643_v29 = vld [vmem:[#allocation77_spill] sm:$0xff] }
 0x43f   : > { %v2844_v17 = vsel %vm1587_vm12, 0, %v17639_v54  ;;  %17641 = vst [vmem:[#allocation25_spill] sm:$0xff] %v13047_v48  ;;  %v3187_v55 = vperm.slane %v3183_v25, %v11809_v41  ;;  %v3202_v13 = vsel %vm1587_vm12, %v17629_v27, %v12452_v19  ;;  %v3207_v15 = vrot.slane %v2794_v38, 4 }
 0x440   : > { %17636 = vst [vmem:[#allocation57_spill] sm:$0xff] %v13027_v42  ;;  %v13042_v52 = vsel %vm1587_vm12, 0, %v13027_v42  ;;  %v13054_v23 = vsel %vm1587_vm12, 0, %v4036_v9  ;;  %v3194_v6 = vrot.slane %v3193_v50, 4  ;;  %v3221_v53 = vsel %vm1587_vm12, %v17643_v29, %v12529_v39  ;;  %v3611_v9 = vpop.permute.xlu2 %3610  ;;  %v17646_v29 = vld [vmem:[#allocation80_spill] sm:$0xff] }
 0x441   : > { %17640 = vst [vmem:[#allocation24_spill] sm:$0xff] %v13042_v52  ;;  %v3206_v1 = vperm.slane %v3202_v13, %v11809_v41  ;;  %v3208_v25 = vsel %vm1587_vm12, %v3207_v15, %v2792_v63  ;;  %v17644_v54 = vrot.slane %v12558_v58, 4  ;;  %v17645_v27 = vrot.slane %v12566_v26, 4 }
 0x442   : > { %17642 = vst [vmem:[#allocation27_spill] sm:$0xff] %v13054_v23  ;;  %v3195_v50 = vsel %vm1587_vm12, %v3194_v6, %v3187_v55  ;;  %v3212_v47 = vperm.slane %v3208_v25, %v11809_v41  ;;  %v3240_v13 = vsel %vm1587_vm12, %v17646_v29, %v17638_v33  ;;  %v3648_v26 = vshrl.u32 %v3571_v18, 16 }
 0x443   : > { %v3227_v19 = vsel %vm1587_vm12, %v17644_v54, %v2818_v60  ;;  %v3246_v38 = vsel %vm1587_vm12, %v17645_v27, %v2844_v17  ;;  %v3199_v63 = vperm.slane %v3195_v50, %v11900_v46  ;;  %v17647_v60 = vld [vmem:[#allocation10_spill] sm:$0xff]  ;;  %v3225_v17 = vperm.slane %v3221_v53, %v11809_v41 }
 0x444   : > { %v3231_v39 = vperm.slane %v3227_v19, %v11809_v41  ;;  %v3250_v58 = vperm.slane %v3246_v38, %v11809_v41  ;;  %v3646_v15 = vpack.i.b16 %v3571_v18, %v17647_v60  ;;  %v3213_v54 = vrot.slane %v3212_v47, 4 }
 0x445   : > { %v3678_v55 = vshrl.u32 %v3611_v9, 16  ;;  %v3244_v6 = vperm.slane %v3240_v13, %v11809_v41  ;;  %v17648_v19 = vshrl.u32 %v17647_v60, 16  ;;  %v3676_v33 = vpack.i.b16 %v3611_v9, %v12849_v49 }
 0x446   : > { %v3232_v27 = vrot.slane %v3231_v39, 4  ;;  %v3251_v25 = vrot.slane %v3250_v58, 4  ;;  %v3214_v50 = vsel %vm1587_vm12, %v3213_v54, %v3206_v1  ;;  %v13085_v29 = vperm.slane %v3646_v15, %v11809_v41 }
 0x447   : > { %v3649_v24 = vpack.i.b16 %v3648_v26, %v17648_v19  ;;  %v3200_v47 = vrot.slane %v3199_v63, 4  ;;  %v3218_v53 = vperm.slane %v3214_v50, %v11900_v46  ;;  %v3476_v13 = vshrl.u32 %v3199_v63, 16 }
 0x448   : > { %v3233_v38 = vsel %vm1587_vm12, %v3232_v27, %v3225_v17  ;;  %v3252_v39 = vsel %vm1587_vm12, %v3251_v25, %v3244_v6  ;;  %v17649_v9 = vshrl.u32 %v12849_v49, 16  ;;  %v3945_v27 = vperm.slane %v3676_v33, %v11809_v41 }
 0x449   : > { %v3237_v18 = vperm.slane %v3233_v38, %v11900_v46  ;;  %v3256_v58 = vperm.slane %v3252_v39, %v11900_v46  ;;  %v13092_v60 = vperm.slane %v3649_v24, %v11809_v41  ;;  %v3201_v1 = vsel %vm1587_vm12, 0, %v3200_v47 }
 0x44a   : > { %v3679_v26 = vpack.i.b16 %v3678_v55, %v17649_v9  ;;  %v3475_v15 = vpack.i.b16 %v3218_v53, %v3199_v63  ;;  %v3477_v54 = vshrl.u32 %v3218_v53, 16  ;;  %v3219_v17 = vrot.slane %v3218_v53, 4 }
 0x44b   : > { %v3487_v19 = vpack.i.b16 %v3256_v58, %v3237_v18  ;;  %v3488_v50 = vshrl.u32 %v3237_v18, 16  ;;  %v3489_v38 = vshrl.u32 %v3256_v58, 16  ;;  %v3238_v6 = vrot.slane %v3237_v18, 4 }
 0x44c   : > { %v4662_v25 = vunpack.c.l.b16 %v3475_v15  ;;  %v3478_v52 = vpack.i.b16 %v3477_v54, %v3476_v13  ;;  %v3220_v39 = vsel %vm1587_vm12, 0, %v3219_v17  ;;  %v3257_v24 = vrot.slane %v3256_v58, 4 }
 0x44d   : > { %v4663_v23 = vunpack.c.l.b16 %v3487_v19  ;;  %v3490_v42 = vpack.i.b16 %v3489_v38, %v3488_v50  ;;  %v3239_v47 = vsel %vm1587_vm12, 0, %v3238_v6  ;;  %v3481_v49 = vpack.i.b16 %v3220_v39, %v3201_v1  ;;  %v3573_v38 = vpop.permute.xlu1 %3572 }
 0x44e   : > { %v4754_v55 = vunpack.c.l.b16 %v3478_v52  ;;  %v3258_v63 = vsel %vm1587_vm12, 0, %v3257_v24  ;;  %v3482_v53 = vshrl.u32 %v3201_v1, 16  ;;  %v3483_v9 = vshrl.u32 %v3220_v39, 16 }
 0x44f   : > { %v4670_v33 = vpack.c.b16 %v4663_v23, %v4662_v25  ;;  %v4755_v44 = vunpack.c.l.b16 %v3490_v42  ;;  %v3493_v12 = vpack.i.b16 %v3258_v63, %v3239_v47  ;;  %v4845_v48 = vunpack.c.l.b16 %v3481_v49 }
 0x450   : > { %v3484_v18 = vpack.i.b16 %v3483_v9, %v3482_v53  ;;  %v3494_v15 = vshrl.u32 %v3239_v47, 16  ;;  %v3495_v13 = vshrl.u32 %v3258_v63, 16  ;;  %v3946_v54 = vrot.slane %v3945_v27, 4 }
 0x451   : > { %v4694_v58 = vsel %vm4674_vm13, %v4670_v33, 0  ;;  %v4762_v17 = vpack.c.b16 %v4755_v44, %v4754_v55  ;;  %v4846_v19 = vunpack.c.l.b16 %v3493_v12  ;;  %v17650_v50 = vrot.slane %v12590_v35, 4 }
 0x452   : > { %4711 = vmatpush.bf16.xpose.msra.mxu3 %v4694_v58  ;;  %v3496_v1 = vpack.i.b16 %v3495_v13, %v3494_v15  ;;  %v4936_v6 = vunpack.c.l.b16 %v3484_v18  ;;  %v3947_v42 = vsel %vm1587_vm12, %v3946_v54, %v12590_v35  ;;  %v3971_v12 = vperm.slane %v3679_v26, %v11809_v41 }
 0x453   : > { %v3949_v52 = vsel %vm1587_vm12, %v3945_v27, %v17650_v50  ;;  %v4785_v25 = vsel %vm4674_vm13, %v4762_v17, 0  ;;  %v4853_v39 = vpack.c.b16 %v4846_v19, %v4845_v48  ;;  %v3953_v24 = vperm.slane %v3947_v42, %v11900_v46  ;;  %v17651_v27 = vld [vmem:[#allocation11_spill] sm:$0xff]  ;;  %v17685_v42 = vld [vmem:[#allocation62_spill] sm:$0xff] }
 0x454   : > { %v3957_v23 = vperm.slane %v3949_v52, %v11900_v46  ;;  %4802 = vmatpush.bf16.xpose.msrb.mxu0 %v4785_v25  ;;  %v4937_v44 = vunpack.c.l.b16 %v3496_v1  ;;  %v3658_v49 = vpack.i.b16 %v3573_v38, %v17651_v27  ;;  %v3660_v55 = vshrl.u32 %v3573_v38, 16 }
 0x455   : > { %v4876_v63 = vsel %vm4674_vm13, %v4853_v39, 0  ;;  %v3958_v53 = vrot.slane %v3953_v24, 4  ;;  %v3972_v9 = vrot.slane %v3971_v12, 4  ;;  %v17652_v35 = vrot.slane %v12600_v3, 4 }
 0x456   : > { %v3960_v47 = vrot.slane %v3957_v23, 4  ;;  %4893 = vmatpush.bf16.xpose.msrb.mxu1 %v4876_v63  ;;  %v4944_v48 = vpack.c.b16 %v4937_v44, %v4936_v6  ;;  %v3844_v13 = vrot.slane %v13085_v29, 4  ;;  %v3870_v54 = vrot.slane %v13092_v60, 4 }
 0x457   : > { %v3975_v33 = vsel %vm1587_vm12, %v3971_v12, %v17652_v35  ;;  %v3973_v58 = vsel %vm1587_vm12, %v3972_v9, %v12600_v3  ;;  %v17653_v17 = vshrl.u32 %v17651_v27, 16  ;;  %v13136_v1 = vperm.slane %v3658_v49, %v11809_v41  ;;  %v17664_v27 = vld [vmem:[#allocation84_spill] sm:$0xff] }
 0x458   : > { %v13117_v18 = vsel %vm1587_vm12, 0, %v3960_v47  ;;  %v3983_v26 = vperm.slane %v3975_v33, %v11900_v46  ;;  %v13121_v15 = vsel %vm1587_vm12, %v3960_v47, %v3953_v24  ;;  %v4967_v50 = vsel %vm4674_vm13, %v4944_v48, 0 }
 0x459   : > { %v3661_v19 = vpack.i.b16 %v3660_v55, %v17653_v17  ;;  %v13131_v52 = vperm.slane %v3973_v58, %v11900_v46  ;;  %4984 = vmatpush.bf16.xpose.msrb.mxu2 %v4967_v50  ;;  %v13139_v6 = vsel %vm1587_vm12, 0, %v3958_v53  ;;  %v17654_v23 = vrot.slane %v12613_v22, 4 }
 0x45a   : > { %v13133_v38 = vrot.slane %v3983_v26, 4  ;;  %v17655_v12 = vrot.slane %v12731_v7, 4  ;;  %v3107_v47 = vsel %vm1587_vm12, %v12627_v20, %v12604_v59  ;;  %v3896_v49 = vrot.slane %v13136_v1, 4 }
 0x45b   : > { %v13143_v3 = vperm.slane %v3661_v19, %v11809_v41  ;;  %v2688_v25 = vsel %vm1587_vm12, 0, %v17654_v23  ;;  %v3984_v39 = vrot.slane %v13131_v52, 4  ;;  %v17656_v55 = vrot.slane %v12739_v8, 4 }
 0x45c   : > { %v13151_v24 = vsel %vm1587_vm12, 0, %v13133_v38  ;;  %v2714_v44 = vsel %vm1587_vm12, 0, %v17655_v12  ;;  %v17657_v53 = vrot.slane %v12637_v34, 4  ;;  %v3126_v59 = vsel %vm1587_vm12, %v12647_v57, %v12613_v22 }
 0x45d   : > { %v2740_v63 = vsel %vm1587_vm12, 0, %v17656_v55  ;;  %v3922_v35 = vrot.slane %v13143_v3, 4  ;;  %v17658_v20 = vrot.slane %v12660_v10, 4  ;;  %v3111_v26 = vperm.slane %v3107_v47, %v11809_v41  ;;  %v17661_v55 = vld [vmem:[#allocation81_spill] sm:$0xff] }
 0x45e   : > { %v3113_v9 = vsel %vm1587_vm12, %v17657_v53, %v12645_v61  ;;  %v3145_v34 = vsel %vm1587_vm12, %v12734_v37, %v12731_v7  ;;  %v17659_v61 = vrot.slane %v12747_v14, 4  ;;  %v13185_v19 = vsel %vm1587_vm12, 0, %v3984_v39  ;;  %v17662_v53 = vld [vmem:[#allocation82_spill] sm:$0xff] }
 0x45f   : > { %v3117_v33 = vperm.slane %v3113_v9, %v11809_v41  ;;  %v3132_v48 = vsel %vm1587_vm12, %v17658_v20, %v2688_v25  ;;  %v3164_v10 = vsel %vm1587_vm12, %v12741_v43, %v12739_v8  ;;  %v3130_v50 = vperm.slane %v3126_v59, %v11809_v41  ;;  %v17663_v59 = vld [vmem:[#allocation85_spill] sm:$0xff] }
 0x460   : > { %v3136_v58 = vperm.slane %v3132_v48, %v11809_v41  ;;  %v3151_v17 = vsel %vm1587_vm12, %v17659_v61, %v2714_v44  ;;  %v3149_v25 = vperm.slane %v3145_v34, %v11809_v41  ;;  %v17660_v37 = vrot.slane %v12759_v62, 4 }
 0x461   : > { %v3118_v22 = vrot.slane %v3117_v33, 4  ;;  %v3155_v57 = vperm.slane %v3151_v17, %v11809_v41  ;;  %v3168_v12 = vperm.slane %v3164_v10, %v11809_v41  ;;  %v2055_v43 = vperm.slane %v12624_v0, %v11809_v41 }
 0x462   : > { %v3137_v23 = vrot.slane %v3136_v58, 4  ;;  %v3170_v7 = vsel %vm1587_vm12, %v17660_v37, %v2740_v63  ;;  %v13206_v62 = vsel %vm1587_vm12, %v17662_v53, %v17661_v55  ;;  %v2049_v20 = vperm.slane %v17663_v59, %v11809_v41 }
 0x463   : > { %v3119_v14 = vsel %vm1587_vm12, %v3118_v22, %v3111_v26  ;;  %v3156_v39 = vrot.slane %v3155_v57, 4  ;;  %v3174_v44 = vperm.slane %v3170_v7, %v11809_v41  ;;  %v2068_v0 = vperm.slane %v13206_v62, %v11809_v41 }
 0x464   : > { %v3123_v47 = vperm.slane %v3119_v14, %v11900_v46  ;;  %v3138_v8 = vsel %vm1587_vm12, %v3137_v23, %v3130_v50  ;;  %v2056_v23 = vrot.slane %v2055_v43, 4 }
 0x465   : > { %v3142_v63 = vperm.slane %v3138_v8, %v11900_v46  ;;  %v3157_v9 = vsel %vm1587_vm12, %v3156_v39, %v3149_v25  ;;  %v3175_v33 = vrot.slane %v3174_v44, 4  ;;  %v13219_v44 = vpop.permute.xlu0 %3588 }
 0x466   : > { %v3161_v48 = vperm.slane %v3157_v9, %v11900_v46  ;;  %v3452_v26 = vshrl.u32 %v3123_v47, 16  ;;  %v3124_v58 = vrot.slane %v3123_v47, 4 }
 0x467   : > { %v3176_v34 = vsel %vm1587_vm12, %v3175_v33, %v3168_v12  ;;  %v3451_v61 = vpack.i.b16 %v3142_v63, %v3123_v47  ;;  %v3453_v17 = vshrl.u32 %v3142_v63, 16  ;;  %v3143_v22 = vrot.slane %v3142_v63, 4 }
 0x468   : > { %v3180_v57 = vperm.slane %v3176_v34, %v11900_v46  ;;  %v3125_v10 = vsel %vm1587_vm12, 0, %v3124_v58  ;;  %v3162_v50 = vrot.slane %v3161_v48, 4  ;;  %v3464_v7 = vshrl.u32 %v3161_v48, 16 }
 0x469   : > { %v4660_v25 = vunpack.c.l.b16 %v3451_v61  ;;  %v3454_v37 = vpack.i.b16 %v3453_v17, %v3452_v26  ;;  %v3144_v14 = vsel %vm1587_vm12, 0, %v3143_v22  ;;  %v3458_v62 = vshrl.u32 %v3125_v10, 16 }
 0x46a   : > { %v3463_v39 = vpack.i.b16 %v3180_v57, %v3161_v48  ;;  %v3465_v8 = vshrl.u32 %v3180_v57, 16  ;;  %v3163_v12 = vsel %vm1587_vm12, 0, %v3162_v50  ;;  %v3181_v47 = vrot.slane %v3180_v57, 4  ;;  %v17665_v50 = vld [vmem:[#allocation83_spill] sm:$0xff] }
 0x46b   : > { %v4752_v55 = vunpack.c.l.b16 %v3454_v37  ;;  %v3457_v53 = vpack.i.b16 %v3144_v14, %v3125_v10  ;;  %v3459_v63 = vshrl.u32 %v3144_v14, 16  ;;  %v3470_v59 = vshrl.u32 %v3163_v12, 16 }
 0x46c   : > { %v4661_v9 = vunpack.c.l.b16 %v3463_v39  ;;  %v3466_v33 = vpack.i.b16 %v3465_v8, %v3464_v7  ;;  %v3182_v43 = vsel %vm1587_vm12, 0, %v3181_v47  ;;  %v2057_v48 = vsel %vm1587_vm12, %v2056_v23, %v2049_v20  ;;  %v3567_v8 = vpop.permute.xlu2 %3566  ;;  %v17668_v23 = vld [vmem:[#allocation90_spill] sm:$0xff] }
 0x46d   : > { %v3469_v26 = vpack.i.b16 %v3182_v43, %v3163_v12  ;;  %v3460_v58 = vpack.i.b16 %v3459_v63, %v3458_v62  ;;  %v3471_v34 = vshrl.u32 %v3182_v43, 16  ;;  %v4843_v22 = vunpack.c.l.b16 %v3457_v53  ;;  %v17667_v62 = vld [vmem:[#allocation89_spill] sm:$0xff] }
 0x46e   : > { %v4669_v61 = vpack.c.b16 %v4661_v9, %v4660_v25  ;;  %v4753_v17 = vunpack.c.l.b16 %v3466_v33  ;;  %v17666_v57 = vrot.slane %v17665_v50, 4  ;;  %v2087_v20 = vperm.slane %v17667_v62, %v11809_v41  ;;  %v17669_v25 = vld [vmem:[#allocation86_spill] sm:$0xff] }
 0x46f   : > { %v4844_v10 = vunpack.c.l.b16 %v3469_v26  ;;  %v3472_v14 = vpack.i.b16 %v3471_v34, %v3470_v59  ;;  %v4934_v39 = vunpack.c.l.b16 %v3460_v58  ;;  %v17670_v53 = vrot.slane %v17669_v25, 4  ;;  %v17671_v26 = vld [vmem:[#allocation87_spill] sm:$0xff]  ;;  %v17672_v58 = vld [vmem:[#allocation88_spill] sm:$0xff]  ;;  %v13251_v25 = vpop.permute.xlu1 %3590 }
 0x470   : > { %v2070_v37 = vsel %vm1587_vm12, %v17666_v57, %v17664_v27  ;;  %v4691_v12 = vsel %vm4674_vm13, %v4669_v61, 0  ;;  %v4761_v47 = vpack.c.b16 %v4753_v17, %v4752_v55  ;;  %v2102_v55 = vsel %vm1587_vm12, %v17672_v58, %v17671_v26  ;;  %v17673_v34 = vld [vmem:[#allocation92_spill] sm:$0xff]  ;;  %v17674_v61 = vld [vmem:[#allocation91_spill] sm:$0xff] }
 0x471   : > { %v2074_v7 = vperm.slane %v2070_v37, %v11809_v41  ;;  %v2089_v63 = vsel %vm1587_vm12, %v17670_v53, %v17668_v23  ;;  %4712 = vmatpush.bf16.xpose.msra.mxu3 %v4691_v12  ;;  %v4852_v9 = vpack.c.b16 %v4844_v10, %v4843_v22  ;;  %v4935_v27 = vunpack.c.l.b16 %v3472_v14  ;;  %v17676_v57 = vld [vmem:[#allocation12_spill] sm:$0xff]  ;;  %v3607_v53 = vpop.permute.xlu0 %3606 }
 0x472   : > { %v2093_v43 = vperm.slane %v2089_v63, %v11809_v41  ;;  %v4782_v59 = vsel %vm4674_vm13, %v4761_v47, 0  ;;  %v17675_v17 = vrot.slane %v17674_v61, 4  ;;  %v3622_v37 = vpack.i.b16 %v3567_v8, %v17676_v57 }
 0x473   : > { %v2075_v33 = vrot.slane %v2074_v7, 4  ;;  %4803 = vmatpush.bf16.xpose.msrb.mxu0 %v4782_v59  ;;  %v4873_v22 = vsel %vm4674_vm13, %v4852_v9, 0  ;;  %v4943_v10 = vpack.c.b16 %v4935_v27, %v4934_v39  ;;  %v2061_v12 = vperm.slane %v2057_v48, %v11900_v46 }
 0x474   : > { %v2108_v50 = vsel %vm1587_vm12, %v17675_v17, %v17673_v34  ;;  %v2094_v7 = vrot.slane %v2093_v43, 4  ;;  %4894 = vmatpush.bf16.xpose.msrb.mxu1 %v4873_v22  ;;  %v3624_v23 = vshrl.u32 %v3567_v8, 16  ;;  %v2106_v39 = vperm.slane %v2102_v55, %v11809_v41 }
 0x475   : > { %v2076_v14 = vsel %vm1587_vm12, %v2075_v33, %v2068_v0  ;;  %v2112_v62 = vperm.slane %v2108_v50, %v11809_v41  ;;  %v4964_v63 = vsel %vm4674_vm13, %v4943_v10, 0  ;;  %v13257_v0 = vperm.slane %v3622_v37, %v11809_v41 }
 0x476   : > { %v2080_v47 = vperm.slane %v2076_v14, %v11900_v46  ;;  %v2095_v59 = vsel %vm1587_vm12, %v2094_v7, %v2087_v20  ;;  %4985 = vmatpush.bf16.xpose.msrb.mxu2 %v4964_v63  ;;  %v17677_v33 = vshrl.u32 %v17676_v57, 16  ;;  %v3653_v43 = vshrl.u32 %v13219_v44, 16 }
 0x477   : > { %v2099_v48 = vperm.slane %v2095_v59, %v11900_v46  ;;  %v2113_v9 = vrot.slane %v2112_v62, 4  ;;  %v3665_v26 = vshrl.u32 %v13251_v25, 16  ;;  %v3652_v58 = vpack.i.b16 %v3607_v53, %v13219_v44 }
 0x478   : > { %v2389_v27 = vpack.i.b16 %v2080_v47, %v2061_v12  ;;  %v3625_v8 = vpack.i.b16 %v3624_v23, %v17677_v33  ;;  %v3654_v20 = vshrl.u32 %v3607_v53, 16  ;;  %v2391_v17 = vshrl.u32 %v2080_v47, 16 }
 0x479   : > { %v2114_v55 = vsel %vm1587_vm12, %v2113_v9, %v2106_v39  ;;  %v3841_v57 = vperm.slane %v3652_v58, %v11809_v41  ;;  %v2390_v22 = vshrl.u32 %v2061_v12, 16  ;;  %v2402_v7 = vshrl.u32 %v2099_v48, 16 }
 0x47a   : > { %v13268_v61 = vperm.slane %v3625_v8, %v11809_v41  ;;  %v2118_v50 = vperm.slane %v2114_v55, %v11900_v46  ;;  %v3655_v37 = vpack.i.b16 %v3654_v20, %v3653_v43  ;;  %v4646_v10 = vunpack.c.l.b16 %v2389_v27 }
 0x47b   : > { %v2081_v44 = vrot.slane %v2080_v47, 4  ;;  %v3842_v23 = vrot.slane %v3841_v57, 4  ;;  %v3845_v53 = vsel %vm1587_vm12, %v3841_v57, %v3844_v13  ;;  %v2392_v39 = vpack.i.b16 %v2391_v17, %v2390_v22  ;;  %v3609_v22 = vpop.permute.xlu1 %3608 }
 0x47c   : > { %v2401_v62 = vpack.i.b16 %v2118_v50, %v2099_v48  ;;  %v3867_v63 = vperm.slane %v3655_v37, %v11809_v41  ;;  %v3853_v59 = vperm.slane %v3845_v53, %v11900_v46  ;;  %v2403_v9 = vshrl.u32 %v2118_v50, 16  ;;  %v3569_v53 = vpop.permute.xlu0 %3568 }
 0x47d   : > { %v2062_v33 = vrot.slane %v2061_v12, 4  ;;  %v3843_v27 = vsel %vm1587_vm12, %v3842_v23, %v13085_v29  ;;  %v2082_v12 = vsel %vm1587_vm12, 0, %v2081_v44  ;;  %v2100_v57 = vrot.slane %v2099_v48, 4 }
 0x47e   : > { %v4647_v8 = vunpack.c.l.b16 %v2401_v62  ;;  %v3868_v43 = vrot.slane %v3867_v63, 4  ;;  %v3871_v47 = vsel %vm1587_vm12, %v3867_v63, %v3870_v54  ;;  %v3849_v58 = vperm.slane %v3843_v27, %v11900_v46 }
 0x47f   : > { %v3856_v20 = vrot.slane %v3853_v59, 4  ;;  %v3879_v13 = vperm.slane %v3871_v47, %v11900_v46  ;;  %v2404_v55 = vpack.i.b16 %v2403_v9, %v2402_v7  ;;  %v2063_v48 = vsel %vm1587_vm12, 0, %v2062_v33 }
 0x480   : > { %v4655_v37 = vpack.c.b16 %v4647_v8, %v4646_v10  ;;  %v3869_v17 = vsel %vm1587_vm12, %v3868_v43, %v13092_v60  ;;  %v3854_v29 = vrot.slane %v3849_v58, 4  ;;  %v4738_v60 = vunpack.c.l.b16 %v2392_v39 }
 0x481   : > { %v13289_v62 = vsel %vm1587_vm12, 0, %v3856_v20  ;;  %v13292_v54 = vperm.slane %v3869_v17, %v11900_v46  ;;  %v13294_v23 = vrot.slane %v3879_v13, 4  ;;  %v13298_v10 = vsel %vm1587_vm12, %v3856_v20, %v3849_v58  ;;  %v13317_v17 = vpop.permute.xlu2 %3618 }
 0x482   : > { %17678 = vst [vmem:[#allocation56_spill] sm:$0xff] %v13289_v62  ;;  %10245 = vmatmul.msk.bf16.vlgmr.msra.gmra.mxu3 %vm4674_vm13, %v4655_v37  ;;  %v4739_v7 = vunpack.c.l.b16 %v2404_v55  ;;  %v2101_v59 = vsel %vm1587_vm12, 0, %v2100_v57  ;;  %v2119_v9 = vrot.slane %v2118_v50, 4  ;;  %v13308_v8 = vsel %vm1587_vm12, 0, %v3854_v29 }
 0x483   : > { %17679 = vst [vmem:[#allocation58_spill] sm:$0xff] %v13292_v54  ;;  %v3880_v44 = vrot.slane %v13292_v54, 4  ;;  %v13304_v63 = vsel %vm1587_vm12, 0, %v13294_v23  ;;  %v2395_v47 = vpack.i.b16 %v2082_v12, %v2063_v48  ;;  %v2396_v58 = vshrl.u32 %v2063_v48, 16 }
 0x484   : > { %17680 = vst [vmem:[#allocation59_spill] sm:$0xff] %v13294_v23  ;;  %v4747_v43 = vpack.c.b16 %v4739_v7, %v4738_v60  ;;  %v2120_v33 = vsel %vm1587_vm12, 0, %v2119_v9  ;;  %v2397_v20 = vshrl.u32 %v2082_v12, 16  ;;  %v2408_v50 = vshrl.u32 %v2101_v59, 16  ;;  %v17683_v7 = vld [vmem:[#allocation13_spill] sm:$0xff] }
 0x485   : > { %17681 = vst [vmem:[#allocation70_spill] sm:$0xff] %v13304_v63  ;;  %v13314_v13 = vsel %vm1587_vm12, 0, %v3880_v44  ;;  %v2407_v55 = vpack.i.b16 %v2120_v33, %v2101_v59  ;;  %v2409_v37 = vshrl.u32 %v2120_v33, 16  ;;  %v3664_v29 = vpack.i.b16 %v3609_v22, %v13251_v25  ;;  %v17684_v33 = vld [vmem:[#allocation60_spill] sm:$0xff] }
 0x486   : > { %17682 = vst [vmem:[#allocation66_spill] sm:$0xff] %v13314_v13  ;;  %10250 = vmatmul.msk.bf16.vlgmr.msrb.gmra.mxu0 %vm4674_vm13, %v4747_v43  ;;  %v2398_v57 = vpack.i.b16 %v2397_v20, %v2396_v58  ;;  %v3666_v60 = vshrl.u32 %v3609_v22, 16  ;;  %v3634_v39 = vpack.i.b16 %v3569_v53, %v17683_v7  ;;  %v4829_v27 = vunpack.c.l.b16 %v2395_v47 }
 0x487   : > { %v4830_v9 = vunpack.c.l.b16 %v2407_v55  ;;  %v2410_v48 = vpack.i.b16 %v2409_v37, %v2408_v50  ;;  %v3636_v12 = vshrl.u32 %v3569_v53, 16  ;;  %v3893_v59 = vperm.slane %v3664_v29, %v11809_v41  ;;  %v13330_v55 = vpop.permute.xlu1 %3584  ;;  %v13339_v37 = vpop.permute.xlu0 %3586  ;;  %v17688_v29 = vld [vmem:[#allocation65_spill] sm:$0xff] }
 0x488   : > { %v3667_v43 = vpack.i.b16 %v3666_v60, %v3665_v26  ;;  %v2121_v58 = vsel %vm1587_vm12, %v17685_v42, %v17684_v33  ;;  %v4920_v14 = vunpack.c.l.b16 %v2398_v57  ;;  %v17686_v34 = vshrl.u32 %v17683_v7, 16  ;;  %v17687_v57 = vld [vmem:[#allocation64_spill] sm:$0xff] }
 0x489   : > { %v4838_v20 = vpack.c.b16 %v4830_v9, %v4829_v27  ;;  %v4921_v22 = vunpack.c.l.b16 %v2410_v48  ;;  %v3894_v53 = vrot.slane %v3893_v59, 4  ;;  %v3897_v25 = vsel %vm1587_vm12, %v3893_v59, %v3896_v49 }
 0x48a   : > { %v3637_v47 = vpack.i.b16 %v3636_v12, %v17686_v34  ;;  %v3919_v26 = vperm.slane %v3667_v43, %v11809_v41  ;;  %v13337_v50 = vperm.slane %v3634_v39, %v11809_v41  ;;  %v3905_v27 = vperm.slane %v3897_v25, %v11900_v46 }
 0x48b   : > { %10255 = vmatmul.msk.bf16.vlgmr.msrb.gmra.mxu1 %vm4674_vm13, %v4838_v20  ;;  %v4929_v42 = vpack.c.b16 %v4921_v22, %v4920_v14  ;;  %v17689_v60 = vrot.slane %v17688_v29, 4  ;;  %v3895_v7 = vsel %vm1587_vm12, %v3894_v53, %v13136_v1  ;;  %v2125_v59 = vperm.slane %v2121_v58, %v11809_v41  ;;  %v17690_v20 = vld [vmem:[#allocation61_spill] sm:$0xff]  ;;  %v17691_v22 = vld [vmem:[#allocation63_spill] sm:$0xff]  ;;  %v17693_v53 = vld [vmem:[#allocation68_spill] sm:$0xff] }
 0x48c   : > { %v13344_v34 = vperm.slane %v3637_v47, %v11809_v41  ;;  %v3920_v39 = vrot.slane %v3919_v26, 4  ;;  %v3923_v9 = vsel %vm1587_vm12, %v3919_v26, %v3922_v35  ;;  %v3901_v48 = vperm.slane %v3895_v7, %v11900_v46  ;;  %v17692_v35 = vld [vmem:[#allocation67_spill] sm:$0xff] }
 0x48d   : > { %v2127_v49 = vsel %vm1587_vm12, %v17689_v60, %v17687_v57  ;;  %10260 = vmatmul.msk.bf16.vlgmr.msrb.gmra.mxu2 %vm4674_vm13, %v4929_v42  ;;  %v3908_v12 = vrot.slane %v3905_v27, 4  ;;  %v3931_v43 = vperm.slane %v3923_v9, %v11900_v46  ;;  %v2140_v47 = vsel %vm1587_vm12, %v17691_v22, %v17690_v20  ;;  %v17702_v20 = vld [vmem:[#allocation72_spill] sm:$0xff]  ;;  %v17709_v29 = vld [vmem:[#allocation71_spill] sm:$0xff] }
 0x48e   : > { %v2131_v14 = vperm.slane %v2127_v49, %v11809_v41  ;;  %v3921_v33 = vsel %vm1587_vm12, %v3920_v39, %v13143_v3  ;;  %v17694_v25 = vrot.slane %v17693_v53, 4  ;;  %v3906_v42 = vrot.slane %v3901_v48, 4  ;;  %v17704_v53 = vld [vmem:[#allocation73_spill] sm:$0xff] }
 0x48f   : > { %v13370_v27 = vsel %vm1587_vm12, 0, %v3908_v12  ;;  %v13373_v57 = vperm.slane %v3921_v33, %v11900_v46  ;;  %v13375_v58 = vrot.slane %v3931_v43, 4  ;;  %v13378_v3 = vsel %vm1587_vm12, %v3908_v12, %v3901_v48  ;;  %v17701_v33 = vld [vmem:[#allocation76_spill] sm:$0xff]  ;;  %v3603_v60 = vpop.permute.xlu1 %3602  ;;  %v13412_v22 = vpop.permute.xlu0 %3604 }
 0x490   : > { %v2132_v1 = vrot.slane %v2131_v14, 4  ;;  %v2146_v26 = vsel %vm1587_vm12, %v17694_v25, %v17692_v35  ;;  %17695 = vst [vmem:[#allocation69_spill] sm:$0xff] %v13370_v27  ;;  %v2144_v14 = vperm.slane %v2140_v47, %v11809_v41  ;;  %v13391_v43 = vsel %vm1587_vm12, 0, %v3906_v42  ;;  %v17705_v25 = vld [vmem:[#allocation74_spill] sm:$0xff]  ;;  %v17707_v42 = vld [vmem:[#allocation75_spill] sm:$0xff] }
 0x491   : > { %17696 = vst [vmem:[#allocation78_spill] sm:$0xff] %v13373_v57  ;;  %v13385_v7 = vsel %vm1587_vm12, 0, %v13375_v58  ;;  %v2150_v12 = vperm.slane %v2146_v26, %v11809_v41  ;;  %v2178_v47 = vsel %vm1587_vm12, %v17705_v25, %v17704_v53  ;;  %v17708_v39 = vrot.slane %v17707_v42, 4 }
 0x492   : > { %17697 = vst [vmem:[#allocation77_spill] sm:$0xff] %v13375_v58  ;;  %v2133_v49 = vsel %vm1587_vm12, %v2132_v1, %v2125_v59  ;;  %v17703_v59 = vrot.slane %v17702_v20, 4  ;;  %v2163_v20 = vperm.slane %v17709_v29, %v11809_v41  ;;  %v3629_v48 = vshrl.u32 %v13330_v55, 16 }
 0x493   : > { %17698 = vst [vmem:[#allocation80_spill] sm:$0xff] %v13378_v3  ;;  %v2137_v9 = vperm.slane %v2133_v49, %v11900_v46  ;;  %v17706_v49 = vld [vmem:[#allocation79_spill] sm:$0xff]  ;;  %v2151_v26 = vrot.slane %v2150_v12, 4  ;;  %v3630_v12 = vshrl.u32 %v3603_v60, 16 }
 0x494   : > { %17699 = vst [vmem:[#allocation10_spill] sm:$0xff] %v13385_v7  ;;  %v2165_v1 = vsel %vm1587_vm12, %v17703_v59, %v17701_v33  ;;  %v2184_v44 = vsel %vm1587_vm12, %v17708_v39, %v17706_v49  ;;  %v2182_v33 = vperm.slane %v2178_v47, %v11809_v41  ;;  %v3628_v39 = vpack.i.b16 %v3603_v60, %v13330_v55 }
 0x495   : > { %17700 = vst [vmem:[#allocation11_spill] sm:$0xff] %v13391_v43  ;;  %v2169_v35 = vperm.slane %v2165_v1, %v11809_v41  ;;  %v2188_v59 = vperm.slane %v2184_v44, %v11809_v41  ;;  %v2414_v53 = vshrl.u32 %v2137_v9, 16  ;;  %v2138_v25 = vrot.slane %v2137_v9, 4 }
 0x496   : > { %v2152_v42 = vsel %vm1587_vm12, %v2151_v26, %v2144_v14  ;;  %v3640_v44 = vpack.i.b16 %v13412_v22, %v13339_v37  ;;  %v3631_v27 = vpack.i.b16 %v3630_v12, %v3629_v48 }
 0x497   : > { %v2170_v1 = vrot.slane %v2169_v35, 4  ;;  %v2189_v7 = vrot.slane %v2188_v59, 4  ;;  %v2156_v49 = vperm.slane %v2152_v42, %v11900_v46  ;;  %v2139_v47 = vsel %vm1587_vm12, 0, %v2138_v25 }
 0x498   : > { %v2420_v3 = vshrl.u32 %v2139_v47, 16 }
 0x499   : > { %v2171_v29 = vsel %vm1587_vm12, %v2170_v1, %v2163_v20  ;;  %v2190_v58 = vsel %vm1587_vm12, %v2189_v7, %v2182_v33  ;;  %v2413_v26 = vpack.i.b16 %v2156_v49, %v2137_v9  ;;  %v2415_v55 = vshrl.u32 %v2156_v49, 16 }
 0x49a   : > { %v2175_v35 = vperm.slane %v2171_v29, %v11900_v46  ;;  %v2194_v14 = vperm.slane %v2190_v58, %v11900_v46  ;;  %v2157_v60 = vrot.slane %v2156_v49, 4  ;;  %v3737_v20 = vperm.slane %v3628_v39, %v11809_v41 }
 0x49b   : > { %v3763_v1 = vperm.slane %v3631_v27, %v11809_v41  ;;  %v4648_v43 = vunpack.c.l.b16 %v2413_v26  ;;  %v2416_v63 = vpack.i.b16 %v2415_v55, %v2414_v53 }
 0x49c   : > { %v2426_v59 = vshrl.u32 %v2175_v35, 16  ;;  %v2176_v42 = vrot.slane %v2175_v35, 4  ;;  %v2425_v25 = vpack.i.b16 %v2194_v14, %v2175_v35  ;;  %v2427_v13 = vshrl.u32 %v2194_v14, 16 }
 0x49d   : > { %v2158_v29 = vsel %vm1587_vm12, 0, %v2157_v60  ;;  %v2195_v48 = vrot.slane %v2194_v14, 4  ;;  %v3738_v33 = vrot.slane %v3737_v20, 4  ;;  %v4740_v12 = vunpack.c.l.b16 %v2416_v63 }
 0x49e   : > { %v2177_v7 = vsel %vm1587_vm12, 0, %v2176_v42  ;;  %v4649_v58 = vunpack.c.l.b16 %v2425_v25  ;;  %v2428_v9 = vpack.i.b16 %v2427_v13, %v2426_v59  ;;  %v2419_v49 = vpack.i.b16 %v2158_v29, %v2139_v47 }
 0x49f   : > { %v2196_v23 = vsel %vm1587_vm12, 0, %v2195_v48  ;;  %v2421_v54 = vshrl.u32 %v2158_v29, 16  ;;  %v2432_v39 = vshrl.u32 %v2177_v7, 16  ;;  %v3739_v27 = vsel %vm1587_vm12, %v3738_v33, %v13257_v0 }
 0x4a0   : > { %v4656_v35 = vpack.c.b16 %v4649_v58, %v4648_v43  ;;  %v4741_v53 = vunpack.c.l.b16 %v2428_v9  ;;  %v2431_v26 = vpack.i.b16 %v2196_v23, %v2177_v7  ;;  %v4831_v55 = vunpack.c.l.b16 %v2419_v49 }
 0x4a1   : > { %v2422_v60 = vpack.i.b16 %v2421_v54, %v2420_v3  ;;  %v2433_v62 = vshrl.u32 %v2196_v23, 16  ;;  %v17710_v14 = vrot.slane %v13257_v0, 4  ;;  %v3745_v63 = vperm.slane %v3739_v27, %v11900_v46 }
 0x4a2   : > { %10246 = vmatmul.msk.bf16.gmra.mxu3 %vm4674_vm13, %v4656_v35  ;;  %v4748_v13 = vpack.c.b16 %v4741_v53, %v4740_v12  ;;  %v4832_v47 = vunpack.c.l.b16 %v2431_v26  ;;  %v3764_v25 = vrot.slane %v3763_v1, 4  ;;  %v3641_v43 = vshrl.u32 %v13339_v37, 16 }
 0x4a3   : > { %v3741_v42 = vsel %vm1587_vm12, %v3737_v20, %v17710_v14  ;;  %v2434_v29 = vpack.i.b16 %v2433_v62, %v2432_v39  ;;  %v3750_v7 = vrot.slane %v3745_v63, 4  ;;  %v17711_v54 = vrot.slane %v13268_v61, 4 }
 0x4a4   : > { %v3749_v59 = vperm.slane %v3741_v42, %v11900_v46  ;;  %10251 = vmatmul.msk.bf16.gmra.mxu0 %vm4674_vm13, %v4748_v13  ;;  %v4839_v0 = vpack.c.b16 %v4832_v47, %v4831_v55  ;;  %v3765_v20 = vsel %vm1587_vm12, %v3764_v25, %v13268_v61  ;;  %v4922_v33 = vunpack.c.l.b16 %v2422_v60  ;;  %v17721_v13 = vld [vmem:[#allocation18_spill] sm:$0xff] }
 0x4a5   : > { %v3767_v23 = vsel %vm1587_vm12, %v3763_v1, %v17711_v54  ;;  %v4923_v58 = vunpack.c.l.b16 %v2434_v29  ;;  %v13447_v9 = vperm.slane %v3765_v20, %v11900_v46  ;;  %v3642_v62 = vshrl.u32 %v13412_v22, 16  ;;  %v17724_v29 = vld [vmem:[#allocation15_spill] sm:$0xff] }
 0x4a6   : > { %v3752_v3 = vrot.slane %v3749_v59, 4  ;;  %v3775_v48 = vperm.slane %v3767_v23, %v11900_v46  ;;  %10256 = vmatmul.msk.bf16.gmra.mxu1 %vm4674_vm13, %v4839_v0  ;;  %v3789_v61 = vperm.slane %v3640_v44, %v11809_v41  ;;  %v17716_v49 = vrot.slane %v13373_v57, 4  ;;  %v17726_v23 = vld [vmem:[#allocation22_spill] sm:$0xff]  ;;  %v17727_v0 = vld [vmem:[#allocation17_spill] sm:$0xff] }
 0x4a7   : > { %17712 = vst [vmem:[#allocation81_spill] sm:$0xff] %v13447_v9  ;;  %v4930_v27 = vpack.c.b16 %v4923_v58, %v4922_v33  ;;  %v3776_v22 = vrot.slane %v13447_v9, 4  ;;  %v3643_v35 = vpack.i.b16 %v3642_v62, %v3641_v43  ;;  %v13467_v53 = vsel %vm1587_vm12, 0, %v3750_v7  ;;  %v17725_v7 = vld [vmem:[#allocation16_spill] sm:$0xff] }
 0x4a8   : > { %v13452_v37 = vsel %vm1587_vm12, 0, %v3752_v3  ;;  %v13454_v1 = vrot.slane %v3775_v48, 4  ;;  %v13457_v12 = vsel %vm1587_vm12, %v3752_v3, %v3745_v63  ;;  %v13463_v39 = vsel %vm1587_vm12, 0, %v17716_v49  ;;  %17718 = vst [vmem:[#allocation89_spill] sm:$0xff] %v13467_v53  ;;  %v17746_v49 = vld [vmem:[#allocation55_spill] sm:$0xff] }
 0x4a9   : > { %17713 = vst [vmem:[#allocation82_spill] sm:$0xff] %v13452_v37  ;;  %v3790_v55 = vrot.slane %v3789_v61, 4  ;;  %v17719_v60 = vrot.slane %v13337_v50, 4  ;;  %10261 = vmatmul.msk.bf16.gmra.mxu2 %vm4674_vm13, %v4930_v27  ;;  %v3815_v63 = vperm.slane %v3643_v35, %v11809_v41  ;;  %v17722_v47 = vrot.slane %v17721_v13, 4 }
 0x4aa   : > { %17714 = vst [vmem:[#allocation85_spill] sm:$0xff] %v13454_v1  ;;  %v13476_v44 = vsel %vm1587_vm12, 0, %v13454_v1  ;;  %v13484_v25 = vsel %vm1587_vm12, 0, %v3776_v22  ;;  %v2197_v54 = vsel %vm1587_vm12, %v17725_v7, %v17724_v29  ;;  %v17728_v3 = vrot.slane %v17727_v0, 4  ;;  %v17730_v22 = vld [vmem:[#allocation19_spill] sm:$0xff]  ;;  %v17734_v7 = vld [vmem:[#allocation54_spill] sm:$0xff] }
 0x4ab   : > { %17715 = vst [vmem:[#allocation84_spill] sm:$0xff] %v13457_v12  ;;  %v3793_v14 = vsel %vm1587_vm12, %v3789_v61, %v17719_v60  ;;  %v1834_v59 = vsel %vm1587_vm12, 0, %v17722_v47  ;;  %v3791_v43 = vsel %vm1587_vm12, %v3790_v55, %v13337_v50  ;;  %v3816_v58 = vrot.slane %v3815_v63, 4 }
 0x4ac   : > { %17717 = vst [vmem:[#allocation83_spill] sm:$0xff] %v13463_v39  ;;  %v3801_v42 = vperm.slane %v3793_v14, %v11900_v46  ;;  %v2203_v20 = vsel %vm1587_vm12, %v17728_v3, %v17726_v23  ;;  %v3797_v48 = vperm.slane %v3791_v43, %v11900_v46  ;;  %v17729_v62 = vrot.slane %v13344_v34, 4  ;;  %v17736_v3 = vld [vmem:[#allocation20_spill] sm:$0xff] }
 0x4ad   : > { %17720 = vst [vmem:[#allocation90_spill] sm:$0xff] %v13476_v44  ;;  %v2207_v27 = vperm.slane %v2203_v20, %v11809_v41  ;;  %v2216_v35 = vsel %vm1587_vm12, %v17730_v22, %v17721_v13  ;;  %v3817_v14 = vsel %vm1587_vm12, %v3816_v58, %v13344_v34  ;;  %v2201_v43 = vperm.slane %v2197_v54, %v11809_v41  ;;  %v17748_v22 = vld [vmem:[#allocation14_spill] sm:$0xff] }
 0x4ae   : > { %17723 = vst [vmem:[#allocation86_spill] sm:$0xff] %v13484_v25  ;;  %v3804_v33 = vrot.slane %v3801_v42, 4  ;;  %v3819_v61 = vsel %vm1587_vm12, %v3815_v63, %v17729_v62  ;;  %v3802_v55 = vrot.slane %v3797_v48, 4  ;;  %v13514_v63 = vperm.slane %v3817_v14, %v11900_v46 }
 0x4af   : > { %v3827_v50 = vperm.slane %v3819_v61, %v11900_v46  ;;  %v2208_v29 = vrot.slane %v2207_v27, 4  ;;  %v17735_v23 = vrot.slane %v17734_v7, 4  ;;  %v17737_v20 = vrot.slane %v17736_v3, 4  ;;  %v3583_v27 = vpop.permute.xlu1 %3582  ;;  %v17743_v3 = vld [vmem:[#allocation51_spill] sm:$0xff] }
 0x4b0   : > { %v13506_v60 = vsel %vm1587_vm12, 0, %v3804_v33  ;;  %v13511_v42 = vsel %vm1587_vm12, %v3804_v33, %v3797_v48  ;;  %v17738_v48 = vld [vmem:[#allocation48_spill] sm:$0xff]  ;;  %v17739_v33 = vld [vmem:[#allocation50_spill] sm:$0xff]  ;;  %v13530_v62 = vsel %vm1587_vm12, 0, %v3802_v55  ;;  %v2220_v61 = vperm.slane %v2216_v35, %v11809_v41 }
 0x4b1   : > { %17731 = vst [vmem:[#allocation87_spill] sm:$0xff] %v13506_v60  ;;  %v13516_v47 = vrot.slane %v3827_v50, 4  ;;  %v1886_v0 = vsel %vm1587_vm12, 0, %v17735_v23  ;;  %v2222_v34 = vsel %vm1587_vm12, %v17737_v20, %v1834_v59  ;;  %v2235_v58 = vsel %vm1587_vm12, %v17739_v33, %v17738_v48  ;;  %v17742_v23 = vld [vmem:[#allocation52_spill] sm:$0xff]  ;;  %v3601_v33 = vpop.permute.xlu0 %3600 }
 0x4b2   : > { %17732 = vst [vmem:[#allocation88_spill] sm:$0xff] %v13511_v42  ;;  %v2209_v54 = vsel %vm1587_vm12, %v2208_v29, %v2201_v43  ;;  %v2226_v50 = vperm.slane %v2222_v34, %v11809_v41  ;;  %v17744_v20 = vrot.slane %v17743_v3, 4  ;;  %v2239_v43 = vperm.slane %v2235_v58, %v11809_v41  ;;  %v17745_v29 = vld [vmem:[#allocation53_spill] sm:$0xff] }
 0x4b3   : > { %17733 = vst [vmem:[#allocation92_spill] sm:$0xff] %v13516_v47  ;;  %v13538_v14 = vsel %vm1587_vm12, 0, %v13516_v47  ;;  %v2213_v59 = vperm.slane %v2209_v54, %v11900_v46  ;;  %v2254_v34 = vsel %vm1587_vm12, %v17745_v29, %v17734_v7  ;;  %v17747_v26 = vrot.slane %v17746_v49, 4 }
 0x4b4   : > { %17740 = vst [vmem:[#allocation91_spill] sm:$0xff] %v13530_v62  ;;  %v2241_v55 = vsel %vm1587_vm12, %v17744_v20, %v17742_v23  ;;  %v2227_v48 = vrot.slane %v2226_v50, 4  ;;  %v2258_v13 = vperm.slane %v2254_v34, %v11809_v41  ;;  %v3719_v3 = vshrl.u32 %v17748_v22, 16 }
 0x4b5   : > { %17741 = vst [vmem:[#allocation12_spill] sm:$0xff] %v13538_v14  ;;  %v2245_v35 = vperm.slane %v2241_v55, %v11809_v41  ;;  %v2260_v54 = vsel %vm1587_vm12, %v17747_v26, %v1886_v0  ;;  %v3718_v23 = vpack.i.b16 %v3583_v27, %v17748_v22  ;;  %v3720_v55 = vshrl.u32 %v3583_v27, 16 }
 0x4b6   : > { %v2228_v50 = vsel %vm1587_vm12, %v2227_v48, %v2220_v61  ;;  %v2264_v20 = vperm.slane %v2260_v54, %v11809_v41  ;;  %v3724_v29 = vpack.i.b16 %v13317_v17, %v3601_v33  ;;  %v3725_v34 = vshrl.u32 %v3601_v33, 16 }
 0x4b7   : > { %v2246_v58 = vrot.slane %v2245_v35, 4  ;;  %v2232_v42 = vperm.slane %v2228_v50, %v11900_v46  ;;  %v4148_v7 = vperm.slane %v3718_v23, %v11809_v41  ;;  %v3721_v0 = vpack.i.b16 %v3720_v55, %v3719_v3 }
 0x4b8   : > { %v2265_v26 = vrot.slane %v2264_v20, 4  ;;  %v2438_v47 = vshrl.u32 %v2213_v59, 16  ;;  %v17749_v48 = vshrl.u32 %v13317_v17, 16  ;;  %v4153_v23 = vperm.slane %v3724_v29, %v11809_v41 }
 0x4b9   : > { %v2247_v49 = vsel %vm1587_vm12, %v2246_v58, %v2239_v43  ;;  %v2437_v60 = vpack.i.b16 %v2232_v42, %v2213_v59  ;;  %v4156_v61 = vrot.slane %v4148_v7, 4  ;;  %v4174_v54 = vperm.slane %v3721_v0, %v11809_v41 }
 0x4ba   : > { %v2251_v22 = vperm.slane %v2247_v49, %v11900_v46  ;;  %v3727_v35 = vpack.i.b16 %v17749_v48, %v3725_v34  ;;  %v2266_v27 = vsel %vm1587_vm12, %v2265_v26, %v2258_v13  ;;  %v2439_v50 = vshrl.u32 %v2232_v42, 16 }
 0x4bb   : > { %v2270_v43 = vperm.slane %v2266_v27, %v11900_v46  ;;  %v4650_v3 = vunpack.c.l.b16 %v2437_v60  ;;  %v4182_v20 = vrot.slane %v4174_v54, 4  ;;  %v4154_v55 = vrot.slane %v4153_v23, 4 }
 0x4bc   : > { %v4179_v58 = vperm.slane %v3727_v35, %v11809_v41  ;;  %v4157_v49 = vsel %vm1587_vm12, %v4153_v23, %v4156_v61  ;;  %v2440_v17 = vpack.i.b16 %v2439_v50, %v2438_v47  ;;  %v2450_v33 = vshrl.u32 %v2251_v22, 16 }
 0x4bd   : > { %v2449_v34 = vpack.i.b16 %v2270_v43, %v2251_v22  ;;  %v4165_v13 = vperm.slane %v4157_v49, %v11900_v46  ;;  %v2451_v0 = vshrl.u32 %v2270_v43, 16  ;;  %v4155_v29 = vsel %vm1587_vm12, %v4154_v55, %v4148_v7 }
 0x4be   : > { %v4180_v26 = vrot.slane %v4179_v58, 4  ;;  %v4183_v48 = vsel %vm1587_vm12, %v4179_v58, %v4182_v20  ;;  %v2214_v14 = vrot.slane %v2213_v59, 4  ;;  %v4161_v60 = vperm.slane %v4155_v29, %v11900_v46  ;;  %v17758_v58 = vld [vmem:[#allocation32_spill] sm:$0xff] }
 0x4bf   : > { %v4651_v27 = vunpack.c.l.b16 %v2449_v34  ;;  %v4168_v35 = vrot.slane %v4165_v13, 4  ;;  %v4191_v47 = vperm.slane %v4183_v48, %v11900_v46  ;;  %v2452_v23 = vpack.i.b16 %v2451_v0, %v2450_v33  ;;  %v17757_v33 = vld [vmem:[#allocation29_spill] sm:$0xff] }
 0x4c0   : > { %v4181_v62 = vsel %vm1587_vm12, %v4180_v26, %v4174_v54  ;;  %v4742_v50 = vunpack.c.l.b16 %v2440_v17  ;;  %v4166_v44 = vrot.slane %v4161_v60, 4  ;;  %v2215_v59 = vsel %vm1587_vm12, 0, %v2214_v14 }
 0x4c1   : > { %v13578_v61 = vperm.slane %v4181_v62, %v11900_v46  ;;  %v4657_v49 = vpack.c.b16 %v4651_v27, %v4650_v3  ;;  %v13582_v7 = vsel %vm1587_vm12, 0, %v4168_v35  ;;  %v13586_v20 = vrot.slane %v4191_v47, 4  ;;  %v17750_v27 = vld [vmem:[#allocation38_spill] sm:$0xff] }
 0x4c2   : > { %v13589_v54 = vsel %vm1587_vm12, %v4168_v35, %v4161_v60  ;;  %v4743_v62 = vunpack.c.l.b16 %v2452_v23  ;;  %v2233_v55 = vrot.slane %v2232_v42, 4  ;;  %v2252_v3 = vrot.slane %v2251_v22, 4  ;;  %v17752_v23 = vld [vmem:[#allocation26_spill] sm:$0xff] }
 0x4c3   : > { %10247 = vmatmul.msk.bf16.gmra.mxu3 %vm4674_vm13, %v4657_v49  ;;  %v2271_v17 = vrot.slane %v2270_v43, 4  ;;  %v13594_v34 = vsel %vm1587_vm12, 0, %v4166_v44  ;;  %v13598_v14 = vsel %vm1587_vm12, 0, %v13586_v20  ;;  %v2444_v26 = vshrl.u32 %v2215_v59, 16 }
 0x4c4   : > { %v4749_v13 = vpack.c.b16 %v4743_v62, %v4742_v50  ;;  %v2234_v0 = vsel %vm1587_vm12, 0, %v2233_v55  ;;  %v2253_v29 = vsel %vm1587_vm12, 0, %v2252_v3  ;;  %v17751_v60 = vrot.slane %v17750_v27, 4  ;;  %v17753_v50 = vld [vmem:[#allocation28_spill] sm:$0xff]  ;;  %v17754_v62 = vld [vmem:[#allocation31_spill] sm:$0xff]  ;;  %v17755_v55 = vld [vmem:[#allocation30_spill] sm:$0xff] }
 0x4c5   : > { %v2272_v48 = vsel %vm1587_vm12, 0, %v2271_v17  ;;  %v2443_v44 = vpack.i.b16 %v2234_v0, %v2215_v59  ;;  %v2445_v43 = vshrl.u32 %v2234_v0, 16  ;;  %v2456_v35 = vshrl.u32 %v2253_v29, 16 }
 0x4c6   : > { %v1990_v42 = vsel %vm1587_vm12, 0, %v17751_v60  ;;  %10252 = vmatmul.msk.bf16.gmra.mxu0 %vm4674_vm13, %v4749_v13  ;;  %v2455_v22 = vpack.i.b16 %v2272_v48, %v2253_v29  ;;  %v2457_v47 = vshrl.u32 %v2272_v48, 16  ;;  %v2273_v49 = vsel %vm1587_vm12, %v17753_v50, %v17752_v23  ;;  %v17759_v23 = vld [vmem:[#allocation34_spill] sm:$0xff]  ;;  %v17760_v50 = vld [vmem:[#allocation33_spill] sm:$0xff] }
 0x4c7   : > { %v17756_v3 = vrot.slane %v17755_v55, 4  ;;  %v2292_v60 = vsel %vm1587_vm12, %v17758_v58, %v17757_v33  ;;  %v4833_v25 = vunpack.c.l.b16 %v2443_v44  ;;  %v2446_v59 = vpack.i.b16 %v2445_v43, %v2444_v26  ;;  %v17762_v58 = vld [vmem:[#allocation35_spill] sm:$0xff]  ;;  %v17763_v33 = vld [vmem:[#allocation36_spill] sm:$0xff] }
 0x4c8   : > { %v4834_v13 = vunpack.c.l.b16 %v2455_v22  ;;  %v2277_v0 = vperm.slane %v2273_v49, %v11809_v41  ;;  %v2458_v29 = vpack.i.b16 %v2457_v47, %v2456_v35  ;;  %v2296_v1 = vperm.slane %v2292_v60, %v11809_v41  ;;  %v17764_v35 = vld [vmem:[#allocation40_spill] sm:$0xff]  ;;  %v17765_v47 = vld [vmem:[#allocation37_spill] sm:$0xff]  ;;  %v17767_v60 = vld [vmem:[#allocation39_spill] sm:$0xff] }
 0x4c9   : > { %v2279_v17 = vsel %vm1587_vm12, %v17756_v3, %v17754_v62  ;;  %v17761_v9 = vrot.slane %v17760_v50, 4  ;;  %v4924_v3 = vunpack.c.l.b16 %v2446_v59  ;;  %v2311_v26 = vsel %vm1587_vm12, %v17763_v33, %v17762_v58  ;;  %v17768_v59 = vld [vmem:[#allocation41_spill] sm:$0xff] }
 0x4ca   : > { %v2283_v48 = vperm.slane %v2279_v17, %v11809_v41  ;;  %v4840_v62 = vpack.c.b16 %v4834_v13, %v4833_v25  ;;  %v4925_v44 = vunpack.c.l.b16 %v2458_v29  ;;  %v2315_v43 = vperm.slane %v2311_v26, %v11809_v41  ;;  %v17770_v26 = vld [vmem:[#allocation46_spill] sm:$0xff] }
 0x4cb   : > { %v2298_v55 = vsel %vm1587_vm12, %v17761_v9, %v17759_v23  ;;  %v17766_v49 = vrot.slane %v17765_v47, 4  ;;  %v2330_v13 = vsel %vm1587_vm12, %v17767_v60, %v17750_v27  ;;  %v17769_v23 = vrot.slane %v17768_v59, 4  ;;  %v17774_v47 = vld [vmem:[#allocation49_spill] sm:$0xff] }
 0x4cc   : > { %v2302_v12 = vperm.slane %v2298_v55, %v11809_v41  ;;  %v2284_v22 = vrot.slane %v2283_v48, 4  ;;  %10257 = vmatmul.msk.bf16.gmra.mxu1 %vm4674_vm13, %v4840_v62  ;;  %v4931_v48 = vpack.c.b16 %v4925_v44, %v4924_v3  ;;  %v2334_v55 = vperm.slane %v2330_v13, %v11809_v41  ;;  %v17772_v44 = vld [vmem:[#allocation42_spill] sm:$0xff] }
 0x4cd   : > { %v2317_v17 = vsel %vm1587_vm12, %v17766_v49, %v17764_v35  ;;  %v2336_v29 = vsel %vm1587_vm12, %v17769_v23, %v1990_v42  ;;  %v17771_v35 = vrot.slane %v17770_v26, 4  ;;  %v17775_v49 = vld [vmem:[#allocation44_spill] sm:$0xff] }
 0x4ce   : > { %v2303_v9 = vrot.slane %v2302_v12, 4  ;;  %v2321_v25 = vperm.slane %v2317_v17, %v11809_v41  ;;  %v2285_v50 = vsel %vm1587_vm12, %v2284_v22, %v2277_v0  ;;  %v2340_v58 = vperm.slane %v2336_v29, %v11809_v41  ;;  %10262 = vmatmul.msk.bf16.gmra.mxu2 %vm4674_vm13, %v4931_v48  ;;  %v17773_v0 = vld [vmem:[#allocation43_spill] sm:$0xff] }
 0x4cf   : > { %v2289_v62 = vperm.slane %v2285_v50, %v11900_v46  ;;  %v2042_v27 = vsel %vm1587_vm12, 0, %v17771_v35  ;;  %v2349_v22 = vsel %vm1587_vm12, %v17773_v0, %v17772_v44  ;;  %v17776_v17 = vrot.slane %v17775_v49, 4 }
 0x4d0   : > { %v2304_v12 = vsel %vm1587_vm12, %v2303_v9, %v2296_v1  ;;  %v2322_v33 = vrot.slane %v2321_v25, 4  ;;  %v2341_v3 = vrot.slane %v2340_v58, 4  ;;  %v2353_v13 = vperm.slane %v2349_v22, %v11809_v41 }
 0x4d1   : > { %v2308_v42 = vperm.slane %v2304_v12, %v11900_v46  ;;  %v2355_v60 = vsel %vm1587_vm12, %v17776_v17, %v17774_v47  ;;  %v2462_v9 = vshrl.u32 %v2289_v62, 16  ;;  %v2290_v25 = vrot.slane %v2289_v62, 4 }
 0x4d2   : > { %v2323_v1 = vsel %vm1587_vm12, %v2322_v33, %v2315_v43  ;;  %v2342_v23 = vsel %vm1587_vm12, %v2341_v3, %v2334_v55  ;;  %v2359_v35 = vperm.slane %v2355_v60, %v11809_v41 }
 0x4d3   : > { %v2327_v59 = vperm.slane %v2323_v1, %v11900_v46  ;;  %v2461_v29 = vpack.i.b16 %v2308_v42, %v2289_v62  ;;  %v2463_v48 = vshrl.u32 %v2308_v42, 16  ;;  %v2346_v50 = vperm.slane %v2342_v23, %v11900_v46 }
 0x4d4   : > { %v2291_v58 = vsel %vm1587_vm12, 0, %v2290_v25  ;;  %v2309_v12 = vrot.slane %v2308_v42, 4  ;;  %v2360_v57 = vrot.slane %v2359_v35, 4 }
 0x4d5   : > { %v4652_v44 = vunpack.c.l.b16 %v2461_v29  ;;  %v2464_v0 = vpack.i.b16 %v2463_v48, %v2462_v9  ;;  %v2474_v43 = vshrl.u32 %v2327_v59, 16  ;;  %v2328_v33 = vrot.slane %v2327_v59, 4 }
 0x4d6   : > { %v2473_v47 = vpack.i.b16 %v2346_v50, %v2327_v59  ;;  %v2475_v49 = vshrl.u32 %v2346_v50, 16  ;;  %v2310_v22 = vsel %vm1587_vm12, 0, %v2309_v12  ;;  %v2347_v17 = vrot.slane %v2346_v50, 4 }
 0x4d7   : > { %v4744_v1 = vunpack.c.l.b16 %v2464_v0  ;;  %v2329_v55 = vsel %vm1587_vm12, 0, %v2328_v33  ;;  %v2467_v62 = vpack.i.b16 %v2310_v22, %v2291_v58  ;;  %v2468_v3 = vshrl.u32 %v2291_v58, 16  ;;  %v17777_v0 = vld [vmem:[#allocation45_spill] sm:$0xff]  ;;  %v17778_v58 = vld [vmem:[#allocation47_spill] sm:$0xff] }
 0x4d8   : > { %v4653_v23 = vunpack.c.l.b16 %v2473_v47  ;;  %v2476_v37 = vpack.i.b16 %v2475_v49, %v2474_v43  ;;  %v2348_v42 = vsel %vm1587_vm12, 0, %v2347_v17  ;;  %v2469_v25 = vshrl.u32 %v2310_v22, 16 }
 0x4d9   : > { %v2479_v60 = vpack.i.b16 %v2348_v42, %v2329_v55  ;;  %v4835_v29 = vunpack.c.l.b16 %v2467_v62  ;;  %v2480_v9 = vshrl.u32 %v2329_v55, 16  ;;  %v2481_v48 = vshrl.u32 %v2348_v42, 16 }
 0x4da   : > { %v4658_v53 = vpack.c.b16 %v4653_v23, %v4652_v44  ;;  %v4745_v59 = vunpack.c.l.b16 %v2476_v37  ;;  %v2470_v39 = vpack.i.b16 %v2469_v25, %v2468_v3  ;;  %v2368_v33 = vsel %vm1587_vm12, %v17777_v0, %v17770_v26 }
 0x4db   : > { %v4836_v12 = vunpack.c.l.b16 %v2479_v60  ;;  %v2482_v50 = vpack.i.b16 %v2481_v48, %v2480_v9  ;;  %v17779_v47 = vrot.slane %v17778_v58, 4  ;;  %v4524_v49 = vrot.slane %v13598_v14, 4 }
 0x4dc   : > { %10248 = vmatmul.msk.bf16.gmra.mxu3 %vm4674_vm13, %v4658_v53  ;;  %v4750_v22 = vpack.c.b16 %v4745_v59, %v4744_v1  ;;  %v4926_v17 = vunpack.c.l.b16 %v2470_v39  ;;  %v2361_v37 = vsel %vm1587_vm12, %v2360_v57, %v2353_v13  ;;  %v2372_v26 = vperm.slane %v2368_v33, %v11809_v41 }
 0x4dd   : > { %v2374_v43 = vsel %vm1587_vm12, %v17779_v47, %v2042_v27  ;;  %v4841_v44 = vpack.c.b16 %v4836_v12, %v4835_v29  ;;  %v4927_v35 = vunpack.c.l.b16 %v2482_v50  ;;  %v2365_v55 = vperm.slane %v2361_v37, %v11900_v46 }
 0x4de   : > { %v2378_v62 = vperm.slane %v2374_v43, %v11809_v41  ;;  %10253 = vmatmul.msk.bf16.gmra.mxu0 %vm4674_vm13, %v4750_v22  ;;  %v17780_v27 = vrot.slane %v13578_v61, 4  ;;  %v17781_v53 = vrot.slane %v13582_v7, 4  ;;  %v4519_v57 = vsel %vm1587_vm12, %v13586_v20, %v13578_v61 }
 0x4df   : > { %10258 = vmatmul.msk.bf16.gmra.mxu1 %vm4674_vm13, %v4841_v44  ;;  %v4932_v13 = vpack.c.b16 %v4927_v35, %v4926_v17  ;;  %v4504_v3 = vperm.slane %v13589_v54, %v11809_v41  ;;  %v4523_v42 = vperm.slane %v4519_v57, %v11809_v41  ;;  %v2486_v7 = vshrl.u32 %v2365_v55, 16 }
 0x4e0   : > { %v4193_v14 = vsel %vm1587_vm12, 0, %v17780_v27  ;;  %v4506_v39 = vsel %vm1587_vm12, %v17781_v53, %v13594_v34  ;;  %v2379_v1 = vrot.slane %v2378_v62, 4  ;;  %v2366_v60 = vrot.slane %v2365_v55, 4 }
 0x4e1   : > { %v4510_v23 = vperm.slane %v4506_v39, %v11809_v41  ;;  %v4525_v25 = vsel %vm1587_vm12, %v4524_v49, %v4193_v14  ;;  %10263 = vmatmul.msk.bf16.gmra.mxu2 %vm4674_vm13, %v4932_v13  ;;  %v4428_v29 = vperm.slane %v12967_v45, %v11809_v41  ;;  %v17782_v48 = vrot.slane %v12970_v5, 4 }
 0x4e2   : > { %v2380_v34 = vsel %vm1587_vm12, %v2379_v1, %v2372_v26  ;;  %v4529_v20 = vperm.slane %v4525_v25, %v11809_v41  ;;  %v2367_v9 = vsel %vm1587_vm12, 0, %v2366_v60  ;;  %v4443_v12 = vsel %vm1587_vm12, %v12964_v16, %v12962_v32 }
 0x4e3   : > { %v4511_v61 = vrot.slane %v4510_v23, 4  ;;  %v2384_v54 = vperm.slane %v2380_v34, %v11900_v46  ;;  %v4430_v59 = vsel %vm1587_vm12, %v17782_v48, %v12974_v4  ;;  %v2492_v33 = vshrl.u32 %v2367_v9, 16 }
 0x4e4   : > { %v4530_v0 = vrot.slane %v4529_v20, 4  ;;  %v4434_v45 = vperm.slane %v4430_v59, %v11809_v41  ;;  %v4447_v4 = vperm.slane %v4443_v12, %v11809_v41  ;;  %v17783_v32 = vrot.slane %v12979_v56, 4 }
 0x4e5   : > { %v4512_v50 = vsel %vm1587_vm12, %v4511_v61, %v4504_v3  ;;  %v2485_v58 = vpack.i.b16 %v2384_v54, %v2365_v55  ;;  %v2487_v43 = vshrl.u32 %v2384_v54, 16  ;;  %v2385_v49 = vrot.slane %v2384_v54, 4 }
 0x4e6   : > { %v4516_v47 = vperm.slane %v4512_v50, %v11900_v46  ;;  %v4531_v5 = vsel %vm1587_vm12, %v4530_v0, %v4523_v42  ;;  %v4435_v22 = vrot.slane %v4434_v45, 4  ;;  %v4449_v16 = vsel %vm1587_vm12, %v17783_v32, %v12988_v21 }
 0x4e7   : > { %v4654_v17 = vunpack.c.l.b16 %v2485_v58  ;;  %v4535_v37 = vperm.slane %v4531_v5, %v11900_v46  ;;  %v2488_v44 = vpack.i.b16 %v2487_v43, %v2486_v7  ;;  %v2386_v35 = vsel %vm1587_vm12, 0, %v2385_v49 }
 0x4e8   : > { %v2491_v55 = vpack.i.b16 %v2386_v35, %v2367_v9  ;;  %v4637_v62 = vshrl.u32 %v4516_v47, 16  ;;  %v4517_v26 = vrot.slane %v4516_v47, 4  ;;  %v2493_v27 = vshrl.u32 %v2386_v35, 16 }
 0x4e9   : > { %v4659_v14 = vpack.c.b16 %v4654_v17, %v4654_v17  ;;  %v4636_v53 = vpack.i.b16 %v4535_v37, %v4516_v47  ;;  %v4746_v39 = vunpack.c.l.b16 %v2488_v44  ;;  %v4638_v57 = vshrl.u32 %v4535_v37, 16 }
 0x4ea   : > { %v4837_v13 = vunpack.c.l.b16 %v2491_v55  ;;  %v4518_v1 = vsel %vm1587_vm12, 0, %v4517_v26  ;;  %v4536_v56 = vrot.slane %v4535_v37, 4  ;;  %v2494_v3 = vpack.i.b16 %v2493_v27, %v2492_v33 }
 0x4eb   : > { %v5550_v21 = vunpack.c.l.b16 %v4636_v53  ;;  %v4751_v23 = vpack.c.b16 %v4746_v39, %v4746_v39  ;;  %v4639_v42 = vpack.i.b16 %v4638_v57, %v4637_v62  ;;  %v4436_v25 = vsel %vm1587_vm12, %v4435_v22, %v4428_v29 }
 0x4ec   : > { %v4842_v7 = vpack.c.b16 %v4837_v13, %v4837_v13  ;;  %v4537_v60 = vsel %vm1587_vm12, 0, %v4536_v56  ;;  %v4928_v34 = vunpack.c.l.b16 %v2494_v3  ;;  %v4440_v61 = vperm.slane %v4436_v25, %v11900_v46  ;;  %10249 = vmatmul.msk.bf16.gmra.mxu3 %vm4674_vm13, %v4659_v14 }
 0x4ed   : > { %v5555_v20 = vpack.c.b16 %v5550_v21, %v5550_v21  ;;  %v5643_v54 = vunpack.c.l.b16 %v4639_v42  ;;  %v4642_v9 = vpack.i.b16 %v4537_v60, %v4518_v1  ;;  %v4453_v48 = vperm.slane %v4449_v16, %v11809_v41 }
 0x4ee   : > { %v4933_v59 = vpack.c.b16 %v4928_v34, %v4928_v34  ;;  %v4466_v12 = vperm.slane %v12866_v30, %v11809_v41  ;;  %v17784_v29 = vrot.slane %v12879_v36, 4  ;;  %v4481_v0 = vsel %vm1587_vm12, %v12886_v11, %v12884_v28  ;;  %10254 = vmatmul.msk.bf16.gmra.mxu0 %vm4674_vm13, %v4751_v23 }
 0x4ef   : > { %v5577_v33 = vsel %vm5575_vm14, %v5555_v20, 0  ;;  %v5648_v45 = vpack.c.b16 %v5643_v54, %v5643_v54  ;;  %v5735_v58 = vunpack.c.l.b16 %v4642_v9  ;;  %v4454_v47 = vrot.slane %v4453_v48, 4  ;;  %10259 = vmatmul.msk.bf16.gmra.mxu1 %vm4674_vm13, %v4842_v7 }
 0x4f0   : > { %v4468_v50 = vsel %vm1587_vm12, %v17784_v29, %v12876_v40  ;;  %5582 = vmatpush.bf16.msrb.mxu3 %v5577_v33  ;;  %v4485_v36 = vperm.slane %v4481_v0, %v11809_v41  ;;  %v17785_v40 = vrot.slane %v12906_v2, 4  ;;  %v4643_v28 = vshrl.u32 %v4518_v1, 16 }
 0x4f1   : > { %v4472_v30 = vperm.slane %v4468_v50, %v11809_v41  ;;  %v5669_v11 = vsel %vm5575_vm14, %v5648_v45, 0  ;;  %v5740_v49 = vpack.c.b16 %v5735_v58, %v5735_v58  ;;  %v4455_v5 = vsel %vm1587_vm12, %v4454_v47, %v4447_v4  ;;  %10264 = vmatmul.msk.bf16.gmra.mxu2 %vm4674_vm13, %v4933_v59 }
 0x4f2   : > { %v4487_v43 = vsel %vm1587_vm12, %v17785_v40, %v12939_v51  ;;  %5674 = vmatpush.bf16.msra.mxu0 %v5669_v11  ;;  %v4459_v32 = vperm.slane %v4455_v5, %v11900_v46  ;;  %v4644_v17 = vshrl.u32 %v4537_v60, 16  ;;  %v4613_v37 = vshrl.u32 %v4440_v61, 16 }
 0x4f3   : > { %v4491_v22 = vperm.slane %v4487_v43, %v11809_v41  ;;  %v4473_v16 = vrot.slane %v4472_v30, 4  ;;  %v5761_v2 = vsel %vm5575_vm14, %v5740_v49, 0  ;;  %v4441_v51 = vrot.slane %v4440_v61, 4  ;;  %v17789_v43 = vld [vmem:[#allocation21_spill] sm:$0xff] }
 0x4f4   : > { %v4352_v35 = vperm.slane %v13121_v15, %v11809_v41  ;;  %5766 = vmatpush.bf16.msra.mxu1 %v5761_v2  ;;  %v4612_v55 = vpack.i.b16 %v4459_v32, %v4440_v61  ;;  %v4645_v62 = vpack.i.b16 %v4644_v17, %v4643_v28  ;;  %v4614_v26 = vshrl.u32 %v4459_v32, 16  ;;  %v17794_v2 = vld [vmem:[#allocation24_spill] sm:$0xff] }
 0x4f5   : > { %v4492_v44 = vrot.slane %v4491_v22, 4  ;;  %v4474_v4 = vsel %vm1587_vm12, %v4473_v16, %v4466_v12  ;;  %v4442_v53 = vsel %vm1587_vm12, 0, %v4441_v51  ;;  %v4460_v39 = vrot.slane %v4459_v32, 4  ;;  %v17791_v32 = vld [vmem:[#allocation23_spill] sm:$0xff]  ;;  %v17792_v16 = vld [vmem:[#allocation57_spill] sm:$0xff] }
 0x4f6   : > { %v4478_v27 = vperm.slane %v4474_v4, %v11900_v46  ;;  %v5548_v13 = vunpack.c.l.b16 %v4612_v55  ;;  %v5827_v1 = vunpack.c.l.b16 %v4645_v62  ;;  %v4615_v56 = vpack.i.b16 %v4614_v26, %v4613_v37  ;;  %v17793_v37 = vld [vmem:[#allocation27_spill] sm:$0xff] }
 0x4f7   : > { %v4493_v14 = vsel %vm1587_vm12, %v4492_v44, %v4485_v36  ;;  %v4461_v15 = vsel %vm1587_vm12, 0, %v4460_v39  ;;  %v17786_v23 = vrot.slane %v13117_v18, 4  ;;  %v4367_v18 = vsel %vm1587_vm12, %v13133_v38, %v13131_v52  ;;  %v17788_v38 = vld [vmem:[#allocation25_spill] sm:$0xff] }
 0x4f8   : > { %v4497_v57 = vperm.slane %v4493_v14, %v11900_v46  ;;  %v4625_v3 = vshrl.u32 %v4478_v27, 16  ;;  %v4479_v21 = vrot.slane %v4478_v27, 4  ;;  %v5832_v7 = vpack.c.b16 %v5827_v1, %v5827_v1 }
 0x4f9   : > { %v4354_v42 = vsel %vm1587_vm12, %v17786_v23, %v13139_v6  ;;  %v5641_v34 = vunpack.c.l.b16 %v4615_v56  ;;  %v4618_v54 = vpack.i.b16 %v4461_v15, %v4442_v53  ;;  %v4371_v0 = vperm.slane %v4367_v18, %v11809_v41 }
 0x4fa   : > { %v4624_v25 = vpack.i.b16 %v4497_v57, %v4478_v27  ;;  %v4626_v60 = vshrl.u32 %v4497_v57, 16  ;;  %v4480_v61 = vsel %vm1587_vm12, 0, %v4479_v21  ;;  %v4498_v20 = vrot.slane %v4497_v57, 4 }
 0x4fb   : > { %v4358_v9 = vperm.slane %v4354_v42, %v11809_v41  ;;  %v5853_v59 = vsel %vm5575_vm14, %v5832_v7, 0  ;;  %v5733_v29 = vunpack.c.l.b16 %v4618_v54  ;;  %v17787_v47 = vrot.slane %v13151_v24, 4 }
 0x4fc   : > { %v5549_v48 = vunpack.c.l.b16 %v4624_v25  ;;  %v4627_v12 = vpack.i.b16 %v4626_v60, %v4625_v3  ;;  %5858 = vmatpush.bf16.msra.mxu2 %v5853_v59  ;;  %v4499_v6 = vsel %vm1587_vm12, 0, %v4498_v20  ;;  %v4390_v52 = vperm.slane %v13031_v31, %v11809_v41 }
 0x4fd   : > { %v4359_v50 = vrot.slane %v4358_v9, 4  ;;  %v4630_v58 = vpack.i.b16 %v4499_v6, %v4480_v61  ;;  %v4373_v30 = vsel %vm1587_vm12, %v17787_v47, %v13185_v19  ;;  %v17790_v28 = vrot.slane %v17789_v43, 4 }
 0x4fe   : > { %v5554_v33 = vpack.c.b16 %v5549_v48, %v5548_v13  ;;  %v5642_v45 = vunpack.c.l.b16 %v4627_v12  ;;  %v4377_v40 = vperm.slane %v4373_v30, %v11809_v41  ;;  %v4405_v17 = vsel %vm1587_vm12, %v17792_v16, %v17791_v32 }
 0x4ff   : > { %v4360_v36 = vsel %vm1587_vm12, %v4359_v50, %v4352_v35  ;;  %v4392_v11 = vsel %vm1587_vm12, %v17790_v28, %v17788_v38  ;;  %v5734_v5 = vunpack.c.l.b16 %v4630_v58  ;;  %v17795_v31 = vrot.slane %v17794_v2, 4  ;;  %v17802_v2 = vld [vmem:[#allocation70_spill] sm:$0xff] }
 0x500   : > { %5583 = vmatpush.bf16.msrb.mxu3 %v5554_v33  ;;  %v5647_v49 = vpack.c.b16 %v5642_v45, %v5641_v34  ;;  %v4364_v22 = vperm.slane %v4360_v36, %v11900_v46  ;;  %v4396_v24 = vperm.slane %v4392_v11, %v11809_v41  ;;  %v4378_v19 = vrot.slane %v4377_v40, 4  ;;  %v17797_v40 = vld [vmem:[#allocation56_spill] sm:$0xff] }
 0x501   : > { %v4411_v44 = vsel %vm1587_vm12, %v17795_v31, %v17793_v37  ;;  %v4619_v51 = vshrl.u32 %v4442_v53, 16  ;;  %v5739_v35 = vpack.c.b16 %v5734_v5, %v5733_v29  ;;  %v4409_v55 = vperm.slane %v4405_v17, %v11809_v41  ;;  %v17800_v5 = vld [vmem:[#allocation59_spill] sm:$0xff]  ;;  %v17801_v37 = vld [vmem:[#allocation66_spill] sm:$0xff] }
 0x502   : > { %5675 = vmatpush.bf16.msra.mxu0 %v5647_v49  ;;  %v4397_v4 = vrot.slane %v4396_v24, 4  ;;  %v4415_v62 = vperm.slane %v4411_v44, %v11809_v41  ;;  %v4379_v26 = vsel %vm1587_vm12, %v4378_v19, %v4371_v0  ;;  %v4620_v27 = vshrl.u32 %v4461_v15, 16  ;;  %v17799_v49 = vld [vmem:[#allocation58_spill] sm:$0xff]  ;;  %v17804_v44 = vld [vmem:[#allocation11_spill] sm:$0xff] }
 0x503   : > { %v4631_v14 = vshrl.u32 %v4480_v61, 16  ;;  %v4632_v39 = vshrl.u32 %v4499_v6, 16  ;;  %5767 = vmatpush.bf16.msra.mxu1 %v5739_v35  ;;  %v4383_v57 = vperm.slane %v4379_v26, %v11900_v46  ;;  %v4589_v56 = vshrl.u32 %v4364_v22, 16 }
 0x504   : > { %v4398_v13 = vsel %vm1587_vm12, %v4397_v4, %v4390_v52  ;;  %v4416_v1 = vrot.slane %v4415_v62, 4  ;;  %v4621_v3 = vpack.i.b16 %v4620_v27, %v4619_v51  ;;  %v4365_v23 = vrot.slane %v4364_v22, 4  ;;  %v17805_v51 = vld [vmem:[#allocation69_spill] sm:$0xff] }
 0x505   : > { %v4402_v53 = vperm.slane %v4398_v13, %v11900_v46  ;;  %v4633_v21 = vpack.i.b16 %v4632_v39, %v4631_v14  ;;  %v4588_v25 = vpack.i.b16 %v4383_v57, %v4364_v22  ;;  %v4590_v7 = vshrl.u32 %v4383_v57, 16  ;;  %v17807_v39 = vld [vmem:[#allocation80_spill] sm:$0xff]  ;;  %v17808_v13 = vld [vmem:[#allocation78_spill] sm:$0xff] }
 0x506   : > { %v4417_v42 = vsel %vm1587_vm12, %v4416_v1, %v4409_v55  ;;  %v4384_v60 = vrot.slane %v4383_v57, 4  ;;  %v5825_v34 = vunpack.c.l.b16 %v4621_v3  ;;  %v4366_v48 = vsel %vm1587_vm12, 0, %v4365_v23  ;;  %v17809_v1 = vld [vmem:[#allocation77_spill] sm:$0xff]  ;;  %v17811_v3 = vld [vmem:[#allocation10_spill] sm:$0xff] }
 0x507   : > { %v4421_v15 = vperm.slane %v4417_v42, %v11900_v46  ;;  %v5826_v61 = vunpack.c.l.b16 %v4633_v21  ;;  %v4601_v20 = vshrl.u32 %v4402_v53, 16  ;;  %v5546_v54 = vunpack.c.l.b16 %v4588_v25 }
 0x508   : > { %v4591_v9 = vpack.i.b16 %v4590_v7, %v4589_v56  ;;  %v4385_v59 = vsel %vm1587_vm12, 0, %v4384_v60  ;;  %v4403_v29 = vrot.slane %v4402_v53, 4  ;;  %v17796_v50 = vrot.slane %v13514_v63, 4 }
 0x509   : > { %v4600_v12 = vpack.i.b16 %v4421_v15, %v4402_v53  ;;  %v5831_v18 = vpack.c.b16 %v5826_v61, %v5825_v34  ;;  %v4602_v6 = vshrl.u32 %v4421_v15, 16  ;;  %v4422_v45 = vrot.slane %v4421_v15, 4  ;;  %v17810_v53 = vld [vmem:[#allocation83_spill] sm:$0xff] }
 0x50a   : > { %v13806_v0 = vsel %vm1587_vm12, 0, %v17796_v50  ;;  %v5639_v33 = vunpack.c.l.b16 %v4591_v9  ;;  %v4594_v58 = vpack.i.b16 %v4385_v59, %v4366_v48  ;;  %v4276_v36 = vperm.slane %v13298_v10, %v11809_v41 }
 0x50b   : > { %v5547_v47 = vunpack.c.l.b16 %v4600_v12  ;;  %5859 = vmatpush.bf16.msra.mxu2 %v5831_v18  ;;  %v4603_v30 = vpack.i.b16 %v4602_v6, %v4601_v20  ;;  %v17798_v52 = vrot.slane %v17797_v40, 4  ;;  %v4404_v43 = vsel %vm1587_vm12, 0, %v4403_v29 }
 0x50c   : > { %v4423_v28 = vsel %vm1587_vm12, 0, %v4422_v45  ;;  %v4291_v22 = vsel %vm1587_vm12, %v17800_v5, %v17799_v49  ;;  %v5731_v16 = vunpack.c.l.b16 %v4594_v58  ;;  %v17806_v35 = vrot.slane %v17805_v51, 4  ;;  %v17816_v5 = vld [vmem:[#allocation84_spill] sm:$0xff] }
 0x50d   : > { %v4278_v38 = vsel %vm1587_vm12, %v17798_v52, %v13308_v8  ;;  %v5553_v24 = vpack.c.b16 %v5547_v47, %v5546_v54  ;;  %v5640_v19 = vunpack.c.l.b16 %v4603_v30  ;;  %v4606_v32 = vpack.i.b16 %v4423_v28, %v4404_v43  ;;  %v17813_v30 = vld [vmem:[#allocation89_spill] sm:$0xff] }
 0x50e   : > { %v4282_v11 = vperm.slane %v4278_v38, %v11809_v41  ;;  %v4295_v17 = vperm.slane %v4291_v22, %v11809_v41  ;;  %v17803_v8 = vrot.slane %v17802_v2, 4  ;;  %v4316_v4 = vsel %vm1587_vm12, %v17806_v35, %v17804_v44 }
 0x50f   : > { %5584 = vmatpush.bf16.msrb.mxu3 %v5553_v24  ;;  %v5646_v55 = vpack.c.b16 %v5640_v19, %v5639_v33  ;;  %v5732_v62 = vunpack.c.l.b16 %v4606_v32  ;;  %v4320_v27 = vperm.slane %v4316_v4, %v11809_v41  ;;  %v4314_v57 = vperm.slane %v17807_v39, %v11809_v41  ;;  %v17818_v39 = vld [vmem:[#allocation85_spill] sm:$0xff] }
 0x510   : > { %v4283_v10 = vrot.slane %v4282_v11, 4  ;;  %v4297_v31 = vsel %vm1587_vm12, %v17803_v8, %v17801_v37  ;;  %v4329_v56 = vsel %vm1587_vm12, %v17809_v1, %v17808_v13  ;;  %v17812_v21 = vrot.slane %v17811_v3, 4  ;;  %v17819_v13 = vld [vmem:[#allocation86_spill] sm:$0xff] }
 0x511   : > { %v4301_v26 = vperm.slane %v4297_v31, %v11809_v41  ;;  %5676 = vmatpush.bf16.msra.mxu0 %v5646_v55  ;;  %v5738_v42 = vpack.c.b16 %v5732_v62, %v5731_v16  ;;  %v4321_v60 = vrot.slane %v4320_v27, 4  ;;  %v4333_v15 = vperm.slane %v4329_v56, %v11809_v41  ;;  %v17820_v1 = vld [vmem:[#allocation90_spill] sm:$0xff] }
 0x512   : > { %v4284_v14 = vsel %vm1587_vm12, %v4283_v10, %v4276_v36  ;;  %v4335_v23 = vsel %vm1587_vm12, %v17812_v21, %v17810_v53  ;;  %v4595_v61 = vshrl.u32 %v4366_v48, 16  ;;  %v4596_v20 = vshrl.u32 %v4385_v59, 16  ;;  %v17814_v36 = vld [vmem:[#allocation82_spill] sm:$0xff] }
 0x513   : > { %v4288_v25 = vperm.slane %v4284_v14, %v11900_v46  ;;  %v4302_v7 = vrot.slane %v4301_v26, 4  ;;  %v4339_v34 = vperm.slane %v4335_v23, %v11809_v41  ;;  %5768 = vmatpush.bf16.msra.mxu1 %v5738_v42  ;;  %v4322_v9 = vsel %vm1587_vm12, %v4321_v60, %v4314_v57  ;;  %v17817_v14 = vld [vmem:[#allocation81_spill] sm:$0xff] }
 0x514   : > { %v4607_v12 = vshrl.u32 %v4404_v43, 16  ;;  %v4608_v18 = vshrl.u32 %v4423_v28, 16  ;;  %v4326_v29 = vperm.slane %v4322_v9, %v11900_v46  ;;  %v4597_v33 = vpack.i.b16 %v4596_v20, %v4595_v61  ;;  %v17822_v20 = vld [vmem:[#allocation91_spill] sm:$0xff] }
 0x515   : > { %v4303_v54 = vsel %vm1587_vm12, %v4302_v7, %v4295_v17  ;;  %v4340_v50 = vrot.slane %v4339_v34, 4  ;;  %v4565_v58 = vshrl.u32 %v4288_v25, 16  ;;  %v4289_v47 = vrot.slane %v4288_v25, 4 }
 0x516   : > { %v4307_v6 = vperm.slane %v4303_v54, %v11900_v46  ;;  %v4609_v45 = vpack.i.b16 %v4608_v18, %v4607_v12  ;;  %v17815_v48 = vrot.slane %v17814_v36, 4  ;;  %v5823_v38 = vunpack.c.l.b16 %v4597_v33  ;;  %v17823_v54 = vld [vmem:[#allocation87_spill] sm:$0xff]  ;;  %v17825_v18 = vld [vmem:[#allocation92_spill] sm:$0xff] }
 0x517   : > { %v4341_v40 = vsel %vm1587_vm12, %v4340_v50, %v4333_v15  ;;  %v4577_v49 = vshrl.u32 %v4326_v29, 16  ;;  %v4200_v22 = vperm.slane %v17816_v5, %v11809_v41  ;;  %v4290_v19 = vsel %vm1587_vm12, 0, %v4289_v47  ;;  %v17826_v33 = vld [vmem:[#allocation88_spill] sm:$0xff] }
 0x518   : > { %v4202_v59 = vsel %vm1587_vm12, %v17815_v48, %v17813_v30  ;;  %v4564_v52 = vpack.i.b16 %v4307_v6, %v4288_v25  ;;  %v4566_v43 = vshrl.u32 %v4307_v6, 16  ;;  %v4345_v28 = vperm.slane %v4341_v40, %v11900_v46  ;;  %v17827_v47 = vld [vmem:[#allocation12_spill] sm:$0xff] }
 0x519   : > { %v5824_v11 = vunpack.c.l.b16 %v4609_v45  ;;  %v4308_v32 = vrot.slane %v4307_v6, 4  ;;  %v4327_v16 = vrot.slane %v4326_v29, 4  ;;  %v4206_v51 = vperm.slane %v4202_v59, %v11809_v41 }
 0x51a   : > { %v4567_v24 = vpack.i.b16 %v4566_v43, %v4565_v58  ;;  %v4576_v10 = vpack.i.b16 %v4345_v28, %v4326_v29  ;;  %v4578_v37 = vshrl.u32 %v4345_v28, 16  ;;  %v4346_v2 = vrot.slane %v4345_v28, 4  ;;  %v4805_v28 = vpop.f32.mrf.mxu0 }
 0x51b   : > { %v5830_v17 = vpack.c.b16 %v5824_v11, %v5823_v38  ;;  %v5544_v8 = vunpack.c.l.b16 %v4564_v52  ;;  %v4309_v31 = vsel %vm1587_vm12, 0, %v4308_v32  ;;  %v4328_v44 = vsel %vm1587_vm12, 0, %v4327_v16  ;;  %v13891_v16 = vpop.f32.mrf.mxu3 }
 0x51c   : > { %v5545_v35 = vunpack.c.l.b16 %v4576_v10  ;;  %v4579_v4 = vpack.i.b16 %v4578_v37, %v4577_v49  ;;  %v4347_v55 = vsel %vm1587_vm12, 0, %v4346_v2  ;;  %v4570_v62 = vpack.i.b16 %v4309_v31, %v4290_v19 }
 0x51d   : > { %5860 = vmatpush.bf16.msra.mxu2 %v5830_v17  ;;  %v4582_v26 = vpack.i.b16 %v4347_v55, %v4328_v44  ;;  %v4207_v27 = vrot.slane %v4206_v51, 4  ;;  %v4215_v57 = vsel %vm1587_vm12, %v17818_v39, %v17817_v14  ;;  %v17821_v56 = vrot.slane %v17820_v1, 4 }
 0x51e   : > { %v5552_v3 = vpack.c.b16 %v5545_v35, %v5544_v8  ;;  %v5637_v21 = vunpack.c.l.b16 %v4567_v24  ;;  %v5638_v23 = vunpack.c.l.b16 %v4579_v4  ;;  %v5729_v42 = vunpack.c.l.b16 %v4570_v62  ;;  %v4896_v35 = vpop.f32.mrf.mxu1 }
 0x51f   : > { %v4221_v53 = vsel %vm1587_vm12, %v17821_v56, %v17819_v13  ;;  %v5730_v25 = vunpack.c.l.b16 %v4582_v26  ;;  %v4208_v7 = vsel %vm1587_vm12, %v4207_v27, %v4200_v22  ;;  %v4219_v60 = vperm.slane %v4215_v57, %v11809_v41 }
 0x520   : > { %v4225_v15 = vperm.slane %v4221_v53, %v11809_v41  ;;  %5585 = vmatpush.bf16.msrb.mxu3 %v5552_v3  ;;  %v5645_v34 = vpack.c.b16 %v5638_v23, %v5637_v21  ;;  %v4212_v61 = vperm.slane %v4208_v7, %v11900_v46  ;;  %v17824_v9 = vrot.slane %v17823_v54, 4 }
 0x521   : > { %v4253_v6 = vsel %vm1587_vm12, %v17825_v18, %v13514_v63  ;;  %v5737_v29 = vpack.c.b16 %v5730_v25, %v5729_v42  ;;  %v4238_v45 = vperm.slane %v17826_v33, %v11809_v41  ;;  %v17828_v30 = vrot.slane %v17827_v47, 4 }
 0x522   : > { %v4240_v12 = vsel %vm1587_vm12, %v17824_v9, %v17822_v20  ;;  %v4226_v50 = vrot.slane %v4225_v15, 4  ;;  %5677 = vmatpush.bf16.msra.mxu0 %v5645_v34  ;;  %v4571_v48 = vshrl.u32 %v4290_v19, 16  ;;  %v4572_v59 = vshrl.u32 %v4309_v31, 16  ;;  %v4807_v54 = vpop.f32.mrf.mxu0 }
 0x523   : > { %v4244_v58 = vperm.slane %v4240_v12, %v11809_v41  ;;  %v4259_v36 = vsel %vm1587_vm12, %v17828_v30, %v13806_v0  ;;  %v4583_v40 = vshrl.u32 %v4328_v44, 16  ;;  %5769 = vmatpush.bf16.msra.mxu1 %v5737_v29  ;;  %v4584_v43 = vshrl.u32 %v4347_v55, 16  ;;  %v4987_v29 = vpop.f32.mrf.mxu2  ;;  %v4716_v47 = vpop.f32.mrf.mxu3 }
 0x524   : > { %v4227_v52 = vsel %vm1587_vm12, %v4226_v50, %v4219_v60  ;;  %v4263_v38 = vperm.slane %v4259_v36, %v11809_v41  ;;  %v4257_v49 = vperm.slane %v4253_v6, %v11809_v41  ;;  %v4573_v5 = vpack.i.b16 %v4572_v59, %v4571_v48 }
 0x525   : > { %v4245_v63 = vrot.slane %v4244_v58, 4  ;;  %v4231_v11 = vperm.slane %v4227_v52, %v11900_v46  ;;  %v4213_v22 = vrot.slane %v4212_v61, 4  ;;  %v4585_v19 = vpack.i.b16 %v4584_v43, %v4583_v40 }
 0x526   : > { %v4264_v0 = vrot.slane %v4263_v38, 4  ;;  %v4541_v32 = vshrl.u32 %v4212_v61, 16  ;;  %v5821_v37 = vunpack.c.l.b16 %v4573_v5  ;;  %v5020_v18 = vmul.f32 0.17677669, %v4805_v28  ;;  %v4898_v40 = vpop.f32.mrf.mxu1 }
 0x527   : > { %v4246_v24 = vsel %vm1587_vm12, %v4245_v63, %v4238_v45  ;;  %v4540_v17 = vpack.i.b16 %v4231_v11, %v4212_v61  ;;  %v4542_v2 = vshrl.u32 %v4231_v11, 16  ;;  %v5822_v31 = vunpack.c.l.b16 %v4585_v19 }
 0x528   : > { %v4250_v10 = vperm.slane %v4246_v24, %v11900_v46  ;;  %v4265_v8 = vsel %vm1587_vm12, %v4264_v0, %v4257_v49  ;;  %v4214_v44 = vsel %vm1587_vm12, 0, %v4213_v22  ;;  %v4232_v51 = vrot.slane %v4231_v11, 4 }
 0x529   : > { %v4269_v4 = vperm.slane %v4265_v8, %v11900_v46  ;;  %v5542_v55 = vunpack.c.l.b16 %v4540_v17  ;;  %v4543_v62 = vpack.i.b16 %v4542_v2, %v4541_v32  ;;  %v5829_v26 = vpack.c.b16 %v5822_v31, %v5821_v37 }
 0x52a   : > { %v4553_v27 = vshrl.u32 %v4250_v10, 16  ;;  %v4233_v14 = vsel %vm1587_vm12, 0, %v4232_v51  ;;  %v4251_v39 = vrot.slane %v4250_v10, 4  ;;  %v4547_v56 = vshrl.u32 %v4214_v44, 16  ;;  %v4810_v19 = vpop.f32.mrf.mxu0 }
 0x52b   : > { %v4552_v57 = vpack.i.b16 %v4269_v4, %v4250_v10  ;;  %v4554_v13 = vshrl.u32 %v4269_v4, 16  ;;  %v4270_v1 = vrot.slane %v4269_v4, 4  ;;  %5861 = vmatpush.bf16.msra.mxu2 %v5829_v26  ;;  %v5635_v53 = vunpack.c.l.b16 %v4543_v62  ;;  %v4719_v17 = vpop.f32.mrf.mxu3  ;;  %v4989_v37 = vpop.f32.mrf.mxu2 }
 0x52c   : > { %v4252_v3 = vsel %vm1587_vm12, 0, %v4251_v39  ;;  %v4546_v21 = vpack.i.b16 %v4233_v14, %v4214_v44  ;;  %v4548_v23 = vshrl.u32 %v4233_v14, 16  ;;  %v5047_v6 = vlaneseq }
 0x52d   : > { %v5543_v42 = vunpack.c.l.b16 %v4552_v57  ;;  %v4555_v25 = vpack.i.b16 %v4554_v13, %v4553_v27  ;;  %v4271_v7 = vsel %vm1587_vm12, 0, %v4270_v1  ;;  %v4559_v60 = vshrl.u32 %v4252_v3, 16 }
 0x52e   : > { %v4558_v15 = vpack.i.b16 %v4271_v7, %v4252_v3  ;;  %v5727_v34 = vunpack.c.l.b16 %v4546_v21  ;;  %v4549_v61 = vpack.i.b16 %v4548_v23, %v4547_v56  ;;  %v4560_v20 = vshrl.u32 %v4271_v7, 16  ;;  %v4901_v31 = vpop.f32.mrf.mxu1 }
 0x52f   : > { %v5551_v9 = vpack.c.b16 %v5543_v42, %v5542_v55  ;;  %v5636_v12 = vunpack.c.l.b16 %v4555_v25  ;;  %v5029_v58 = vmul.f32 0.17677669, %v4896_v35  ;;  %v13900_v36 = vand.u32 127, %v5047_v6 }
 0x530   : > { %v5728_v50 = vunpack.c.l.b16 %v4558_v15  ;;  %v4561_v33 = vpack.i.b16 %v4560_v20, %v4559_v60  ;;  %v5819_v45 = vunpack.c.l.b16 %v4549_v61  ;;  %v5038_v52 = vmul.f32 0.17677669, %v4987_v29 }
 0x531   : > { %5586 = vmatpush.bf16.msrb.mxu3 %v5551_v9  ;;  %v5644_v30 = vpack.c.b16 %v5636_v12, %v5635_v53  ;;  %vm5049_vm0 = vcmp.lt.s32.totalorder %v13900_v36, 65  ;;  %v5021_v49 = vmul.f32 0.17677669, %v4807_v54  ;;  %v5011_v22 = vmul.f32 0.17677669, %v13891_v16 }
 0x532   : > { %v5736_v48 = vpack.c.b16 %v5728_v50, %v5727_v34  ;;  %v5820_v59 = vunpack.c.l.b16 %v4561_v33  ;;  %v13905_v38 = vsel %vm5049_vm0, %v5020_v18, -1e+30  ;;  %v13909_v43 = vsel %vm5049_vm0, %v5029_v58, -1e+30  ;;  %v4812_v62 = vpop.f32.mrf.mxu0 }
 0x533   : > { %5678 = vmatpush.bf16.msra.mxu0 %v5644_v30  ;;  %v5114_v28 = vsel %vm5086_vm15, %v13905_v38, -inf  ;;  %v5141_v11 = vsel %vm5086_vm15, %v13909_v43, -inf  ;;  %v13917_v5 = vsel %vm5049_vm0, %v5038_v52, -1e+30  ;;  %v5030_v0 = vmul.f32 0.17677669, %v4898_v40  ;;  %v4721_v39 = vpop.f32.mrf.mxu3  ;;  %v4992_v13 = vpop.f32.mrf.mxu2 }
 0x534   : > { %5770 = vmatpush.bf16.msra.mxu1 %v5736_v48  ;;  %v5828_v63 = vpack.c.b16 %v5820_v59, %v5819_v45  ;;  %5115 = vmax.xlane.f32.xlu0 %v5114_v28  ;;  %v5168_v24 = vsel %vm5086_vm15, %v13917_v5, -inf  ;;  %v13924_v32 = vsel %vm5049_vm0, %v5021_v49, -1e+30  ;;  %v13928_v10 = vsel %vm5049_vm0, %v5011_v22, -1e+30 }
 0x535   : > { %5142 = vmax.xlane.f32.xlu2 %v5141_v11  ;;  %5169 = vmax.xlane.f32.xlu1 %v5168_v24  ;;  %v13932_v16 = vsel %vm5049_vm0, %v5030_v0, -1e+30  ;;  %v5117_v2 = vsel %vm5086_vm15, %v13924_v32, -inf  ;;  %v5022_v8 = vmul.f32 0.17677669, %v4810_v19  ;;  %v5087_v44 = vsel %vm5086_vm15, %v13928_v10, -inf }
 0x536   : > { %5862 = vmatpush.bf16.msra.mxu2 %v5828_v63  ;;  %v5144_v51 = vsel %vm5086_vm15, %v13932_v16, -inf  ;;  %v5012_v35 = vmul.f32 0.17677669, %v4716_v47  ;;  %v5031_v4 = vmul.f32 0.17677669, %v4901_v31  ;;  %v4903_v53 = vpop.f32.mrf.mxu1 }
 0x537   : > { %v13942_v55 = vsel %vm5049_vm0, %v5022_v8, -1e+30  ;;  %v5023_v57 = vmul.f32 0.17677669, %v4812_v62  ;;  %v5039_v1 = vmul.f32 0.17677669, %v4989_v37 }
 0x538   : > { %v5120_v26 = vsel %vm5086_vm15, %v13942_v55, -inf  ;;  %v13948_v27 = vsel %vm5049_vm0, %v5012_v35, -1e+30  ;;  %v13952_v14 = vsel %vm5049_vm0, %v5031_v4, -1e+30 }
 0x539   : > { %v5090_v56 = vsel %vm5086_vm15, %v13948_v27, -inf  ;;  %v5147_v3 = vsel %vm5086_vm15, %v13952_v14, -inf  ;;  %v5014_v21 = vmul.f32 0.17677669, %v4721_v39  ;;  %v13960_v23 = vsel %vm5049_vm0, %v5023_v57, -1e+30 }
 0x53a   : > { %v13964_v42 = vsel %vm5049_vm0, %v5039_v1, -1e+30  ;;  %v5123_v7 = vsel %vm5086_vm15, %v13960_v23, -inf  ;;  %v5013_v34 = vmul.f32 0.17677669, %v4719_v17 }
 0x53b   : > { %v13968_v25 = vsel %vm5049_vm0, %v5014_v21, -1e+30  ;;  %v5171_v15 = vsel %vm5086_vm15, %v13964_v42, -inf  ;;  %v5040_v20 = vmul.f32 0.17677669, %v4992_v13  ;;  %v4994_v9 = vpop.f32.mrf.mxu2 }
 0x53c   : > { %5088 = vmax.xlane.f32.xlu0 %v5087_v44  ;;  %v5096_v61 = vsel %vm5086_vm15, %v13968_v25, -inf  ;;  %v13978_v6 = vsel %vm5049_vm0, %v5013_v34, -1e+30  ;;  %v5032_v45 = vmul.f32 0.17677669, %v4903_v53 }
 0x53d   : > { %5118 = vmax.xlane.f32.xlu2 %v5117_v2  ;;  %5145 = vmax.xlane.f32.xlu1 %v5144_v51  ;;  %v13982_v29 = vsel %vm5049_vm0, %v5040_v20, -1e+30  ;;  %v5093_v33 = vsel %vm5086_vm15, %v13978_v6, -inf  ;;  %v5041_v24 = vmul.f32 0.17677669, %v4994_v9 }
 0x53e   : > { %v5174_v58 = vsel %vm5086_vm15, %v13982_v29, -inf  ;;  %v13996_v28 = vsel %vm5049_vm0, %v5032_v45, -1e+30 }
 0x53f   : > { %v5150_v22 = vsel %vm5086_vm15, %v13996_v28, -inf  ;;  %v14014_v44 = vsel %vm5049_vm0, %v5041_v24, -1e+30 }
 0x540   : > { %v5177_v62 = vsel %vm5086_vm15, %v14014_v44, -inf }
 0x543   : > { %v4815_v60 = vpop.f32.mrf.mxu0 }
 0x544   : > { %5121 = vmax.xlane.f32.xlu0 %v5120_v26  ;;  %v5024_v54 = vmul.f32 0.17677669, %v4815_v60 }
 0x545   : > { %5091 = vmax.xlane.f32.xlu2 %v5090_v56  ;;  %5148 = vmax.xlane.f32.xlu1 %v5147_v3 }
 0x546   : > { %v4724_v18 = vpop.f32.mrf.mxu3  ;;  %v13986_v50 = vsel %vm5049_vm0, %v5024_v54, -1e+30 }
 0x547   : > { %v5126_v30 = vsel %vm5086_vm15, %v13986_v50, -inf  ;;  %v5015_v59 = vmul.f32 0.17677669, %v4724_v18 }
 0x549   : > { %v4906_v12 = vpop.f32.mrf.mxu1  ;;  %v14004_v49 = vsel %vm5049_vm0, %v5015_v59, -1e+30 }
 0x54a   : > { %v5033_v48 = vmul.f32 0.17677669, %v4906_v12  ;;  %v5099_v19 = vsel %vm5086_vm15, %v14004_v49, -inf }
 0x54b   : > { %v4817_v47 = vpop.f32.mrf.mxu0 }
 0x54c   : > { %5172 = vmax.xlane.f32.xlu0 %v5171_v15  ;;  %v14000_v11 = vsel %vm5049_vm0, %v5033_v48, -1e+30  ;;  %v5025_v17 = vmul.f32 0.17677669, %v4817_v47 }
 0x54d   : > { %5124 = vmax.xlane.f32.xlu2 %v5123_v7  ;;  %5097 = vmax.xlane.f32.xlu1 %v5096_v61  ;;  %v5153_v0 = vsel %vm5086_vm15, %v14000_v11, -inf }
 0x54e   : > { %v4726_v63 = vpop.f32.mrf.mxu3  ;;  %v14018_v51 = vsel %vm5049_vm0, %v5025_v17, -1e+30 }
 0x54f   : > { %v5129_v39 = vsel %vm5086_vm15, %v14018_v51, -inf  ;;  %v5016_v13 = vmul.f32 0.17677669, %v4726_v63 }
 0x551   : > { %v4908_v40 = vpop.f32.mrf.mxu1  ;;  %v4997_v52 = vpop.f32.mrf.mxu2  ;;  %v14036_v7 = vsel %vm5049_vm0, %v5016_v13, -1e+30 }
 0x552   : > { %v5042_v26 = vmul.f32 0.17677669, %v4997_v52  ;;  %v5034_v61 = vmul.f32 0.17677669, %v4908_v40  ;;  %v5102_v20 = vsel %vm5086_vm15, %v14036_v7, -inf }
 0x554   : > { %5094 = vmax.xlane.f32.xlu0 %v5093_v33  ;;  %v14032_v21 = vsel %vm5049_vm0, %v5042_v26, -1e+30 }
 0x555   : > { %5175 = vmax.xlane.f32.xlu2 %v5174_v58  ;;  %5127 = vmax.xlane.f32.xlu1 %v5126_v30  ;;  %v5180_v34 = vsel %vm5086_vm15, %v14032_v21, -inf  ;;  %v14054_v58 = vsel %vm5049_vm0, %v5034_v61, -1e+30 }
 0x556   : > { %v5156_v59 = vsel %vm5086_vm15, %v14054_v58, -inf }
 0x559   : > { %v4999_v31 = vpop.f32.mrf.mxu2 }
 0x55a   : > { %v5043_v1 = vmul.f32 0.17677669, %v4999_v31 }
 0x55b   : > { %v4820_v37 = vpop.f32.mrf.mxu0 }
 0x55c   : > { %5151 = vmax.xlane.f32.xlu0 %v5150_v22  ;;  %v5026_v2 = vmul.f32 0.17677669, %v4820_v37  ;;  %v4911_v8 = vpop.f32.mrf.mxu1  ;;  %v14040_v60 = vsel %vm5049_vm0, %v5043_v1, -1e+30 }
 0x55d   : > { %5154 = vmax.xlane.f32.xlu2 %v5153_v0  ;;  %5100 = vmax.xlane.f32.xlu1 %v5099_v19  ;;  %v5183_v54 = vsel %vm5086_vm15, %v14040_v60, -inf  ;;  %v5035_v9 = vmul.f32 0.17677669, %v4911_v8 }
 0x55e   : > { %v14022_v35 = vsel %vm5049_vm0, %v5026_v2, -1e+30 }
 0x55f   : > { %v4729_v4 = vpop.f32.mrf.mxu3  ;;  %v5132_v57 = vsel %vm5086_vm15, %v14022_v35, -inf  ;;  %v14062_v30 = vsel %vm5049_vm0, %v5035_v9, -1e+30 }
 0x560   : > { %v5017_v40 = vmul.f32 0.17677669, %v4729_v4  ;;  %v5159_v63 = vsel %vm5086_vm15, %v14062_v30, -inf }
 0x562   : > { %v14072_v37 = vsel %vm5049_vm0, %v5017_v40, -1e+30 }
 0x563   : > { %v4822_v56 = vpop.f32.mrf.mxu0  ;;  %v5105_v4 = vsel %vm5086_vm15, %v14072_v37, -inf }
 0x564   : > { %5178 = vmax.xlane.f32.xlu0 %v5177_v62  ;;  %v4913_v53 = vpop.f32.mrf.mxu1  ;;  %v5002_v3 = vpop.f32.mrf.mxu2  ;;  %v5027_v12 = vmul.f32 0.17677669, %v4822_v56 }
 0x565   : > { %5130 = vmax.xlane.f32.xlu2 %v5129_v39  ;;  %5133 = vmax.xlane.f32.xlu1 %v5132_v57  ;;  %v5044_v22 = vmul.f32 0.17677669, %v5002_v3  ;;  %v5036_v57 = vmul.f32 0.17677669, %v4913_v53 }
 0x566   : > { %v14058_v47 = vsel %vm5049_vm0, %v5027_v12, -1e+30 }
 0x567   : > { %v4731_v15 = vpop.f32.mrf.mxu3  ;;  %v5135_v52 = vsel %vm5086_vm15, %v14058_v47, -inf  ;;  %v14076_v2 = vsel %vm5049_vm0, %v5044_v22, -1e+30  ;;  %v14094_v3 = vsel %vm5049_vm0, %v5036_v57, -1e+30 }
 0x568   : > { %v5018_v24 = vmul.f32 0.17677669, %v4731_v15  ;;  %v5186_v26 = vsel %vm5086_vm15, %v14076_v2, -inf  ;;  %v5162_v53 = vsel %vm5086_vm15, %v14094_v3, -inf }
 0x56a   : > { %v14080_v8 = vsel %vm5049_vm0, %v5018_v24, -1e+30 }
 0x56b   : > { %v14048_v18 = vpop.f32.mrf.mxu0  ;;  %v5108_v39 = vsel %vm5086_vm15, %v14080_v8, -inf }
 0x56c   : > { %5181 = vmax.xlane.f32.xlu0 %v5180_v34  ;;  %v14050_v33 = vpop.f32.mrf.mxu1  ;;  %v5004_v45 = vpop.f32.mrf.mxu2 }
 0x56d   : > { %5103 = vmax.xlane.f32.xlu2 %v5102_v20  ;;  %5184 = vmax.xlane.f32.xlu1 %v5183_v54  ;;  %v5045_v62 = vmul.f32 0.17677669, %v5004_v45 }
 0x56f   : > { %v4734_v48 = vpop.f32.mrf.mxu3  ;;  %v14090_v56 = vsel %vm5049_vm0, %v5045_v62, -1e+30 }
 0x570   : > { %v5019_v13 = vmul.f32 0.17677669, %v4734_v48  ;;  %v5189_v34 = vsel %vm5086_vm15, %v14090_v56, -inf }
 0x572   : > { %v14098_v15 = vsel %vm5049_vm0, %v5019_v13, -1e+30 }
 0x573   : > { %v4827_v0 = vpop.f32.mrf.mxu0  ;;  %v5111_v61 = vsel %vm5086_vm15, %v14098_v15, -inf }
 0x574   : > { %5157 = vmax.xlane.f32.xlu0 %v5156_v59  ;;  %v4918_v19 = vpop.f32.mrf.mxu1  ;;  %v5007_v17 = vpop.f32.mrf.mxu2 }
 0x575   : > { %5136 = vmax.xlane.f32.xlu2 %v5135_v52  ;;  %5160 = vmax.xlane.f32.xlu1 %v5159_v63  ;;  %v5046_v20 = vmul.f32 0.17677669, %v5007_v17 }
 0x577   : > { %v4736_v31 = vpop.f32.mrf.mxu3  ;;  %v14108_v54 = vsel %vm5049_vm0, %v5046_v20, -1e+30 }
 0x578   : > { %v5192_v9 = vsel %vm5086_vm15, %v14108_v54, -inf }
 0x57c   : > { %5106 = vmax.xlane.f32.xlu0 %v5105_v4  ;;  %v5009_v1 = vpop.f32.mrf.mxu2 }
 0x57d   : > { %5187 = vmax.xlane.f32.xlu2 %v5186_v26  ;;  %5109 = vmax.xlane.f32.xlu1 %v5108_v39 }
 0x584   : > { %5190 = vmax.xlane.f32.xlu0 %v5189_v34 }
 0x585   : > { %5163 = vmax.xlane.f32.xlu2 %v5162_v53  ;;  %5112 = vmax.xlane.f32.xlu1 %v5111_v61 }
 0x58d   : > { %5193 = vmax.xlane.f32.xlu2 %v5192_v9 }
 0x5a7   : > { %v5116_v12 = vpop.xlane.xlu0 %5115 }
 0x5a8   : > { %v5204_v45 = vsub.f32 %v13905_v38, %v5116_v12  ;;  %v5143_v48 = vpop.xlane.xlu2 %5142  ;;  %v5170_v59 = vpop.xlane.xlu1 %5169 }
 0x5a9   : > { %v5213_v40 = vsub.f32 %v13909_v43, %v5143_v48  ;;  %v5222_v52 = vsub.f32 %v13917_v5, %v5170_v59 }
 0x5aa   : > { %v5249_v63 = vmul.f32 1.442695, %v5204_v45 }
 0x5ab   : > { %v5267_v22 = vmul.f32 1.442695, %v5213_v40  ;;  %v5285_v24 = vmul.f32 1.442695, %v5222_v52 }
 0x5ac   : > { %10878 = vpow2.f32 %v5249_v63 }
 0x5ad   : > { %10880 = vpow2.f32 %v5267_v22 }
 0x5ae   : > { %10882 = vpow2.f32 %v5285_v24 }
 0x5af   : > { %v5089_v0 = vpop.xlane.xlu0 %5088 }
 0x5b0   : > { %v5195_v19 = vsub.f32 %v13928_v10, %v5089_v0  ;;  %v5119_v17 = vpop.xlane.xlu2 %5118  ;;  %v5146_v31 = vpop.xlane.xlu1 %5145 }
 0x5b1   : > { %v5214_v4 = vsub.f32 %v13932_v16, %v5146_v31  ;;  %v5205_v43 = vsub.f32 %v13924_v32, %v5119_v17 }
 0x5b2   : > { %v14117_v38 = vpop.eup %10878  ;;  %v5231_v62 = vmul.f32 1.442695, %v5195_v19 }
 0x5b3   : > { %v14120_v26 = vpop.eup %10880  ;;  %v5330_v5 = vsel %vm5086_vm15, %v14117_v38, 0.0  ;;  %v5269_v39 = vmul.f32 1.442695, %v5214_v4  ;;  %v5251_v16 = vmul.f32 1.442695, %v5205_v43 }
 0x5b4   : > { %10884 = vpow2.f32 %v5231_v62  ;;  %5331 = vadd.xlane.f32.xlu2 %v5330_v5  ;;  %v5357_v10 = vsel %vm5086_vm15, %v14120_v26, 0.0  ;;  %v14126_v57 = vpop.eup %10882 }
 0x5b5   : > { %5358 = vadd.xlane.f32.xlu0 %v5357_v10  ;;  %10886 = vpow2.f32 %v5269_v39  ;;  %v5384_v53 = vsel %vm5086_vm15, %v14126_v57, 0.0 }
 0x5b6   : > { %10888 = vpow2.f32 %v5251_v16 }
 0x5b7   : > { %v5122_v13 = vpop.xlane.xlu0 %5121 }
 0x5b8   : > { %v5092_v1 = vpop.xlane.xlu2 %5091  ;;  %v5149_v34 = vpop.xlane.xlu1 %5148  ;;  %v5206_v9 = vsub.f32 %v13942_v55, %v5122_v13 }
 0x5b9   : > { %v5196_v32 = vsub.f32 %v13948_v27, %v5092_v1  ;;  %v5215_v61 = vsub.f32 %v13952_v14, %v5149_v34 }
 0x5ba   : > { %v14132_v20 = vpop.eup %10884  ;;  %v5253_v14 = vmul.f32 1.442695, %v5206_v9 }
 0x5bb   : > { %v5233_v12 = vmul.f32 1.442695, %v5196_v32  ;;  %v5303_v45 = vsel %vm5086_vm15, %v14132_v20, 0.0  ;;  %v5271_v48 = vmul.f32 1.442695, %v5215_v61  ;;  %v14137_v59 = vpop.eup %10886 }
 0x5bc   : > { %5385 = vadd.xlane.f32.xlu2 %v5384_v53  ;;  %v5360_v27 = vsel %vm5086_vm15, %v14137_v59, 0.0  ;;  %v14141_v52 = vpop.eup %10888 }
 0x5bd   : > { %10890 = vpow2.f32 %v5233_v12  ;;  %5304 = vadd.xlane.f32.xlu0 %v5303_v45  ;;  %5361 = vadd.xlane.f32.xlu1 %v5360_v27  ;;  %v5333_v62 = vsel %vm5086_vm15, %v14141_v52, 0.0 }
 0x5be   : > { %10892 = vpow2.f32 %v5271_v48 }
 0x5bf   : > { %v5173_v40 = vpop.xlane.xlu0 %5172  ;;  %10894 = vpow2.f32 %v5253_v14 }
 0x5c0   : > { %v5223_v55 = vsub.f32 %v13964_v42, %v5173_v40  ;;  %v5125_v63 = vpop.xlane.xlu2 %5124  ;;  %v5098_v22 = vpop.xlane.xlu1 %5097 }
 0x5c1   : > { %v5207_v24 = vsub.f32 %v13960_v23, %v5125_v63  ;;  %v5198_v31 = vsub.f32 %v13968_v25, %v5098_v22 }
 0x5c2   : > { %v5287_v0 = vmul.f32 1.442695, %v5223_v55 }
 0x5c3   : > { %v14145_v19 = vpop.eup %10890  ;;  %v5255_v17 = vmul.f32 1.442695, %v5207_v24  ;;  %v5237_v5 = vmul.f32 1.442695, %v5198_v31 }
 0x5c4   : > { %v14148_v4 = vpop.eup %10892  ;;  %10896 = vpow2.f32 %v5287_v0  ;;  %v5306_v42 = vsel %vm5086_vm15, %v14145_v19, 0.0  ;;  %v5037_v0 = vmul.f32 0.17677669, %v14050_v33 }
 0x5c5   : > { %10898 = vpow2.f32 %v5255_v17  ;;  %5334 = vadd.xlane.f32.xlu0 %v5333_v62  ;;  %v5363_v23 = vsel %vm5086_vm15, %v14148_v4, 0.0  ;;  %5307 = vadd.xlane.f32.xlu1 %v5306_v42  ;;  %v14157_v16 = vpop.eup %10894 }
 0x5c6   : > { %5364 = vadd.xlane.f32.xlu2 %v5363_v23  ;;  %10900 = vpow2.f32 %v5237_v5  ;;  %v5336_v9 = vsel %vm5086_vm15, %v14157_v16, 0.0 }
 0x5c7   : > { %v5095_v43 = vpop.xlane.xlu0 %5094 }
 0x5c8   : > { %v5197_v25 = vsub.f32 %v13978_v6, %v5095_v43  ;;  %v5176_v39 = vpop.xlane.xlu2 %5175  ;;  %v5128_v10 = vpop.xlane.xlu1 %5127 }
 0x5c9   : > { %v5224_v13 = vsub.f32 %v13982_v29, %v5176_v39  ;;  %v5208_v63 = vsub.f32 %v13986_v50, %v5128_v10 }
 0x5ca   : > { %v14160_v1 = vpop.eup %10896  ;;  %v5235_v34 = vmul.f32 1.442695, %v5197_v25  ;;  %v14193_v25 = vsel %vm5049_vm0, %v5037_v0, -1e+30 }
 0x5cb   : > { %v14162_v32 = vpop.eup %10898  ;;  %v5289_v53 = vmul.f32 1.442695, %v5224_v13  ;;  %v5387_v61 = vsel %vm5086_vm15, %v14160_v1, 0.0  ;;  %v5257_v17 = vmul.f32 1.442695, %v5208_v63 }
 0x5cc   : > { %10902 = vpow2.f32 %v5235_v34  ;;  %v5339_v6 = vsel %vm5086_vm15, %v14162_v32, 0.0  ;;  %v14171_v27 = vpop.eup %10900 }
 0x5cd   : > { %10904 = vpow2.f32 %v5289_v53  ;;  %5388 = vadd.xlane.f32.xlu0 %v5387_v61  ;;  %5337 = vadd.xlane.f32.xlu1 %v5336_v9  ;;  %v5312_v24 = vsel %vm5086_vm15, %v14171_v27, 0.0 }
 0x5ce   : > { %5340 = vadd.xlane.f32.xlu2 %v5339_v6 }
 0x5cf   : > { %v5152_v29 = vpop.xlane.xlu0 %5151 }
 0x5d0   : > { %v5216_v12 = vsub.f32 %v13996_v28, %v5152_v29  ;;  %v5155_v45 = vpop.xlane.xlu2 %5154  ;;  %v5101_v48 = vpop.xlane.xlu1 %5100 }
 0x5d1   : > { %v5217_v33 = vsub.f32 %v14000_v11, %v5155_v45  ;;  %v5199_v29 = vsub.f32 %v14004_v49, %v5101_v48  ;;  %v5028_v48 = vmul.f32 0.17677669, %v14048_v18 }
 0x5d2   : > { %v14173_v14 = vpop.eup %10902  ;;  %v5273_v40 = vmul.f32 1.442695, %v5216_v12 }
 0x5d3   : > { %v14175_v55 = vpop.eup %10904  ;;  %v5309_v28 = vsel %vm5086_vm15, %v14173_v14, 0.0  ;;  %v5275_v13 = vmul.f32 1.442695, %v5217_v33  ;;  %v14230_v33 = vsel %vm5049_vm0, %v5028_v48, -1e+30 }
 0x5d4   : > { %10906 = vpow2.f32 %v5273_v40  ;;  %v5390_v22 = vsel %vm5086_vm15, %v14175_v55, 0.0 }
 0x5d5   : > { %5391 = vadd.xlane.f32.xlu0 %v5390_v22  ;;  %5310 = vadd.xlane.f32.xlu1 %v5309_v28  ;;  %10908 = vpow2.f32 %v5257_v17 }
 0x5d6   : > { %5313 = vadd.xlane.f32.xlu2 %v5312_v24 }
 0x5d7   : > { %v5179_v31 = vpop.xlane.xlu0 %5178 }
 0x5d8   : > { %v5225_v62 = vsub.f32 %v14014_v44, %v5179_v31  ;;  %v5131_v50 = vpop.xlane.xlu2 %5130  ;;  %v14186_v42 = vpop.xlane.xlu1 %5133  ;;  %v5165_v44 = vsel %vm5086_vm15, %v14193_v25, -inf }
 0x5d9   : > { %v5209_v5 = vsub.f32 %v14018_v51, %v5131_v50 }
 0x5da   : > { %v14188_v23 = vpop.eup %10906  ;;  %v5291_v43 = vmul.f32 1.442695, %v5225_v62 }
 0x5db   : > { %v5366_v39 = vsel %vm5086_vm15, %v14188_v23, 0.0  ;;  %v5259_v10 = vmul.f32 1.442695, %v5209_v5  ;;  %v14201_v6 = vpop.eup %10908 }
 0x5dc   : > { %10910 = vpow2.f32 %v5291_v43  ;;  %v5342_v45 = vsel %vm5086_vm15, %v14201_v6, 0.0 }
 0x5dd   : > { %5367 = vadd.xlane.f32.xlu0 %v5366_v39  ;;  %10912 = vpow2.f32 %v5259_v10 }
 0x5de   : > { %5166 = vmax.xlane.f32.xlu2 %v5165_v44  ;;  %10914 = vpow2.f32 %v5275_v13 }
 0x5df   : > { %v5182_v34 = vpop.xlane.xlu0 %5181 }
 0x5e0   : > { %v5226_v51 = vsub.f32 %v14032_v21, %v5182_v34  ;;  %v5104_v53 = vpop.xlane.xlu2 %5103  ;;  %v5185_v61 = vpop.xlane.xlu1 %5184  ;;  %v5239_v21 = vmul.f32 1.442695, %v5199_v29 }
 0x5e1   : > { %v5200_v17 = vsub.f32 %v14036_v7, %v5104_v53  ;;  %v5227_v62 = vsub.f32 %v14040_v60, %v5185_v61 }
 0x5e2   : > { %v14203_v9 = vpop.eup %10910  ;;  %v5293_v11 = vmul.f32 1.442695, %v5226_v51  ;;  %v5138_v51 = vsel %vm5086_vm15, %v14230_v33, -inf }
 0x5e3   : > { %v5393_v12 = vsel %vm5086_vm15, %v14203_v9, 0.0  ;;  %v14210_v63 = vpop.eup %10912  ;;  %v5241_v18 = vmul.f32 1.442695, %v5200_v17  ;;  %v5295_v5 = vmul.f32 1.442695, %v5227_v62 }
 0x5e4   : > { %10916 = vpow2.f32 %v5293_v11  ;;  %5394 = vadd.xlane.f32.xlu1 %v5393_v12  ;;  %v14215_v0 = vpop.eup %10914  ;;  %v5345_v50 = vsel %vm5086_vm15, %v14210_v63, 0.0 }
 0x5e5   : > { %5343 = vadd.xlane.f32.xlu0 %v5342_v45  ;;  %10918 = vpow2.f32 %v5239_v21  ;;  %v5369_v43 = vsel %vm5086_vm15, %v14215_v0, 0.0 }
 0x5e7   : > { %v5158_v40 = vpop.xlane.xlu0 %5157 }
 0x5e8   : > { %v5218_v22 = vsub.f32 %v14054_v58, %v5158_v40  ;;  %v14213_v24 = vpop.xlane.xlu2 %5136  ;;  %v5161_v28 = vpop.xlane.xlu1 %5160 }
 0x5e9   : > { %v5219_v34 = vsub.f32 %v14062_v30, %v5161_v28 }
 0x5ea   : > { %v14217_v49 = vpop.eup %10916  ;;  %v5277_v31 = vmul.f32 1.442695, %v5218_v22 }
 0x5eb   : > { %v5396_v58 = vsel %vm5086_vm15, %v14217_v49, 0.0  ;;  %v14232_v44 = vpop.eup %10918 }
 0x5ec   : > { %10920 = vpow2.f32 %v5277_v31  ;;  %5346 = vadd.xlane.f32.xlu1 %v5345_v50  ;;  %5397 = vadd.xlane.f32.xlu2 %v5396_v58  ;;  %v5315_v11 = vsel %vm5086_vm15, %v14232_v44, 0.0 }
 0x5ed   : > { %5370 = vadd.xlane.f32.xlu0 %v5369_v43  ;;  %10922 = vpow2.f32 %v5241_v18  ;;  %v5211_v18 = vsub.f32 %v14058_v47, %v14213_v24 }
 0x5ee   : > { %10924 = vpow2.f32 %v5295_v5 }
 0x5ef   : > { %v5107_v7 = vpop.xlane.xlu0 %5106  ;;  %v5263_v47 = vmul.f32 1.442695, %v5211_v18 }
 0x5f0   : > { %v5188_v60 = vpop.xlane.xlu2 %5187  ;;  %v5110_v39 = vpop.xlane.xlu1 %5109  ;;  %v5201_v53 = vsub.f32 %v14072_v37, %v5107_v7  ;;  %v5210_v7 = vsub.f32 %v14022_v35, %v14186_v42 }
 0x5f1   : > { %v5228_v10 = vsub.f32 %v14076_v2, %v5188_v60  ;;  %v5279_v2 = vmul.f32 1.442695, %v5219_v34  ;;  %v5202_v28 = vsub.f32 %v14080_v8, %v5110_v39 }
 0x5f2   : > { %v14235_v13 = vpop.eup %10920  ;;  %v5243_v29 = vmul.f32 1.442695, %v5201_v53  ;;  %v5261_v34 = vmul.f32 1.442695, %v5210_v7 }
 0x5f3   : > { %v5297_v36 = vmul.f32 1.442695, %v5228_v10  ;;  %v5372_v61 = vsel %vm5086_vm15, %v14235_v13, 0.0  ;;  %v14245_v12 = vpop.eup %10922 }
 0x5f4   : > { %5139 = vmax.xlane.f32.xlu2 %v5138_v51  ;;  %5373 = vadd.xlane.f32.xlu1 %v5372_v61  ;;  %v14247_v40 = vpop.eup %10924  ;;  %v5318_v62 = vsel %vm5086_vm15, %v14245_v12, 0.0 }
 0x5f5   : > { %10926 = vpow2.f32 %v5297_v36  ;;  %5316 = vadd.xlane.f32.xlu0 %v5315_v11  ;;  %v5399_v50 = vsel %vm5086_vm15, %v14247_v40, 0.0 }
 0x5f6   : > { %10928 = vpow2.f32 %v5279_v2 }
 0x5f7   : > { %v5191_v30 = vpop.xlane.xlu0 %5190  ;;  %10930 = vpow2.f32 %v5243_v29 }
 0x5f8   : > { %v5164_v45 = vpop.xlane.xlu2 %5163  ;;  %v5113_v21 = vpop.xlane.xlu1 %5112  ;;  %v5229_v17 = vsub.f32 %v14090_v56, %v5191_v30 }
 0x5f9   : > { %v5220_v37 = vsub.f32 %v14094_v3, %v5164_v45  ;;  %v5203_v22 = vsub.f32 %v14098_v15, %v5113_v21  ;;  %v5245_v15 = vmul.f32 1.442695, %v5202_v28 }
 0x5fa   : > { %v5299_v58 = vmul.f32 1.442695, %v5229_v17 }
 0x5fb   : > { %v14252_v48 = vpop.eup %10926  ;;  %v5281_v31 = vmul.f32 1.442695, %v5220_v37  ;;  %v5247_v8 = vmul.f32 1.442695, %v5203_v22 }
 0x5fc   : > { %v5402_v3 = vsel %vm5086_vm15, %v14252_v48, 0.0  ;;  %5319 = vadd.xlane.f32.xlu1 %v5318_v62  ;;  %v14261_v43 = vpop.eup %10928 }
 0x5fd   : > { %10932 = vpow2.f32 %v5281_v31  ;;  %5400 = vadd.xlane.f32.xlu0 %v5399_v50  ;;  %5403 = vadd.xlane.f32.xlu2 %v5402_v3  ;;  %v14263_v56 = vpop.eup %10930  ;;  %v5375_v60 = vsel %vm5086_vm15, %v14261_v43, 0.0 }
 0x5fe   : > { %10934 = vpow2.f32 %v5247_v8  ;;  %v5321_v10 = vsel %vm5086_vm15, %v14263_v56, 0.0 }
 0x5ff   : > { %10936 = vpow2.f32 %v5245_v15 }
 0x600   : > { %10938 = vpow2.f32 %v5299_v58  ;;  %v5194_v35 = vpop.xlane.xlu2 %5193 }
 0x601   : > { %10940 = vpow2.f32 %v5263_v47  ;;  %v5230_v36 = vsub.f32 %v14108_v54, %v5194_v35 }
 0x602   : > { %10942 = vpow2.f32 %v5261_v34 }
 0x603   : > { %v14267_v5 = vpop.eup %10932  ;;  %v5301_v2 = vmul.f32 1.442695, %v5230_v36 }
 0x604   : > { %v5378_v39 = vsel %vm5086_vm15, %v14267_v5, 0.0  ;;  %5376 = vadd.xlane.f32.xlu1 %v5375_v60  ;;  %v14277_v24 = vpop.eup %10934 }
 0x605   : > { %5379 = vadd.xlane.f32.xlu2 %v5378_v39  ;;  %5322 = vadd.xlane.f32.xlu0 %v5321_v10  ;;  %v14279_v51 = vpop.eup %10936  ;;  %v5327_v53 = vsel %vm5086_vm15, %v14277_v24, 0.0  ;;  %10944 = vpow2.f32 %v5301_v2 }
 0x606   : > { %v14281_v42 = vpop.eup %10938  ;;  %v5324_v61 = vsel %vm5086_vm15, %v14279_v51, 0.0 }
 0x607   : > { %v5405_v11 = vsel %vm5086_vm15, %v14281_v42, 0.0  ;;  %v14290_v29 = vpop.eup %10940 }
 0x608   : > { %v14292_v30 = vpop.eup %10942  ;;  %v5351_v45 = vsel %vm5086_vm15, %v14290_v29, 0.0 }
 0x609   : > { %v5348_v54 = vsel %vm5086_vm15, %v14292_v30, 0.0 }
 0x60b   : > { %v14298_v21 = vpop.eup %10944 }
 0x60c   : > { %5325 = vadd.xlane.f32.xlu1 %v5324_v61  ;;  %v5408_v37 = vsel %vm5086_vm15, %v14298_v21, 0.0 }
 0x60d   : > { %5328 = vadd.xlane.f32.xlu2 %v5327_v53  ;;  %5406 = vadd.xlane.f32.xlu0 %v5405_v11 }
 0x614   : > { %5352 = vadd.xlane.f32.xlu1 %v5351_v45 }
 0x615   : > { %5349 = vadd.xlane.f32.xlu0 %v5348_v54 }
 0x61d   : > { %5409 = vadd.xlane.f32.xlu0 %v5408_v37 }
 0x627   : > { %v5332_v22 = vpop.xlane.xlu2 %5331 }
 0x628   : > { %v5359_v28 = vpop.xlane.xlu0 %5358 }
 0x629   : > { %10946 = vrcp.f32 %v5359_v28 }
 0x62f   : > { %v5386_v31 = vpop.xlane.xlu2 %5385  ;;  %v10947_v50 = vpop.eup %10946 }
 0x630   : > { %v5305_v17 = vpop.xlane.xlu0 %5304  ;;  %v5362_v62 = vpop.xlane.xlu1 %5361  ;;  %v5465_v3 = vmul.f32 %v10947_v50, %v14120_v26 }
 0x631   : > { %10948 = vrcp.f32 %v5362_v62 }
 0x632   : > { %10950 = vrcp.f32 %v5332_v22  ;;  %v5501_v18 = vpack.c.bf16 %v5465_v3, %v5465_v3 }
 0x633   : > { %10952 = vrcp.f32 %v5305_v17 }
 0x634   : > { %v5713_v35 = vunpack.c.l.b16 %v5501_v18 }
 0x637   : > { %v10949_v8 = vpop.eup %10948 }
 0x638   : > { %v5335_v15 = vpop.xlane.xlu0 %5334  ;;  %v10951_v58 = vpop.eup %10950  ;;  %v5466_v7 = vmul.f32 %v10949_v8, %v14137_v59 }
 0x639   : > { %10954 = vrcp.f32 %v5335_v15  ;;  %v5308_v60 = vpop.xlane.xlu1 %5307  ;;  %v5365_v39 = vpop.xlane.xlu2 %5364  ;;  %v5456_v34 = vmul.f32 %v10951_v58, %v14117_v38 }
 0x63a   : > { %v10953_v10 = vpop.eup %10952  ;;  %10956 = vrcp.f32 %v5308_v60  ;;  %v5502_v47 = vpack.c.bf16 %v5466_v7, %v5466_v7 }
 0x63b   : > { %10958 = vrcp.f32 %v5386_v31  ;;  %v5447_v53 = vmul.f32 %v10953_v10, %v14132_v20  ;;  %v5492_v2 = vpack.c.bf16 %v5456_v34, %v5456_v34 }
 0x63c   : > { %v5714_v36 = vunpack.c.l.b16 %v5502_v47 }
 0x63d   : > { %v5483_v37 = vpack.c.bf16 %v5447_v53, %v5447_v53  ;;  %v5621_v31 = vunpack.c.l.b16 %v5492_v2 }
 0x63e   : > { %v5722_v61 = vpack.c.b16 %v5714_v36, %v5713_v35 }
 0x63f   : > { %v10955_v26 = vpop.eup %10954  ;;  %v5528_v3 = vunpack.c.l.b16 %v5483_v37 }
 0x640   : > { %v10957_v11 = vpop.eup %10956  ;;  %v5457_v45 = vmul.f32 %v10955_v26, %v14141_v52  ;;  %v5389_v59 = vpop.xlane.xlu0 %5388  ;;  %10275 = vmatmul.msk.bf16.vlgmr.msra.gmra.mxu1 %vm5086_vm15, %v5722_v61 }
 0x641   : > { %v10959_v54 = vpop.eup %10958  ;;  %v5448_v22 = vmul.f32 %v10957_v11, %v14145_v19  ;;  %10960 = vrcp.f32 %v5389_v59  ;;  %v5341_v28 = vpop.xlane.xlu2 %5340 }
 0x642   : > { %v5338_v17 = vpop.xlane.xlu1 %5337  ;;  %v5493_v38 = vpack.c.bf16 %v5457_v45, %v5457_v45  ;;  %10962 = vrcp.f32 %v5341_v28  ;;  %v5474_v62 = vmul.f32 %v10959_v54, %v14126_v57 }
 0x643   : > { %v5484_v20 = vpack.c.bf16 %v5448_v22, %v5448_v22  ;;  %10964 = vrcp.f32 %v5338_v17 }
 0x644   : > { %v5622_v50 = vunpack.c.l.b16 %v5493_v38  ;;  %v5510_v19 = vpack.c.bf16 %v5474_v62, %v5474_v62  ;;  %10966 = vrcp.f32 %v5365_v39 }
 0x645   : > { %v5529_v52 = vunpack.c.l.b16 %v5484_v20 }
 0x646   : > { %v5630_v8 = vpack.c.b16 %v5622_v50, %v5621_v31  ;;  %v5805_v36 = vunpack.c.l.b16 %v5510_v19 }
 0x647   : > { %v10961_v15 = vpop.eup %10960  ;;  %v5537_v58 = vpack.c.b16 %v5529_v52, %v5528_v3 }
 0x648   : > { %v10963_v18 = vpop.eup %10962  ;;  %v5475_v7 = vmul.f32 %v10961_v15, %v14160_v1  ;;  %10270 = vmatmul.msk.bf16.vlgmr.msra.gmra.mxu0 %vm5086_vm15, %v5630_v8  ;;  %v5392_v60 = vpop.xlane.xlu0 %5391 }
 0x649   : > { %v10965_v10 = vpop.eup %10964  ;;  %v5314_v47 = vpop.xlane.xlu2 %5313  ;;  %10265 = vmatmul.msk.bf16.vlgmr.msrb.gmra.mxu3 %vm5086_vm15, %v5537_v58  ;;  %v5459_v57 = vmul.f32 %v10963_v18, %v14162_v32 }
 0x64a   : > { %v5311_v34 = vpop.xlane.xlu1 %5310  ;;  %v5511_v35 = vpack.c.bf16 %v5475_v7, %v5475_v7  ;;  %10968 = vrcp.f32 %v5314_v47  ;;  %v5458_v53 = vmul.f32 %v10965_v10, %v14157_v16  ;;  %v10967_v2 = vpop.eup %10966 }
 0x64b   : > { %10970 = vrcp.f32 %v5311_v34  ;;  %v5495_v1 = vpack.c.bf16 %v5459_v57, %v5459_v57  ;;  %v5467_v62 = vmul.f32 %v10967_v2, %v14148_v4 }
 0x64c   : > { %v5806_v26 = vunpack.c.l.b16 %v5511_v35  ;;  %v5494_v61 = vpack.c.bf16 %v5458_v53, %v5458_v53 }
 0x64d   : > { %v5624_v54 = vunpack.c.l.b16 %v5495_v1 }
 0x64e   : > { %v5814_v11 = vpack.c.b16 %v5806_v26, %v5805_v36  ;;  %v5623_v59 = vunpack.c.l.b16 %v5494_v61 }
 0x650   : > { %v10969_v45 = vpop.eup %10968  ;;  %10280 = vmatmul.msk.bf16.vlgmr.msra.gmra.mxu2 %vm5086_vm15, %v5814_v11  ;;  %v5368_v39 = vpop.xlane.xlu0 %5367  ;;  %v5631_v20 = vpack.c.b16 %v5624_v54, %v5623_v59 }
 0x651   : > { %v10971_v37 = vpop.eup %10970  ;;  %10972 = vrcp.f32 %v5368_v39  ;;  %v5167_v32 = vpop.xlane.xlu2 %5166  ;;  %v5450_v22 = vmul.f32 %v10969_v45, %v14171_v27 }
 0x652   : > { %10974 = vrcp.f32 %v5392_v60  ;;  %v5221_v16 = vsub.f32 %v14193_v25, %v5167_v32  ;;  %v5449_v28 = vmul.f32 %v10971_v37, %v14173_v14  ;;  %v5503_v14 = vpack.c.bf16 %v5467_v62, %v5467_v62 }
 0x653   : > { %v5486_v17 = vpack.c.bf16 %v5450_v22, %v5450_v22 }
 0x654   : > { %v5283_v38 = vmul.f32 1.442695, %v5221_v16  ;;  %v5485_v31 = vpack.c.bf16 %v5449_v28, %v5449_v28  ;;  %v5715_v7 = vunpack.c.l.b16 %v5503_v14 }
 0x655   : > { %v5531_v50 = vunpack.c.l.b16 %v5486_v17 }
 0x656   : > { %10976 = vpow2.f32 %v5283_v38  ;;  %v5530_v3 = vunpack.c.l.b16 %v5485_v31 }
 0x657   : > { %v10973_v52 = vpop.eup %10972  ;;  %v5395_v8 = vpop.xlane.xlu1 %5394 }
 0x658   : > { %v10975_v15 = vpop.eup %10974  ;;  %10978 = vrcp.f32 %v5395_v8  ;;  %10271 = vmatmul.msk.bf16.gmra.mxu0 %vm5086_vm15, %v5631_v20  ;;  %v5344_v27 = vpop.xlane.xlu0 %5343  ;;  %v5538_v58 = vpack.c.b16 %v5531_v50, %v5530_v3  ;;  %v5468_v25 = vmul.f32 %v10973_v52, %v14188_v23 }
 0x659   : > { %10980 = vrcp.f32 %v5344_v27  ;;  %v5476_v4 = vmul.f32 %v10975_v15, %v14175_v55 }
 0x65a   : > { %10266 = vmatmul.msk.bf16.gmra.mxu3 %vm5086_vm15, %v5538_v58  ;;  %v5504_v18 = vpack.c.bf16 %v5468_v25, %v5468_v25 }
 0x65b   : > { %v5512_v53 = vpack.c.bf16 %v5476_v4, %v5476_v4 }
 0x65c   : > { %v14324_v19 = vpop.eup %10976  ;;  %v5716_v60 = vunpack.c.l.b16 %v5504_v18 }
 0x65d   : > { %v5381_v10 = vsel %vm5086_vm15, %v14324_v19, 0.0  ;;  %v5807_v1 = vunpack.c.l.b16 %v5512_v53 }
 0x65e   : > { %v10979_v47 = vpop.eup %10978  ;;  %v5723_v34 = vpack.c.b16 %v5716_v60, %v5715_v7  ;;  %5382 = vadd.xlane.f32.xlu1 %v5381_v10 }
 0x65f   : > { %v5347_v57 = vpop.xlane.xlu1 %5346  ;;  %v5398_v35 = vpop.xlane.xlu2 %5397  ;;  %v5477_v23 = vmul.f32 %v10979_v47, %v14203_v9 }
 0x660   : > { %v10981_v36 = vpop.eup %10980  ;;  %10982 = vrcp.f32 %v5347_v57  ;;  %10276 = vmatmul.msk.bf16.gmra.mxu1 %vm5086_vm15, %v5723_v34  ;;  %v5371_v55 = vpop.xlane.xlu0 %5370 }
 0x661   : > { %v5513_v26 = vpack.c.bf16 %v5477_v23, %v5477_v23  ;;  %10984 = vrcp.f32 %v5371_v55  ;;  %v5460_v61 = vmul.f32 %v10981_v36, %v14201_v6 }
 0x663   : > { %v5808_v11 = vunpack.c.l.b16 %v5513_v26  ;;  %v5496_v39 = vpack.c.bf16 %v5460_v61, %v5460_v61 }
 0x665   : > { %v5815_v2 = vpack.c.b16 %v5808_v11, %v5807_v1  ;;  %v5625_v6 = vunpack.c.l.b16 %v5496_v39 }
 0x666   : > { %v10983_v45 = vpop.eup %10982 }
 0x667   : > { %v5461_v59 = vmul.f32 %v10983_v45, %v14210_v63  ;;  %v5140_v54 = vpop.xlane.xlu2 %5139  ;;  %v5374_v37 = vpop.xlane.xlu1 %5373  ;;  %10281 = vmatmul.msk.bf16.gmra.mxu2 %vm5086_vm15, %v5815_v2 }
 0x668   : > { %v10985_v9 = vpop.eup %10984  ;;  %v5212_v32 = vsub.f32 %v14230_v33, %v5140_v54  ;;  %10986 = vrcp.f32 %v5374_v37  ;;  %v5317_v22 = vpop.xlane.xlu0 %5316 }
 0x669   : > { %v5497_v16 = vpack.c.bf16 %v5461_v59, %v5461_v59  ;;  %10988 = vrcp.f32 %v5317_v22  ;;  %v5469_v38 = vmul.f32 %v10985_v9, %v14215_v0 }
 0x66a   : > { %v5265_v28 = vmul.f32 1.442695, %v5212_v32  ;;  %10990 = vrcp.f32 %v5398_v35 }
 0x66b   : > { %v5626_v17 = vunpack.c.l.b16 %v5497_v16  ;;  %v5505_v31 = vpack.c.bf16 %v5469_v38, %v5469_v38 }
 0x66c   : > { %10992 = vpow2.f32 %v5265_v28 }
 0x66d   : > { %v5632_v20 = vpack.c.b16 %v5626_v17, %v5625_v6  ;;  %v5717_v58 = vunpack.c.l.b16 %v5505_v31 }
 0x66e   : > { %v10987_v63 = vpop.eup %10986 }
 0x66f   : > { %v5470_v62 = vmul.f32 %v10987_v63, %v14235_v13  ;;  %v5320_v50 = vpop.xlane.xlu1 %5319  ;;  %10272 = vmatmul.msk.bf16.gmra.mxu0 %vm5086_vm15, %v5632_v20  ;;  %v10989_v33 = vpop.eup %10988 }
 0x670   : > { %v5404_v3 = vpop.xlane.xlu2 %5403  ;;  %10994 = vrcp.f32 %v5320_v50  ;;  %v5401_v52 = vpop.xlane.xlu0 %5400  ;;  %v5451_v14 = vmul.f32 %v10989_v33, %v14232_v44 }
 0x671   : > { %v10991_v8 = vpop.eup %10990  ;;  %v5506_v15 = vpack.c.bf16 %v5470_v62, %v5470_v62  ;;  %10996 = vrcp.f32 %v5401_v52 }
 0x672   : > { %v14337_v27 = vpop.eup %10992  ;;  %v5478_v13 = vmul.f32 %v10991_v8, %v14217_v49  ;;  %v5487_v10 = vpack.c.bf16 %v5451_v14, %v5451_v14 }
 0x673   : > { %v5718_v0 = vunpack.c.l.b16 %v5506_v15  ;;  %v5354_v25 = vsel %vm5086_vm15, %v14337_v27, 0.0 }
 0x674   : > { %5355 = vadd.xlane.f32.xlu2 %v5354_v25  ;;  %v5514_v35 = vpack.c.bf16 %v5478_v13, %v5478_v13  ;;  %v5532_v49 = vunpack.c.l.b16 %v5487_v10 }
 0x675   : > { %v5724_v18 = vpack.c.b16 %v5718_v0, %v5717_v58 }
 0x676   : > { %v10995_v4 = vpop.eup %10994  ;;  %v5809_v55 = vunpack.c.l.b16 %v5514_v35 }
 0x677   : > { %v5377_v7 = vpop.xlane.xlu1 %5376  ;;  %10277 = vmatmul.msk.bf16.gmra.mxu1 %vm5086_vm15, %v5724_v18  ;;  %v5452_v60 = vmul.f32 %v10995_v4, %v14245_v12  ;;  %v10997_v47 = vpop.eup %10996 }
 0x678   : > { %v5380_v34 = vpop.xlane.xlu2 %5379  ;;  %10998 = vrcp.f32 %v5377_v7  ;;  %v5323_v57 = vpop.xlane.xlu0 %5322  ;;  %v5479_v23 = vmul.f32 %v10997_v47, %v14247_v40 }
 0x679   : > { %11000 = vrcp.f32 %v5380_v34  ;;  %v5488_v44 = vpack.c.bf16 %v5452_v60, %v5452_v60 }
 0x67a   : > { %11002 = vrcp.f32 %v5323_v57  ;;  %v5515_v53 = vpack.c.bf16 %v5479_v23, %v5479_v23 }
 0x67b   : > { %v5533_v36 = vunpack.c.l.b16 %v5488_v44  ;;  %11004 = vrcp.f32 %v5404_v3 }
 0x67c   : > { %v5810_v26 = vunpack.c.l.b16 %v5515_v53 }
 0x67d   : > { %v5539_v61 = vpack.c.b16 %v5533_v36, %v5532_v49 }
 0x67e   : > { %v10999_v1 = vpop.eup %10998  ;;  %v5816_v45 = vpack.c.b16 %v5810_v26, %v5809_v55 }
 0x67f   : > { %v11001_v12 = vpop.eup %11000  ;;  %v5471_v11 = vmul.f32 %v10999_v1, %v14261_v43  ;;  %v5326_v2 = vpop.xlane.xlu1 %5325  ;;  %10267 = vmatmul.msk.bf16.gmra.mxu3 %vm5086_vm15, %v5539_v61 }
 0x680   : > { %v11003_v39 = vpop.eup %11002  ;;  %v5472_v40 = vmul.f32 %v11001_v12, %v14267_v5  ;;  %11006 = vrcp.f32 %v5326_v2  ;;  %v5407_v59 = vpop.xlane.xlu0 %5406  ;;  %10282 = vmatmul.msk.bf16.gmra.mxu2 %vm5086_vm15, %v5816_v45 }
 0x681   : > { %v5507_v54 = vpack.c.bf16 %v5471_v11, %v5471_v11  ;;  %v11005_v37 = vpop.eup %11004  ;;  %11008 = vrcp.f32 %v5407_v59  ;;  %v5453_v22 = vmul.f32 %v11003_v39, %v14263_v56  ;;  %v5329_v43 = vpop.xlane.xlu2 %5328 }
 0x682   : > { %v5508_v9 = vpack.c.bf16 %v5472_v40, %v5472_v40  ;;  %v5480_v28 = vmul.f32 %v11005_v37, %v14252_v48  ;;  %11010 = vrcp.f32 %v5329_v43 }
 0x683   : > { %v5719_v32 = vunpack.c.l.b16 %v5507_v54  ;;  %v5489_v20 = vpack.c.bf16 %v5453_v22, %v5453_v22 }
 0x684   : > { %v5720_v16 = vunpack.c.l.b16 %v5508_v9  ;;  %v5516_v62 = vpack.c.bf16 %v5480_v28, %v5480_v28 }
 0x685   : > { %v5534_v3 = vunpack.c.l.b16 %v5489_v20 }
 0x686   : > { %v11007_v6 = vpop.eup %11006  ;;  %v5725_v17 = vpack.c.b16 %v5720_v16, %v5719_v32  ;;  %v5811_v8 = vunpack.c.l.b16 %v5516_v62 }
 0x687   : > { %v5353_v38 = vpop.xlane.xlu1 %5352  ;;  %v5454_v5 = vmul.f32 %v11007_v6, %v14279_v51  ;;  %v11009_v63 = vpop.eup %11008 }
 0x688   : > { %11012 = vrcp.f32 %v5353_v38  ;;  %10278 = vmatmul.msk.bf16.gmra.mxu1 %vm5086_vm15, %v5725_v17  ;;  %v5350_v31 = vpop.xlane.xlu0 %5349  ;;  %v5481_v50 = vmul.f32 %v11009_v63, %v14281_v42  ;;  %v11011_v52 = vpop.eup %11010 }
 0x689   : > { %11014 = vrcp.f32 %v5350_v31  ;;  %v5490_v56 = vpack.c.bf16 %v5454_v5, %v5454_v5  ;;  %v5455_v4 = vmul.f32 %v11011_v52, %v14277_v24 }
 0x68a   : > { %v5517_v33 = vpack.c.bf16 %v5481_v50, %v5481_v50 }
 0x68b   : > { %v5535_v48 = vunpack.c.l.b16 %v5490_v56  ;;  %v5491_v47 = vpack.c.bf16 %v5455_v4, %v5455_v4 }
 0x68c   : > { %v5812_v15 = vunpack.c.l.b16 %v5517_v33 }
 0x68d   : > { %v5540_v58 = vpack.c.b16 %v5535_v48, %v5534_v3  ;;  %v5536_v35 = vunpack.c.l.b16 %v5491_v47 }
 0x68e   : > { %v11013_v0 = vpop.eup %11012  ;;  %v5817_v14 = vpack.c.b16 %v5812_v15, %v5811_v8 }
 0x68f   : > { %v11015_v51 = vpop.eup %11014  ;;  %v5463_v25 = vmul.f32 %v11013_v0, %v14290_v29  ;;  %10268 = vmatmul.msk.bf16.gmra.mxu3 %vm5086_vm15, %v5540_v58  ;;  %v5541_v44 = vpack.c.b16 %v5536_v35, %v5536_v35 }
 0x690   : > { %v5462_v13 = vmul.f32 %v11015_v51, %v14292_v30  ;;  %v5410_v18 = vpop.xlane.xlu0 %5409  ;;  %10283 = vmatmul.msk.bf16.gmra.mxu2 %vm5086_vm15, %v5817_v14 }
 0x691   : > { %v5499_v42 = vpack.c.bf16 %v5463_v25, %v5463_v25  ;;  %11016 = vrcp.f32 %v5410_v18 }
 0x692   : > { %v5498_v7 = vpack.c.bf16 %v5462_v13, %v5462_v13 }
 0x693   : > { %v5628_v60 = vunpack.c.l.b16 %v5499_v42 }
 0x694   : > { %v5627_v10 = vunpack.c.l.b16 %v5498_v7 }
 0x696   : > { %v5633_v34 = vpack.c.b16 %v5628_v60, %v5627_v10 }
 0x697   : > { %v11017_v57 = vpop.eup %11016 }
 0x698   : > { %v5482_v29 = vmul.f32 %v11017_v57, %v14298_v21  ;;  %10273 = vmatmul.msk.bf16.gmra.mxu0 %vm5086_vm15, %v5633_v34 }
 0x69a   : > { %v5518_v23 = vpack.c.bf16 %v5482_v29, %v5482_v29 }
 0x69c   : > { %v5813_v30 = vunpack.c.l.b16 %v5518_v23 }
 0x69e   : > { %v5818_v53 = vpack.c.b16 %v5813_v30, %v5813_v30 }
 0x69f   : > { %10269 = vmatmul.msk.bf16.gmra.mxu3 %vm5086_vm15, %v5541_v44 }
 0x6a0   : > { %10284 = vmatmul.msk.bf16.gmra.mxu2 %vm5086_vm15, %v5818_v53 }
 0x6bd   : > { %v5772_v49 = vpop.f32.mrf.mxu1 }
 0x6be   : > { %v5888_v36 = vrot.slane %v5772_v49, 4 }
 0x6c5   : > { %v5680_v24 = vpop.f32.mrf.mxu0  ;;  %v5774_v39 = vpop.f32.mrf.mxu1 }
 0x6c6   : > { %v5903_v45 = vrot.slane %v5680_v24, 4  ;;  %v5945_v43 = vrot.slane %v5774_v39, 4 }
 0x6cc   : > { %v5588_v55 = vpop.f32.mrf.mxu3 }
 0x6cd   : > { %v5891_v26 = vrot.slane %v5588_v55, 4  ;;  %v5890_v61 = vsel %vm1587_vm12, %v5888_v36, %v5588_v55  ;;  %v5682_v1 = vpop.f32.mrf.mxu0 }
 0x6ce   : > { %v5896_v11 = vperm.slane %v5890_v61, %v11809_v41  ;;  %v5959_v15 = vrot.slane %v5682_v1, 4 }
 0x6cf   : > { %v5892_v21 = vsel %vm1587_vm12, %v5772_v49, %v5891_v26 }
 0x6d0   : > { %v5900_v12 = vperm.slane %v5892_v21, %v11809_v41  ;;  %v5915_v32 = vrot.slane %v5896_v11, 4 }
 0x6d1   : > { %v5383_v2 = vpop.xlane.xlu1 %5382 }
 0x6d2   : > { %11018 = vrcp.f32 %v5383_v2  ;;  %v5927_v40 = vrot.slane %v5900_v12, 4 }
 0x6d3   : > { %v5864_v59 = vpop.f32.mrf.mxu2 }
 0x6d4   : > { %v5901_v54 = vrot.slane %v5864_v59, 4  ;;  %v5904_v37 = vsel %vm1587_vm12, %v5864_v59, %v5903_v45  ;;  %v5590_v9 = vpop.f32.mrf.mxu3 }
 0x6d5   : > { %v5912_v22 = vperm.slane %v5904_v37, %v11809_v41  ;;  %v5947_v16 = vrot.slane %v5590_v9, 4  ;;  %v5946_v31 = vsel %vm1587_vm12, %v5945_v43, %v5590_v9  ;;  %v14380_v52 = vpop.f32.mrf.mxu0 }
 0x6d6   : > { %v5902_v28 = vsel %vm1587_vm12, %v5901_v54, %v5680_v24  ;;  %v5952_v51 = vperm.slane %v5946_v31, %v11809_v41  ;;  %v6015_v4 = vrot.slane %v14380_v52, 4 }
 0x6d7   : > { %v5908_v6 = vperm.slane %v5902_v28, %v11809_v41  ;;  %v5925_v17 = vrot.slane %v5912_v22, 4  ;;  %v5928_v38 = vsel %vm1587_vm12, %v5912_v22, %v5927_v40  ;;  %v5948_v5 = vsel %vm1587_vm12, %v5774_v39, %v5947_v16 }
 0x6d8   : > { %v11019_v20 = vpop.eup %11018  ;;  %v5936_v63 = vperm.slane %v5928_v38, %v11900_v46  ;;  %v5956_v8 = vperm.slane %v5948_v5, %v11809_v41  ;;  %v5971_v44 = vrot.slane %v5952_v51, 4 }
 0x6d9   : > { %v5913_v62 = vrot.slane %v5908_v6, 4  ;;  %v5916_v50 = vsel %vm1587_vm12, %v5908_v6, %v5915_v32  ;;  %v5926_v56 = vsel %vm1587_vm12, %v5925_v17, %v5900_v12  ;;  %v5473_v0 = vmul.f32 %v11019_v20, %v14324_v19 }
 0x6da   : > { %v5924_v33 = vperm.slane %v5916_v50, %v11900_v46  ;;  %v5932_v3 = vperm.slane %v5926_v56, %v11900_v46  ;;  %v5943_v48 = vrot.slane %v5936_v63, 4  ;;  %v5983_v57 = vrot.slane %v5956_v8, 4 }
 0x6db   : > { %v5914_v58 = vsel %vm1587_vm12, %v5913_v62, %v5896_v11  ;;  %v5866_v25 = vpop.f32.mrf.mxu2  ;;  %v5509_v30 = vpack.c.bf16 %v5473_v0, %v5473_v0 }
 0x6dc   : > { %v5920_v14 = vperm.slane %v5914_v58, %v11900_v46  ;;  %v5939_v13 = vrot.slane %v5924_v33, 4  ;;  %v5941_v18 = vrot.slane %v5932_v3, 4  ;;  %v5944_v42 = vsel %vm1587_vm12, 0.0, %v5943_v48 }
 0x6dd   : > { %v5957_v7 = vrot.slane %v5866_v25, 4  ;;  %v5960_v60 = vsel %vm1587_vm12, %v5866_v25, %v5959_v15  ;;  %v5777_v10 = vpop.f32.mrf.mxu1  ;;  %v6409_v34 = vrot.slane %v5944_v42, 4  ;;  %v5593_v29 = vpop.f32.mrf.mxu3  ;;  %v6404_v23 = vsel %vm1587_vm12, %v5943_v48, %v5932_v3 }
 0x6de   : > { %v14391_v47 = vsel %vm1587_vm12, 0.0, %v5939_v13  ;;  %v6393_v19 = vsel %vm1587_vm12, %v5939_v13, %v5920_v14  ;;  %v5937_v35 = vrot.slane %v5920_v14, 4  ;;  %v5942_v53 = vsel %vm1587_vm12, 0.0, %v5941_v18  ;;  %v14413_v9 = vpop.f32.mrf.mxu0 }
 0x6df   : > { %v14397_v24 = vperm.slane %v6393_v19, %v11809_v41  ;;  %v5958_v49 = vsel %vm1587_vm12, %v5957_v7, %v5682_v1  ;;  %v5968_v36 = vperm.slane %v5960_v60, %v11809_v41  ;;  %v6398_v55 = vrot.slane %v14391_v47, 4 }
 0x6e0   : > { %v5964_v26 = vperm.slane %v5958_v49, %v11809_v41  ;;  %v6001_v61 = vrot.slane %v5777_v10, 4  ;;  %v6003_v21 = vrot.slane %v5593_v29, 4  ;;  %v14404_v12 = vperm.slane %v6404_v23, %v11809_v41 }
 0x6e1   : > { %v6410_v11 = vsel %vm1587_vm12, %v6409_v34, %v5942_v53  ;;  %v5981_v2 = vrot.slane %v5968_v36, 4  ;;  %v5984_v45 = vsel %vm1587_vm12, %v5968_v36, %v5983_v57  ;;  %v5938_v38 = vsel %vm1587_vm12, 0.0, %v5937_v35 }
 0x6e2   : > { %v5969_v39 = vrot.slane %v5964_v26, 4  ;;  %v5972_v40 = vsel %vm1587_vm12, %v5964_v26, %v5971_v44  ;;  %v5992_v1 = vperm.slane %v5984_v45, %v11900_v46  ;;  %v6002_v59 = vsel %vm1587_vm12, %v6001_v61, %v5593_v29 }
 0x6e3   : > { %v5980_v54 = vperm.slane %v5972_v40, %v11900_v46  ;;  %v5982_v37 = vsel %vm1587_vm12, %v5981_v2, %v5956_v8  ;;  %v6004_v32 = vsel %vm1587_vm12, %v5777_v10, %v6003_v21  ;;  %v6008_v22 = vperm.slane %v6002_v59, %v11809_v41 }
 0x6e4   : > { %v5970_v16 = vsel %vm1587_vm12, %v5969_v39, %v5952_v51  ;;  %v5988_v43 = vperm.slane %v5982_v37, %v11900_v46  ;;  %v5999_v28 = vrot.slane %v5992_v1, 4  ;;  %v6012_v6 = vperm.slane %v6004_v32, %v11809_v41 }
 0x6e5   : > { %v5779_v17 = vpop.f32.mrf.mxu1  ;;  %v5976_v5 = vperm.slane %v5970_v16, %v11900_v46  ;;  %v5995_v20 = vrot.slane %v5980_v54, 4  ;;  %v5721_v63 = vunpack.c.l.b16 %v5509_v30  ;;  %v6071_v50 = vrot.slane %v14413_v9, 4  ;;  %v5595_v3 = vpop.f32.mrf.mxu3 }
 0x6e6   : > { %v5997_v31 = vrot.slane %v5988_v43, 4  ;;  %v6458_v62 = vsel %vm1587_vm12, %v5999_v28, %v5988_v43  ;;  %v6027_v56 = vrot.slane %v6008_v22, 4  ;;  %v14425_v8 = vsel %vm1587_vm12, 0.0, %v5999_v28 }
 0x6e7   : > { %v5356_v33 = vpop.xlane.xlu2 %5355  ;;  %v5993_v48 = vrot.slane %v5976_v5, 4  ;;  %v6039_v15 = vrot.slane %v6012_v6, 4  ;;  %v6057_v58 = vrot.slane %v5779_v17, 4  ;;  %v14428_v0 = vsel %vm1587_vm12, 0.0, %v5995_v20 }
 0x6e8   : > { %v14431_v51 = vsel %vm1587_vm12, %v5995_v20, %v5976_v5  ;;  %v14434_v25 = vperm.slane %v6458_v62, %v11809_v41  ;;  %11020 = vrcp.f32 %v5356_v33  ;;  %v14437_v14 = vsel %vm1587_vm12, 0.0, %v5997_v31 }
 0x6e9   : > { %v5726_v13 = vpack.c.b16 %v5721_v63, %v5721_v63  ;;  %v6058_v18 = vsel %vm1587_vm12, %v6057_v58, %v5595_v3  ;;  %v6059_v42 = vrot.slane %v5595_v3, 4  ;;  %v6399_v19 = vsel %vm1587_vm12, %v6398_v55, %v5938_v38 }
 0x6ea   : > { %v5869_v7 = vpop.f32.mrf.mxu2  ;;  %v14441_v60 = vperm.slane %v6058_v18, %v11809_v41  ;;  %v6452_v34 = vrot.slane %v14428_v0, 4  ;;  %v14454_v23 = vperm.slane %v6399_v19, %v11809_v41  ;;  %v6463_v30 = vrot.slane %v14425_v8, 4 }
 0x6eb   : > { %v6013_v10 = vrot.slane %v5869_v7, 4  ;;  %v6016_v47 = vsel %vm1587_vm12, %v5869_v7, %v6015_v4  ;;  %10279 = vmatmul.msk.bf16.gmra.mxu1 %vm5086_vm15, %v5726_v13  ;;  %v6060_v57 = vsel %vm1587_vm12, %v5779_v17, %v6059_v42  ;;  %v5994_v53 = vsel %vm1587_vm12, 0.0, %v5993_v48 }
 0x6ec   : > { %v6024_v29 = vperm.slane %v6016_v47, %v11809_v41  ;;  %v14451_v35 = vpop.f32.mrf.mxu0  ;;  %v6068_v44 = vperm.slane %v6060_v57, %v11809_v41  ;;  %v14464_v26 = vperm.slane %v6410_v11, %v11809_v41  ;;  %v6083_v21 = vrot.slane %v14441_v60, 4 }
 0x6ed   : > { %v6014_v4 = vsel %vm1587_vm12, %v6013_v10, %v14380_v52  ;;  %v6127_v45 = vrot.slane %v14451_v35, 4  ;;  %v6417_v39 = vrot.slane %v14397_v24, 4  ;;  %v6415_v59 = vrot.slane %v14454_v23, 4 }
 0x6ee   : > { %v6020_v49 = vperm.slane %v6014_v4, %v11809_v41  ;;  %v6037_v36 = vrot.slane %v6024_v29, 4  ;;  %v6040_v55 = vsel %vm1587_vm12, %v6024_v29, %v6039_v15  ;;  %v11021_v61 = vpop.eup %11020  ;;  %v6095_v54 = vrot.slane %v6068_v44, 4 }
 0x6ef   : > { %v6048_v2 = vperm.slane %v6040_v55, %v11900_v46  ;;  %v14476_v16 = vmul.f32 %v11021_v61, %v14337_v27  ;;  %v6418_v17 = vsel %vm1587_vm12, %v14454_v23, %v6417_v39  ;;  %v6429_v38 = vrot.slane %v14404_v12, 4 }
 0x6f0   : > { %v6025_v52 = vrot.slane %v6020_v49, 4  ;;  %v6028_v40 = vsel %vm1587_vm12, %v6020_v49, %v6027_v56  ;;  %v6038_v1 = vsel %vm1587_vm12, %v6037_v36, %v6012_v6  ;;  %v14493_v13 = vperm.slane %v6418_v17, %v11900_v46 }
 0x6f1   : > { %v6036_v11 = vperm.slane %v6028_v40, %v11900_v46  ;;  %v6044_v37 = vperm.slane %v6038_v1, %v11900_v46  ;;  %v6055_v32 = vrot.slane %v6048_v2, 4  ;;  %v5500_v15 = vpack.c.bf16 %v14476_v16, %v14476_v16 }
 0x6f2   : > { %v6026_v43 = vsel %vm1587_vm12, %v6025_v52, %v6008_v22  ;;  %v5871_v28 = vpop.f32.mrf.mxu2  ;;  %v6427_v18 = vrot.slane %v14464_v26, 4  ;;  %v6430_v29 = vsel %vm1587_vm12, %v14464_v26, %v6429_v38  ;;  %v6451_v39 = vperm.slane %v14431_v51, %v11809_v41 }
 0x6f3   : > { %v6032_v6 = vperm.slane %v6026_v43, %v11900_v46  ;;  %v6051_v5 = vrot.slane %v6036_v11, 4  ;;  %v6053_v20 = vrot.slane %v6044_v37, 4  ;;  %v6056_v63 = vsel %vm1587_vm12, 0.0, %v6055_v32 }
 0x6f4   : > { %v6512_v31 = vsel %vm1587_vm12, %v6055_v32, %v6044_v37  ;;  %v6517_v62 = vrot.slane %v6056_v63, 4  ;;  %v6069_v56 = vrot.slane %v5871_v28, 4  ;;  %v6072_v27 = vsel %vm1587_vm12, %v5871_v28, %v6071_v50  ;;  %v14528_v32 = vpop.f32.mrf.mxu1  ;;  %v14555_v63 = vpop.f32.mrf.mxu0 }
 0x6f5   : > { %v6049_v33 = vrot.slane %v6032_v6, 4  ;;  %v6052_v22 = vsel %vm1587_vm12, 0.0, %v6051_v5  ;;  %v6054_v3 = vsel %vm1587_vm12, 0.0, %v6053_v20  ;;  %v6501_v48 = vsel %vm1587_vm12, %v6051_v5, %v6032_v6 }
 0x6f6   : > { %v6518_v58 = vsel %vm1587_vm12, %v6517_v62, %v6054_v3  ;;  %v14497_v42 = vperm.slane %v6501_v48, %v11809_v41  ;;  %v6506_v50 = vrot.slane %v6052_v22, 4  ;;  %v6070_v7 = vsel %vm1587_vm12, %v6069_v56, %v14413_v9 }
 0x6f7   : > { %v6080_v10 = vperm.slane %v6072_v27, %v11809_v41  ;;  %v6050_v47 = vsel %vm1587_vm12, 0.0, %v6049_v33  ;;  %v14504_v19 = vperm.slane %v6512_v31, %v11809_v41  ;;  %v6076_v57 = vperm.slane %v6070_v7, %v11809_v41 }
 0x6f8   : > { %v14510_v4 = vperm.slane %v6518_v58, %v11809_v41  ;;  %v6438_v9 = vperm.slane %v6430_v29, %v11900_v46  ;;  %v6445_v40 = vrot.slane %v14493_v13, 4  ;;  %v6453_v1 = vsel %vm1587_vm12, %v6452_v34, %v5994_v53 }
 0x6f9   : > { %v6093_v49 = vrot.slane %v6080_v10, 4  ;;  %v6096_v36 = vsel %vm1587_vm12, %v6080_v10, %v6095_v54  ;;  %v6081_v55 = vrot.slane %v6076_v57, 4  ;;  %v6084_v61 = vsel %vm1587_vm12, %v6076_v57, %v6083_v21 }
 0x6fa   : > { %v6104_v2 = vperm.slane %v6096_v36, %v11900_v46  ;;  %v6092_v52 = vperm.slane %v6084_v61, %v11900_v46  ;;  %v6457_v37 = vperm.slane %v6453_v1, %v11809_v41  ;;  %v6464_v0 = vsel %vm1587_vm12, %v6463_v30, %v14437_v14 }
 0x6fb   : > { %v6094_v26 = vsel %vm1587_vm12, %v6093_v49, %v6068_v44  ;;  %v6082_v54 = vsel %vm1587_vm12, %v6081_v55, %v14441_v60  ;;  %v6471_v44 = vrot.slane %v6451_v39, 4  ;;  %v6468_v28 = vperm.slane %v6464_v0, %v11809_v41 }
 0x6fc   : > { %v6100_v21 = vperm.slane %v6094_v26, %v11900_v46  ;;  %v6111_v11 = vrot.slane %v6104_v2, 4  ;;  %v6088_v51 = vperm.slane %v6082_v54, %v11900_v46  ;;  %v6107_v43 = vrot.slane %v6092_v52, 4 }
 0x6fd   : > { %v14548_v8 = vsel %vm1587_vm12, %v6506_v50, %v6050_v47  ;;  %v6537_v14 = vrot.slane %v14504_v19, 4  ;;  %v6446_v20 = vsel %vm1587_vm12, %v6438_v9, %v6445_v40  ;;  %v6472_v27 = vsel %vm1587_vm12, %v6457_v37, %v6471_v44 }
 0x6fe   : > { %v6109_v34 = vrot.slane %v6100_v21, 4  ;;  %v14536_v53 = vsel %vm1587_vm12, 0.0, %v6111_v11  ;;  %v6566_v60 = vsel %vm1587_vm12, %v6111_v11, %v6100_v21  ;;  %v6105_v17 = vrot.slane %v6088_v51, 4 }
 0x6ff   : > { %v14541_v38 = vsel %vm1587_vm12, 0.0, %v6107_v43  ;;  %v6555_v6 = vsel %vm1587_vm12, %v6107_v43, %v6088_v51  ;;  %v14545_v5 = vperm.slane %v6566_v60, %v11809_v41  ;;  %v6571_v56 = vrot.slane %v14536_v53, 4 }
 0x700   : > { %v14552_v30 = vsel %vm1587_vm12, 0.0, %v6109_v34  ;;  %v14558_v31 = vperm.slane %v6555_v6, %v11809_v41  ;;  %v6560_v62 = vrot.slane %v14541_v38, 4  ;;  %v6480_v33 = vperm.slane %v6472_v27, %v11900_v46 }
 0x701   : > { %v6481_v22 = vrot.slane %v6468_v28, 4  ;;  %v6483_v3 = vrot.slane %v14434_v25, 4  ;;  %v6469_v48 = vrot.slane %v6457_v37, 4  ;;  %v14566_v50 = vsel %vm1587_vm12, 0.0, %v6105_v17 }
 0x702   : > { %v5598_v58 = vpop.f32.mrf.mxu3  ;;  %v6591_v7 = vrot.slane %v14545_v5, 4  ;;  %v6183_v10 = vrot.slane %v14555_v63, 4  ;;  %v6443_v47 = vrot.slane %v6438_v9, 4  ;;  %v6499_v29 = vrot.slane %v6480_v33, 4 }
 0x703   : > { %v6484_v57 = vsel %vm1587_vm12, %v6468_v28, %v6483_v3  ;;  %v6416_v49 = vsel %vm1587_vm12, %v6415_v59, %v14397_v24  ;;  %v6428_v36 = vsel %vm1587_vm12, %v6427_v18, %v14404_v12  ;;  %v5874_v55 = vpop.f32.mrf.mxu2  ;;  %v6113_v2 = vrot.slane %v14528_v32, 4  ;;  %v5784_v59 = vpop.f32.mrf.mxu1 }
 0x704   : > { %v6492_v61 = vperm.slane %v6484_v57, %v11900_v46  ;;  %v6444_v52 = vsel %vm1587_vm12, %v6443_v47, %v14493_v13  ;;  %v14582_v9 = vperm.slane %v6416_v49, %v11900_v46  ;;  %v14585_v26 = vperm.slane %v6428_v36, %v11900_v46 }
 0x705   : > { %v6470_v23 = vsel %vm1587_vm12, %v6469_v48, %v6451_v39  ;;  %v6482_v24 = vsel %vm1587_vm12, %v6481_v22, %v14434_v25  ;;  %v5629_v12 = vunpack.c.l.b16 %v5500_v15  ;;  %v6114_v25 = vsel %vm1587_vm12, %v6113_v2, %v5598_v58 }
 0x706   : > { %v6500_v18 = vsel %vm1587_vm12, %v6492_v61, %v6499_v29  ;;  %v6497_v40 = vrot.slane %v6492_v61, 4  ;;  %v6441_v13 = vrot.slane %v14582_v9, 4  ;;  %v14596_v1 = vperm.slane %v6470_v23, %v11900_v46 }
 0x707   : > { %v10802_v54 = vpack.i.bf16 %v6500_v18, %v6446_v20  ;;  %v14599_v21 = vperm.slane %v6482_v24, %v11900_v46  ;;  %v5634_v39 = vpack.c.b16 %v5629_v12, %v5629_v12  ;;  %v6169_v15 = vrot.slane %v5784_v59, 4 }
 0x708   : > { %v6498_v11 = vsel %vm1587_vm12, %v6497_v40, %v6480_v33  ;;  %v6495_v16 = vrot.slane %v14596_v1, 4  ;;  %v6115_v37 = vrot.slane %v5598_v58, 4  ;;  %v6120_v43 = vperm.slane %v6114_v25, %v11809_v41 }
 0x709   : > { %10803 = vrot.lane.b32.xlu2 %v10802_v54, %s11182_s29  ;;  %v10797_v51 = vpack.i.bf16 %v6498_v11, %v6444_v52  ;;  %10274 = vmatmul.msk.bf16.gmra.mxu0 %vm5086_vm15, %v5634_v39  ;;  %v6125_v0 = vrot.slane %v5874_v55, 4  ;;  %v6128_v44 = vsel %vm1587_vm12, %v5874_v55, %v6127_v45  ;;  %v6442_v60 = vsel %vm1587_vm12, %v14585_v26, %v6441_v13 }
 0x70a   : > { %v5600_v34 = vpop.f32.mrf.mxu3  ;;  %v6496_v28 = vsel %vm1587_vm12, %v14599_v21, %v6495_v16  ;;  %v6116_v17 = vsel %vm1587_vm12, %v14528_v32, %v6115_v37  ;;  %v6136_v6 = vperm.slane %v6128_v44, %v11809_v41  ;;  %v6139_v33 = vrot.slane %v6120_v43, 4 }
 0x70b   : > { %10798 = vrot.lane.b32.xlu1 %v10797_v51, %s11183_s24  ;;  %v10792_v20 = vpack.i.bf16 %v6496_v28, %v6442_v60  ;;  %v6124_v27 = vperm.slane %v6116_v17, %v11809_v41  ;;  %v6126_v45 = vsel %vm1587_vm12, %v6125_v0, %v14451_v35  ;;  %v5876_v22 = vpop.f32.mrf.mxu2  ;;  %v6170_v58 = vsel %vm1587_vm12, %v6169_v15, %v5600_v34  ;;  %v14639_v40 = vpop.f32.mrf.mxu1 }
 0x70c   : > { %v6132_v3 = vperm.slane %v6126_v45, %v11809_v41  ;;  %v6149_v48 = vrot.slane %v6136_v6, 4  ;;  %v6171_v47 = vrot.slane %v5600_v34, 4  ;;  %v6176_v57 = vperm.slane %v6170_v58, %v11809_v41 }
 0x70d   : > { %10793 = vrot.lane.b32.xlu0 %v10792_v20, %s11184_s1  ;;  %v6151_v32 = vrot.slane %v6124_v27, 4  ;;  %v6181_v29 = vrot.slane %v5876_v22, 4  ;;  %v6184_v49 = vsel %vm1587_vm12, %v5876_v22, %v6183_v10  ;;  %v6572_v10 = vsel %vm1587_vm12, %v6571_v56, %v14552_v30 }
 0x70e   : > { %v6137_v36 = vrot.slane %v6132_v3, 4  ;;  %v6140_v55 = vsel %vm1587_vm12, %v6132_v3, %v6139_v33  ;;  %v6150_v35 = vsel %vm1587_vm12, %v6149_v48, %v6124_v27  ;;  %v6172_v61 = vsel %vm1587_vm12, %v5784_v59, %v6171_v47 }
 0x70f   : > { %v6148_v2 = vperm.slane %v6140_v55, %v11900_v46  ;;  %v6152_v52 = vsel %vm1587_vm12, %v6136_v6, %v6151_v32  ;;  %v6156_v23 = vperm.slane %v6150_v35, %v11900_v46  ;;  %v6180_v24 = vperm.slane %v6172_v61, %v11809_v41 }
 0x710   : > { %v6138_v12 = vsel %vm1587_vm12, %v6137_v36, %v6120_v43  ;;  %v6160_v18 = vperm.slane %v6152_v52, %v11900_v46  ;;  %v6182_v59 = vsel %vm1587_vm12, %v6181_v29, %v14555_v63  ;;  %v6195_v25 = vrot.slane %v6176_v57, 4 }
 0x711   : > { %v6144_v13 = vperm.slane %v6138_v12, %v11900_v46  ;;  %v6163_v54 = vrot.slane %v6148_v2, 4  ;;  %v6165_v39 = vrot.slane %v6156_v23, 4  ;;  %v6207_v53 = vrot.slane %v6180_v24, 4 }
 0x712   : > { %v14644_v11 = vpop.f32.mrf.mxu3  ;;  %v6167_v16 = vrot.slane %v6160_v18, 4  ;;  %v6188_v30 = vperm.slane %v6182_v59, %v11809_v41  ;;  %v6192_v56 = vperm.slane %v6184_v49, %v11809_v41  ;;  %v14649_v15 = vperm.slane %v6572_v10, %v11809_v41 }
 0x713   : > { %v6161_v37 = vrot.slane %v6144_v13, 4  ;;  %v6164_v51 = vsel %vm1587_vm12, 0.0, %v6163_v54  ;;  %v6225_v63 = vrot.slane %v14639_v40, 4  ;;  %v14653_v43 = vpop.f32.mrf.mxu2  ;;  %v6609_v44 = vsel %vm1587_vm12, %v6163_v54, %v6144_v13 }
 0x714   : > { %v6168_v0 = vsel %vm1587_vm12, 0.0, %v6167_v16  ;;  %v6620_v34 = vsel %vm1587_vm12, %v6167_v16, %v6156_v23  ;;  %v6511_v60 = vperm.slane %v14548_v8, %v11809_v41  ;;  %v6166_v28 = vsel %vm1587_vm12, 0.0, %v6165_v39 }
 0x715   : > { %v6614_v17 = vrot.slane %v6164_v51, 4  ;;  %v6625_v6 = vrot.slane %v6168_v0, 4  ;;  %v6193_v20 = vrot.slane %v6188_v30, 4  ;;  %v14662_v27 = vperm.slane %v6620_v34, %v11809_v41 }
 0x716   : > { %v6196_v33 = vsel %vm1587_vm12, %v6188_v30, %v6195_v25  ;;  %v6205_v45 = vrot.slane %v6192_v56, 4  ;;  %v6208_v22 = vsel %vm1587_vm12, %v6192_v56, %v6207_v53  ;;  %v6162_v3 = vsel %vm1587_vm12, 0.0, %v6161_v37  ;;  %v14715_v53 = vpop.f32.mrf.mxu1 }
 0x717   : > { %v14668_v48 = vperm.slane %v6609_v44, %v11809_v41  ;;  %v6194_v8 = vsel %vm1587_vm12, %v6193_v20, %v6176_v57  ;;  %v6204_v58 = vperm.slane %v6196_v33, %v11900_v46  ;;  %v6626_v47 = vsel %vm1587_vm12, %v6625_v6, %v6166_v28 }
 0x718   : > { %v6200_v32 = vperm.slane %v6194_v8, %v11900_v46  ;;  %v6206_v29 = vsel %vm1587_vm12, %v6205_v45, %v6180_v24  ;;  %v6216_v49 = vperm.slane %v6208_v22, %v11900_v46  ;;  %v6525_v35 = vrot.slane %v14497_v42, 4 }
 0x719   : > { %v6212_v36 = vperm.slane %v6206_v29, %v11900_v46  ;;  %v6219_v55 = vrot.slane %v6204_v58, 4  ;;  %v6538_v57 = vsel %vm1587_vm12, %v14510_v4, %v6537_v14  ;;  %v14685_v2 = vsel %vm1587_vm12, %v6614_v17, %v6162_v3  ;;  %v5695_v29 = vpop.f32.mrf.mxu0 }
 0x71a   : > { %v14682_v61 = vpop.f32.mrf.mxu3  ;;  %v6645_v52 = vrot.slane %v14662_v27, 4  ;;  %v6217_v23 = vrot.slane %v6200_v32, 4  ;;  %v6223_v24 = vrot.slane %v6216_v49, 4  ;;  %v6526_v18 = vsel %vm1587_vm12, %v6511_v60, %v6525_v35 }
 0x71b   : > { %v6221_v10 = vrot.slane %v6212_v36, 4  ;;  %v6663_v12 = vsel %vm1587_vm12, %v6219_v55, %v6200_v32  ;;  %v6561_v59 = vsel %vm1587_vm12, %v6560_v62, %v14566_v50  ;;  %v14694_v14 = vpop.f32.mrf.mxu2  ;;  %v14697_v13 = vperm.slane %v6626_v47, %v11809_v41 }
 0x71c   : > { %v14700_v54 = vsel %vm1587_vm12, 0.0, %v6219_v55  ;;  %v6224_v39 = vsel %vm1587_vm12, 0.0, %v6223_v24  ;;  %v14704_v25 = vperm.slane %v6538_v57, %v11900_v46  ;;  %v14707_v16 = vsel %vm1587_vm12, 0.0, %v6217_v23 }
 0x71d   : > { %v14710_v38 = vperm.slane %v6663_v12, %v11809_v41  ;;  %v6679_v62 = vrot.slane %v6224_v39, 4  ;;  %v14713_v50 = vperm.slane %v6526_v18, %v11900_v46  ;;  %v6222_v30 = vsel %vm1587_vm12, 0.0, %v6221_v10 }
 0x71e   : > { %v6565_v56 = vperm.slane %v6561_v59, %v11809_v41  ;;  %v6579_v37 = vrot.slane %v14558_v31, 4  ;;  %v6592_v51 = vsel %vm1587_vm12, %v14649_v15, %v6591_v7  ;;  %v6668_v0 = vrot.slane %v14700_v54, 4 }
 0x71f   : > { %v6674_v44 = vsel %vm1587_vm12, %v6223_v24, %v6212_v36  ;;  %v6680_v34 = vsel %vm1587_vm12, %v6679_v62, %v6222_v30  ;;  %v6553_v28 = vrot.slane %v14713_v50, 4  ;;  %v6600_v6 = vperm.slane %v6592_v51, %v11900_v46 }
 0x720   : > { %v6580_v17 = vsel %vm1587_vm12, %v6565_v56, %v6579_v37  ;;  %v6281_v20 = vrot.slane %v14715_v53, 4  ;;  %v6523_v33 = vrot.slane %v6511_v60, 4  ;;  %v6535_v22 = vrot.slane %v14510_v4, 4 }
 0x721   : > { %v6554_v45 = vsel %vm1587_vm12, %v14704_v25, %v6553_v28  ;;  %v6588_v7 = vperm.slane %v6580_v17, %v11900_v46  ;;  %v6577_v3 = vrot.slane %v6565_v56, 4  ;;  %v6589_v47 = vrot.slane %v14649_v15, 4 }
 0x722   : > { %v14735_v8 = vpop.f32.mrf.mxu3  ;;  %v6524_v58 = vsel %vm1587_vm12, %v6523_v33, %v14497_v42  ;;  %v6226_v60 = vsel %vm1587_vm12, %v6225_v63, %v14644_v11  ;;  %v6227_v32 = vrot.slane %v14644_v11, 4  ;;  %v6536_v4 = vsel %vm1587_vm12, %v6535_v22, %v14504_v19 }
 0x723   : > { %v6607_v49 = vrot.slane %v6588_v7, 4  ;;  %v14746_v36 = vperm.slane %v6524_v58, %v11900_v46  ;;  %v6578_v42 = vsel %vm1587_vm12, %v6577_v3, %v14558_v31  ;;  %v14752_v55 = vpop.f32.mrf.mxu2  ;;  %v14755_v15 = vperm.slane %v6536_v4, %v11900_v46 }
 0x724   : > { %v14758_v63 = vperm.slane %v6578_v42, %v11900_v46  ;;  %v6590_v11 = vsel %vm1587_vm12, %v6589_v47, %v14545_v5  ;;  %v6228_v35 = vsel %vm1587_vm12, %v14639_v40, %v6227_v32  ;;  %v6232_v23 = vperm.slane %v6226_v60, %v11809_v41 }
 0x725   : > { %v6608_v57 = vsel %vm1587_vm12, %v6600_v6, %v6607_v49  ;;  %v6549_v19 = vrot.slane %v14746_v36, 4  ;;  %v14767_v31 = vperm.slane %v6590_v11, %v11900_v46  ;;  %v6236_v12 = vperm.slane %v6228_v35, %v11809_v41 }
 0x726   : > { %v10817_v24 = vpack.i.bf16 %v6608_v57, %v6554_v45  ;;  %v6603_v10 = vrot.slane %v14758_v63, 4  ;;  %v6237_v18 = vrot.slane %v14653_v43, 4  ;;  %v6251_v40 = vrot.slane %v6232_v23, 4 }
 0x727   : > { %v6550_v5 = vsel %vm1587_vm12, %v14755_v15, %v6549_v19  ;;  %v6239_v59 = vrot.slane %v5695_v29, 4  ;;  %v6551_v39 = vrot.slane %v14704_v25, 4  ;;  %v6263_v30 = vrot.slane %v6236_v12, 4 }
 0x728   : > { %10818 = vrot.lane.b32.xlu2 %v10817_v24, %s11182_s29  ;;  %v6604_v62 = vsel %vm1587_vm12, %v14767_v31, %v6603_v10  ;;  %v6238_v56 = vsel %vm1587_vm12, %v6237_v18, %v5695_v29  ;;  %v6605_v37 = vrot.slane %v6600_v6, 4  ;;  %v14781_v51 = vperm.slane %v6674_v44, %v11809_v41 }
 0x729   : > { %v10807_v28 = vpack.i.bf16 %v6604_v62, %v6550_v5  ;;  %v6240_v17 = vsel %vm1587_vm12, %v14653_v43, %v6239_v59  ;;  %v6244_v33 = vperm.slane %v6238_v56, %v11809_v41  ;;  %v6282_v3 = vsel %vm1587_vm12, %v6281_v20, %v14682_v61  ;;  %v5697_v20 = vpop.f32.mrf.mxu0 }
 0x72a   : > { %v5610_v45 = vpop.f32.mrf.mxu3  ;;  %v6248_v25 = vperm.slane %v6240_v17, %v11809_v41  ;;  %v6606_v22 = vsel %vm1587_vm12, %v6605_v37, %v6588_v7  ;;  %v6283_v58 = vrot.slane %v14682_v61, 4  ;;  %v14792_v6 = vperm.slane %v6680_v34, %v11809_v41 }
 0x72b   : > { %10808 = vrot.lane.b32.xlu0 %v10807_v28, %s11184_s1  ;;  %v6249_v44 = vrot.slane %v6244_v33, 4  ;;  %v6252_v43 = vsel %vm1587_vm12, %v6244_v33, %v6251_v40  ;;  %v6552_v47 = vsel %vm1587_vm12, %v6551_v39, %v14713_v50  ;;  %v5886_v60 = vpop.f32.mrf.mxu2  ;;  %v6288_v42 = vperm.slane %v6282_v3, %v11809_v41 }
 0x72c   : > { %v6260_v32 = vperm.slane %v6252_v43, %v11900_v46  ;;  %v6261_v7 = vrot.slane %v6248_v25, 4  ;;  %v6264_v29 = vsel %vm1587_vm12, %v6248_v25, %v6263_v30  ;;  %v6284_v61 = vsel %vm1587_vm12, %v14715_v53, %v6283_v58 }
 0x72d   : > { %v6250_v34 = vsel %vm1587_vm12, %v6249_v44, %v6232_v23  ;;  %v6272_v49 = vperm.slane %v6264_v29, %v11900_v46  ;;  %v10812_v4 = vpack.i.bf16 %v6606_v22, %v6552_v47  ;;  %v6293_v57 = vrot.slane %v14694_v14, 4 }
 0x72e   : > { %v6256_v11 = vperm.slane %v6250_v34, %v11900_v46  ;;  %v6262_v50 = vsel %vm1587_vm12, %v6261_v7, %v6236_v12  ;;  %v6275_v35 = vrot.slane %v6260_v32, 4  ;;  %v6292_v53 = vperm.slane %v6284_v61, %v11809_v41 }
 0x72f   : > { %v6268_v19 = vperm.slane %v6262_v50, %v11900_v46  ;;  %v6279_v24 = vrot.slane %v6272_v49, 4  ;;  %v6295_v10 = vrot.slane %v5697_v20, 4  ;;  %v6294_v40 = vsel %vm1587_vm12, %v6293_v57, %v5697_v20 }
 0x730   : > { %v6273_v18 = vrot.slane %v6256_v11, 4  ;;  %v6276_v23 = vsel %vm1587_vm12, 0.0, %v6275_v35  ;;  %v6717_v5 = vsel %vm1587_vm12, %v6275_v35, %v6256_v11  ;;  %v6307_v37 = vrot.slane %v6288_v42, 4 }
 0x731   : > { %v6277_v59 = vrot.slane %v6268_v19, 4  ;;  %v14814_v39 = vsel %vm1587_vm12, 0.0, %v6279_v24  ;;  %v14817_v12 = vperm.slane %v6717_v5, %v11809_v41  ;;  %v6722_v62 = vrot.slane %v6276_v23, 4 }
 0x732   : > { %v6274_v30 = vsel %vm1587_vm12, 0.0, %v6273_v18  ;;  %v6728_v56 = vsel %vm1587_vm12, %v6279_v24, %v6268_v19  ;;  %v6296_v28 = vsel %vm1587_vm12, %v14694_v14, %v6295_v10  ;;  %v6699_v17 = vrot.slane %v14781_v51, 4  ;;  %v10654_v14 = vld [vmem:[%s11337_s20 + $0x38] sm:$0xff] }
 0x733   : > { %v6723_v33 = vsel %vm1587_vm12, %v6722_v62, %v6274_v30  ;;  %v6733_v45 = vrot.slane %v14814_v39, 4  ;;  %10813 = vrot.lane.b32.xlu0 %v10812_v4, %s11183_s24  ;;  %v6319_v25 = vrot.slane %v6292_v53, 4  ;;  %v14828_v22 = vsel %vm1587_vm12, 0.0, %v6277_v59  ;;  %7089 = vmatpush.bf16.msra.mxu3 %v10654_v14 }
 0x734   : > { %v14831_v3 = vperm.slane %v6728_v56, %v11809_v41  ;;  %v6300_v58 = vperm.slane %v6294_v40, %v11809_v41  ;;  %v6304_v44 = vperm.slane %v6296_v28, %v11809_v41  ;;  %v6741_v43 = vrot.slane %v14817_v12, 4 }
 0x735   : > { %v6619_v47 = vperm.slane %v14685_v2, %v11809_v41  ;;  %v6633_v60 = vrot.slane %v14668_v48, 4  ;;  %v6646_v32 = vsel %vm1587_vm12, %v14697_v13, %v6645_v52  ;;  %v14845_v7 = vperm.slane %v6723_v33, %v11809_v41 }
 0x736   : > { %v6305_v29 = vrot.slane %v6300_v58, 4  ;;  %v6308_v61 = vsel %vm1587_vm12, %v6300_v58, %v6307_v37  ;;  %v6317_v20 = vrot.slane %v6304_v44, 4  ;;  %v6320_v49 = vsel %vm1587_vm12, %v6304_v44, %v6319_v25 }
 0x737   : > { %v6316_v34 = vperm.slane %v6308_v61, %v11900_v46  ;;  %v6634_v2 = vsel %vm1587_vm12, %v6619_v47, %v6633_v60  ;;  %v6654_v4 = vperm.slane %v6646_v32, %v11900_v46  ;;  %v6328_v50 = vperm.slane %v6320_v49, %v11900_v46 }
 0x738   : > { %v6306_v11 = vsel %vm1587_vm12, %v6305_v29, %v6288_v42  ;;  %v6318_v52 = vsel %vm1587_vm12, %v6317_v20, %v6292_v53  ;;  %v6642_v35 = vperm.slane %v6634_v2, %v11900_v46  ;;  %v6669_v10 = vsel %vm1587_vm12, %v6668_v0, %v14707_v16 }
 0x739   : > { %v6312_v57 = vperm.slane %v6306_v11, %v11900_v46  ;;  %v6324_v19 = vperm.slane %v6318_v52, %v11900_v46  ;;  %v6331_v24 = vrot.slane %v6316_v34, 4  ;;  %v6335_v18 = vrot.slane %v6328_v50, 4 }
 0x73a   : > { %v6661_v23 = vrot.slane %v6642_v35, 4  ;;  %v6673_v42 = vperm.slane %v6669_v10, %v11809_v41  ;;  %v6687_v53 = vrot.slane %v14710_v38, 4  ;;  %v6739_v16 = vrot.slane %v14845_v7, 4 }
 0x73b   : > { %v6329_v5 = vrot.slane %v6312_v57, 4  ;;  %v6332_v40 = vsel %vm1587_vm12, 0.0, %v6331_v24  ;;  %v6333_v59 = vrot.slane %v6324_v19, 4  ;;  %v6771_v62 = vsel %vm1587_vm12, %v6331_v24, %v6312_v57 }
 0x73c   : > { %v6336_v30 = vsel %vm1587_vm12, 0.0, %v6335_v18  ;;  %v6775_v56 = vperm.slane %v6771_v62, %v11809_v41  ;;  %v6776_v37 = vrot.slane %v6332_v40, 4  ;;  %v6782_v54 = vsel %vm1587_vm12, %v6335_v18, %v6324_v19  ;;  %v10653_v18 = vld [vmem:[%s11337_s20 + $0x30] sm:$0xff] }
 0x73d   : > { %v6330_v0 = vsel %vm1587_vm12, 0.0, %v6329_v5  ;;  %v6334_v28 = vsel %vm1587_vm12, 0.0, %v6333_v59  ;;  %v14873_v33 = vperm.slane %v6782_v54, %v11809_v41  ;;  %v6787_v58 = vrot.slane %v6336_v30, 4  ;;  %7090 = vmatpush.bf16.msra.mxu3 %v10653_v18 }
 0x73e   : > { %v6777_v25 = vsel %vm1587_vm12, %v6776_v37, %v6330_v0  ;;  %v6795_v44 = vrot.slane %v6775_v56, 4  ;;  %v6688_v14 = vsel %vm1587_vm12, %v6673_v42, %v6687_v53  ;;  %v6662_v60 = vsel %vm1587_vm12, %v6654_v4, %v6661_v23 }
 0x73f   : > { %v6696_v32 = vperm.slane %v6688_v14, %v11900_v46  ;;  %v6700_v29 = vsel %vm1587_vm12, %v14792_v6, %v6699_v17  ;;  %v6659_v61 = vrot.slane %v6654_v4, 4  ;;  %v6631_v34 = vrot.slane %v6619_v47, 4 }
 0x740   : > { %v6708_v20 = vperm.slane %v6700_v29, %v11900_v46  ;;  %v6643_v49 = vrot.slane %v14697_v13, 4  ;;  %v6685_v2 = vrot.slane %v6673_v42, 4  ;;  %v6781_v11 = vperm.slane %v6777_v25, %v11809_v41  ;;  %v10651_v29 = vld [vmem:[%s11337_s20 + $0x20] sm:$0xff] }
 0x741   : > { %v6715_v52 = vrot.slane %v6696_v32, 4  ;;  %v6660_v50 = vsel %vm1587_vm12, %v6659_v61, %v6642_v35  ;;  %v6697_v57 = vrot.slane %v14792_v6, 4  ;;  %v6632_v24 = vsel %vm1587_vm12, %v6631_v34, %v14668_v48 }
 0x742   : > { %v6713_v19 = vrot.slane %v6708_v20, 4  ;;  %v6644_v17 = vsel %vm1587_vm12, %v6643_v49, %v14662_v27  ;;  %v6686_v47 = vsel %vm1587_vm12, %v6685_v2, %v14710_v38  ;;  %v14894_v4 = vperm.slane %v6632_v24, %v11900_v46 }
 0x743   : > { %v6716_v13 = vsel %vm1587_vm12, %v6708_v20, %v6715_v52  ;;  %v14897_v10 = vperm.slane %v6644_v17, %v11900_v46  ;;  %v14900_v6 = vperm.slane %v6686_v47, %v11900_v46  ;;  %v6698_v27 = vsel %vm1587_vm12, %v6697_v57, %v14781_v51 }
 0x744   : > { %v10832_v35 = vpack.i.bf16 %v6716_v13, %v6662_v60  ;;  %v6714_v48 = vsel %vm1587_vm12, %v6713_v19, %v6696_v32  ;;  %v6734_v38 = vsel %vm1587_vm12, %v6733_v45, %v14828_v22  ;;  %v6793_v23 = vrot.slane %v6781_v11, 4  ;;  %v10652_v45 = vld [vmem:[%s11337_s20 + $0x28] sm:$0xff] }
 0x745   : > { %v10827_v42 = vpack.i.bf16 %v6714_v48, %v6660_v50  ;;  %v6657_v53 = vrot.slane %v14894_v4, 4  ;;  %v14912_v5 = vperm.slane %v6698_v27, %v11900_v46  ;;  %v6711_v40 = vrot.slane %v14900_v6, 4  ;;  %7091 = vmatpush.bf16.msra.mxu3 %v10652_v45 }
 0x746   : > { %10833 = vrot.lane.b32.xlu2 %v10832_v35, %s11182_s29  ;;  %v6738_v59 = vperm.slane %v6734_v38, %v11809_v41  ;;  %v6742_v51 = vsel %vm1587_vm12, %v14845_v7, %v6741_v43  ;;  %v6753_v39 = vrot.slane %v14831_v3, 4  ;;  %v6788_v30 = vsel %vm1587_vm12, %v6787_v58, %v6334_v28 }
 0x747   : > { %10828 = vrot.lane.b32.xlu0 %v10827_v42, %s11183_s24  ;;  %v6658_v22 = vsel %vm1587_vm12, %v14897_v10, %v6657_v53  ;;  %v6750_v62 = vperm.slane %v6742_v51, %v11900_v46  ;;  %v6712_v37 = vsel %vm1587_vm12, %v14912_v5, %v6711_v40  ;;  %v6792_v43 = vperm.slane %v6788_v30, %v11809_v41  ;;  %v10648_v42 = vld [vmem:[%s11337_s20 + $0x8] sm:$0xff]  ;;  %v10647_v53 = vld [vmem:[%s11337_s20] sm:$0xff] }
 0x748   : > { %v6754_v54 = vsel %vm1587_vm12, %v6738_v59, %v6753_v39  ;;  %v6796_v7 = vsel %vm1587_vm12, %v6781_v11, %v6795_v44  ;;  %v10822_v0 = vpack.i.bf16 %v6712_v37, %v6658_v22  ;;  %v6807_v60 = vrot.slane %v14873_v33, 4 }
 0x749   : > { %v6762_v25 = vperm.slane %v6754_v54, %v11900_v46  ;;  %v6804_v14 = vperm.slane %v6796_v7, %v11900_v46  ;;  %v6740_v32 = vsel %vm1587_vm12, %v6739_v16, %v14817_v12  ;;  %v6751_v28 = vrot.slane %v6738_v59, 4  ;;  %7092 = vmatpush.bf16.msra.mxu3 %v10651_v29 }
 0x74a   : > { %v6794_v58 = vsel %vm1587_vm12, %v6793_v23, %v6775_v56  ;;  %10823 = vrot.lane.b32.xlu1 %v10822_v0, %s11184_s1  ;;  %v6769_v61 = vrot.slane %v6750_v62, 4  ;;  %v14942_v20 = vperm.slane %v6740_v32, %v11900_v46  ;;  %v6808_v34 = vsel %vm1587_vm12, %v6792_v43, %v6807_v60  ;;  %v10649_v23 = vld [vmem:[%s11337_s20 + $0x10] sm:$0xff] }
 0x74b   : > { %v6823_v44 = vrot.slane %v6804_v14, 4  ;;  %v6752_v49 = vsel %vm1587_vm12, %v6751_v28, %v14831_v3  ;;  %v14948_v12 = vperm.slane %v6794_v58, %v11900_v46  ;;  %v6805_v16 = vrot.slane %v6792_v43, 4  ;;  %v10650_v3 = vld [vmem:[%s11337_s20 + $0x18] sm:$0xff] }
 0x74c   : > { %v6816_v56 = vperm.slane %v6808_v34, %v11900_v46  ;;  %v6767_v2 = vrot.slane %v6762_v25, 4  ;;  %v14952_v11 = vperm.slane %v6752_v49, %v11900_v46  ;;  %v6765_v52 = vrot.slane %v14942_v20, 4 }
 0x74d   : > { %v6806_v50 = vsel %vm1587_vm12, %v6805_v16, %v14873_v33  ;;  %v6819_v57 = vrot.slane %v14948_v12, 4  ;;  %v6770_v19 = vsel %vm1587_vm12, %v6762_v25, %v6769_v61  ;;  %7093 = vmatpush.bf16.msra.mxu3 %v10650_v3  ;;  %v6439_v45 = vrot.slane %v14585_v26, 4 }
 0x74e   : > { %v6824_v24 = vsel %vm1587_vm12, %v6816_v56, %v6823_v44  ;;  %v6821_v17 = vrot.slane %v6816_v56, 4  ;;  %v14962_v47 = vperm.slane %v6806_v50, %v11900_v46  ;;  %v6768_v35 = vsel %vm1587_vm12, %v6767_v2, %v6750_v62 }
 0x74f   : > { %v10847_v13 = vpack.i.bf16 %v6824_v24, %v6770_v19  ;;  %v6766_v48 = vsel %vm1587_vm12, %v14952_v11, %v6765_v52  ;;  %v6493_v22 = vrot.slane %v14599_v21, 4  ;;  %v6339_v43 = vrot.slane %v14735_v8, 4 }
 0x750   : > { %v6822_v33 = vsel %vm1587_vm12, %v6821_v17, %v6804_v14  ;;  %v6820_v27 = vsel %vm1587_vm12, %v14962_v47, %v6819_v57  ;;  %v6440_v14 = vsel %vm1587_vm12, %v6439_v45, %v14582_v9 }
 0x751   : > { %10848 = vrot.lane.b32.xlu2 %v10847_v13, %s11182_s29  ;;  %v10842_v38 = vpack.i.bf16 %v6822_v33, %v6768_v35  ;;  %v10837_v18 = vpack.i.bf16 %v6820_v27, %v6766_v48  ;;  %7094 = vmatpush.bf16.msra.mxu3 %v10649_v23  ;;  %v6494_v26 = vsel %vm1587_vm12, %v6493_v22, %v14596_v1  ;;  %v6349_v1 = vrot.slane %v14752_v55, 4 }
 0x753   : > { %10843 = vrot.lane.b32.xlu0 %v10842_v38, %s11183_s24  ;;  %10838 = vrot.lane.b32.xlu1 %v10837_v18, %s11184_s1 }
 0x755   : > { %7095 = vmatpush.bf16.msra.mxu3 %v10648_v42 }
 0x759   : > { %7096 = vmatpush.bf16.msra.mxu3 %v10647_v53 }
 0x763   : > { %v10804_v62 = vpop.permute.xlu2 %10803 }
 0x764   : > { %v10806_v21 = vunpack.i.h.bf16 %v10804_v62  ;;  %v10805_v60 = vunpack.i.l.bf16 %v10804_v62 }
 0x768   : > { %v5792_v40 = vpop.f32.mrf.mxu1 }
 0x769   : > { %v6337_v51 = vrot.slane %v5792_v40, 4  ;;  %v6340_v58 = vsel %vm1587_vm12, %v5792_v40, %v6339_v43 }
 0x76a   : > { %v6348_v49 = vperm.slane %v6340_v58, %v11809_v41 }
 0x76b   : > { %v6338_v25 = vsel %vm1587_vm12, %v6337_v51, %v14735_v8 }
 0x76c   : > { %v6344_v8 = vperm.slane %v6338_v25, %v11809_v41  ;;  %v6375_v3 = vrot.slane %v6348_v49, 4 }
 0x76e   : > { %v6363_v52 = vrot.slane %v6344_v8, 4 }
 0x770   : > { %v5794_v59 = vpop.f32.mrf.mxu1 }
 0x77d   : > { %v10799_v39 = vpop.permute.xlu1 %10798 }
 0x77e   : > { %v10801_v30 = vunpack.i.h.bf16 %v10799_v39  ;;  %v10800_v37 = vunpack.i.l.bf16 %v10799_v39 }
 0x77f   : > { %v10794_v54 = vpop.permute.xlu0 %10793 }
 0x780   : > { %v10796_v7 = vunpack.i.h.bf16 %v10794_v54  ;;  %v10795_v0 = vunpack.i.l.bf16 %v10794_v54 }
 0x782   : > { %v6988_v32 = vsel %vm4674_vm13, %v6494_v26, %v10796_v7  ;;  %v6987_v28 = vsel %vm4674_vm13, %v6440_v14, %v10795_v0 }
 0x783   : > { %v6998_v29 = vsel %vm6996_vm1, %v6988_v32, %v10801_v30  ;;  %v6997_v61 = vsel %vm6996_vm1, %v6987_v28, %v10800_v37 }
 0x784   : > { %v7007_v9 = vsel %vm7006_vm2, %v6997_v61, %v10805_v60  ;;  %v7008_v44 = vsel %vm7006_vm2, %v6998_v29, %v10806_v21 }
 0x785   : > { %v7016_v34 = vpack.c.bf16 %v7008_v44, %v7007_v9 }
 0x786   : > { %v5700_v16 = vpop.f32.mrf.mxu0 }
 0x787   : > { %7097 = vmatmul.bf16.vlgmr.msra.gmra.mxu3 %v7016_v34  ;;  %v6350_v56 = vsel %vm1587_vm12, %v6349_v1, %v5700_v16  ;;  %v6351_v2 = vrot.slane %v5700_v16, 4 }
 0x788   : > { %v6356_v50 = vperm.slane %v6350_v56, %v11809_v41 }
 0x789   : > { %v6352_v57 = vsel %vm1587_vm12, %v14752_v55, %v6351_v2 }
 0x78a   : > { %v6360_v19 = vperm.slane %v6352_v57, %v11809_v41  ;;  %v6361_v24 = vrot.slane %v6356_v50, 4  ;;  %v6364_v17 = vsel %vm1587_vm12, %v6356_v50, %v6363_v52  ;;  %v6547_v57 = vrot.slane %v14755_v15, 4 }
 0x78b   : > { %v6372_v13 = vperm.slane %v6364_v17, %v11900_v46 }
 0x78c   : > { %v6362_v35 = vsel %vm1587_vm12, %v6361_v24, %v6344_v8  ;;  %v6373_v33 = vrot.slane %v6360_v19, 4  ;;  %v6376_v48 = vsel %vm1587_vm12, %v6360_v19, %v6375_v3  ;;  %v6601_v3 = vrot.slane %v14767_v31, 4  ;;  %v10819_v24 = vpop.permute.xlu2 %10818 }
 0x78d   : > { %v6368_v27 = vperm.slane %v6362_v35, %v11900_v46  ;;  %v6384_v38 = vperm.slane %v6376_v48, %v11900_v46  ;;  %v6387_v18 = vrot.slane %v6372_v13, 4  ;;  %v6548_v13 = vsel %vm1587_vm12, %v6547_v57, %v14746_v36 }
 0x78e   : > { %v6374_v55 = vsel %vm1587_vm12, %v6373_v33, %v6348_v49  ;;  %v5702_v23 = vpop.f32.mrf.mxu0  ;;  %v6602_v35 = vsel %vm1587_vm12, %v6601_v3, %v14758_v63  ;;  %v6655_v63 = vrot.slane %v14897_v10, 4  ;;  %v11112_v3 = vld [vmem:[#allocation2 + $0x30] sm:$0xff] }
 0x78f   : > { %v6380_v42 = vperm.slane %v6374_v55, %v11900_v46  ;;  %v6385_v53 = vrot.slane %v6368_v27, 4  ;;  %v6388_v40 = vsel %vm1587_vm12, 0.0, %v6387_v18  ;;  %v6391_v59 = vrot.slane %v6384_v38, 4 }
 0x790   : > { %v6825_v51 = vsel %vm1587_vm12, %v6387_v18, %v6368_v27  ;;  %v6830_v39 = vrot.slane %v6388_v40, 4  ;;  %v10821_v27 = vunpack.i.h.bf16 %v10819_v24  ;;  %v10820_v38 = vunpack.i.l.bf16 %v10819_v24 }
 0x791   : > { %v6386_v45 = vsel %vm1587_vm12, 0.0, %v6385_v53  ;;  %v6389_v22 = vrot.slane %v6380_v42, 4  ;;  %v6392_v62 = vsel %vm1587_vm12, 0.0, %v6391_v59  ;;  %v6829_v30 = vperm.slane %v6825_v51, %v11809_v41 }
 0x792   : > { %v6831_v37 = vsel %vm1587_vm12, %v6830_v39, %v6386_v45  ;;  %v6841_v54 = vrot.slane %v6392_v62, 4  ;;  %v6836_v43 = vsel %vm1587_vm12, %v6391_v59, %v6380_v42  ;;  %v6709_v40 = vrot.slane %v14912_v5, 4 }
 0x793   : > { %v6390_v7 = vsel %vm1587_vm12, 0.0, %v6389_v22  ;;  %v6835_v0 = vperm.slane %v6831_v37, %v11809_v41  ;;  %v6840_v25 = vperm.slane %v6836_v43, %v11809_v41  ;;  %v6849_v14 = vrot.slane %v6829_v30, 4 }
 0x794   : > { %v6842_v26 = vsel %vm1587_vm12, %v6841_v54, %v6390_v7  ;;  %v6710_v37 = vsel %vm1587_vm12, %v6709_v40, %v14900_v6 }
 0x795   : > { %v6846_v21 = vperm.slane %v6842_v26, %v11809_v41  ;;  %v6850_v60 = vsel %vm1587_vm12, %v6835_v0, %v6849_v14  ;;  %v6861_v32 = vrot.slane %v6840_v25, 4  ;;  %v6847_v28 = vrot.slane %v6835_v0, 4 }
 0x796   : > { %v6858_v58 = vperm.slane %v6850_v60, %v11900_v46 }
 0x797   : > { %v6862_v29 = vsel %vm1587_vm12, %v6846_v21, %v6861_v32  ;;  %v6848_v61 = vsel %vm1587_vm12, %v6847_v28, %v6829_v30  ;;  %v6859_v8 = vrot.slane %v6846_v21, 4  ;;  %v6656_v30 = vsel %vm1587_vm12, %v6655_v63, %v14894_v4 }
 0x798   : > { %v6870_v9 = vperm.slane %v6862_v29, %v11900_v46  ;;  %v6877_v44 = vrot.slane %v6858_v58, 4  ;;  %v15026_v1 = vperm.slane %v6848_v61, %v11900_v46  ;;  %v6763_v4 = vrot.slane %v14952_v11, 4 }
 0x799   : > { %v6860_v34 = vsel %vm1587_vm12, %v6859_v8, %v6840_v25  ;;  %v6817_v21 = vrot.slane %v14962_v47, 4 }
 0x79a   : > { %v6878_v41 = vsel %vm1587_vm12, %v6870_v9, %v6877_v44  ;;  %v6875_v49 = vrot.slane %v6870_v9, 4  ;;  %v15031_v16 = vperm.slane %v6860_v34, %v11900_v46  ;;  %v6873_v56 = vrot.slane %v15026_v1, 4 }
 0x79b   : > { %6976 = vrot.lane.b32.xlu2 %v6878_v41, %s11182_s29  ;;  %v6764_v61 = vsel %vm1587_vm12, %v6763_v4, %v14942_v20  ;;  %v6818_v8 = vsel %vm1587_vm12, %v6817_v21, %v14948_v12  ;;  %v10854_v20 = vld [vmem:[%s17829_s26] ss:$0 sm:$0xff] }
 0x79c   : > { %v6876_v2 = vsel %vm1587_vm12, %v6875_v49, %v6858_v58  ;;  %v6874_v52 = vsel %vm1587_vm12, %v15031_v16, %v6873_v56  ;;  %v6871_v57 = vrot.slane %v15031_v16, 4 }
 0x79d   : > { %v10809_v50 = vpop.permute.xlu0 %10808  ;;  %6940 = vrot.lane.b32.xlu0 %v6876_v2, %s11183_s24  ;;  %6904 = vrot.lane.b32.xlu1 %v6874_v52, %s11184_s1  ;;  %s17949_s24 = sld [smem:[#allocation101_spill]] (!%p10609_p8) }
 0x79e   : > { %v10811_v46 = vunpack.i.h.bf16 %v10809_v50  ;;  %v10810_v19 = vunpack.i.l.bf16 %v10809_v50  ;;  %v6872_v24 = vsel %vm1587_vm12, %v6871_v57, %v15026_v1  ;;  %v11114_v1 = vld [vmem:[#allocation2 + $0x18] sm:$0xff] }
 0x7a0   : > { %v6990_v18 = vsel %vm4674_vm13, %v6602_v35, %v10811_v46  ;;  %v6989_v15 = vsel %vm4674_vm13, %v6548_v13, %v10810_v19  ;;  %v10834_v59 = vpop.permute.xlu2 %10833 }
 0x7a1   : > { %v10836_v54 = vunpack.i.h.bf16 %v10834_v59  ;;  %v10835_v43 = vunpack.i.l.bf16 %v10834_v59 }
 0x7a5   : > { %v10814_v17 = vpop.permute.xlu0 %10813 }
 0x7a6   : > { %v10816_v33 = vunpack.i.h.bf16 %v10814_v17  ;;  %v10815_v48 = vunpack.i.l.bf16 %v10814_v17 }
 0x7a8   : > { %v6999_v31 = vsel %vm6996_vm1, %v6989_v15, %v10815_v48  ;;  %v7000_v55 = vsel %vm6996_vm1, %v6990_v18, %v10816_v33  ;;  %v11113_v18 = vld [vmem:[#allocation2] sm:$0xff] }
 0x7a9   : > { %v7009_v23 = vsel %vm7006_vm2, %v6999_v31, %v10820_v38  ;;  %v7010_v42 = vsel %vm7006_vm2, %v7000_v55, %v10821_v27 }
 0x7aa   : > { %v7017_v36 = vpack.c.bf16 %v7010_v42, %v7009_v23 }
 0x7ab   : > { %v10849_v9 = vpop.permute.xlu2 %10848 }
 0x7ac   : > { %7102 = vmatmul.bf16.gmra.mxu3 %v7017_v36  ;;  %v10851_v41 = vunpack.i.h.bf16 %v10849_v9  ;;  %v10850_v49 = vunpack.i.l.bf16 %v10849_v9 }
 0x7b9   : > { %v10829_v53 = vpop.permute.xlu0 %10828 }
 0x7ba   : > { %v10831_v39 = vunpack.i.h.bf16 %v10829_v53  ;;  %v10830_v45 = vunpack.i.l.bf16 %v10829_v53  ;;  %v11115_v53 = vld [vmem:[#allocation2 + $0x10] sm:$0xff] }
 0x7bc   : > { %v10824_v51 = vpop.permute.xlu1 %10823 }
 0x7bd   : > { %v10826_v22 = vunpack.i.h.bf16 %v10824_v51  ;;  %v10825_v62 = vunpack.i.l.bf16 %v10824_v51  ;;  %v11116_v51 = vld [vmem:[#allocation2 + $0x20] sm:$0xff] }
 0x7bf   : > { %v6991_v7 = vsel %vm4674_vm13, %v6656_v30, %v10825_v62  ;;  %v6992_v10 = vsel %vm4674_vm13, %v6710_v37, %v10826_v22  ;;  %v11117_v62 = vld [vmem:[#allocation2 + $0x28] sm:$0xff] }
 0x7c0   : > { %v7002_v5 = vsel %vm6996_vm1, %v6992_v10, %v10831_v39  ;;  %v7001_v0 = vsel %vm6996_vm1, %v6991_v7, %v10830_v45 }
 0x7c1   : > { %v7011_v25 = vsel %vm7006_vm2, %v7001_v0, %v10835_v43  ;;  %v7012_v14 = vsel %vm7006_vm2, %v7002_v5, %v10836_v54  ;;  %v11118_v43 = vld [vmem:[#allocation2 + $0x40] sm:$0xff]  ;;  %v17837_v5 = vld [vmem:[#allocation9_spill] sm:$0xff] }
 0x7c2   : > { %v7018_v26 = vpack.c.bf16 %v7012_v14, %v7011_v25 }
 0x7c4   : > { %7107 = vmatmul.bf16.gmra.mxu3 %v7018_v26 }
 0x7c5   : > { %v10839_v6 = vpop.permute.xlu1 %10838  ;;  %v10844_v60 = vpop.permute.xlu0 %10843 }
 0x7c6   : > { %v10841_v32 = vunpack.i.h.bf16 %v10839_v6  ;;  %v10840_v28 = vunpack.i.l.bf16 %v10839_v6  ;;  %v10846_v58 = vunpack.i.h.bf16 %v10844_v60  ;;  %v10845_v29 = vunpack.i.l.bf16 %v10844_v60 }
 0x7c8   : > { %v6993_v44 = vsel %vm4674_vm13, %v6764_v61, %v10840_v28  ;;  %v6994_v11 = vsel %vm4674_vm13, %v6818_v8, %v10841_v32  ;;  %v11119_v32 = vld [vmem:[#allocation2 + $0x38] sm:$0xff]  ;;  %v11120_v8 = vld [vmem:[#allocation2 + $0x8] sm:$0xff] }
 0x7c9   : > { %v7004_v47 = vsel %vm6996_vm1, %v6994_v11, %v10846_v58  ;;  %v7003_v34 = vsel %vm6996_vm1, %v6993_v44, %v10845_v29 }
 0x7ca   : > { %v7013_v56 = vsel %vm7006_vm2, %v7003_v34, %v10850_v49  ;;  %v7014_v2 = vsel %vm7006_vm2, %v7004_v47, %v10851_v41 }
 0x7cb   : > { %v7019_v52 = vpack.c.bf16 %v7014_v2, %v7013_v56 }
 0x7d4   : > { %7112 = vmatmul.bf16.gmra.mxu3 %v7019_v52 }
 0x7f5   : > { %v6977_v35 = vpop.permute.xlu2 %6976 }
 0x80a   : > { %v7098_v12 = vpop.f32.mrf.mxu3 }
 0x80b   : > { %v7099_v50 = vadd.f32 %v10854_v20, %v7098_v12 }
 0x80d   : > { %v15082_v46 = vadd.f32 %v11112_v3, %v7099_v50 }
 0x80f   : > { %17830 = vst [vmem:[#allocation13_spill] sm:$0xff] %v15082_v46  ;;  %7133 = vadd.xlane.f32.xlu1 %v15082_v46  ;;  %v6905_v19 = vpop.permute.xlu1 %6904  ;;  %v6941_v17 = vpop.permute.xlu0 %6940 }
 0x810   : > { %v6995_v13 = vsel %vm4674_vm13, %v6872_v24, %v6905_v19 }
 0x811   : > { %v7005_v33 = vsel %vm6996_vm1, %v6995_v13, %v6941_v17 }
 0x812   : > { %v7100_v48 = vpop.f32.mrf.mxu3  ;;  %v7015_v27 = vsel %vm7006_vm2, %v7005_v33, %v6977_v35 }
 0x813   : > { %v7101_v38 = vadd.f32 %v10854_v20, %v7100_v48  ;;  %v7020_v16 = vpack.c.bf16 %v7015_v27, %v7015_v27  ;;  %v10431_v27 = vld [vmem:[%s11361_s21 + $0xe0] sm:$0xf] }
 0x815   : > { %v15090_v15 = vadd.f32 %v11113_v18, %v7101_v38  ;;  %7117 = vmatmul.bf16.gmra.mxu3 %v7020_v16  ;;  %v10685_v38 = vld [vmem:[%s11361_s21 + $0xec] sm:$0xf0]  ;;  %v10683_v16 = vld [vmem:[%s11361_s21 + $0xe4] sm:$0xf] }
 0x816   : > { %v10432_v18 = vor.u32 %v10685_v38, %v10431_v27  ;;  %v10391_v38 = vld [vmem:[%s11361_s21 + $0x88] sm:$0xf] }
 0x817   : > { %17831 = vst [vmem:[#allocation60_spill] sm:$0xff] %v15090_v15  ;;  %7135 = vadd.xlane.f32.xlu0 %v15090_v15 }
 0x818   : > { %7544 = vmatpush.bf16.msrb.mxu0 %v10432_v18  ;;  %v10672_v18 = vld [vmem:[%s11361_s21 + $0x8c] sm:$0xf] }
 0x82f   : > { %v7103_v31 = vpop.f32.mrf.mxu3 }
 0x830   : > { %v7104_v55 = vadd.f32 %v10854_v20, %v7103_v31  ;;  %v10433_v31 = vld [vmem:[%s11361_s21 + $0xf0] sm:$0xf0] }
 0x832   : > { %v15093_v23 = vadd.f32 %v11114_v1, %v7104_v55  ;;  %v10439_v55 = vld [vmem:[%s11361_s21 + $0xe8] sm:$0xf]  ;;  %v10686_v1 = vld [vmem:[%s11361_s21 + $0xf4] sm:$0xf0] }
 0x834   : > { %17832 = vst [vmem:[#allocation62_spill] sm:$0xff] %v15093_v23  ;;  %7137 = vadd.xlane.f32.xlu2 %v15093_v23 }
 0x837   : > { %v7105_v42 = vpop.f32.mrf.mxu3 }
 0x838   : > { %v7106_v36 = vadd.f32 %v10854_v20, %v7105_v42  ;;  %v10436_v42 = vor.u32 %v10683_v16, %v10433_v31  ;;  %v10674_v16 = vld [vmem:[%s11361_s21 + $0x94] sm:$0xf0] }
 0x83a   : > { %v15096_v63 = vadd.f32 %v11115_v53, %v7106_v36  ;;  %v10440_v36 = vor.u32 %v10686_v1, %v10439_v55  ;;  %v10684_v53 = vld [vmem:[%s11361_s21 + $0xec] sm:$0xf]  ;;  %7577 = vmatpush.bf16.msrb.mxu1 %v10436_v42 }
 0x83c   : > { %17833 = vst [vmem:[#allocation64_spill] sm:$0xff] %v15096_v63  ;;  %7139 = vadd.xlane.f32.xlu1 %v15096_v63  ;;  %7610 = vmatpush.bf16.msrb.mxu2 %v10440_v36  ;;  %v10393_v36 = vld [vmem:[%s11361_s21 + $0x98] sm:$0xf0] }
 0x847   : > { %v7108_v40 = vpop.f32.mrf.mxu3 }
 0x848   : > { %v7109_v59 = vadd.f32 %v10854_v20, %v7108_v40  ;;  %v10441_v40 = vld [vmem:[%s11361_s21 + $0xf8] sm:$0xf0] }
 0x84a   : > { %v15099_v39 = vadd.f32 %v11116_v51, %v7109_v59  ;;  %v10444_v59 = vor.u32 %v10684_v53, %v10441_v40  ;;  %v10367_v53 = vld [vmem:[%s11361_s21 + $0x60] sm:$0xf] }
 0x84c   : > { %17834 = vst [vmem:[#allocation65_spill] sm:$0xff] %v15099_v39  ;;  %7141 = vadd.xlane.f32.xlu2 %v15099_v39  ;;  %7643 = vmatpush.bf16.msrb.mxu3 %v10444_v59  ;;  %v10392_v59 = vor.u32 %v10674_v16, %v10391_v38 }
 0x84f   : > { %v7110_v45 = vpop.f32.mrf.mxu3 }
 0x850   : > { %v7111_v22 = vadd.f32 %v10854_v20, %v7110_v45 }
 0x852   : > { %v15102_v30 = vadd.f32 %v11117_v62, %v7111_v22  ;;  %v10415_v62 = vld [vmem:[%s11361_s21 + $0xc0] sm:$0xf] }
 0x854   : > { %17835 = vst [vmem:[#allocation61_spill] sm:$0xff] %v15102_v30  ;;  %7143 = vadd.xlane.f32.xlu0 %v15102_v30 }
 0x857   : > { %v7113_v37 = vpop.f32.mrf.mxu3 }
 0x858   : > { %v7114_v54 = vadd.f32 %v10854_v20, %v7113_v37  ;;  %v10681_v37 = vld [vmem:[%s11361_s21 + $0xcc] sm:$0xf0] }
 0x85a   : > { %v15105_v7 = vadd.f32 %v11118_v43, %v7114_v54  ;;  %v10416_v54 = vor.u32 %v10681_v37, %v10415_v62  ;;  %v10679_v43 = vld [vmem:[%s11361_s21 + $0xc4] sm:$0xf]  ;;  %v10369_v37 = vld [vmem:[%s11361_s21 + $0x70] sm:$0xf0] }
 0x85b   : > { %v10667_v62 = vld [vmem:[%s11361_s21 + $0x64] sm:$0xf] }
 0x85c   : > { %17836 = vst [vmem:[#allocation63_spill] sm:$0xff] %v15105_v7  ;;  %7145 = vadd.xlane.f32.xlu0 %v15105_v7  ;;  %7545 = vmatpush.bf16.msrb.mxu0 %v10416_v54 }
 0x85f   : > { %v7115_v26 = vpop.f32.mrf.mxu3 }
 0x860   : > { %v7116_v21 = vadd.f32 %v10854_v20, %v7115_v26  ;;  %v10682_v26 = vld [vmem:[%s11361_s21 + $0xd4] sm:$0xf0] }
 0x862   : > { %v15118_v28 = vadd.f32 %v11119_v32, %v7116_v21  ;;  %v10425_v21 = vld [vmem:[%s11361_s21 + $0xd8] sm:$0xf0] }
 0x864   : > { %17838 = vst [vmem:[#allocation67_spill] sm:$0xff] %v15118_v28 }
 0x882   : > { %v7134_v10 = vpop.xlane.xlu1 %7133 }
 0x883   : > { %v7151_v0 = vmul.f32 %v7134_v10, %v17837_v5  ;;  %v10417_v10 = vld [vmem:[%s11361_s21 + $0xd0] sm:$0xf0] }
 0x885   : > { %v15110_v25 = vsub.f32 %v15082_v46, %v7151_v0  ;;  %v10423_v0 = vld [vmem:[%s11361_s21 + $0xc8] sm:$0xf] }
 0x887   : > { %v7169_v14 = vmul.f32 %v15110_v25, %v15110_v25 }
 0x889   : > { %7178 = vadd.xlane.f32.xlu1 %v7169_v14  ;;  %v10420_v14 = vor.u32 %v10679_v43, %v10417_v10  ;;  %v10375_v43 = vld [vmem:[%s11361_s21 + $0x68] sm:$0xf]  ;;  %v10670_v10 = vld [vmem:[%s11361_s21 + $0x74] sm:$0xf0] }
 0x88a   : > { %v7136_v4 = vpop.xlane.xlu0 %7135 }
 0x88b   : > { %v7152_v6 = vmul.f32 %v7136_v4, %v17837_v5  ;;  %v10680_v4 = vld [vmem:[%s11361_s21 + $0xcc] sm:$0xf]  ;;  %7578 = vmatpush.bf16.msrb.mxu1 %v10420_v14 }
 0x88c   : > { %v10428_v32 = vor.u32 %v10680_v4, %v10425_v21  ;;  %v10377_v4 = vld [vmem:[%s11361_s21 + $0x78] sm:$0xf0]  ;;  %v10351_v21 = vld [vmem:[%s11361_s21 + $0x40] sm:$0xf] }
 0x88d   : > { %v15116_v60 = vsub.f32 %v15090_v15, %v7152_v6  ;;  %v10424_v6 = vor.u32 %v10682_v26, %v10423_v0  ;;  %v10668_v26 = vld [vmem:[%s11361_s21 + $0x6c] sm:$0xf]  ;;  %v10713_v15 = vld [vmem:[%s11371_s3 + $0xd0] sm:$0xff] }
 0x88e   : > { %7644 = vmatpush.bf16.msrb.mxu3 %v10428_v32  ;;  %v10665_v32 = vld [vmem:[%s11361_s21 + $0x4c] sm:$0xf0] }
 0x88f   : > { %v7170_v58 = vmul.f32 %v15116_v60, %v15116_v60  ;;  %7611 = vmatpush.bf16.msrb.mxu2 %v10424_v6  ;;  %v10372_v6 = vor.u32 %v10667_v62, %v10369_v37  ;;  %v10343_v62 = vld [vmem:[%s11361_s21 + $0x28] sm:$0xf]  ;;  %v10662_v37 = vld [vmem:[%s11361_s21 + $0x34] sm:$0xf0] }
 0x891   : > { %7180 = vadd.xlane.f32.xlu2 %v7170_v58  ;;  %7147 = vadd.xlane.f32.xlu1 %v15118_v28  ;;  %v10399_v58 = vld [vmem:[%s11361_s21 + $0xa0] sm:$0xf] }
 0x898   : > { %v7118_v29 = vpop.f32.mrf.mxu3 }
 0x899   : > { %v7119_v61 = vadd.f32 %v10854_v20, %v7118_v29  ;;  %v10677_v29 = vld [vmem:[%s11361_s21 + $0xac] sm:$0xf0] }
 0x89b   : > { %v15123_v9 = vadd.f32 %v11120_v8, %v7119_v61  ;;  %v10675_v61 = vld [vmem:[%s11361_s21 + $0xa4] sm:$0xf]  ;;  %v10400_v8 = vor.u32 %v10677_v29, %v10399_v58  ;;  %v10353_v29 = vld [vmem:[%s11361_s21 + $0x50] sm:$0xf0] }
 0x89c   : > { %v10663_v58 = vld [vmem:[%s11361_s21 + $0x44] sm:$0xf] }
 0x89d   : > { %17839 = vst [vmem:[#allocation68_spill] sm:$0xff] %v15123_v9  ;;  %7149 = vadd.xlane.f32.xlu1 %v15123_v9  ;;  %7546 = vmatpush.bf16.msrb.mxu0 %v10400_v8  ;;  %v10376_v8 = vor.u32 %v10670_v10, %v10375_v43  ;;  %v10344_v10 = vor.u32 %v10662_v37, %v10343_v62 }
 0x8a0   : > { %v7120_v44 = vpop.f32.mrf.mxu3 }
 0x8a1   : > { %v10401_v44 = vld [vmem:[%s11361_s21 + $0xb0] sm:$0xf0] }
 0x8a7   : > { %v7138_v11 = vpop.xlane.xlu2 %7137 }
 0x8a8   : > { %v7153_v47 = vmul.f32 %v7138_v11, %v17837_v5  ;;  %v10407_v11 = vld [vmem:[%s11361_s21 + $0xa8] sm:$0xf] }
 0x8aa   : > { %v15128_v34 = vsub.f32 %v15093_v23, %v7153_v47  ;;  %v10678_v47 = vld [vmem:[%s11361_s21 + $0xb4] sm:$0xf0]  ;;  %v10705_v23 = vld [vmem:[%s11371_s3 + $0x90] sm:$0xff] }
 0x8ac   : > { %v7171_v41 = vmul.f32 %v15128_v34, %v15128_v34 }
 0x8ae   : > { %7182 = vadd.xlane.f32.xlu2 %v7171_v41 }
 0x8af   : > { %v7140_v49 = vpop.xlane.xlu1 %7139 }
 0x8b0   : > { %v7154_v56 = vmul.f32 %v7140_v49, %v17837_v5 }
 0x8b2   : > { %v15134_v2 = vsub.f32 %v15096_v63, %v7154_v56  ;;  %v10404_v56 = vor.u32 %v10675_v61, %v10401_v44  ;;  %v10380_v44 = vor.u32 %v10668_v26, %v10377_v4  ;;  %v10319_v26 = vld [vmem:[%s11361_s21] sm:$0xf] }
 0x8b4   : > { %v7172_v52 = vmul.f32 %v15134_v2, %v15134_v2  ;;  %7579 = vmatpush.bf16.msrb.mxu1 %v10404_v56 }
 0x8b6   : > { %7184 = vadd.xlane.f32.xlu0 %v7172_v52  ;;  %v10408_v52 = vor.u32 %v10678_v47, %v10407_v11  ;;  %v10359_v11 = vld [vmem:[%s11361_s21 + $0x48] sm:$0xf]  ;;  %v10666_v47 = vld [vmem:[%s11361_s21 + $0x54] sm:$0xf0] }
 0x8b8   : > { %7612 = vmatpush.bf16.msrb.mxu2 %v10408_v52  ;;  %v10352_v52 = vor.u32 %v10665_v32, %v10351_v21  ;;  %v10657_v32 = vld [vmem:[%s11361_s21 + $0xc] sm:$0xf0] }
 0x8bc   : > { %7613 = vmatpush.bf16.msrb.mxu2 %v10392_v59  ;;  %v10659_v59 = vld [vmem:[%s11361_s21 + $0x24] sm:$0xf] }
 0x8bf   : > { %v7142_v20 = vpop.xlane.xlu2 %7141 }
 0x8c0   : > { %v7155_v12 = vmul.f32 %v7142_v20, %v17837_v5  ;;  %v10676_v20 = vld [vmem:[%s11361_s21 + $0xac] sm:$0xf]  ;;  %7614 = vmatpush.bf16.msrb.mxu2 %v10376_v8 }
 0x8c2   : > { %v15140_v50 = vsub.f32 %v15099_v39, %v7155_v12  ;;  %v10409_v12 = vld [vmem:[%s11361_s21 + $0xb8] sm:$0xf0] }
 0x8c4   : > { %v7173_v57 = vmul.f32 %v15140_v50, %v15140_v50 }
 0x8c6   : > { %7186 = vadd.xlane.f32.xlu2 %v7173_v57  ;;  %v10383_v57 = vld [vmem:[%s11361_s21 + $0x80] sm:$0xf] }
 0x8c7   : > { %v7144_v3 = vpop.xlane.xlu0 %7143 }
 0x8c8   : > { %v7156_v19 = vmul.f32 %v7144_v3, %v17837_v5 }
 0x8ca   : > { %v15146_v24 = vsub.f32 %v15102_v30, %v7156_v19 }
 0x8cc   : > { %v7174_v17 = vmul.f32 %v15146_v24, %v15146_v24 }
 0x8ce   : > { %7188 = vadd.xlane.f32.xlu0 %v7174_v17  ;;  %v10412_v17 = vor.u32 %v10676_v20, %v10409_v12  ;;  %v10356_v12 = vor.u32 %v10663_v58, %v10353_v29  ;;  %v10655_v58 = vld [vmem:[%s11361_s21 + $0x4] sm:$0xf]  ;;  %v10321_v29 = vld [vmem:[%s11361_s21 + $0x10] sm:$0xf0] }
 0x8cf   : > { %v7146_v13 = vpop.xlane.xlu0 %7145  ;;  %v10324_v8 = vor.u32 %v10655_v58, %v10321_v29 }
 0x8d0   : > { %v7157_v35 = vmul.f32 %v7146_v13, %v17837_v5  ;;  %v10673_v13 = vld [vmem:[%s11361_s21 + $0x8c] sm:$0xf0]  ;;  %7645 = vmatpush.bf16.msrb.mxu3 %v10412_v17 }
 0x8d1   : > { %v10384_v27 = vor.u32 %v10673_v13, %v10383_v57  ;;  %v10360_v57 = vor.u32 %v10666_v47, %v10359_v11  ;;  %v10658_v11 = vld [vmem:[%s11361_s21 + $0x14] sm:$0xf0]  ;;  %v10656_v47 = vld [vmem:[%s11361_s21 + $0xc] sm:$0xf] }
 0x8d2   : > { %v15152_v33 = vsub.f32 %v15105_v7, %v7157_v35  ;;  %v10671_v35 = vld [vmem:[%s11361_s21 + $0x84] sm:$0xf] }
 0x8d3   : > { %7547 = vmatpush.bf16.msrb.mxu0 %v10384_v27  ;;  %7615 = vmatpush.bf16.msrb.mxu2 %v10360_v57 }
 0x8d4   : > { %v7175_v48 = vmul.f32 %v15152_v33, %v15152_v33 }
 0x8d6   : > { %7190 = vadd.xlane.f32.xlu1 %v7175_v48  ;;  %v10385_v48 = vld [vmem:[%s11361_s21 + $0x90] sm:$0xf0] }
 0x8d7   : > { %v10388_v42 = vor.u32 %v10671_v35, %v10385_v48  ;;  %7616 = vmatpush.bf16.msrb.mxu2 %v10344_v10 }
 0x8d9   : > { %7580 = vmatpush.bf16.msrb.mxu1 %v10388_v42 }
 0x8dd   : > { %7581 = vmatpush.bf16.msrb.mxu1 %v10372_v6 }
 0x8e1   : > { %7582 = vmatpush.bf16.msrb.mxu1 %v10356_v12 }
 0x8fc   : > { %v7179_v51 = vpop.xlane.xlu1 %7178 }
 0x8fd   : > { %v7196_v45 = vmul.f32 %v7179_v51, %v17837_v5  ;;  %v10396_v51 = vor.u32 %v10672_v18, %v10393_v36  ;;  %v15238_v18 = vld [vmem:[%s17840_s23] ss:$0 sm:$0xff] }
 0x8ff   : > { %v15165_v22 = vadd.f32 1e-06, %v7196_v45  ;;  %v10669_v45 = vld [vmem:[%s11361_s21 + $0x6c] sm:$0xf0]  ;;  %7646 = vmatpush.bf16.msrb.mxu3 %v10396_v51  ;;  %v15255_v51 = vld [vmem:[%s17843_s5] ss:$0 sm:$0xff] }
 0x900   : > { %v10368_v14 = vor.u32 %v10669_v45, %v10367_v53  ;;  %v10335_v53 = vld [vmem:[%s11361_s21 + $0x20] sm:$0xf]  ;;  %v10337_v45 = vld [vmem:[%s11361_s21 + $0x30] sm:$0xf0] }
 0x901   : > { %11022 = vrsqrt.f32 %v15165_v22  ;;  %vm7220_vm4 = vweird.f32 %v15165_v22  ;;  %v10340_v43 = vor.u32 %v10659_v59, %v10337_v45 }
 0x902   : > { %7548 = vmatpush.bf16.msrb.mxu0 %v10368_v14  ;;  %v10345_v14 = vld [vmem:[%s11361_s21 + $0x38] sm:$0xf0] }
 0x903   : > { %7647 = vmatpush.bf16.msrb.mxu3 %v10380_v44  ;;  %7583 = vmatpush.bf16.msrb.mxu1 %v10340_v43  ;;  %v10327_v44 = vld [vmem:[%s11361_s21 + $0x8] sm:$0xf] }
 0x904   : > { %v7181_v41 = vpop.xlane.xlu2 %7180  ;;  %v7148_v49 = vpop.xlane.xlu1 %7147 }
 0x905   : > { %v7197_v3 = vmul.f32 %v7181_v41, %v17837_v5  ;;  %v7158_v19 = vmul.f32 %v7148_v49, %v17837_v5  ;;  %v10664_v41 = vld [vmem:[%s11361_s21 + $0x4c] sm:$0xf]  ;;  %v10361_v49 = vld [vmem:[%s11361_s21 + $0x58] sm:$0xf0] }
 0x906   : > { %v10364_v13 = vor.u32 %v10664_v41, %v10361_v49  ;;  %7549 = vmatpush.bf16.msrb.mxu0 %v10352_v52  ;;  %v10328_v49 = vor.u32 %v10658_v11, %v10327_v44 }
 0x907   : > { %v15193_v31 = vpop.eup %11022  ;;  %v15195_v55 = vadd.f32 1e-06, %v7197_v3  ;;  %v15198_v1 = vsub.f32 %v15118_v28, %v7158_v19  ;;  %7584 = vmatpush.bf16.msrb.mxu1 %v10324_v8 }
 0x908   : > { %v7215_v40 = vmul.f32 %v15193_v31, %v15165_v22  ;;  %vm7221_vm3 = vweird.f32 %v15193_v31  ;;  %7648 = vmatpush.bf16.msrb.mxu3 %v10364_v13  ;;  %7617 = vmatpush.bf16.msrb.mxu2 %v10328_v49 }
 0x909   : > { %11024 = vrsqrt.f32 %v15195_v55  ;;  %v7176_v54 = vmul.f32 %v15198_v1, %v15198_v1  ;;  %vm7222_vm5 = vmor %vm7220_vm4, %vm7221_vm3  ;;  %vm7230_vm7 = vweird.f32 %v15195_v55 }
 0x90a   : > { %v7216_v0 = vmul.f32 %v15193_v31, %v7215_v40  ;;  %v10661_v40 = vld [vmem:[%s11361_s21 + $0x2c] sm:$0xf0] }
 0x90b   : > { %7192 = vadd.xlane.f32.xlu2 %v7176_v54 }
 0x90c   : > { %v7217_v61 = vmul.f32 0.5, %v7216_v0  ;;  %v10660_v0 = vld [vmem:[%s11361_s21 + $0x2c] sm:$0xf] }
 0x90d   : > { %v10348_v6 = vor.u32 %v10660_v0, %v10345_v14 }
 0x90e   : > { %v7218_v56 = vsub.f32 1.5, %v7217_v61  ;;  %v10320_v61 = vor.u32 %v10657_v32, %v10319_v26 }
 0x90f   : > { %v11025_v20 = vpop.eup %11024  ;;  %7649 = vmatpush.bf16.msrb.mxu3 %v10348_v6 }
 0x910   : > { %v7219_v3 = vmul.f32 %v15193_v31, %v7218_v56  ;;  %v7225_v19 = vmul.f32 %v11025_v20, %v15195_v55  ;;  %v7150_v17 = vpop.xlane.xlu1 %7149  ;;  %vm7231_vm6 = vweird.f32 %v11025_v20  ;;  %v10329_v56 = vld [vmem:[%s11361_s21 + $0x18] sm:$0xf0] }
 0x911   : > { %v7159_v35 = vmul.f32 %v7150_v17, %v17837_v5  ;;  %vm15241_vm8 = vmor %vm7230_vm7, %vm7231_vm6  ;;  %v10332_v52 = vor.u32 %v10656_v47, %v10329_v56 }
 0x912   : > { %v7226_v48 = vmul.f32 %v11025_v20, %v7225_v19  ;;  %v7223_v27 = vsel %vm7222_vm5, %v15193_v31, %v7219_v3 }
 0x913   : > { %v15230_v16 = vsub.f32 %v15123_v9, %v7159_v35  ;;  %v7304_v31 = vmul.f32 %v7223_v27, %v15110_v25  ;;  %v10336_v25 = vor.u32 %v10661_v40, %v10335_v53  ;;  %7650 = vmatpush.bf16.msrb.mxu3 %v10332_v52 }
 0x914   : > { %v7227_v38 = vmul.f32 0.5, %v7226_v48 }
 0x915   : > { %v7177_v55 = vmul.f32 %v15230_v16, %v15230_v16  ;;  %v7316_v4 = vmul.f32 %v15238_v18, %v7304_v31  ;;  %7550 = vmatpush.bf16.msrb.mxu0 %v10336_v25 }
 0x916   : > { %v7228_v22 = vsub.f32 1.5, %v7227_v38 }
 0x917   : > { %7194 = vadd.xlane.f32.xlu0 %v7177_v55 }
 0x918   : > { %v7229_v36 = vmul.f32 %v11025_v20, %v7228_v22 }
 0x919   : > { %7551 = vmatpush.bf16.msrb.mxu0 %v10320_v61 }
 0x91a   : > { %v7233_v54 = vsel %vm15241_vm8, %v11025_v20, %v7229_v36 }
 0x91b   : > { %v7305_v21 = vmul.f32 %v7233_v54, %v15116_v60  ;;  %v7328_v60 = vadd.f32 %v15255_v51, %v7316_v4 }
 0x91d   : > { %v7317_v41 = vmul.f32 %v15238_v18, %v7305_v21 }
 0x91f   : > { %v7329_v20 = vadd.f32 %v15255_v51, %v7317_v41 }
 0x921   : > { %v7183_v12 = vpop.xlane.xlu2 %7182  ;;  %v7337_v57 = vpack.c.bf16 %v7329_v20, %v7328_v60 }
 0x922   : > { %v7198_v3 = vmul.f32 %v7183_v12, %v17837_v5 }
 0x923   : > { %7552 = vmatmul.bf16.vlgmr.msrb.gmra.mxu0 %v7337_v57  ;;  %7585 = vmatmul.bf16.vlgmr.msrb.gmra.mxu1 %v7337_v57 }
 0x924   : > { %v7207_v19 = vadd.f32 1e-06, %v7198_v3  ;;  %7618 = vmatmul.bf16.vlgmr.msrb.gmra.mxu2 %v7337_v57  ;;  %7651 = vmatmul.bf16.vlgmr.msrb.gmra.mxu3 %v7337_v57 }
 0x926   : > { %11026 = vrsqrt.f32 %v7207_v19  ;;  %vm7240_vm10 = vweird.f32 %v7207_v19 }
 0x929   : > { %v7185_v17 = vpop.xlane.xlu0 %7184 }
 0x92a   : > { %v7199_v13 = vmul.f32 %v7185_v17, %v17837_v5 }
 0x92c   : > { %v11027_v35 = vpop.eup %11026  ;;  %v7208_v48 = vadd.f32 1e-06, %v7199_v13 }
 0x92d   : > { %v7235_v27 = vmul.f32 %v11027_v35, %v7207_v19  ;;  %vm7241_vm9 = vweird.f32 %v11027_v35 }
 0x92e   : > { %11028 = vrsqrt.f32 %v7208_v48  ;;  %vm7242_vm11 = vmor %vm7240_vm10, %vm7241_vm9  ;;  %vm7250_vm13 = vweird.f32 %v7208_v48 }
 0x92f   : > { %v7236_v38 = vmul.f32 %v11027_v35, %v7235_v27 }
 0x931   : > { %v7237_v22 = vmul.f32 0.5, %v7236_v38 }
 0x933   : > { %v7238_v31 = vsub.f32 1.5, %v7237_v22 }
 0x934   : > { %v11029_v42 = vpop.eup %11028 }
 0x935   : > { %v7245_v36 = vmul.f32 %v11029_v42, %v7208_v48  ;;  %v7239_v53 = vmul.f32 %v11027_v35, %v7238_v31  ;;  %vm7251_vm12 = vweird.f32 %v11029_v42 }
 0x936   : > { %vm7252_vm14 = vmor %vm7250_vm13, %vm7251_vm12 }
 0x937   : > { %v7246_v40 = vmul.f32 %v11029_v42, %v7245_v36  ;;  %v7243_v55 = vsel %vm7242_vm11, %v11027_v35, %v7239_v53 }
 0x938   : > { %v7306_v37 = vmul.f32 %v7243_v55, %v15128_v34 }
 0x939   : > { %v7247_v59 = vmul.f32 0.5, %v7246_v40  ;;  %v7187_v25 = vpop.xlane.xlu2 %7186 }
 0x93a   : > { %v7200_v62 = vmul.f32 %v7187_v25, %v17837_v5  ;;  %v7318_v14 = vmul.f32 %v15238_v18, %v7306_v37 }
 0x93b   : > { %v7248_v45 = vsub.f32 1.5, %v7247_v59 }
 0x93c   : > { %v7209_v43 = vadd.f32 1e-06, %v7200_v62  ;;  %v7330_v6 = vadd.f32 %v15255_v51, %v7318_v14 }
 0x93d   : > { %v7249_v54 = vmul.f32 %v11029_v42, %v7248_v45 }
 0x93e   : > { %11030 = vrsqrt.f32 %v7209_v43  ;;  %vm7260_vm0 = vweird.f32 %v7209_v43 }
 0x93f   : > { %v7253_v10 = vsel %vm7252_vm14, %v11029_v42, %v7249_v54 }
 0x940   : > { %v7307_v0 = vmul.f32 %v7253_v10, %v15134_v2 }
 0x941   : > { %v7189_v26 = vpop.xlane.xlu0 %7188 }
 0x942   : > { %v7319_v4 = vmul.f32 %v15238_v18, %v7307_v0  ;;  %v7201_v21 = vmul.f32 %v7189_v26, %v17837_v5 }
 0x944   : > { %v7331_v32 = vadd.f32 %v15255_v51, %v7319_v4  ;;  %v11031_v34 = vpop.eup %11030  ;;  %v7210_v58 = vadd.f32 1e-06, %v7201_v21 }
 0x945   : > { %v7255_v29 = vmul.f32 %v11031_v34, %v7209_v43  ;;  %vm7261_vm15 = vweird.f32 %v11031_v34 }
 0x946   : > { %v7338_v61 = vpack.c.bf16 %v7331_v32, %v7330_v6  ;;  %11032 = vrsqrt.f32 %v7210_v58  ;;  %vm7262_vm1 = vmor %vm7260_vm0, %vm7261_vm15  ;;  %vm7270_vm3 = vweird.f32 %v7210_v58 }
 0x947   : > { %v7256_v8 = vmul.f32 %v11031_v34, %v7255_v29 }
 0x948   : > { %7557 = vmatmul.bf16.gmra.mxu0 %v7338_v61  ;;  %7590 = vmatmul.bf16.gmra.mxu1 %v7338_v61 }
 0x949   : > { %7623 = vmatmul.bf16.gmra.mxu2 %v7338_v61  ;;  %7656 = vmatmul.bf16.gmra.mxu3 %v7338_v61  ;;  %v7257_v2 = vmul.f32 0.5, %v7256_v8 }
 0x94b   : > { %v7258_v44 = vsub.f32 1.5, %v7257_v2 }
 0x94c   : > { %v11033_v11 = vpop.eup %11032 }
 0x94d   : > { %v7259_v47 = vmul.f32 %v11031_v34, %v7258_v44  ;;  %v7265_v41 = vmul.f32 %v11033_v11, %v7210_v58  ;;  %vm7271_vm2 = vweird.f32 %v11033_v11 }
 0x94e   : > { %vm7272_vm4 = vmor %vm7270_vm3, %vm7271_vm2 }
 0x94f   : > { %v7266_v49 = vmul.f32 %v11033_v11, %v7265_v41  ;;  %v7263_v56 = vsel %vm7262_vm1, %v11031_v34, %v7259_v47 }
 0x950   : > { %v7308_v20 = vmul.f32 %v7263_v56, %v15140_v50  ;;  %v7191_v50 = vpop.xlane.xlu1 %7190 }
 0x951   : > { %v7267_v52 = vmul.f32 0.5, %v7266_v49  ;;  %v7202_v27 = vmul.f32 %v7191_v50, %v17837_v5 }
 0x952   : > { %v7320_v19 = vmul.f32 %v15238_v18, %v7308_v20 }
 0x953   : > { %v7268_v60 = vsub.f32 1.5, %v7267_v52  ;;  %v7211_v38 = vadd.f32 1e-06, %v7202_v27 }
 0x954   : > { %v7332_v13 = vadd.f32 %v15255_v51, %v7320_v19 }
 0x955   : > { %v7269_v12 = vmul.f32 %v11033_v11, %v7268_v60  ;;  %11034 = vrsqrt.f32 %v7211_v38  ;;  %vm7280_vm6 = vweird.f32 %v7211_v38 }
 0x957   : > { %v7273_v57 = vsel %vm7272_vm4, %v11033_v11, %v7269_v12 }
 0x958   : > { %v7309_v3 = vmul.f32 %v7273_v57, %v15146_v24 }
 0x95a   : > { %v7321_v17 = vmul.f32 %v15238_v18, %v7309_v3 }
 0x95b   : > { %v11035_v22 = vpop.eup %11034 }
 0x95c   : > { %v7333_v35 = vadd.f32 %v15255_v51, %v7321_v17  ;;  %v7275_v24 = vmul.f32 %v11035_v22, %v7211_v38  ;;  %vm7281_vm5 = vweird.f32 %v11035_v22 }
 0x95d   : > { %vm7282_vm7 = vmor %vm7280_vm6, %vm7281_vm5 }
 0x95e   : > { %v7339_v48 = vpack.c.bf16 %v7333_v35, %v7332_v13  ;;  %v7276_v31 = vmul.f32 %v11035_v22, %v7275_v24 }
 0x960   : > { %7562 = vmatmul.bf16.gmra.mxu0 %v7339_v48  ;;  %7595 = vmatmul.bf16.gmra.mxu1 %v7339_v48  ;;  %v7277_v40 = vmul.f32 0.5, %v7276_v31 }
 0x961   : > { %7628 = vmatmul.bf16.gmra.mxu2 %v7339_v48  ;;  %7661 = vmatmul.bf16.gmra.mxu3 %v7339_v48 }
 0x962   : > { %v7278_v59 = vsub.f32 1.5, %v7277_v40 }
 0x964   : > { %v7279_v25 = vmul.f32 %v11035_v22, %v7278_v59 }
 0x966   : > { %v7283_v37 = vsel %vm7282_vm7, %v11035_v22, %v7279_v25 }
 0x967   : > { %v7310_v10 = vmul.f32 %v7283_v37, %v15152_v33  ;;  %v7374_v33 = vld [vmem:[%s11366_s27] sm:$0xf] }
 0x968   : > { %v15302_v58 = vperm.slane %v7374_v33, 0  ;;  %v15312_v2 = vperm.slane %v7374_v33, 1  ;;  %v15314_v11 = vperm.slane %v7374_v33, 2  ;;  %v15336_v17 = vperm.slane %v7374_v33, 3 }
 0x969   : > { %v7322_v4 = vmul.f32 %v15238_v18, %v7310_v10 }
 0x96b   : > { %v7334_v6 = vadd.f32 %v15255_v51, %v7322_v4 }
 0x97e   : > { %v7193_v42 = vpop.xlane.xlu2 %7192 }
 0x97f   : > { %v7203_v36 = vmul.f32 %v7193_v42, %v17837_v5 }
 0x981   : > { %v7212_v53 = vadd.f32 1e-06, %v7203_v36 }
 0x983   : > { %11036 = vrsqrt.f32 %v7212_v53  ;;  %vm7290_vm9 = vweird.f32 %v7212_v53 }
 0x989   : > { %v11037_v55 = vpop.eup %11036 }
 0x98a   : > { %v7285_v45 = vmul.f32 %v11037_v55, %v7212_v53  ;;  %vm7291_vm8 = vweird.f32 %v11037_v55  ;;  %v7195_v37 = vpop.xlane.xlu0 %7194 }
 0x98b   : > { %vm7292_vm10 = vmor %vm7290_vm9, %vm7291_vm8 }
 0x98c   : > { %v7286_v62 = vmul.f32 %v11037_v55, %v7285_v45 }
 0x98e   : > { %v7287_v54 = vmul.f32 0.5, %v7286_v62 }
 0x990   : > { %v7288_v43 = vsub.f32 1.5, %v7287_v54 }
 0x992   : > { %v7289_v0 = vmul.f32 %v11037_v55, %v7288_v43 }
 0x994   : > { %v7293_v14 = vsel %vm7292_vm10, %v11037_v55, %v7289_v0 }
 0x995   : > { %v7311_v26 = vmul.f32 %v7293_v14, %v15198_v1  ;;  %v7204_v14 = vmul.f32 %v7195_v37, %v17837_v5 }
 0x997   : > { %v7323_v21 = vmul.f32 %v15238_v18, %v7311_v26  ;;  %v15372_v33 = vadd.f32 1e-06, %v7204_v14 }
 0x999   : > { %v7335_v32 = vadd.f32 %v15255_v51, %v7323_v21  ;;  %11038 = vrsqrt.f32 %v15372_v33  ;;  %vm7300_vm14 = vweird.f32 %v15372_v33 }
 0x99b   : > { %v7340_v34 = vpack.c.bf16 %v7335_v32, %v7334_v6 }
 0x99d   : > { %7567 = vmatmul.bf16.gmra.mxu0 %v7340_v34  ;;  %7600 = vmatmul.bf16.gmra.mxu1 %v7340_v34 }
 0x99e   : > { %7633 = vmatmul.bf16.gmra.mxu2 %v7340_v34  ;;  %7666 = vmatmul.bf16.gmra.mxu3 %v7340_v34 }
 0x9a0   : > { %v7553_v29 = vpop.f32.mrf.mxu0  ;;  %v7586_v44 = vpop.f32.mrf.mxu1 }
 0x9a1   : > { %v15305_v61 = vadd.f32 %v7553_v29, %v15302_v58  ;;  %v15319_v49 = vadd.f32 %v7586_v44, %v15312_v2 }
 0x9a3   : > { %v15308_v1 = vmul.f32 0.70710677, %v15305_v61  ;;  %v15326_v60 = vmul.f32 0.70710677, %v15319_v49 }
 0x9a5   : > { %v7748_v8 = vmul.f32 %v15308_v1, %v15308_v1  ;;  %v7788_v57 = vmul.f32 %v15326_v60, %v15326_v60 }
 0x9a7   : > { %v15316_v47 = vmin.f32 %v7748_v8, 16.0  ;;  %v7619_v41 = vpop.f32.mrf.mxu2  ;;  %v7652_v13 = vpop.f32.mrf.mxu3  ;;  %v15338_v35 = vmin.f32 %v7788_v57, 16.0 }
 0x9a8   : > { %v15322_v56 = vadd.f32 %v7619_v41, %v15314_v11  ;;  %v15343_v27 = vadd.f32 %v7652_v13, %v15336_v17  ;;  %v7555_v42 = vpop.f32.mrf.mxu0 }
 0x9a9   : > { %v7761_v52 = vmul.f32 3.8918573e-05, %v15316_v47  ;;  %v7801_v38 = vmul.f32 3.8918573e-05, %v15338_v35  ;;  %v15352_v53 = vadd.f32 %v7555_v42, %v15302_v58  ;;  %v7750_v6 = vmul.f32 2.1237322e-06, %v15316_v47  ;;  %v7588_v42 = vpop.f32.mrf.mxu1 }
 0x9aa   : > { %v15329_v20 = vmul.f32 0.70710677, %v15322_v56  ;;  %v15349_v31 = vmul.f32 0.70710677, %v15343_v27 }
 0x9ab   : > { %v7762_v12 = vadd.f32 0.001143296, %v7761_v52  ;;  %v7802_v36 = vadd.f32 0.001143296, %v7801_v38  ;;  %v15358_v45 = vmul.f32 0.70710677, %v15352_v53 }
 0x9ac   : > { %v7828_v3 = vmul.f32 %v15329_v20, %v15329_v20  ;;  %v7868_v55 = vmul.f32 %v15349_v31, %v15349_v31  ;;  %v7751_v41 = vadd.f32 0.00028619796, %v7750_v6  ;;  %v7790_v38 = vmul.f32 2.1237322e-06, %v15338_v35 }
 0x9ad   : > { %v7763_v19 = vmul.f32 %v7762_v12, %v15316_v47  ;;  %v7803_v25 = vmul.f32 %v7802_v36, %v15338_v35  ;;  %v7908_v0 = vmul.f32 %v15358_v45, %v15358_v45  ;;  %v15386_v36 = vpop.eup %11038 }
 0x9ae   : > { %v15340_v48 = vmin.f32 %v7828_v3, 16.0  ;;  %v15362_v43 = vmin.f32 %v7868_v55, 16.0  ;;  %vm7301_vm11 = vweird.f32 %v15386_v36 }
 0x9af   : > { %v7764_v50 = vadd.f32 0.014752088, %v7763_v19  ;;  %v7804_v10 = vadd.f32 0.014752088, %v7803_v25  ;;  %v15370_v34 = vmin.f32 %v7908_v0, 16.0  ;;  %v7752_v19 = vmul.f32 %v7751_v41, %v15316_v47  ;;  %vm15462_vm1 = vmor %vm7300_vm14, %vm7301_vm11 }
 0x9b0   : > { %v7841_v22 = vmul.f32 3.8918573e-05, %v15340_v48  ;;  %v7881_v21 = vmul.f32 3.8918573e-05, %v15362_v43  ;;  %v7830_v6 = vmul.f32 2.1237322e-06, %v15340_v48 }
 0x9b1   : > { %v7765_v24 = vmul.f32 %v7764_v50, %v15316_v47  ;;  %v7805_v32 = vmul.f32 %v7804_v10, %v15338_v35  ;;  %v7921_v5 = vmul.f32 3.8918573e-05, %v15370_v34  ;;  %v7295_v10 = vmul.f32 %v15386_v36, %v15372_v33 }
 0x9b2   : > { %v7842_v40 = vadd.f32 0.001143296, %v7841_v22  ;;  %v7882_v44 = vadd.f32 0.001143296, %v7881_v21 }
 0x9b3   : > { %v7766_v59 = vadd.f32 0.112945676, %v7765_v24  ;;  %v7806_v52 = vadd.f32 0.112945676, %v7805_v32  ;;  %v7922_v50 = vadd.f32 0.001143296, %v7921_v5 }
 0x9b4   : > { %v7843_v62 = vmul.f32 %v7842_v40, %v15340_v48  ;;  %v7883_v3 = vmul.f32 %v7882_v44, %v15362_v43  ;;  %v7753_v40 = vadd.f32 0.0036580483, %v7752_v19  ;;  %v7296_v44 = vmul.f32 %v15386_v36, %v7295_v10 }
 0x9b5   : > { %v7767_v54 = vmul.f32 %v7766_v59, %v15316_v47  ;;  %v7807_v13 = vmul.f32 %v7806_v52, %v15338_v35  ;;  %v15389_v59 = vadd.f32 %v7588_v42, %v15312_v2  ;;  %v7923_v25 = vmul.f32 %v7922_v50, %v15370_v34 }
 0x9b6   : > { %v7844_v26 = vadd.f32 0.014752088, %v7843_v62  ;;  %v7884_v24 = vadd.f32 0.014752088, %v7883_v3  ;;  %v7791_v62 = vadd.f32 0.00028619796, %v7790_v38  ;;  %v7754_v14 = vmul.f32 %v7753_v40, %v15316_v47 }
 0x9b7   : > { %v7768_v4 = vadd.f32 0.4994258, %v7767_v54  ;;  %v7808_v55 = vadd.f32 0.4994258, %v7807_v13  ;;  %v15393_v54 = vmul.f32 0.70710677, %v15389_v59 }
 0x9b8   : > { %v7845_v29 = vmul.f32 %v7844_v26, %v15340_v48  ;;  %v7885_v0 = vmul.f32 %v7884_v24, %v15362_v43  ;;  %v7924_v32 = vadd.f32 0.014752088, %v7923_v25  ;;  %v7755_v5 = vadd.f32 0.05243302, %v7754_v14 }
 0x9b9   : > { %v7769_v8 = vmul.f32 %v7768_v4, %v15316_v47  ;;  %v7948_v26 = vmul.f32 %v15393_v54, %v15393_v54  ;;  %v7809_v21 = vmul.f32 %v7808_v55, %v15338_v35  ;;  %v7831_v19 = vadd.f32 0.00028619796, %v7830_v6 }
 0x9ba   : > { %v7846_v12 = vadd.f32 0.112945676, %v7845_v29  ;;  %v7792_v29 = vmul.f32 %v7791_v62, %v15338_v35  ;;  %v7886_v41 = vadd.f32 0.112945676, %v7885_v0  ;;  %v7925_v13 = vmul.f32 %v7924_v32, %v15370_v34 }
 0x9bb   : > { %v15378_v57 = vadd.f32 1.0, %v7769_v8  ;;  %v15408_v52 = vmin.f32 %v7948_v26, 16.0  ;;  %v15412_v3 = vadd.f32 1.0, %v7809_v21  ;;  %v7297_v24 = vmul.f32 0.5, %v7296_v44 }
 0x9bc   : > { %v7847_v22 = vmul.f32 %v7846_v12, %v15340_v48  ;;  %v7793_v38 = vadd.f32 0.0036580483, %v7792_v29  ;;  %v7887_v42 = vmul.f32 %v7886_v41, %v15362_v43  ;;  %v7756_v55 = vmul.f32 %v7755_v5, %v15316_v47 }
 0x9bd   : > { %11040 = vrcp.f32 %v15378_v57  ;;  %v7961_v50 = vmul.f32 3.8918573e-05, %v15408_v52  ;;  %v7832_v62 = vmul.f32 %v7831_v19, %v15340_v48  ;;  %v7298_v14 = vsub.f32 1.5, %v7297_v24 }
 0x9be   : > { %v7848_v37 = vadd.f32 0.4994258, %v7847_v22  ;;  %11042 = vrcp.f32 %v15412_v3  ;;  %v7794_v0 = vmul.f32 %v7793_v38, %v15338_v35  ;;  %v7870_v26 = vmul.f32 2.1237322e-06, %v15362_v43 }
 0x9bf   : > { %v7962_v40 = vadd.f32 0.001143296, %v7961_v50  ;;  %v7888_v21 = vadd.f32 0.4994258, %v7887_v42  ;;  %v7757_v6 = vadd.f32 0.18741608, %v7756_v55  ;;  %vm7776_vm13 = vweird.f32 %v15378_v57 }
 0x9c0   : > { %v7849_v8 = vmul.f32 %v7848_v37, %v15340_v48  ;;  %v7926_v37 = vadd.f32 0.112945676, %v7925_v13  ;;  %v7795_v41 = vadd.f32 0.05243302, %v7794_v0  ;;  %v7871_v19 = vadd.f32 0.00028619796, %v7870_v26  ;;  %v7621_v0 = vpop.f32.mrf.mxu2 }
 0x9c1   : > { %v7963_v10 = vmul.f32 %v7962_v40, %v15408_v52  ;;  %v7889_v13 = vmul.f32 %v7888_v21, %v15362_v43  ;;  %v7758_v38 = vmul.f32 %v7757_v6, %v15316_v47  ;;  %v7780_v24 = vand.u32 2147483647, %v15378_v57 }
 0x9c2   : > { %v15416_v22 = vadd.f32 1.0, %v7849_v8  ;;  %v7833_v8 = vadd.f32 0.0036580483, %v7832_v62  ;;  %v7927_v44 = vmul.f32 %v7926_v37, %v15370_v34  ;;  %v7782_v42 = vand.u32 2147483648, %v15378_v57 }
 0x9c3   : > { %v15401_v4 = vpop.eup %11040  ;;  %v7964_v32 = vadd.f32 0.014752088, %v7963_v10  ;;  %v7796_v37 = vmul.f32 %v7795_v41, %v15338_v35  ;;  %v7910_v10 = vmul.f32 2.1237322e-06, %v15370_v34  ;;  %v7872_v26 = vmul.f32 %v7871_v19, %v15362_v43 }
 0x9c4   : > { %v7772_v12 = vmul.f32 %v15401_v4, %v15378_v57  ;;  %11044 = vrcp.f32 %v15416_v22  ;;  %v15428_v5 = vpop.eup %11042  ;;  %vm7777_vm12 = vweird.f32 %v15401_v4  ;;  %v7928_v62 = vadd.f32 0.4994258, %v7927_v44 }
 0x9c5   : > { %v7965_v40 = vmul.f32 %v7964_v32, %v15408_v52  ;;  %v7812_v47 = vmul.f32 %v15428_v5, %v15412_v3  ;;  %v15450_v21 = vadd.f32 1.0, %v7889_v13  ;;  %v15453_v6 = vadd.f32 %v7621_v0, %v15314_v11  ;;  %vm15456_vm15 = vmor %vm7776_vm13, %vm7777_vm12 }
 0x9c6   : > { %v7773_v25 = vsub.f32 1.0, %v7772_v12  ;;  %v7299_v12 = vmul.f32 %v15386_v36, %v7298_v14  ;;  %v7759_v57 = vadd.f32 1.1283791, %v7758_v38  ;;  %vm7781_vm0 = vcmp.eq.f32.partialorder %v7780_v24, 8.507059e+37 }
 0x9c7   : > { %v7783_v41 = vor.u32 1.1754944e-38, %v7782_v42  ;;  %v7929_v33 = vmul.f32 %v7928_v62, %v15370_v34  ;;  %v7797_v38 = vadd.f32 0.18741608, %v7796_v37  ;;  %v7911_v24 = vadd.f32 0.00028619796, %v7910_v10 }
 0x9c8   : > { %v7774_v29 = vmul.f32 %v15401_v4, %v7773_v25  ;;  %v7834_v25 = vmul.f32 %v7833_v8, %v15340_v48  ;;  %v7303_v13 = vsel %vm15462_vm1, %v15386_v36, %v7299_v12  ;;  %v7813_v0 = vsub.f32 1.0, %v7812_v47 }
 0x9c9   : > { %v7873_v28 = vadd.f32 0.0036580483, %v7872_v26  ;;  %11046 = vrcp.f32 %v15450_v21  ;;  %v7760_v36 = vmul.f32 %v7759_v57, %v15308_v1  ;;  %v7312_v62 = vmul.f32 %v7303_v13, %v15230_v16 }
 0x9ca   : > { %v15433_v50 = vpop.eup %11044  ;;  %v7775_v55 = vadd.f32 %v15401_v4, %v7774_v29  ;;  %v7966_v29 = vadd.f32 0.112945676, %v7965_v40  ;;  %v7835_v19 = vadd.f32 0.05243302, %v7834_v25  ;;  %v15474_v40 = vmul.f32 0.70710677, %v15453_v6 }
 0x9cb   : > { %v7852_v14 = vmul.f32 %v15433_v50, %v15416_v22  ;;  %v15483_v25 = vadd.f32 1.0, %v7929_v33  ;;  %v15487_v37 = vmul.f32 0.5, %v15305_v61  ;;  %v7912_v47 = vmul.f32 %v7911_v24, %v15370_v34 }
 0x9cc   : > { %v7779_v44 = vsel %vm15456_vm15, %v15401_v4, %v7775_v55  ;;  %v7950_v4 = vmul.f32 2.1237322e-06, %v15408_v52  ;;  %v7967_v42 = vmul.f32 %v7966_v29, %v15408_v52  ;;  %v7988_v55 = vmul.f32 %v15474_v40, %v15474_v40 }
 0x9cd   : > { %v7853_v9 = vsub.f32 1.0, %v7852_v14  ;;  %v7784_v32 = vsel %vm7781_vm0, %v7783_v41, %v7779_v44  ;;  %v7836_v12 = vmul.f32 %v7835_v19, %v15340_v48  ;;  %v7814_v26 = vmul.f32 %v15428_v5, %v7813_v0 }
 0x9ce   : > { %v15490_v10 = vmin.f32 %v7988_v55, 16.0  ;;  %v15492_v14 = vmul.f32 %v7784_v32, %v7760_v36  ;;  %v7874_v1 = vmul.f32 %v7873_v28, %v15362_v43  ;;  %v7798_v57 = vmul.f32 %v7797_v38, %v15338_v35 }
 0x9cf   : > { %v7854_v29 = vmul.f32 %v15433_v50, %v7853_v9  ;;  %v7951_v8 = vadd.f32 0.00028619796, %v7950_v4  ;;  %v7968_v44 = vadd.f32 0.4994258, %v7967_v42  ;;  %v15499_v61 = vpop.eup %11046  ;;  %vm7816_vm2 = vweird.f32 %v15412_v3 }
 0x9d0   : > { %v8001_v16 = vmul.f32 3.8918573e-05, %v15490_v10  ;;  %v7820_v41 = vand.u32 2147483647, %v15412_v3  ;;  %v7837_v19 = vadd.f32 0.18741608, %v7836_v12  ;;  %11048 = vrcp.f32 %v15483_v25 }
 0x9d1   : > { %vm7817_vm3 = vweird.f32 %v15428_v5  ;;  %v7822_v9 = vand.u32 2147483648, %v15412_v3  ;;  %v7913_v28 = vadd.f32 0.0036580483, %v7912_v47  ;;  %v7815_v35 = vadd.f32 %v15428_v5, %v7814_v26  ;;  %v7654_v26 = vpop.f32.mrf.mxu3 }
 0x9d2   : > { %v8002_v33 = vadd.f32 0.001143296, %v8001_v16  ;;  %v7855_v13 = vadd.f32 %v15433_v50, %v7854_v29  ;;  %vm7857_vm4 = vweird.f32 %v15433_v50  ;;  %v7875_v38 = vadd.f32 0.05243302, %v7874_v1  ;;  %vm15516_vm5 = vmor %vm7816_vm2, %vm7817_vm3 }
 0x9d3   : > { %v7892_v24 = vmul.f32 %v15499_v61, %v15450_v21  ;;  %v7952_v0 = vmul.f32 %v7951_v8, %v15408_v52  ;;  %v7969_v32 = vmul.f32 %v7968_v44, %v15408_v52  ;;  %v7799_v42 = vadd.f32 1.1283791, %v7798_v57 }
 0x9d4   : > { %v8003_v4 = vmul.f32 %v8002_v33, %v15490_v10  ;;  %v7838_v36 = vmul.f32 %v7837_v19, %v15340_v48  ;;  %vm7856_vm6 = vweird.f32 %v15416_v22  ;;  %v7862_v12 = vand.u32 2147483648, %v15416_v22 }
 0x9d5   : > { %vm15523_vm7 = vcmp.eq.f32.partialorder %v7820_v41, 8.507059e+37  ;;  %vm15527_vm8 = vmor %vm7856_vm6, %vm7857_vm4  ;;  %v7860_v3 = vand.u32 2147483647, %v15416_v22  ;;  %v7914_v29 = vmul.f32 %v7913_v28, %v15370_v34  ;;  %v7819_v48 = vsel %vm15516_vm5, %v15428_v5, %v7815_v35 }
 0x9d6   : > { %v8004_v1 = vadd.f32 0.014752088, %v8003_v4  ;;  %v15533_v57 = vpop.eup %11048  ;;  %v7823_v8 = vor.u32 1.1754944e-38, %v7822_v9  ;;  %v7859_v44 = vsel %vm15527_vm8, %v15433_v50, %v7855_v13  ;;  %v7876_v16 = vmul.f32 %v7875_v38, %v15362_v43 }
 0x9d7   : > { %v7893_v41 = vsub.f32 1.0, %v7892_v24  ;;  %v7953_v19 = vadd.f32 0.0036580483, %v7952_v0  ;;  %v15542_v33 = vadd.f32 1.0, %v7969_v32  ;;  %v7839_v28 = vadd.f32 1.1283791, %v7838_v36 }
 0x9d8   : > { %v8005_v22 = vmul.f32 %v8004_v1, %v15490_v10  ;;  %v7863_v4 = vor.u32 1.1754944e-38, %v7862_v12  ;;  %v7990_v7 = vmul.f32 2.1237322e-06, %v15490_v10  ;;  %v7324_v55 = vmul.f32 %v15238_v18, %v7312_v62 }
 0x9d9   : > { %vm7861_vm9 = vcmp.eq.f32.partialorder %v7860_v3, 8.507059e+37  ;;  %v7915_v5 = vadd.f32 0.05243302, %v7914_v29  ;;  %v7932_v9 = vmul.f32 %v15533_v57, %v15483_v25  ;;  %v7824_v35 = vsel %vm15523_vm7, %v7823_v8, %v7819_v48 }
 0x9da   : > { %v8006_v50 = vadd.f32 0.112945676, %v8005_v22  ;;  %v7864_v13 = vsel %vm7861_vm9, %v7863_v4, %v7859_v44  ;;  %v7877_v38 = vadd.f32 0.18741608, %v7876_v16  ;;  %v7336_v24 = vadd.f32 %v15255_v51, %v7324_v55 }
 0x9db   : > { %v7894_v0 = vmul.f32 %v15499_v61, %v7893_v41  ;;  %v7954_v32 = vmul.f32 %v7953_v19, %v15408_v52  ;;  %11050 = vrcp.f32 %v15542_v33  ;;  %v7800_v62 = vmul.f32 %v7799_v42, %v15326_v60 }
 0x9dc   : > { %v8007_v18 = vmul.f32 %v8006_v50, %v15490_v10  ;;  %v7840_v36 = vmul.f32 %v7839_v28, %v15329_v20  ;;  %v7991_v12 = vadd.f32 0.00028619796, %v7990_v7  ;;  %v7341_v47 = vpack.c.bf16 %v7336_v24, %v7336_v24 }
 0x9dd   : > { %v7916_v3 = vmul.f32 %v7915_v5, %v15370_v34  ;;  %v7933_v29 = vsub.f32 1.0, %v7932_v9  ;;  %v15560_v51 = vadd.f32 %v7654_v26, %v15336_v17  ;;  %v15563_v48 = vmul.f32 0.5, %v15319_v49 }
 0x9de   : > { %v8008_v1 = vadd.f32 0.4994258, %v8007_v18  ;;  %v7825_v8 = vmul.f32 %v7824_v35, %v7800_v62  ;;  %v7865_v44 = vmul.f32 %v7864_v13, %v7840_v36  ;;  %v7878_v16 = vmul.f32 %v7877_v38, %v15362_v43  ;;  %7572 = vmatmul.bf16.gmra.mxu0 %v7341_v47  ;;  %7605 = vmatmul.bf16.gmra.mxu1 %v7341_v47 }
 0x9df   : > { %v7895_v7 = vadd.f32 %v15499_v61, %v7894_v0  ;;  %vm7897_vm10 = vweird.f32 %v15499_v61  ;;  %v7955_v60 = vadd.f32 0.05243302, %v7954_v32  ;;  %7638 = vmatmul.bf16.gmra.mxu2 %v7341_v47  ;;  %7671 = vmatmul.bf16.gmra.mxu3 %v7341_v47  ;;  %v7678_v42 = vmul.f32 0.5, %v15322_v56 }
 0x9e0   : > { %v8009_v20 = vmul.f32 %v8008_v1, %v15490_v10  ;;  %vm7896_vm11 = vweird.f32 %v15450_v21  ;;  %v7992_v49 = vmul.f32 %v7991_v12, %v15490_v10  ;;  %v15573_v41 = vmul.f32 0.70710677, %v15560_v51 }
 0x9e1   : > { %v15575_v43 = vpop.eup %11050  ;;  %v7902_v19 = vand.u32 2147483648, %v15450_v21  ;;  %v7917_v22 = vadd.f32 0.18741608, %v7916_v3  ;;  %v7934_v28 = vmul.f32 %v15533_v57, %v7933_v29  ;;  %v10445_v55 = vclamps-f32 %v15492_v14, 1.0  ;;  %vm15584_vm12 = vmor %vm7896_vm11, %vm7897_vm10 }
 0x9e2   : > { %v15579_v4 = vadd.f32 1.0, %v8009_v20  ;;  %v10446_v5 = vclamps-f32 %v7825_v8, 1.0  ;;  %v7900_v9 = vand.u32 2147483647, %v15450_v21  ;;  %v8028_v50 = vmul.f32 %v15573_v41, %v15573_v41 }
 0x9e3   : > { %v10447_v35 = vclamps-f32 %v7865_v44, 1.0  ;;  %v7879_v13 = vadd.f32 1.1283791, %v7878_v16  ;;  %v7899_v38 = vsel %vm15584_vm12, %v15499_v61, %v7895_v7  ;;  %v7956_v14 = vmul.f32 %v7955_v60, %v15408_v52 }
 0x9e4   : > { %v7972_v24 = vmul.f32 %v15575_v43, %v15542_v33  ;;  %v7993_v0 = vadd.f32 0.0036580483, %v7992_v49  ;;  %11052 = vrcp.f32 %v15579_v4  ;;  %v15598_v32 = vmin.f32 %v8028_v50, 16.0 }
 0x9e5   : > { %v7903_v21 = vor.u32 1.1754944e-38, %v7902_v19  ;;  %v7918_v18 = vmul.f32 %v7917_v22, %v15370_v34  ;;  %v7935_v62 = vadd.f32 %v15533_v57, %v7934_v28  ;;  %vm7937_vm13 = vweird.f32 %v15533_v57 }
 0x9e6   : > { %v9188_v36 = vadd.f32 1.0, %v10445_v55  ;;  %vm7901_vm14 = vcmp.eq.f32.partialorder %v7900_v9, 8.507059e+37  ;;  %v7942_v61 = vand.u32 2147483648, %v15483_v25  ;;  %v8041_v12 = vmul.f32 3.8918573e-05, %v15598_v32 }
 0x9e7   : > { %v7904_v26 = vsel %vm7901_vm14, %v7903_v21, %v7899_v38  ;;  %vm7936_vm15 = vweird.f32 %v15483_v25  ;;  %v7940_v47 = vand.u32 2147483647, %v15483_v25  ;;  %v7957_v3 = vadd.f32 0.18741608, %v7956_v14  ;;  %v7591_v21 = vpop.f32.mrf.mxu1 }
 0x9e8   : > { %v7880_v29 = vmul.f32 %v7879_v13, %v15349_v31  ;;  %vm15608_vm0 = vmor %vm7936_vm15, %vm7937_vm13  ;;  %v7973_v1 = vsub.f32 1.0, %v7972_v24  ;;  %v7994_v8 = vmul.f32 %v7993_v0, %v15490_v10  ;;  %v8042_v44 = vadd.f32 0.001143296, %v8041_v12  ;;  %v7558_v0 = vpop.f32.mrf.mxu0 }
 0x9e9   : > { %v9189_v16 = vadd.f32 1.0, %v10446_v5  ;;  %v9190_v7 = vadd.f32 1.0, %v10447_v35  ;;  %v7919_v60 = vadd.f32 1.1283791, %v7918_v18  ;;  %v7939_v20 = vsel %vm15608_vm0, %v15533_v57, %v7935_v62  ;;  %v10694_v18 = vld [vmem:[%s11371_s3 + $0x38] sm:$0xff] }
 0x9ea   : > { %v15616_v49 = vpop.eup %11052  ;;  %v7905_v25 = vmul.f32 %v7904_v26, %v7880_v29  ;;  %v7943_v19 = vor.u32 1.1754944e-38, %v7942_v61  ;;  %v8030_v31 = vmul.f32 2.1237322e-06, %v15598_v32  ;;  %v8043_v22 = vmul.f32 %v8042_v44, %v15598_v32  ;;  %v10702_v62 = vld [vmem:[%s11371_s3 + $0x78] sm:$0xff]  ;;  %9540 = vmatpush.bf16.msra.mxu0 %v10694_v18  ;;  %v10693_v44 = vld [vmem:[%s11371_s3 + $0x30] sm:$0xff] }
 0x9eb   : > { %v15621_v28 = vmul.f32 %v9188_v36, %v15487_v37  ;;  %v15624_v55 = vmul.f32 0.5, %v15343_v27  ;;  %vm7941_vm1 = vcmp.eq.f32.partialorder %v7940_v47, 8.507059e+37  ;;  %v7958_v5 = vmul.f32 %v7957_v3, %v15408_v52  ;;  %9573 = vmatpush.bf16.msra.mxu1 %v10702_v62  ;;  %v7657_v62 = vpop.f32.mrf.mxu3 }
 0x9ec   : > { %v7944_v57 = vsel %vm7941_vm1, %v7943_v19, %v7939_v20  ;;  %v7974_v56 = vmul.f32 %v15575_v43, %v7973_v1  ;;  %v7995_v9 = vadd.f32 0.05243302, %v7994_v8  ;;  %v8044_v50 = vadd.f32 0.014752088, %v8043_v22 }
 0x9ed   : > { %v15629_v35 = vmul.f32 %v9189_v16, %v15563_v48  ;;  %v15632_v13 = vmul.f32 0.5, %v15352_v53  ;;  %v7920_v37 = vmul.f32 %v7919_v60, %v15358_v45  ;;  %v8012_v27 = vmul.f32 %v15616_v49, %v15579_v4  ;;  %v10701_v16 = vld [vmem:[%s11371_s3 + $0x70] sm:$0xff] }
 0x9ee   : > { %v15637_v38 = vmul.f32 %v9190_v7, %v7678_v42  ;;  %v10448_v52 = vclamps-f32 %v7905_v25, 1.0  ;;  %v8031_v14 = vadd.f32 0.00028619796, %v8030_v31  ;;  %v8045_v24 = vmul.f32 %v8044_v50, %v15598_v32  ;;  %9541 = vmatpush.bf16.msra.mxu0 %v10693_v44 }
 0x9ef   : > { %v7945_v48 = vmul.f32 %v7944_v57, %v7920_v37  ;;  %v7959_v36 = vadd.f32 1.1283791, %v7958_v5  ;;  %v15643_v53 = vadd.f32 %v7558_v0, %v15302_v58  ;;  %v15646_v45 = vadd.f32 %v7591_v21, %v15312_v2  ;;  %9574 = vmatpush.bf16.msra.mxu1 %v10701_v16  ;;  %v7624_v0 = vpop.f32.mrf.mxu2 }
 0x9f0   : > { %v7975_v42 = vadd.f32 %v15575_v43, %v7974_v56  ;;  %vm7977_vm2 = vweird.f32 %v15575_v43  ;;  %v7996_v61 = vmul.f32 %v7995_v9, %v15490_v10  ;;  %v8046_v12 = vadd.f32 0.112945676, %v8045_v24 }
 0x9f1   : > { %v7982_v26 = vand.u32 2147483648, %v15542_v33  ;;  %v8013_v47 = vsub.f32 1.0, %v8012_v27  ;;  %v15653_v3 = vmul.f32 0.70710677, %v15643_v53  ;;  %v15656_v29 = vmul.f32 0.70710677, %v15646_v45 }
 0x9f2   : > { %vm7976_vm3 = vweird.f32 %v15542_v33  ;;  %v7980_v34 = vand.u32 2147483647, %v15542_v33  ;;  %v8032_v1 = vmul.f32 %v8031_v14, %v15598_v32  ;;  %v8047_v8 = vmul.f32 %v8046_v12, %v15598_v32 }
 0x9f3   : > { %v9191_v7 = vadd.f32 1.0, %v10448_v52  ;;  %v15665_v60 = vmul.f32 0.5, %v15389_v59  ;;  %vm15669_vm4 = vmor %vm7976_vm3, %vm7977_vm2  ;;  %v8068_v25 = vmul.f32 %v15653_v3, %v15653_v3  ;;  %v8108_v33 = vmul.f32 %v15656_v29, %v15656_v29 }
 0x9f4   : > { %v10449_v19 = vclamps-f32 %v7945_v48, 1.0  ;;  %v7979_v31 = vsel %vm15669_vm4, %v15575_v43, %v7975_v42  ;;  %v7997_v22 = vadd.f32 0.18741608, %v7996_v61  ;;  %v8048_v59 = vadd.f32 0.4994258, %v8047_v8 }
 0x9f5   : > { %v7983_v5 = vor.u32 1.1754944e-38, %v7982_v26  ;;  %v8014_v57 = vmul.f32 %v15616_v49, %v8013_v47  ;;  %v15681_v56 = vmin.f32 %v8068_v25, 16.0  ;;  %v15683_v9 = vmin.f32 %v8108_v33, 16.0 }
 0x9f6   : > { %v7960_v50 = vmul.f32 %v7959_v36, %v15393_v54  ;;  %vm7981_vm5 = vcmp.eq.f32.partialorder %v7980_v34, 8.507059e+37  ;;  %v8033_v37 = vadd.f32 0.0036580483, %v8032_v1  ;;  %v8049_v27 = vmul.f32 %v8048_v59, %v15598_v32 }
 0x9f7   : > { %v7984_v52 = vsel %vm7981_vm5, %v7983_v5, %v7979_v31  ;;  %v8070_v43 = vmul.f32 2.1237322e-06, %v15681_v56  ;;  %v8081_v14 = vmul.f32 3.8918573e-05, %v15681_v56  ;;  %v8110_v24 = vmul.f32 2.1237322e-06, %v15683_v9 }
 0x9f8   : > { %v7998_v21 = vmul.f32 %v7997_v22, %v15490_v10  ;;  %vm8016_vm6 = vweird.f32 %v15579_v4  ;;  %v15692_v18 = vadd.f32 1.0, %v8049_v27  ;;  %v8121_v54 = vmul.f32 3.8918573e-05, %v15683_v9 }
 0x9f9   : > { %v8015_v48 = vadd.f32 %v15616_v49, %v8014_v57  ;;  %vm8017_vm7 = vweird.f32 %v15616_v49  ;;  %v8071_v36 = vadd.f32 0.00028619796, %v8070_v43  ;;  %v8082_v42 = vadd.f32 0.001143296, %v8081_v14  ;;  %v10710_v14 = vld [vmem:[%s11371_s3 + $0xb8] sm:$0xff] }
 0x9fa   : > { %v8022_v61 = vand.u32 2147483648, %v15579_v4  ;;  %11054 = vrcp.f32 %v15692_v18  ;;  %v8111_v12 = vadd.f32 0.00028619796, %v8110_v24  ;;  %v15700_v10 = vadd.f32 %v7624_v0, %v15314_v11  ;;  %vm15713_vm8 = vmor %vm8016_vm6, %vm8017_vm7  ;;  %v10718_v24 = vld [vmem:[%s11371_s3 + $0xf8] sm:$0xff]  ;;  %9606 = vmatpush.bf16.msra.mxu2 %v10710_v14 }
 0x9fb   : > { %v8020_v26 = vand.u32 2147483647, %v15579_v4  ;;  %v8034_v47 = vmul.f32 %v8033_v37, %v15598_v32  ;;  %v8083_v34 = vmul.f32 %v8082_v42, %v15681_v56  ;;  %v15706_v1 = vadd.f32 %v7657_v62, %v15336_v17  ;;  %9639 = vmatpush.bf16.msra.mxu3 %v10718_v24 }
 0x9fc   : > { %v15709_v8 = vmul.f32 %v9191_v7, %v15624_v55  ;;  %v9192_v44 = vadd.f32 1.0, %v10449_v19  ;;  %v7985_v16 = vmul.f32 %v7984_v52, %v7960_v50  ;;  %v8122_v25 = vadd.f32 0.001143296, %v8121_v54 }
 0x9fd   : > { %v7999_v33 = vadd.f32 1.1283791, %v7998_v21  ;;  %v8019_v31 = vsel %vm15713_vm8, %v15616_v49, %v8015_v48  ;;  %v8072_v22 = vmul.f32 %v8071_v36, %v15681_v56  ;;  %v8084_v55 = vadd.f32 0.014752088, %v8083_v34  ;;  %v7560_v48 = vpop.f32.mrf.mxu0 }
 0x9fe   : > { %v8023_v7 = vor.u32 1.1754944e-38, %v8022_v61  ;;  %v8112_v19 = vmul.f32 %v8111_v12, %v15683_v9  ;;  %v8123_v4 = vmul.f32 %v8122_v25, %v15683_v9  ;;  %v15724_v59 = vmul.f32 0.70710677, %v15700_v10 }
 0x9ff   : > { %vm8021_vm9 = vcmp.eq.f32.partialorder %v8020_v26, 8.507059e+37  ;;  %v8035_v5 = vadd.f32 0.05243302, %v8034_v47  ;;  %v8085_v57 = vmul.f32 %v8084_v55, %v15681_v56  ;;  %v15728_v50 = vmul.f32 0.70710677, %v15706_v1  ;;  %v10692_v26 = vld [vmem:[%s11371_s3 + $0x28] sm:$0xff] }
 0xa00   : > { %v15730_v49 = vpop.eup %11054  ;;  %v10450_v37 = vclamps-f32 %v7985_v16, 1.0  ;;  %v8024_v27 = vsel %vm8021_vm9, %v8023_v7, %v8019_v31  ;;  %v8124_v52 = vadd.f32 0.014752088, %v8123_v4  ;;  %v8148_v43 = vmul.f32 %v15724_v59, %v15724_v59  ;;  %v10700_v47 = vld [vmem:[%s11371_s3 + $0x68] sm:$0xff]  ;;  %9542 = vmatpush.bf16.msra.mxu0 %v10692_v26 }
 0xa01   : > { %v8000_v0 = vmul.f32 %v7999_v33, %v15474_v40  ;;  %v8052_v21 = vmul.f32 %v15730_v49, %v15692_v18  ;;  %v8073_v54 = vadd.f32 0.0036580483, %v8072_v22  ;;  %v8086_v62 = vadd.f32 0.112945676, %v8085_v57  ;;  %9575 = vmatpush.bf16.msra.mxu1 %v10700_v47 }
 0xa02   : > { %v15740_v36 = vmul.f32 %v9192_v44, %v15632_v13  ;;  %v8113_v42 = vadd.f32 0.0036580483, %v8112_v19  ;;  %v8125_v61 = vmul.f32 %v8124_v52, %v15683_v9  ;;  %v15743_v12 = vmin.f32 %v8148_v43, 16.0  ;;  %v10709_v19 = vld [vmem:[%s11371_s3 + $0xb0] sm:$0xff] }
 0xa03   : > { %v8025_v40 = vmul.f32 %v8024_v27, %v8000_v0  ;;  %v8036_v34 = vmul.f32 %v8035_v5, %v15598_v32  ;;  %v8087_v16 = vmul.f32 %v8086_v62, %v15681_v56  ;;  %v8188_v20 = vmul.f32 %v15728_v50, %v15728_v50  ;;  %9607 = vmatpush.bf16.msra.mxu2 %v10709_v19 }
 0xa04   : > { %v8126_v13 = vadd.f32 0.112945676, %v8125_v61  ;;  %v8150_v44 = vmul.f32 2.1237322e-06, %v15743_v12  ;;  %v8161_v25 = vmul.f32 3.8918573e-05, %v15743_v12  ;;  %v15754_v33 = vadd.f32 %v7560_v48, %v15302_v58 }
 0xa05   : > { %v9193_v31 = vadd.f32 1.0, %v10450_v37  ;;  %v8053_v22 = vsub.f32 1.0, %v8052_v21  ;;  %v8074_v55 = vmul.f32 %v8073_v54, %v15681_v56  ;;  %v8088_v7 = vadd.f32 0.4994258, %v8087_v16  ;;  %v10717_v37 = vld [vmem:[%s11371_s3 + $0xf0] sm:$0xff] }
 0xa06   : > { %v8114_v4 = vmul.f32 %v8113_v42, %v15683_v9  ;;  %v8127_v5 = vmul.f32 %v8126_v13, %v15683_v9  ;;  %v8151_v57 = vadd.f32 0.00028619796, %v8150_v44  ;;  %v8162_v27 = vadd.f32 0.001143296, %v8161_v25  ;;  %9640 = vmatpush.bf16.msra.mxu3 %v10717_v37 }
 0xa07   : > { %v7682_v52 = vmul.f32 0.5, %v15453_v6  ;;  %v8037_v43 = vadd.f32 0.18741608, %v8036_v34  ;;  %v8089_v14 = vmul.f32 %v8088_v7, %v15681_v56  ;;  %v15762_v24 = vmin.f32 %v8188_v20, 16.0 }
 0xa08   : > { %v10451_v21 = vclamps-f32 %v8025_v40, 1.0  ;;  %v8128_v54 = vadd.f32 0.4994258, %v8127_v5  ;;  %v15768_v62 = vmul.f32 0.70710677, %v15754_v33  ;;  %v8054_v48 = vmul.f32 %v15730_v49, %v8053_v22 }
 0xa09   : > { %v8075_v42 = vadd.f32 0.05243302, %v8074_v55  ;;  %v15771_v61 = vadd.f32 1.0, %v8089_v14  ;;  %v8163_v6 = vmul.f32 %v8162_v27, %v15743_v12  ;;  %v15775_v26 = vmul.f32 %v9193_v31, %v15665_v60 }
 0xa0a   : > { %v8115_v47 = vadd.f32 0.05243302, %v8114_v4  ;;  %v8129_v34 = vmul.f32 %v8128_v54, %v15683_v9  ;;  %v8152_v40 = vmul.f32 %v8151_v57, %v15743_v12  ;;  %v15780_v16 = vmul.f32 0.5, %v15560_v51 }
 0xa0b   : > { %v8038_v20 = vmul.f32 %v8037_v43, %v15598_v32  ;;  %11056 = vrcp.f32 %v15771_v61  ;;  %v8190_v13 = vmul.f32 2.1237322e-06, %v15762_v24  ;;  %v9194_v44 = vadd.f32 1.0, %v10451_v21 }
 0xa0c   : > { %vm8057_vm10 = vweird.f32 %v15730_v49  ;;  %v8062_v60 = vand.u32 2147483648, %v15692_v18  ;;  %v15787_v25 = vadd.f32 1.0, %v8129_v34  ;;  %v8055_v31 = vadd.f32 %v15730_v49, %v8054_v48 }
 0xa0d   : > { %v8076_v22 = vmul.f32 %v8075_v42, %v15681_v56  ;;  %v8164_v55 = vadd.f32 0.014752088, %v8163_v6  ;;  %v8228_v51 = vmul.f32 %v15768_v62, %v15768_v62  ;;  %v15796_v7 = vmul.f32 0.5, %v15643_v53  ;;  %v7593_v42 = vpop.f32.mrf.mxu1  ;;  %v10691_v6 = vld [vmem:[%s11371_s3 + $0x20] sm:$0xff] }
 0xa0e   : > { %v8116_v19 = vmul.f32 %v8115_v47, %v15683_v9  ;;  %v8153_v4 = vadd.f32 0.0036580483, %v8152_v40  ;;  %vm8056_vm11 = vweird.f32 %v15692_v18  ;;  %v8060_v5 = vand.u32 2147483647, %v15692_v18  ;;  %v10699_v47 = vld [vmem:[%s11371_s3 + $0x60] sm:$0xff]  ;;  %9543 = vmatpush.bf16.msra.mxu0 %v10691_v6 }
 0xa0f   : > { %11058 = vrcp.f32 %v15787_v25  ;;  %v8191_v57 = vadd.f32 0.00028619796, %v8190_v13  ;;  %v15802_v27 = vmul.f32 %v9194_v44, %v7682_v52  ;;  %v8039_v43 = vadd.f32 1.1283791, %v8038_v20  ;;  %vm15806_vm12 = vmor %vm8056_vm11, %vm8057_vm10  ;;  %9576 = vmatpush.bf16.msra.mxu1 %v10699_v47 }
 0xa10   : > { %v8165_v14 = vmul.f32 %v8164_v55, %v15743_v12  ;;  %v8201_v37 = vmul.f32 3.8918573e-05, %v15762_v24  ;;  %v8059_v18 = vsel %vm15806_vm12, %v15730_v49, %v8055_v31  ;;  %v8063_v54 = vor.u32 1.1754944e-38, %v8062_v60 }
 0xa11   : > { %v15812_v21 = vpop.eup %11056  ;;  %v8077_v52 = vadd.f32 0.18741608, %v8076_v22  ;;  %v15817_v48 = vmin.f32 %v8228_v51, 16.0  ;;  %v8117_v40 = vadd.f32 0.18741608, %v8116_v19  ;;  %v8154_v20 = vmul.f32 %v8153_v4, %v15743_v12  ;;  %v10708_v19 = vld [vmem:[%s11371_s3 + $0xa8] sm:$0xff] }
 0xa12   : > { %v8092_v34 = vmul.f32 %v15812_v21, %v15771_v61  ;;  %v8166_v13 = vadd.f32 0.112945676, %v8165_v14  ;;  %vm8061_vm13 = vcmp.eq.f32.partialorder %v8060_v5, 8.507059e+37  ;;  %v15825_v44 = vmul.f32 0.5, %v15646_v45  ;;  %v10716_v14 = vld [vmem:[%s11371_s3 + $0xe8] sm:$0xff]  ;;  %9608 = vmatpush.bf16.msra.mxu2 %v10708_v19  ;;  %v10707_v45 = vld [vmem:[%s11371_s3 + $0xa0] sm:$0xff] }
 0xa13   : > { %v8192_v49 = vmul.f32 %v8191_v57, %v15762_v24  ;;  %v8202_v60 = vadd.f32 0.001143296, %v8201_v37  ;;  %v8040_v31 = vmul.f32 %v8039_v43, %v15573_v41  ;;  %v8064_v22 = vsel %vm8061_vm13, %v8063_v54, %v8059_v18  ;;  %9641 = vmatpush.bf16.msra.mxu3 %v10716_v14 }
 0xa14   : > { %v8167_v55 = vmul.f32 %v8166_v13, %v15743_v12  ;;  %v15831_v51 = vadd.f32 %v7593_v42, %v15312_v2  ;;  %v8078_v5 = vmul.f32 %v8077_v52, %v15681_v56  ;;  %v8241_v53 = vmul.f32 3.8918573e-05, %v15817_v48 }
 0xa15   : > { %v15834_v4 = vpop.eup %11058  ;;  %v8203_v57 = vmul.f32 %v8202_v60, %v15762_v24  ;;  %v8093_v41 = vsub.f32 1.0, %v8092_v34  ;;  %v8118_v43 = vmul.f32 %v8117_v40, %v15683_v9  ;;  %v8155_v37 = vadd.f32 0.05243302, %v8154_v20 }
 0xa16   : > { %v8168_v18 = vadd.f32 0.4994258, %v8167_v55  ;;  %v8065_v54 = vmul.f32 %v8064_v22, %v8040_v31  ;;  %v15844_v42 = vmul.f32 0.5, %v15700_v10  ;;  %v8193_v6 = vadd.f32 0.0036580483, %v8192_v49  ;;  %9609 = vmatpush.bf16.msra.mxu2 %v10707_v45 }
 0xa17   : > { %v8204_v47 = vadd.f32 0.014752088, %v8203_v57  ;;  %v8132_v56 = vmul.f32 %v15834_v4, %v15787_v25  ;;  %v15850_v13 = vmul.f32 0.5, %v15706_v1  ;;  %v15853_v9 = vmul.f32 0.5, %v15754_v33 }
 0xa18   : > { %v8169_v52 = vmul.f32 %v8168_v18, %v15743_v12  ;;  %v8079_v34 = vadd.f32 1.1283791, %v8078_v5  ;;  %v8230_v10 = vmul.f32 2.1237322e-06, %v15817_v48  ;;  %v8242_v20 = vadd.f32 0.001143296, %v8241_v53 }
 0xa19   : > { %v8205_v40 = vmul.f32 %v8204_v47, %v15762_v24  ;;  %v8094_v49 = vmul.f32 %v15812_v21, %v8093_v41  ;;  %v8119_v60 = vadd.f32 1.1283791, %v8118_v43  ;;  %v8156_v31 = vmul.f32 %v8155_v37, %v15743_v12  ;;  %v7626_v37 = vpop.f32.mrf.mxu2 }
 0xa1a   : > { %v15859_v22 = vadd.f32 1.0, %v8169_v52  ;;  %v10452_v55 = vclamps-f32 %v8065_v54, 1.0  ;;  %v8100_v1 = vand.u32 2147483647, %v15771_v61  ;;  %v8194_v19 = vmul.f32 %v8193_v6, %v15762_v24 }
 0xa1b   : > { %v8206_v33 = vadd.f32 0.112945676, %v8205_v40  ;;  %v8102_v5 = vand.u32 2147483648, %v15771_v61  ;;  %v8133_v57 = vsub.f32 1.0, %v8132_v56  ;;  %v8243_v53 = vmul.f32 %v8242_v20, %v15817_v48 }
 0xa1c   : > { %11060 = vrcp.f32 %v15859_v22  ;;  %v8080_v14 = vmul.f32 %v8079_v34, %v15653_v3  ;;  %vm8096_vm14 = vweird.f32 %v15771_v61  ;;  %v8231_v43 = vadd.f32 0.00028619796, %v8230_v10 }
 0xa1d   : > { %v8207_v41 = vmul.f32 %v8206_v33, %v15762_v24  ;;  %v8095_v18 = vadd.f32 %v15812_v21, %v8094_v49  ;;  %vm8097_vm15 = vweird.f32 %v15812_v21  ;;  %v15872_v54 = vmul.f32 %v8119_v60, %v15656_v29  ;;  %v7659_v29 = vpop.f32.mrf.mxu3 }
 0xa1e   : > { %v8157_v6 = vadd.f32 0.18741608, %v8156_v31  ;;  %v9195_v47 = vadd.f32 1.0, %v10452_v55  ;;  %vm15874_vm0 = vcmp.eq.f32.partialorder %v8100_v1, 8.507059e+37  ;;  %v8195_v3 = vadd.f32 0.05243302, %v8194_v19  ;;  %vm15884_vm1 = vmor %vm8096_vm14, %vm8097_vm15 }
 0xa1f   : > { %v8208_v52 = vadd.f32 0.4994258, %v8207_v41  ;;  %v8103_v34 = vor.u32 1.1754944e-38, %v8102_v5  ;;  %v8134_v40 = vmul.f32 %v15834_v4, %v8133_v57  ;;  %v8244_v10 = vadd.f32 0.014752088, %v8243_v53 }
 0xa20   : > { %v15880_v20 = vadd.f32 %v7626_v37, %v15314_v11  ;;  %v8140_v49 = vand.u32 2147483647, %v15787_v25  ;;  %v8232_v31 = vmul.f32 %v8231_v43, %v15817_v48  ;;  %v15892_v55 = vmul.f32 0.70710677, %v15831_v51 }
 0xa21   : > { %v8209_v60 = vmul.f32 %v8208_v52, %v15762_v24  ;;  %v8099_v19 = vsel %vm15884_vm1, %v15812_v21, %v8095_v18  ;;  %v8142_v61 = vand.u32 2147483648, %v15787_v25  ;;  %v8158_v33 = vmul.f32 %v8157_v6, %v15743_v12 }
 0xa22   : > { %v15894_v1 = vpop.eup %11060  ;;  %v8245_v5 = vmul.f32 %v8244_v10, %v15817_v48  ;;  %v15903_v57 = vmul.f32 %v9195_v47, %v15780_v16  ;;  %vm8137_vm2 = vweird.f32 %v15834_v4  ;;  %v8196_v53 = vmul.f32 %v8195_v3, %v15762_v24 }
 0xa23   : > { %v15907_v41 = vadd.f32 1.0, %v8209_v60  ;;  %v8135_v43 = vadd.f32 %v15834_v4, %v8134_v40  ;;  %v8268_v21 = vmul.f32 %v15892_v55, %v15892_v55  ;;  %v15913_v12 = vmul.f32 0.70710677, %v15880_v20  ;;  %v10698_v60 = vld [vmem:[%s11371_s3 + $0x58] sm:$0xff] }
 0xa24   : > { %v8246_v37 = vadd.f32 0.112945676, %v8245_v5  ;;  %v8104_v16 = vsel %vm15874_vm0, %v8103_v34, %v8099_v19  ;;  %v8172_v18 = vmul.f32 %v15894_v1, %v15859_v22  ;;  %v8233_v6 = vadd.f32 0.0036580483, %v8232_v31  ;;  %9577 = vmatpush.bf16.msra.mxu1 %v10698_v60  ;;  %v10697_v31 = vld [vmem:[%s11371_s3 + $0x50] sm:$0xff] }
 0xa25   : > { %11062 = vrcp.f32 %v15907_v41  ;;  %vm8136_vm3 = vweird.f32 %v15787_v25  ;;  %vm15921_vm4 = vcmp.eq.f32.partialorder %v8140_v49, 8.507059e+37  ;;  %v8159_v3 = vadd.f32 1.1283791, %v8158_v33  ;;  %v10690_v49 = vld [vmem:[%s11371_s3 + $0x18] sm:$0xff] }
 0xa26   : > { %v8247_v52 = vmul.f32 %v8246_v37, %v15817_v48  ;;  %vm15928_vm5 = vmor %vm8136_vm3, %vm8137_vm2  ;;  %v8143_v34 = vor.u32 1.1754944e-38, %v8142_v61  ;;  %v8197_v40 = vadd.f32 0.18741608, %v8196_v53  ;;  %v15932_v10 = vmin.f32 %v8268_v21, 16.0  ;;  %9544 = vmatpush.bf16.msra.mxu0 %v10690_v49 }
 0xa27   : > { %v8308_v25 = vmul.f32 %v15913_v12, %v15913_v12  ;;  %v8105_v19 = vmul.f32 %v8104_v16, %v8080_v14  ;;  %v8139_v33 = vsel %vm15928_vm5, %v15834_v4, %v8135_v43  ;;  %v8173_v5 = vsub.f32 1.0, %v8172_v18  ;;  %v10715_v43 = vld [vmem:[%s11371_s3 + $0xe0] sm:$0xff] }
 0xa28   : > { %v8248_v61 = vadd.f32 0.4994258, %v8247_v52  ;;  %v8234_v53 = vmul.f32 %v8233_v6, %v15817_v48  ;;  %v8270_v37 = vmul.f32 2.1237322e-06, %v15932_v10  ;;  %v8281_v21 = vmul.f32 3.8918573e-05, %v15932_v10  ;;  %9642 = vmatpush.bf16.msra.mxu3 %v10715_v43  ;;  %9578 = vmatpush.bf16.msra.mxu1 %v10697_v31 }
 0xa29   : > { %v15949_v14 = vmul.f32 0.5, %v15831_v51  ;;  %v15951_v16 = vmin.f32 %v8308_v25, 16.0  ;;  %v15954_v4 = vadd.f32 %v7659_v29, %v15336_v17  ;;  %v15960_v6 = vmul.f32 %v8159_v3, %v15724_v59 }
 0xa2a   : > { %v8249_v32 = vmul.f32 %v8248_v61, %v15817_v48  ;;  %v8198_v52 = vmul.f32 %v8197_v40, %v15762_v24  ;;  %v8271_v56 = vadd.f32 0.00028619796, %v8270_v37  ;;  %v8282_v49 = vadd.f32 0.001143296, %v8281_v21  ;;  %v10689_v61 = vld [vmem:[%s11371_s3 + $0x10] sm:$0xff] }
 0xa2b   : > { %v15957_v18 = vpop.eup %11062  ;;  %v10453_v60 = vclamps-f32 %v8105_v19, 1.0  ;;  %v8144_v51 = vsel %vm15921_vm4, %v8143_v34, %v8139_v33  ;;  %v8174_v59 = vmul.f32 %v15894_v1, %v8173_v5  ;;  %v8180_v3 = vand.u32 2147483647, %v15859_v22  ;;  %9545 = vmatpush.bf16.msra.mxu0 %v10689_v61 }
 0xa2c   : > { %v8212_v25 = vmul.f32 %v15957_v18, %v15907_v41  ;;  %v15967_v29 = vadd.f32 1.0, %v8249_v32  ;;  %v8235_v24 = vadd.f32 0.05243302, %v8234_v53  ;;  %v8283_v40 = vmul.f32 %v8282_v49, %v15932_v10 }
 0xa2d   : > { %vm8176_vm6 = vweird.f32 %v15859_v22  ;;  %v8182_v45 = vand.u32 2147483648, %v15859_v22  ;;  %v8310_v47 = vmul.f32 2.1237322e-06, %v15951_v16  ;;  %v15978_v34 = vmul.f32 0.70710677, %v15954_v4 }
 0xa2e   : > { %v8145_v32 = vmul.f32 %v8144_v51, %v15872_v54  ;;  %v8213_v19 = vsub.f32 1.0, %v8212_v25  ;;  %v8272_v33 = vmul.f32 %v8271_v56, %v15932_v10  ;;  %v8284_v5 = vadd.f32 0.014752088, %v8283_v40 }
 0xa2f   : > { %v9196_v53 = vadd.f32 1.0, %v10453_v60  ;;  %v8199_v37 = vadd.f32 1.1283791, %v8198_v52  ;;  %11064 = vrcp.f32 %v15967_v29  ;;  %v8321_v21 = vmul.f32 3.8918573e-05, %v15951_v16 }
 0xa30   : > { %v8175_v43 = vadd.f32 %v15894_v1, %v8174_v59  ;;  %vm8177_vm7 = vweird.f32 %v15894_v1  ;;  %v8236_v49 = vmul.f32 %v8235_v24, %v15817_v48  ;;  %v8285_v31 = vmul.f32 %v8284_v5, %v15932_v10 }
 0xa31   : > { %vm15988_vm8 = vcmp.eq.f32.partialorder %v8180_v3, 8.507059e+37  ;;  %v8311_v56 = vadd.f32 0.00028619796, %v8310_v47  ;;  %v8322_v51 = vadd.f32 0.001143296, %v8321_v21  ;;  %v8348_v52 = vmul.f32 %v15978_v34, %v15978_v34  ;;  %vm16000_vm9 = vmor %vm8176_vm6, %vm8177_vm7 }
 0xa32   : > { %v10454_v60 = vclamps-f32 %v8145_v32, 1.0  ;;  %v8214_v25 = vmul.f32 %v15957_v18, %v8213_v19  ;;  %v8273_v61 = vadd.f32 0.0036580483, %v8272_v33  ;;  %v8286_v59 = vadd.f32 0.112945676, %v8285_v31 }
 0xa33   : > { %v15996_v40 = vmul.f32 %v9196_v53, %v15796_v7  ;;  %v8183_v24 = vor.u32 1.1754944e-38, %v8182_v45  ;;  %v8200_v47 = vmul.f32 %v8199_v37, %v15728_v50  ;;  %v8323_v5 = vmul.f32 %v8322_v51, %v15951_v16 }
 0xa34   : > { %v8179_v32 = vsel %vm16000_vm9, %v15894_v1, %v8175_v43  ;;  %v8237_v19 = vadd.f32 0.18741608, %v8236_v49  ;;  %v16010_v33 = vmul.f32 0.5, %v15880_v20  ;;  %v16012_v7 = vmin.f32 %v8348_v52, 16.0 }
 0xa35   : > { %v16014_v22 = vpop.eup %11064  ;;  %v8222_v53 = vand.u32 2147483648, %v15907_v41  ;;  %v8287_v45 = vmul.f32 %v8286_v59, %v15932_v10  ;;  %v8312_v50 = vmul.f32 %v8311_v56, %v15951_v16  ;;  %v8324_v37 = vadd.f32 0.014752088, %v8323_v5 }
 0xa36   : > { %v9197_v21 = vadd.f32 1.0, %v10454_v60  ;;  %v8215_v31 = vadd.f32 %v15957_v18, %v8214_v25  ;;  %vm8217_vm10 = vweird.f32 %v15957_v18  ;;  %v8274_v1 = vmul.f32 %v8273_v61, %v15932_v10  ;;  %v7563_v25 = vpop.f32.mrf.mxu0  ;;  %v10714_v61 = vld [vmem:[%s11371_s3 + $0xd8] sm:$0xff] }
 0xa37   : > { %v8184_v20 = vsel %vm15988_vm8, %v8183_v24, %v8179_v32  ;;  %vm8216_vm11 = vweird.f32 %v15907_v41  ;;  %v8288_v43 = vadd.f32 0.4994258, %v8287_v45  ;;  %v8325_v49 = vmul.f32 %v8324_v37, %v15951_v16  ;;  %9643 = vmatpush.bf16.msra.mxu3 %v10714_v61 }
 0xa38   : > { %v8220_v51 = vand.u32 2147483647, %v15907_v41  ;;  %v8238_v56 = vmul.f32 %v8237_v19, %v15817_v48  ;;  %v8252_v52 = vmul.f32 %v16014_v22, %v15967_v29  ;;  %v8361_v60 = vmul.f32 3.8918573e-05, %v16012_v7  ;;  %vm16031_vm12 = vmor %vm8216_vm11, %vm8217_vm10 }
 0xa39   : > { %v8223_v54 = vor.u32 1.1754944e-38, %v8222_v53  ;;  %v8289_v59 = vmul.f32 %v8288_v43, %v15932_v10  ;;  %v8313_v3 = vadd.f32 0.0036580483, %v8312_v50  ;;  %v8326_v24 = vadd.f32 0.112945676, %v8325_v49 }
 0xa3a   : > { %v8185_v5 = vmul.f32 %v8184_v20, %v15960_v6  ;;  %v8219_v48 = vsel %vm16031_vm12, %v15957_v18, %v8215_v31  ;;  %v8275_v41 = vadd.f32 0.05243302, %v8274_v1  ;;  %v8362_v32 = vadd.f32 0.001143296, %v8361_v60  ;;  %v7596_v18 = vpop.f32.mrf.mxu1  ;;  %v10706_v60 = vld [vmem:[%s11371_s3 + $0x98] sm:$0xff] }
 0xa3b   : > { %v16040_v19 = vadd.f32 1.0, %v8289_v59  ;;  %v8327_v45 = vmul.f32 %v8326_v24, %v15951_v16  ;;  %v8350_v53 = vmul.f32 2.1237322e-06, %v16012_v7  ;;  %v7564_v37 = vadd.f32 %v7563_v25, %v15302_v58  ;;  %9610 = vmatpush.bf16.msra.mxu2 %v10706_v60  ;;  %9644 = vmatpush.bf16.msra.mxu3 %v10713_v15 }
 0xa3c   : > { %v16046_v50 = vmul.f32 %v9197_v21, %v15825_v44  ;;  %vm8221_vm13 = vcmp.eq.f32.partialorder %v8220_v51, 8.507059e+37  ;;  %v8253_v6 = vsub.f32 1.0, %v8252_v52  ;;  %v8363_v20 = vmul.f32 %v8362_v32, %v16012_v7 }
 0xa3d   : > { %v8224_v31 = vsel %vm8221_vm13, %v8223_v54, %v8219_v48  ;;  %v8239_v1 = vadd.f32 1.1283791, %v8238_v56  ;;  %v8314_v43 = vmul.f32 %v8313_v3, %v15951_v16  ;;  %v16051_v49 = vmul.f32 0.5, %v15954_v4 }
 0xa3e   : > { %v10455_v59 = vclamps-f32 %v8185_v5, 1.0  ;;  %v8276_v25 = vmul.f32 %v8275_v41, %v15932_v10  ;;  %11066 = vrcp.f32 %v16040_v19  ;;  %v8328_v44 = vadd.f32 0.4994258, %v8327_v45 }
 0xa3f   : > { %v8351_v21 = vadd.f32 0.00028619796, %v8350_v53  ;;  %v8364_v51 = vadd.f32 0.014752088, %v8363_v20  ;;  %v16057_v52 = vmul.f32 0.70710677, %v7564_v37  ;;  %v16060_v54 = vadd.f32 %v7596_v18, %v15312_v2  ;;  %9611 = vmatpush.bf16.msra.mxu2 %v10705_v23 }
 0xa40   : > { %v8225_v56 = vmul.f32 %v8224_v31, %v8200_v47  ;;  %v8254_v4 = vmul.f32 %v16014_v22, %v8253_v6  ;;  %v8260_v3 = vand.u32 2147483647, %v15967_v29  ;;  %v8329_v24 = vmul.f32 %v8328_v44, %v15951_v16 }
 0xa41   : > { %v8262_v5 = vand.u32 2147483648, %v15967_v29  ;;  %v8315_v48 = vadd.f32 0.05243302, %v8314_v43  ;;  %v8365_v41 = vmul.f32 %v8364_v51, %v16012_v7  ;;  %v8388_v32 = vmul.f32 %v16057_v52, %v16057_v52 }
 0xa42   : > { %v9198_v45 = vadd.f32 1.0, %v10455_v59  ;;  %v8240_v53 = vmul.f32 %v8239_v1, %v15768_v62  ;;  %v8277_v20 = vadd.f32 0.18741608, %v8276_v25  ;;  %v16070_v18 = vadd.f32 1.0, %v8329_v24 }
 0xa43   : > { %v8352_v47 = vmul.f32 %v8351_v21, %v16012_v7  ;;  %v8366_v6 = vadd.f32 0.112945676, %v8365_v41  ;;  %v16073_v31 = vmin.f32 %v8388_v32, 16.0  ;;  %v16076_v60 = vmul.f32 0.70710677, %v16060_v54 }
 0xa44   : > { %v16078_v43 = vpop.eup %11066  ;;  %v10456_v61 = vclamps-f32 %v8225_v56, 1.0  ;;  %v8255_v44 = vadd.f32 %v16014_v22, %v8254_v4  ;;  %vm8257_vm14 = vweird.f32 %v16014_v22  ;;  %11068 = vrcp.f32 %v16070_v18 }
 0xa45   : > { %vm8256_vm15 = vweird.f32 %v15967_v29  ;;  %vm16084_vm0 = vcmp.eq.f32.partialorder %v8260_v3, 8.507059e+37  ;;  %v8263_v1 = vor.u32 1.1754944e-38, %v8262_v5  ;;  %v8316_v59 = vmul.f32 %v8315_v48, %v15951_v16  ;;  %v7629_v5 = vpop.f32.mrf.mxu2 }
 0xa46   : > { %v8278_v25 = vmul.f32 %v8277_v20, %v15932_v10  ;;  %v8367_v21 = vmul.f32 %v8366_v6, %v16012_v7  ;;  %v8390_v51 = vmul.f32 2.1237322e-06, %v16073_v31  ;;  %v8401_v56 = vmul.f32 3.8918573e-05, %v16073_v31  ;;  %vm16096_vm1 = vmor %vm8256_vm15, %vm8257_vm14 }
 0xa47   : > { %v16094_v4 = vmul.f32 %v9198_v45, %v15844_v42  ;;  %v8292_v3 = vmul.f32 %v16078_v43, %v16040_v19  ;;  %v8353_v24 = vadd.f32 0.0036580483, %v8352_v47  ;;  %v8428_v10 = vmul.f32 %v16076_v60, %v16076_v60 }
 0xa48   : > { %v9199_v48 = vadd.f32 1.0, %v10456_v61  ;;  %v8259_v41 = vsel %vm16096_vm1, %v16014_v22, %v8255_v44  ;;  %v8368_v32 = vadd.f32 0.4994258, %v8367_v21  ;;  %v8402_v42 = vadd.f32 0.001143296, %v8401_v56 }
 0xa49   : > { %v8317_v45 = vadd.f32 0.18741608, %v8316_v59  ;;  %v16107_v20 = vmul.f32 0.5, %v7564_v37  ;;  %v8391_v6 = vadd.f32 0.00028619796, %v8390_v51  ;;  %v16109_v0 = vmin.f32 %v8428_v10, 16.0 }
 0xa4a   : > { %v16111_v30 = vpop.eup %11068  ;;  %v8279_v47 = vadd.f32 1.1283791, %v8278_v25  ;;  %v8369_v39 = vmul.f32 %v8368_v32, %v16012_v7  ;;  %v8403_v63 = vmul.f32 %v8402_v42, %v16073_v31  ;;  %v16116_v61 = vadd.f32 %v7629_v5, %v15314_v11 }
 0xa4b   : > { %v8264_v22 = vsel %vm16084_vm0, %v8263_v1, %v8259_v41  ;;  %v8293_v44 = vsub.f32 1.0, %v8292_v3  ;;  %v8332_v37 = vmul.f32 %v16111_v30, %v16070_v18  ;;  %v8354_v59 = vmul.f32 %v8353_v24, %v16012_v7 }
 0xa4c   : > { %17882 = vst [vmem:[#allocation76_spill] sm:$0xff] %v16116_v61  ;;  %v16124_v21 = vmul.f32 %v9199_v48, %v15850_v13  ;;  %v16126_v25 = vadd.f32 1.0, %v8369_v39  ;;  %v8404_v51 = vadd.f32 0.014752088, %v8403_v63  ;;  %v8430_v56 = vmul.f32 2.1237322e-06, %v16109_v0 }
 0xa4d   : > { %v8318_v29 = vmul.f32 %v8317_v45, %v15951_v16  ;;  %v8333_v10 = vsub.f32 1.0, %v8332_v37  ;;  %v8392_v62 = vmul.f32 %v8391_v6, %v16073_v31  ;;  %v8441_v1 = vmul.f32 3.8918573e-05, %v16109_v0 }
 0xa4e   : > { %v16132_v3 = vmul.f32 %v8264_v22, %v8240_v53  ;;  %v8300_v5 = vand.u32 2147483647, %v16040_v19  ;;  %11070 = vrcp.f32 %v16126_v25  ;;  %v16137_v13 = vmul.f32 0.70710677, %v16116_v61  ;;  %v7662_v22 = vpop.f32.mrf.mxu3 }
 0xa4f   : > { %v16140_v63 = vmul.f32 %v8279_v47, %v15892_v55  ;;  %v8294_v39 = vmul.f32 %v16078_v43, %v8293_v44  ;;  %v8355_v16 = vadd.f32 0.05243302, %v8354_v59  ;;  %v8405_v24 = vmul.f32 %v8404_v51, %v16073_v31 }
 0xa50   : > { %vm8296_vm2 = vweird.f32 %v16040_v19  ;;  %v8302_v53 = vand.u32 2147483648, %v16040_v19  ;;  %v8431_v48 = vadd.f32 0.00028619796, %v8430_v56  ;;  %v8442_v41 = vadd.f32 0.001143296, %v8441_v1 }
 0xa51   : > { %v8319_v32 = vadd.f32 1.1283791, %v8318_v29  ;;  %v8334_v42 = vmul.f32 %v16111_v30, %v8333_v10  ;;  %v8393_v45 = vadd.f32 0.0036580483, %v8392_v62  ;;  %v8406_v6 = vadd.f32 0.112945676, %v8405_v24 }
 0xa52   : > { %vm16148_vm3 = vcmp.eq.f32.partialorder %v8300_v5, 8.507059e+37  ;;  %v8443_v44 = vmul.f32 %v8442_v41, %v16109_v0  ;;  %v8468_v37 = vmul.f32 %v16137_v13, %v16137_v13  ;;  %v8295_v59 = vadd.f32 %v16078_v43, %v8294_v39  ;;  %v10688_v41 = vld [vmem:[%s11371_s3 + $0x8] sm:$0xff] }
 0xa53   : > { %vm8297_vm4 = vweird.f32 %v16078_v43  ;;  %v8356_v51 = vmul.f32 %v8355_v16, %v16012_v7  ;;  %v8407_v56 = vmul.f32 %v8406_v6, %v16073_v31  ;;  %v8303_v10 = vor.u32 1.1754944e-38, %v8302_v53  ;;  %v10696_v6 = vld [vmem:[%s11371_s3 + $0x48] sm:$0xff]  ;;  %9546 = vmatpush.bf16.msra.mxu0 %v10688_v41  ;;  %v10687_v53 = vld [vmem:[%s11371_s3] sm:$0xff] }
 0xa54   : > { %v16159_v29 = vpop.eup %11070  ;;  %v8432_v62 = vmul.f32 %v8431_v48, %v16109_v0  ;;  %v8444_v1 = vadd.f32 0.014752088, %v8443_v44  ;;  %v16163_v5 = vadd.f32 %v7662_v22, %v15336_v17  ;;  %v8335_v24 = vadd.f32 %v16111_v30, %v8334_v42  ;;  %vm16173_vm6 = vmor %vm8296_vm2, %vm8297_vm4  ;;  %9579 = vmatpush.bf16.msra.mxu1 %v10696_v6 }
 0xa55   : > { %vm8337_vm5 = vweird.f32 %v16111_v30  ;;  %v8342_v39 = vand.u32 2147483648, %v16070_v18  ;;  %v8394_v16 = vmul.f32 %v8393_v45, %v16073_v31  ;;  %v8372_v48 = vmul.f32 %v16159_v29, %v16126_v25 }
 0xa56   : > { %v8408_v42 = vadd.f32 0.4994258, %v8407_v56  ;;  %v8445_v22 = vmul.f32 %v8444_v1, %v16109_v0  ;;  %v16180_v44 = vmin.f32 %v8468_v37, 16.0  ;;  %v8299_v45 = vsel %vm16173_vm6, %v16078_v43, %v8295_v59 }
 0xa57   : > { %vm8336_vm7 = vweird.f32 %v16070_v18  ;;  %v8340_v19 = vand.u32 2147483647, %v16070_v18  ;;  %v8357_v55 = vadd.f32 0.18741608, %v8356_v51  ;;  %v8433_v43 = vadd.f32 0.0036580483, %v8432_v62  ;;  %9547 = vmatpush.bf16.msra.mxu0 %v10687_v53 }
 0xa58   : > { %vm16191_vm8 = vmor %vm8336_vm7, %vm8337_vm5  ;;  %v8409_v37 = vmul.f32 %v8408_v42, %v16073_v31  ;;  %v8446_v59 = vadd.f32 0.112945676, %v8445_v22  ;;  %v8470_v1 = vmul.f32 2.1237322e-06, %v16180_v44  ;;  %v8343_v51 = vor.u32 1.1754944e-38, %v8342_v39  ;;  %v10695_v22 = vld [vmem:[%s11371_s3 + $0x40] sm:$0xff] }
 0xa59   : > { %v8339_v18 = vsel %vm16191_vm8, %v16111_v30, %v8335_v24  ;;  %v8395_v41 = vadd.f32 0.05243302, %v8394_v16  ;;  %v8481_v6 = vmul.f32 3.8918573e-05, %v16180_v44  ;;  %v8304_v46 = vsel %vm16148_vm3, %v8303_v10, %v8299_v45  ;;  %9580 = vmatpush.bf16.msra.mxu1 %v10695_v22 }
 0xa5a   : > { %v8373_v61 = vsub.f32 1.0, %v8372_v48  ;;  %v16204_v42 = vadd.f32 1.0, %v8409_v37  ;;  %v8447_v62 = vmul.f32 %v8446_v59, %v16109_v0  ;;  %vm8341_vm9 = vcmp.eq.f32.partialorder %v8340_v19, 8.507059e+37 }
 0xa5b   : > { %v8358_v56 = vmul.f32 %v8357_v55, %v16012_v7  ;;  %v8471_v30 = vadd.f32 0.00028619796, %v8470_v1  ;;  %v8482_v24 = vadd.f32 0.001143296, %v8481_v6  ;;  %v8320_v39 = vmul.f32 %v8319_v32, %v15913_v12  ;;  %v7565_v7 = vpop.f32.mrf.mxu0 }
 0xa5c   : > { %v8344_v23 = vsel %vm8341_vm9, %v8343_v51, %v8339_v18  ;;  %v8434_v15 = vmul.f32 %v8433_v43, %v16109_v0  ;;  %v16212_v47 = vmul.f32 0.70710677, %v16163_v5  ;;  %v8305_v10 = vmul.f32 %v8304_v46, %v16140_v63 }
 0xa5d   : > { %v8396_v16 = vmul.f32 %v8395_v41, %v16073_v31  ;;  %11072 = vrcp.f32 %v16204_v42  ;;  %v8448_v48 = vadd.f32 0.4994258, %v8447_v62  ;;  %v17889_v55 = vclamps-f32 %v16132_v3, 1.0 }
 0xa5e   : > { %v8374_v12 = vmul.f32 %v16159_v29, %v8373_v61  ;;  %v16221_v32 = vmul.f32 0.5, %v16060_v54  ;;  %v8483_v19 = vmul.f32 %v8482_v24, %v16180_v44  ;;  %v17890_v37 = vpack.c.bf16 %v15740_v36, %v15621_v28 }
 0xa5f   : > { %v9200_v45 = vadd.f32 1.0, %v17889_v55  ;;  %v8345_v46 = vmul.f32 %v8344_v23, %v8320_v39  ;;  %v8359_v63 = vadd.f32 1.1283791, %v8358_v56  ;;  %v8449_v43 = vmul.f32 %v8448_v48, %v16109_v0 }
 0xa60   : > { %9548 = vmatmul.bf16.vlgmr.msra.gmra.mxu0 %v17890_v37  ;;  %v8472_v59 = vmul.f32 %v8471_v30, %v16180_v44  ;;  %v17891_v3 = vpack.c.bf16 %v15775_v26, %v15629_v35  ;;  %v8435_v61 = vadd.f32 0.05243302, %v8434_v15  ;;  %v8484_v1 = vadd.f32 0.014752088, %v8483_v19  ;;  %v10703_v15 = vld [vmem:[%s11371_s3 + $0x80] sm:$0xff] }
 0xa61   : > { %v8508_v54 = vmul.f32 %v16212_v47, %v16212_v47  ;;  %v16235_v18 = vadd.f32 %v7565_v7, %v15302_v58  ;;  %v10458_v28 = vclamps-f32 %v8305_v10, 1.0  ;;  %v8382_v36 = vand.u32 2147483648, %v16126_v25 }
 0xa62   : > { %9581 = vmatmul.bf16.vlgmr.msra.gmra.mxu1 %v17891_v3  ;;  %v8397_v51 = vadd.f32 0.18741608, %v8396_v16  ;;  %v16238_v41 = vadd.f32 1.0, %v8449_v43  ;;  %v8375_v6 = vadd.f32 %v16159_v29, %v8374_v12  ;;  %vm8377_vm10 = vweird.f32 %v16159_v29  ;;  %v10704_v43 = vld [vmem:[%s11371_s3 + $0x88] sm:$0xff] }
 0xa63   : > { %v8485_v35 = vmul.f32 %v8484_v1, %v16180_v44  ;;  %v16243_v26 = vmin.f32 %v8508_v54, 16.0  ;;  %v16245_v53 = vpop.eup %11072  ;;  %v16248_v62 = vmul.f32 %v9200_v45, %v15853_v9  ;;  %v10459_v22 = vclamps-f32 %v8345_v46, 1.0  ;;  %v10712_v54 = vld [vmem:[%s11371_s3 + $0xc8] sm:$0xff]  ;;  %9612 = vmatpush.bf16.msra.mxu2 %v10704_v43 }
 0xa64   : > { %v8473_v56 = vadd.f32 0.0036580483, %v8472_v59  ;;  %v16251_v30 = vmul.f32 0.70710677, %v16235_v18  ;;  %vm8376_vm11 = vweird.f32 %v16126_v25  ;;  %v8380_v24 = vand.u32 2147483647, %v16126_v25  ;;  %9645 = vmatpush.bf16.msra.mxu3 %v10712_v54 }
 0xa65   : > { %v8436_v39 = vmul.f32 %v8435_v61, %v16109_v0  ;;  %11074 = vrcp.f32 %v16238_v41  ;;  %v9201_v23 = vadd.f32 1.0, %v10458_v28  ;;  %vm16257_vm12 = vmor %vm8376_vm11, %vm8377_vm10  ;;  %v8383_v9 = vor.u32 1.1754944e-38, %v8382_v36 }
 0xa66   : > { %v8398_v10 = vmul.f32 %v8397_v51, %v16073_v31  ;;  %v8486_v16 = vadd.f32 0.112945676, %v8485_v35  ;;  %v8379_v48 = vsel %vm16257_vm12, %v16159_v29, %v8375_v6  ;;  %v8412_v25 = vmul.f32 %v16245_v53, %v16204_v42 }
 0xa67   : > { %v8510_v7 = vmul.f32 2.1237322e-06, %v16243_v26  ;;  %v8521_v55 = vmul.f32 3.8918573e-05, %v16243_v26  ;;  %v9202_v45 = vadd.f32 1.0, %v10459_v22  ;;  %v8474_v12 = vmul.f32 %v8473_v56, %v16180_v44  ;;  %9613 = vmatpush.bf16.msra.mxu2 %v10703_v15 }
 0xa68   : > { %v8487_v19 = vmul.f32 %v8486_v16, %v16180_v44  ;;  %v8548_v31 = vmul.f32 %v16251_v30, %v16251_v30  ;;  %v8360_v37 = vmul.f32 %v8359_v63, %v15978_v34  ;;  %vm8381_vm13 = vcmp.eq.f32.partialorder %v8380_v24, 8.507059e+37 }
 0xa69   : > { %v8437_v29 = vadd.f32 0.18741608, %v8436_v39  ;;  %v8522_v46 = vadd.f32 0.001143296, %v8521_v55  ;;  %v8384_v59 = vsel %vm8381_vm13, %v8383_v9, %v8379_v48  ;;  %v8399_v3 = vadd.f32 1.1283791, %v8398_v10  ;;  %v7598_v48 = vpop.f32.mrf.mxu1 }
 0xa6a   : > { %v8488_v61 = vadd.f32 0.4994258, %v8487_v19  ;;  %v16275_v1 = vmin.f32 %v8548_v31, 16.0  ;;  %v16281_v36 = vmul.f32 %v9201_v23, %v15949_v14  ;;  %v8413_v51 = vsub.f32 1.0, %v8412_v25  ;;  %v10711_v25 = vld [vmem:[%s11371_s3 + $0xc0] sm:$0xff] }
 0xa6b   : > { %v16278_v28 = vpop.eup %11074  ;;  %v8511_v6 = vadd.f32 0.00028619796, %v8510_v7  ;;  %v8523_v34 = vmul.f32 %v8522_v46, %v16243_v26  ;;  %v16285_v63 = vmul.f32 %v9202_v45, %v16010_v33  ;;  %v8475_v35 = vadd.f32 0.05243302, %v8474_v12  ;;  %v7631_v12 = vpop.f32.mrf.mxu2  ;;  %9646 = vmatpush.bf16.msra.mxu3 %v10711_v25 }
 0xa6c   : > { %v8489_v22 = vmul.f32 %v8488_v61, %v16180_v44  ;;  %v8550_v56 = vmul.f32 2.1237322e-06, %v16275_v1  ;;  %v8385_v24 = vmul.f32 %v8384_v59, %v8360_v37  ;;  %v8420_v39 = vand.u32 2147483647, %v16204_v42 }
 0xa6d   : > { %v8438_v14 = vmul.f32 %v8437_v29, %v16109_v0  ;;  %v8524_v23 = vadd.f32 0.014752088, %v8523_v34  ;;  %v16293_v9 = vmul.f32 %v8399_v3, %v16057_v52  ;;  %v8452_v33 = vmul.f32 %v16278_v28, %v16238_v41 }
 0xa6e   : > { %v16297_v10 = vadd.f32 1.0, %v8489_v22  ;;  %v8551_v16 = vadd.f32 0.00028619796, %v8550_v56  ;;  %v8414_v7 = vmul.f32 %v16245_v53, %v8413_v51  ;;  %v8512_v55 = vmul.f32 %v8511_v6, %v16243_v26 }
 0xa6f   : > { %v8525_v45 = vmul.f32 %v8524_v23, %v16243_v26  ;;  %v8561_v0 = vmul.f32 3.8918573e-05, %v16275_v1  ;;  %vm8416_vm14 = vweird.f32 %v16204_v42  ;;  %v8422_v52 = vand.u32 2147483648, %v16204_v42 }
 0xa70   : > { %v8476_v19 = vmul.f32 %v8475_v35, %v16180_v44  ;;  %11076 = vrcp.f32 %v16297_v10  ;;  %v10460_v31 = vclamps-f32 %v8385_v24, 1.0  ;;  %vm16308_vm15 = vcmp.eq.f32.partialorder %v8420_v39, 8.507059e+37 }
 0xa71   : > { %v8439_v29 = vadd.f32 1.1283791, %v8438_v14  ;;  %v8526_v46 = vadd.f32 0.112945676, %v8525_v45  ;;  %v16313_v43 = vadd.f32 %v7598_v48, %v15312_v2  ;;  %v8453_v59 = vsub.f32 1.0, %v8452_v33 }
 0xa72   : > { %v8552_v3 = vmul.f32 %v8551_v16, %v16275_v1  ;;  %v8562_v61 = vadd.f32 0.001143296, %v8561_v0  ;;  %v16317_v54 = vadd.f32 %v7631_v12, %v15314_v11  ;;  %v17896_v51 = vpack.c.bf16 %v15802_v27, %v15637_v38 }
 0xa73   : > { %v8415_v6 = vadd.f32 %v16245_v53, %v8414_v7  ;;  %vm8417_vm0 = vweird.f32 %v16245_v53  ;;  %v8513_v34 = vadd.f32 0.0036580483, %v8512_v55  ;;  %v8527_v35 = vmul.f32 %v8526_v46, %v16243_v26 }
 0xa74   : > { %9614 = vmatmul.bf16.vlgmr.msra.gmra.mxu2 %v17896_v51  ;;  %v17897_v22 = vpack.c.bf16 %v15903_v57, %v15709_v8  ;;  %v8423_v56 = vor.u32 1.1754944e-38, %v8422_v52  ;;  %v8477_v24 = vadd.f32 0.18741608, %v8476_v19  ;;  %v16329_v39 = vmul.f32 0.5, %v16235_v18  ;;  %vm16342_vm1 = vmor %vm8416_vm14, %vm8417_vm0 }
 0xa75   : > { %v8563_v14 = vmul.f32 %v8562_v61, %v16275_v1  ;;  %v16333_v38 = vmul.f32 %v8439_v29, %v16076_v60  ;;  %v8528_v27 = vadd.f32 0.4994258, %v8527_v35  ;;  %v8553_v23 = vadd.f32 0.0036580483, %v8552_v3 }
 0xa76   : > { %9647 = vmatmul.bf16.vlgmr.msra.gmra.mxu3 %v17897_v22  ;;  %v16336_v15 = vmul.f32 0.70710677, %v16313_v43  ;;  %v16338_v33 = vpop.eup %11076  ;;  %v9203_v16 = vadd.f32 1.0, %v10460_v31  ;;  %v8454_v57 = vmul.f32 %v16278_v28, %v8453_v59  ;;  %v16348_v60 = vmul.f32 0.70710677, %v16317_v54 }
 0xa77   : > { %v8564_v18 = vadd.f32 0.014752088, %v8563_v14  ;;  %v8419_v48 = vsel %vm16342_vm1, %v16245_v53, %v8415_v6  ;;  %v8460_v25 = vand.u32 2147483647, %v16238_v41  ;;  %v8462_v7 = vand.u32 2147483648, %v16238_v41 }
 0xa78   : > { %v8514_v42 = vmul.f32 %v8513_v34, %v16243_v26  ;;  %v8492_v55 = vmul.f32 %v16338_v33, %v16297_v10  ;;  %v8529_v45 = vmul.f32 %v8528_v27, %v16243_v26  ;;  %v8588_v12 = vmul.f32 %v16336_v15, %v16336_v15 }
 0xa79   : > { %v8565_v0 = vmul.f32 %v8564_v18, %v16275_v1  ;;  %vm8457_vm2 = vweird.f32 %v16278_v28  ;;  %v8478_v53 = vmul.f32 %v8477_v24, %v16180_v44  ;;  %v8554_v52 = vmul.f32 %v8553_v23, %v16275_v1 }
 0xa7a   : > { %v8628_v19 = vmul.f32 %v16348_v60, %v16348_v60  ;;  %v8424_v31 = vsel %vm16308_vm15, %v8423_v56, %v8419_v48  ;;  %v8455_v29 = vadd.f32 %v16278_v28, %v8454_v57  ;;  %v16370_v59 = vmin.f32 %v8588_v12, 16.0 }
 0xa7b   : > { %v8566_v46 = vadd.f32 0.112945676, %v8565_v0  ;;  %vm8456_vm3 = vweird.f32 %v16238_v41  ;;  %v8515_v3 = vadd.f32 0.05243302, %v8514_v42  ;;  %v16373_v61 = vadd.f32 1.0, %v8529_v45 }
 0xa7c   : > { %v16375_v51 = vmin.f32 %v8628_v19, 16.0  ;;  %v16378_v44 = vmul.f32 %v9203_v16, %v16051_v49  ;;  %vm16380_vm4 = vcmp.eq.f32.partialorder %v8460_v25, 8.507059e+37  ;;  %v8463_v37 = vor.u32 1.1754944e-38, %v8462_v7  ;;  %vm16387_vm5 = vmor %vm8456_vm3, %vm8457_vm2 }
 0xa7d   : > { %v8493_v34 = vsub.f32 1.0, %v8492_v55  ;;  %v8425_v35 = vmul.f32 %v8424_v31, %v16293_v9  ;;  %v8555_v22 = vadd.f32 0.05243302, %v8554_v52  ;;  %v8567_v56 = vmul.f32 %v8566_v46, %v16275_v1  ;;  %v7664_v52 = vpop.f32.mrf.mxu3 }
 0xa7e   : > { %v8590_v49 = vmul.f32 2.1237322e-06, %v16370_v59  ;;  %v8459_v24 = vsel %vm16387_vm5, %v16278_v28, %v8455_v29  ;;  %v8479_v14 = vadd.f32 1.1283791, %v8478_v53  ;;  %v8601_v27 = vmul.f32 3.8918573e-05, %v16370_v59 }
 0xa7f   : > { %v8630_v9 = vmul.f32 2.1237322e-06, %v16375_v51  ;;  %v8516_v23 = vmul.f32 %v8515_v3, %v16243_v26  ;;  %11078 = vrcp.f32 %v16373_v61  ;;  %v8568_v16 = vadd.f32 0.4994258, %v8567_v56 }
 0xa80   : > { %v8591_v8 = vadd.f32 0.00028619796, %v8590_v49  ;;  %v8494_v57 = vmul.f32 %v16338_v33, %v8493_v34  ;;  %v8602_v18 = vadd.f32 0.001143296, %v8601_v27  ;;  %v8641_v25 = vmul.f32 3.8918573e-05, %v16375_v51 }
 0xa81   : > { %v8631_v48 = vadd.f32 0.00028619796, %v8630_v9  ;;  %v10461_v7 = vclamps-f32 %v8425_v35, 1.0  ;;  %v8556_v28 = vmul.f32 %v8555_v22, %v16275_v1  ;;  %v8569_v42 = vmul.f32 %v8568_v16, %v16275_v1 }
 0xa82   : > { %v8592_v55 = vmul.f32 %v8591_v8, %v16370_v59  ;;  %v8500_v45 = vand.u32 2147483647, %v16297_v10  ;;  %v8603_v0 = vmul.f32 %v8602_v18, %v16370_v59  ;;  %v8642_v53 = vadd.f32 0.001143296, %v8641_v25 }
 0xa83   : > { %v8632_v12 = vmul.f32 %v8631_v48, %v16375_v51  ;;  %v8464_v19 = vsel %vm16380_vm4, %v8463_v37, %v8459_v24  ;;  %vm8497_vm6 = vweird.f32 %v16338_v33  ;;  %v8502_v31 = vand.u32 2147483648, %v16297_v10 }
 0xa84   : > { %v8517_v29 = vadd.f32 0.18741608, %v8516_v23  ;;  %v8495_v46 = vadd.f32 %v16338_v33, %v8494_v57  ;;  %v16413_v3 = vadd.f32 1.0, %v8569_v42  ;;  %v8604_v34 = vadd.f32 0.014752088, %v8603_v0 }
 0xa85   : > { %v8643_v35 = vmul.f32 %v8642_v53, %v16375_v51  ;;  %v16416_v41 = vpop.eup %11078  ;;  %v16419_v22 = vmul.f32 %v8479_v14, %v16137_v13  ;;  %v8557_v56 = vadd.f32 0.18741608, %v8556_v28  ;;  %v8593_v6 = vadd.f32 0.0036580483, %v8592_v55 }
 0xa86   : > { %v16422_v37 = vadd.f32 %v7664_v52, %v15336_v17  ;;  %v9204_v49 = vadd.f32 1.0, %v10461_v7  ;;  %vm8496_vm7 = vweird.f32 %v16297_v10  ;;  %11080 = vrcp.f32 %v16413_v3 }
 0xa87   : > { %v8633_v24 = vadd.f32 0.0036580483, %v8632_v12  ;;  %v16427_v27 = vmul.f32 %v8464_v19, %v16333_v38  ;;  %vm16431_vm8 = vmor %vm8496_vm7, %vm8497_vm6  ;;  %vm16435_vm9 = vcmp.eq.f32.partialorder %v8500_v45, 8.507059e+37  ;;  %v8503_v14 = vor.u32 1.1754944e-38, %v8502_v31 }
 0xa88   : > { %v8605_v23 = vmul.f32 %v8604_v34, %v16370_v59  ;;  %v8499_v10 = vsel %vm16431_vm8, %v16338_v33, %v8495_v46  ;;  %v8518_v38 = vmul.f32 %v8517_v29, %v16243_v26  ;;  %v8532_v16 = vmul.f32 %v16416_v41, %v16373_v61 }
 0xa89   : > { %v8644_v8 = vadd.f32 0.014752088, %v8643_v35  ;;  %v8558_v57 = vmul.f32 %v8557_v56, %v16275_v1  ;;  %v8594_v18 = vmul.f32 %v8593_v6, %v16370_v59  ;;  %v16449_v25 = vmul.f32 0.70710677, %v16422_v37 }
 0xa8a   : > { %v8606_v48 = vadd.f32 0.112945676, %v8605_v23  ;;  %v8634_v7 = vmul.f32 %v8633_v24, %v16375_v51  ;;  %v9264_v33 = vpack.c.bf16 %v16248_v62, %v15996_v40  ;;  %v9265_v26 = vpack.c.bf16 %v16281_v36, %v16046_v50 }
 0xa8b   : > { %v8645_v28 = vmul.f32 %v8644_v8, %v16375_v51  ;;  %v16458_v42 = vmul.f32 %v9204_v49, %v16107_v20  ;;  %v10462_v1 = vclamps-f32 %v16427_v27, 1.0  ;;  %v8668_v45 = vmul.f32 %v16449_v25, %v16449_v25 }
 0xa8c   : > { %v8607_v55 = vmul.f32 %v8606_v48, %v16370_v59  ;;  %v11081_v0 = vpop.eup %11080  ;;  %v8504_v12 = vsel %vm16435_vm9, %v8503_v14, %v8499_v10  ;;  %v16466_v53 = vadd.f32 1.1283791, %v8518_v38  ;;  %v8533_v40 = vsub.f32 1.0, %v8532_v16  ;;  %9553 = vmatmul.bf16.gmra.mxu0 %v9264_v33  ;;  %9586 = vmatmul.bf16.gmra.mxu1 %v9265_v26 }
 0xa8d   : > { %v8646_v62 = vadd.f32 0.112945676, %v8645_v28  ;;  %vm8537_vm10 = vweird.f32 %v16416_v41  ;;  %v8559_v50 = vadd.f32 1.1283791, %v8558_v57  ;;  %v8572_v20 = vmul.f32 %v11081_v0, %v16413_v3 }
 0xa8e   : > { %v8595_v36 = vadd.f32 0.05243302, %v8594_v18  ;;  %v8608_v52 = vadd.f32 0.4994258, %v8607_v55  ;;  %v8635_v19 = vadd.f32 0.05243302, %v8634_v7  ;;  %v9266_v56 = vpack.c.bf16 %v16285_v63, %v16094_v4 }
 0xa8f   : > { %v8647_v31 = vmul.f32 %v8646_v62, %v16375_v51  ;;  %v16471_v29 = vmin.f32 %v8668_v45, 16.0  ;;  %v8573_v46 = vsub.f32 1.0, %v8572_v20  ;;  %v8580_v34 = vand.u32 2147483647, %v16413_v3 }
 0xa90   : > { %v8582_v35 = vand.u32 2147483648, %v16413_v3  ;;  %v8534_v6 = vmul.f32 %v16416_v41, %v8533_v40  ;;  %v8609_v49 = vmul.f32 %v8608_v52, %v16370_v59  ;;  %vm8577_vm11 = vweird.f32 %v11081_v0  ;;  %9619 = vmatmul.bf16.gmra.mxu2 %v9266_v56 }
 0xa91   : > { %v8648_v24 = vadd.f32 0.4994258, %v8647_v31  ;;  %v8670_v27 = vmul.f32 2.1237322e-06, %v16471_v29  ;;  %v8574_v9 = vmul.f32 %v11081_v0, %v8573_v46  ;;  %v8596_v13 = vmul.f32 %v8595_v36, %v16370_v59 }
 0xa92   : > { %v8681_v14 = vmul.f32 3.8918573e-05, %v16471_v29  ;;  %v16482_v23 = vadd.f32 1.0, %v8609_v49  ;;  %v8636_v10 = vmul.f32 %v8635_v19, %v16375_v51  ;;  %v8560_v38 = vmul.f32 %v8559_v50, %v16251_v30 }
 0xa93   : > { %v8649_v4 = vmul.f32 %v8648_v24, %v16375_v51  ;;  %v8671_v63 = vadd.f32 0.00028619796, %v8670_v27  ;;  %v8575_v16 = vadd.f32 %v11081_v0, %v8574_v9  ;;  %vm8576_vm12 = vweird.f32 %v16413_v3 }
 0xa94   : > { %v8682_v8 = vadd.f32 0.001143296, %v8681_v14  ;;  %v8535_v57 = vadd.f32 %v16416_v41, %v8534_v6  ;;  %vm8578_vm13 = vmor %vm8576_vm12, %vm8577_vm11  ;;  %vm8581_vm14 = vcmp.eq.f32.partialorder %v8580_v34, 8.507059e+37  ;;  %v8583_v18 = vor.u32 1.1754944e-38, %v8582_v35 }
 0xa95   : > { %11082 = vrcp.f32 %v16482_v23  ;;  %v8579_v48 = vsel %vm8578_vm13, %v11081_v0, %v8575_v16  ;;  %v8597_v7 = vadd.f32 0.18741608, %v8596_v13  ;;  %v16490_v28 = vadd.f32 1.0, %v8649_v4 }
 0xa96   : > { %v8672_v33 = vmul.f32 %v8671_v63, %v16471_v29  ;;  %v8542_v26 = vand.u32 2147483648, %v16373_v61  ;;  %v8584_v30 = vsel %vm8581_vm14, %v8583_v18, %v8579_v48  ;;  %v8637_v55 = vadd.f32 0.18741608, %v8636_v10 }
 0xa97   : > { %v8683_v3 = vmul.f32 %v8682_v8, %v16471_v29  ;;  %vm8536_vm15 = vweird.f32 %v16373_v61  ;;  %v8540_v45 = vand.u32 2147483647, %v16373_v61  ;;  %v8585_v40 = vmul.f32 %v8584_v30, %v8560_v38 }
 0xa98   : > { %11084 = vrcp.f32 %v16490_v28  ;;  %v8505_v0 = vmul.f32 %v8504_v12, %v16419_v22  ;;  %vm16501_vm0 = vmor %vm8536_vm15, %vm8537_vm10  ;;  %v8673_v50 = vadd.f32 0.0036580483, %v8672_v33  ;;  %v9267_v36 = vpack.c.bf16 %v16378_v44, %v16124_v21 }
 0xa99   : > { %v8684_v20 = vadd.f32 0.014752088, %v8683_v3  ;;  %v16507_v52 = vadd.f32 1.0, %v10462_v1  ;;  %v8539_v61 = vsel %vm16501_vm0, %v16416_v41, %v8535_v57  ;;  %v10465_v19 = vclamps-f32 %v8585_v40, 1.0 }
 0xa9a   : > { %v8598_v22 = vmul.f32 %v8597_v7, %v16370_v59  ;;  %v8543_v31 = vor.u32 1.1754944e-38, %v8542_v26  ;;  %v8638_v46 = vmul.f32 %v8637_v55, %v16375_v51  ;;  %v8674_v34 = vmul.f32 %v8673_v50, %v16471_v29  ;;  %9652 = vmatmul.bf16.gmra.mxu3 %v9267_v36  ;;  %v7568_v7 = vpop.f32.mrf.mxu0 }
 0xa9b   : > { %v11083_v12 = vpop.eup %11082  ;;  %v8685_v35 = vmul.f32 %v8684_v20, %v16471_v29  ;;  %v8520_v21 = vmul.f32 %v16466_v53, %v16212_v47  ;;  %vm8541_vm1 = vcmp.eq.f32.partialorder %v8540_v45, 8.507059e+37  ;;  %v9208_v44 = vadd.f32 1.0, %v10465_v19 }
 0xa9c   : > { %v8612_v1 = vmul.f32 %v11083_v12, %v16482_v23  ;;  %v10463_v41 = vclamps-f32 %v8505_v0, 1.0  ;;  %v8544_v56 = vsel %vm8541_vm1, %v8543_v31, %v8539_v61  ;;  %v8675_v6 = vadd.f32 0.05243302, %v8674_v34 }
 0xa9d   : > { %v8686_v59 = vadd.f32 0.112945676, %v8685_v35  ;;  %v9244_v24 = vmul.f32 %v9208_v44, %v16329_v39  ;;  %v8599_v51 = vadd.f32 1.1283791, %v8598_v22  ;;  %v8622_v9 = vand.u32 2147483648, %v16482_v23 }
 0xa9e   : > { %v11085_v49 = vpop.eup %11084  ;;  %v8613_v27 = vsub.f32 1.0, %v8612_v1  ;;  %v8639_v13 = vadd.f32 1.1283791, %v8638_v46  ;;  %v8676_v47 = vmul.f32 %v8675_v6, %v16471_v29  ;;  %vm8617_vm2 = vweird.f32 %v11083_v12 }
 0xa9f   : > { %v8652_v14 = vmul.f32 %v11085_v49, %v16490_v28  ;;  %v8687_v53 = vmul.f32 %v8686_v59, %v16471_v29  ;;  %v8620_v4 = vand.u32 2147483647, %v16482_v23  ;;  %v9268_v63 = vpack.c.bf16 %v9244_v24, %v16458_v42 }
 0xaa0   : > { %v8614_v10 = vmul.f32 %v11083_v12, %v8613_v27  ;;  %vm8616_vm3 = vweird.f32 %v16482_v23  ;;  %v8677_v38 = vadd.f32 0.18741608, %v8676_v47  ;;  %v8623_v57 = vor.u32 1.1754944e-38, %v8622_v9 }
 0xaa1   : > { %v8653_v39 = vsub.f32 1.0, %v8652_v14  ;;  %v8688_v16 = vadd.f32 0.4994258, %v8687_v53  ;;  %v8660_v18 = vand.u32 2147483647, %v16490_v28  ;;  %v8662_v48 = vand.u32 2147483648, %v16490_v28  ;;  %9558 = vmatmul.bf16.gmra.mxu0 %v9268_v63  ;;  %vm8618_vm4 = vmor %vm8616_vm3, %vm8617_vm2  ;;  %v7667_v14 = vpop.f32.mrf.mxu3 }
 0xaa2   : > { %v8615_v8 = vadd.f32 %v11083_v12, %v8614_v10  ;;  %vm8657_vm5 = vweird.f32 %v11085_v49  ;;  %v16531_v42 = vadd.f32 %v7568_v7, %v15302_v58  ;;  %v8600_v23 = vmul.f32 %v8599_v51, %v16336_v15 }
 0xaa3   : > { %v8654_v33 = vmul.f32 %v11085_v49, %v8653_v39  ;;  %v8689_v26 = vmul.f32 %v8688_v16, %v16471_v29  ;;  %vm8621_vm6 = vcmp.eq.f32.partialorder %v8620_v4, 8.507059e+37  ;;  %v8678_v55 = vmul.f32 %v8677_v38, %v16471_v29  ;;  %v7601_v29 = vpop.f32.mrf.mxu1 }
 0xaa4   : > { %v8619_v30 = vsel %vm8618_vm4, %v11083_v12, %v8615_v8  ;;  %vm8656_vm7 = vweird.f32 %v16490_v28  ;;  %v9206_v0 = vadd.f32 1.0, %v10463_v41  ;;  %v8663_v50 = vor.u32 1.1754944e-38, %v8662_v48  ;;  %v17910_v12 = vld [vmem:[#allocation76_spill] sm:$0xff] }
 0xaa5   : > { %v8624_v3 = vsel %vm8621_vm6, %v8623_v57, %v8619_v30  ;;  %v8655_v45 = vadd.f32 %v11085_v49, %v8654_v33  ;;  %v16536_v40 = vadd.f32 1.0, %v8689_v26  ;;  %vm8658_vm8 = vmor %vm8656_vm7, %vm8657_vm5  ;;  %v16539_v20 = vmul.f32 0.70710677, %v16531_v42 }
 0xaa6   : > { %v8625_v62 = vmul.f32 %v8624_v3, %v8600_v23  ;;  %v8640_v36 = vmul.f32 %v8639_v13, %v16348_v60  ;;  %vm8661_vm9 = vcmp.eq.f32.partialorder %v8660_v18, 8.507059e+37  ;;  %v16543_v61 = vmul.f32 %v8544_v56, %v8520_v21  ;;  %v7634_v13 = vpop.f32.mrf.mxu2 }
 0xaa7   : > { %v8659_v15 = vsel %vm8658_vm8, %v11085_v49, %v8655_v45  ;;  %11086 = vrcp.f32 %v16536_v40  ;;  %v8679_v22 = vadd.f32 1.1283791, %v8678_v55  ;;  %v7694_v31 = vmul.f32 0.5, %v17910_v12 }
 0xaa8   : > { %v10466_v19 = vclamps-f32 %v8625_v62, 1.0  ;;  %v8664_v28 = vsel %vm8661_vm9, %v8663_v50, %v8659_v15  ;;  %v8708_v34 = vmul.f32 %v16539_v20, %v16539_v20  ;;  %v16549_v35 = vadd.f32 %v7601_v29, %v15312_v2 }
 0xaa9   : > { %v8665_v46 = vmul.f32 %v8664_v28, %v8640_v36  ;;  %v9241_v60 = vmul.f32 %v16507_v52, %v16221_v32  ;;  %v7697_v44 = vmul.f32 0.5, %v16313_v43  ;;  %v7698_v21 = vmul.f32 0.5, %v16317_v54 }
 0xaaa   : > { %v9209_v1 = vadd.f32 1.0, %v10466_v19  ;;  %v9242_v41 = vmul.f32 %v9206_v0, %v7694_v31  ;;  %v16555_v6 = vmin.f32 %v8708_v34, 16.0  ;;  %v16558_v59 = vmul.f32 0.70710677, %v16549_v35 }
 0xaab   : > { %v10467_v56 = vclamps-f32 %v8665_v46, 1.0  ;;  %v10464_v49 = vclamps-f32 %v16543_v61, 1.0  ;;  %v8680_v51 = vmul.f32 %v8679_v22, %v16449_v25  ;;  %v8700_v27 = vand.u32 2147483647, %v16536_v40 }
 0xaac   : > { %v9245_v24 = vmul.f32 %v9209_v1, %v7697_v44  ;;  %v8710_v43 = vmul.f32 2.1237322e-06, %v16555_v6  ;;  %v8721_v54 = vmul.f32 3.8918573e-05, %v16555_v6  ;;  %v8748_v9 = vmul.f32 %v16558_v59, %v16558_v59 }
 0xaad   : > { %v11087_v32 = vpop.eup %11086  ;;  %v9210_v52 = vadd.f32 1.0, %v10467_v56  ;;  %v8702_v53 = vand.u32 2147483648, %v16536_v40  ;;  %v16570_v25 = vadd.f32 %v7634_v13, %v15314_v11  ;;  %vm16574_vm10 = vcmp.eq.f32.partialorder %v8700_v27, 8.507059e+37 }
 0xaae   : > { %v8692_v47 = vmul.f32 %v11087_v32, %v16536_v40  ;;  %v9269_v10 = vpack.c.bf16 %v9245_v24, %v9241_v60  ;;  %v8711_v63 = vadd.f32 0.00028619796, %v8710_v43  ;;  %v8722_v39 = vadd.f32 0.001143296, %v8721_v54 }
 0xaaf   : > { %v9246_v4 = vmul.f32 %v9210_v52, %v7698_v21  ;;  %v16572_v38 = vmin.f32 %v8748_v9, 16.0  ;;  %v16579_v57 = vmul.f32 0.70710677, %v16570_v25  ;;  %v16582_v18 = vadd.f32 %v7667_v14, %v15336_v17 }
 0xab0   : > { %v8693_v16 = vsub.f32 1.0, %v8692_v47  ;;  %9591 = vmatmul.bf16.gmra.mxu1 %v9269_v10  ;;  %v8712_v7 = vmul.f32 %v8711_v63, %v16555_v6  ;;  %v8723_v33 = vmul.f32 %v8722_v39, %v16555_v6  ;;  %vm8697_vm11 = vweird.f32 %v11087_v32 }
 0xab1   : > { %v9270_v48 = vpack.c.bf16 %v9246_v4, %v9242_v41  ;;  %v8750_v26 = vmul.f32 2.1237322e-06, %v16572_v38  ;;  %v8761_v30 = vmul.f32 3.8918573e-05, %v16572_v38  ;;  %v8788_v55 = vmul.f32 %v16579_v57, %v16579_v57 }
 0xab2   : > { %v8694_v23 = vmul.f32 %v11087_v32, %v8693_v16  ;;  %vm8696_vm12 = vweird.f32 %v16536_v40  ;;  %v8713_v3 = vadd.f32 0.0036580483, %v8712_v7  ;;  %v8724_v45 = vadd.f32 0.014752088, %v8723_v33 }
 0xab3   : > { %9624 = vmatmul.bf16.gmra.mxu2 %v9270_v48  ;;  %v8751_v0 = vadd.f32 0.00028619796, %v8750_v26  ;;  %v8703_v50 = vor.u32 1.1754944e-38, %v8702_v53  ;;  %v8762_v36 = vadd.f32 0.001143296, %v8761_v30  ;;  %v16591_v15 = vmin.f32 %v8788_v55, 16.0  ;;  %vm8698_vm13 = vmor %vm8696_vm12, %vm8697_vm11  ;;  %v7570_v30 = vpop.f32.mrf.mxu0 }
 0xab4   : > { %v8695_v62 = vadd.f32 %v11087_v32, %v8694_v23  ;;  %v8714_v29 = vmul.f32 %v8713_v3, %v16555_v6  ;;  %v8725_v61 = vmul.f32 %v8724_v45, %v16555_v6  ;;  %v16597_v28 = vmul.f32 0.70710677, %v16582_v18 }
 0xab5   : > { %v8752_v19 = vmul.f32 %v8751_v0, %v16572_v38  ;;  %v8763_v22 = vmul.f32 %v8762_v36, %v16572_v38  ;;  %v8790_v12 = vmul.f32 2.1237322e-06, %v16591_v15  ;;  %v8801_v31 = vmul.f32 3.8918573e-05, %v16591_v15 }
 0xab6   : > { %v8699_v40 = vsel %vm8698_vm13, %v11087_v32, %v8695_v62  ;;  %v9207_v46 = vadd.f32 1.0, %v10464_v49  ;;  %v8726_v60 = vadd.f32 0.112945676, %v8725_v61  ;;  %v8715_v24 = vadd.f32 0.05243302, %v8714_v29 }
 0xab7   : > { %v8704_v34 = vsel %vm16574_vm10, %v8703_v50, %v8699_v40  ;;  %v8753_v44 = vadd.f32 0.0036580483, %v8752_v19  ;;  %v8764_v21 = vadd.f32 0.014752088, %v8763_v22  ;;  %v8791_v41 = vadd.f32 0.00028619796, %v8790_v12 }
 0xab8   : > { %v8705_v1 = vmul.f32 %v8704_v34, %v8680_v51  ;;  %v8802_v56 = vadd.f32 0.001143296, %v8801_v31  ;;  %v8727_v27 = vmul.f32 %v8726_v60, %v16555_v6  ;;  %v8828_v52 = vmul.f32 %v16597_v28, %v16597_v28  ;;  %v7603_v31 = vpop.f32.mrf.mxu1 }
 0xab9   : > { %v8754_v32 = vmul.f32 %v8753_v44, %v16572_v38  ;;  %v8765_v49 = vmul.f32 %v8764_v21, %v16572_v38  ;;  %v8792_v54 = vmul.f32 %v8791_v41, %v16591_v15  ;;  %v7695_v51 = vmul.f32 0.5, %v16163_v5 }
 0xaba   : > { %v10468_v43 = vclamps-f32 %v8705_v1, 1.0  ;;  %v8803_v9 = vmul.f32 %v8802_v56, %v16591_v15  ;;  %v7699_v13 = vmul.f32 0.5, %v16422_v37  ;;  %v8728_v14 = vadd.f32 0.4994258, %v8727_v27 }
 0xabb   : > { %v8755_v47 = vadd.f32 0.05243302, %v8754_v32  ;;  %v8766_v10 = vadd.f32 0.112945676, %v8765_v49  ;;  %v8793_v4 = vadd.f32 0.0036580483, %v8792_v54  ;;  %v8716_v39 = vmul.f32 %v8715_v24, %v16555_v6 }
 0xabc   : > { %v9211_v53 = vadd.f32 1.0, %v10468_v43  ;;  %v16613_v63 = vmin.f32 %v8828_v52, 16.0  ;;  %v8729_v16 = vmul.f32 %v8728_v14, %v16555_v6  ;;  %v8804_v8 = vadd.f32 0.014752088, %v8803_v9 }
 0xabd   : > { %v9243_v48 = vmul.f32 %v9207_v46, %v7695_v51  ;;  %v8767_v33 = vmul.f32 %v8766_v10, %v16572_v38  ;;  %v8756_v37 = vmul.f32 %v8755_v47, %v16572_v38  ;;  %v8794_v45 = vmul.f32 %v8793_v4, %v16591_v15 }
 0xabe   : > { %v9247_v7 = vmul.f32 %v9211_v53, %v7699_v13  ;;  %v8830_v5 = vmul.f32 2.1237322e-06, %v16613_v63  ;;  %v16619_v26 = vadd.f32 1.0, %v8729_v16  ;;  %v8805_v23 = vmul.f32 %v8804_v8, %v16591_v15 }
 0xabf   : > { %v8768_v3 = vadd.f32 0.4994258, %v8767_v33  ;;  %v8717_v62 = vadd.f32 0.18741608, %v8716_v39  ;;  %v7571_v36 = vadd.f32 %v7570_v30, %v15302_v58  ;;  %v8841_v19 = vmul.f32 3.8918573e-05, %v16613_v63  ;;  %v16681_v30 = vpop.f32.mrf.mxu0 }
 0xac0   : > { %v9271_v55 = vpack.c.bf16 %v9247_v7, %v9243_v48  ;;  %v8831_v0 = vadd.f32 0.00028619796, %v8830_v5  ;;  %11088 = vrcp.f32 %v16619_v26  ;;  %v8806_v29 = vadd.f32 0.112945676, %v8805_v23 }
 0xac1   : > { %v8769_v50 = vmul.f32 %v8768_v3, %v16572_v38  ;;  %v8757_v40 = vadd.f32 0.18741608, %v8756_v37  ;;  %v8795_v12 = vadd.f32 0.05243302, %v8794_v45  ;;  %v8718_v46 = vmul.f32 %v8717_v62, %v16555_v6 }
 0xac2   : > { %9657 = vmatmul.bf16.gmra.mxu3 %v9271_v55  ;;  %v8832_v61 = vmul.f32 %v8831_v0, %v16613_v63  ;;  %v8807_v34 = vmul.f32 %v8806_v29, %v16591_v15  ;;  %v8842_v44 = vadd.f32 0.001143296, %v8841_v19  ;;  %v16634_v1 = vmul.f32 0.5, %v16531_v42 }
 0xac3   : > { %v16629_v22 = vadd.f32 1.0, %v8769_v50  ;;  %v16637_v21 = vmul.f32 0.70710677, %v7571_v36  ;;  %v16642_v56 = vmul.f32 0.5, %v16549_v35  ;;  %v7604_v6 = vadd.f32 %v7603_v31, %v15312_v2 }
 0xac4   : > { %v8833_v60 = vadd.f32 0.0036580483, %v8832_v61  ;;  %v8808_v24 = vadd.f32 0.4994258, %v8807_v34  ;;  %v8758_v42 = vmul.f32 %v8757_v40, %v16572_v38  ;;  %v8796_v52 = vmul.f32 %v8795_v12, %v16591_v15 }
 0xac5   : > { %11090 = vrcp.f32 %v16629_v22  ;;  %v8843_v43 = vmul.f32 %v8842_v44, %v16613_v63  ;;  %v8719_v49 = vadd.f32 1.1283791, %v8718_v46  ;;  %v16652_v54 = vmul.f32 0.5, %v16570_v25 }
 0xac6   : > { %v16639_v41 = vpop.eup %11088  ;;  %v8834_v27 = vmul.f32 %v8833_v60, %v16613_v63  ;;  %v8809_v35 = vmul.f32 %v8808_v24, %v16591_v15  ;;  %v16656_v9 = vmul.f32 0.5, %v16582_v18  ;;  %v8868_v47 = vmul.f32 %v16637_v21, %v16637_v21 }
 0xac7   : > { %v8732_v32 = vmul.f32 %v16639_v41, %v16619_v26  ;;  %v8844_v14 = vadd.f32 0.014752088, %v8843_v43  ;;  %v8740_v38 = vand.u32 2147483647, %v16619_v26  ;;  %v8742_v53 = vand.u32 2147483648, %v16619_v26 }
 0xac8   : > { %v8835_v13 = vadd.f32 0.05243302, %v8834_v27  ;;  %v16662_v10 = vadd.f32 1.0, %v8809_v35  ;;  %v16664_v4 = vmul.f32 0.70710677, %v7604_v6  ;;  %v16669_v8 = vmin.f32 %v8868_v47, 16.0 }
 0xac9   : > { %v8733_v51 = vsub.f32 1.0, %v8732_v32  ;;  %v8759_v39 = vadd.f32 1.1283791, %v8758_v42  ;;  %v8797_v16 = vadd.f32 0.18741608, %v8796_v52  ;;  %v8845_v18 = vmul.f32 %v8844_v14, %v16613_v63 }
 0xaca   : > { %11092 = vrcp.f32 %v16662_v10  ;;  %v16675_v33 = vmul.f32 0.5, %v7571_v36  ;;  %v8720_v5 = vmul.f32 %v8719_v49, %v16539_v20  ;;  %vm8736_vm14 = vweird.f32 %v16619_v26 }
 0xacb   : > { %v16666_v25 = vpop.eup %11090  ;;  %v8734_v48 = vmul.f32 %v16639_v41, %v8733_v51  ;;  %v8782_v37 = vand.u32 2147483648, %v16629_v22  ;;  %v8836_v23 = vmul.f32 %v8835_v13, %v16613_v63  ;;  %vm16683_vm15 = vcmp.eq.f32.partialorder %v8740_v38, 8.507059e+37 }
 0xacc   : > { %v8772_v7 = vmul.f32 %v16666_v25, %v16629_v22  ;;  %v8846_v45 = vadd.f32 0.112945676, %v8845_v18  ;;  %v8870_v0 = vmul.f32 2.1237322e-06, %v16669_v8  ;;  %v8908_v62 = vmul.f32 %v16664_v4, %v16664_v4 }
 0xacd   : > { %v8743_v20 = vor.u32 1.1754944e-38, %v8742_v53  ;;  %v16691_v50 = vmul.f32 %v8759_v39, %v16558_v59  ;;  %v8780_v36 = vand.u32 2147483647, %v16629_v22  ;;  %v8798_v29 = vmul.f32 %v8797_v16, %v16591_v15  ;;  %v16703_v59 = vpop.f32.mrf.mxu1  ;;  %v7636_v53 = vpop.f32.mrf.mxu2 }
 0xace   : > { %v8773_v3 = vsub.f32 1.0, %v8772_v7  ;;  %v8735_v61 = vadd.f32 %v16639_v41, %v8734_v48  ;;  %vm8737_vm0 = vweird.f32 %v16639_v41  ;;  %v8847_v19 = vmul.f32 %v8846_v45, %v16613_v63  ;;  %v7575_v39 = vpop.f32.mrf.mxu0 }
 0xacf   : > { %v8871_v40 = vadd.f32 0.00028619796, %v8870_v0  ;;  %vm8776_vm1 = vweird.f32 %v16629_v22  ;;  %v8881_v31 = vmul.f32 3.8918573e-05, %v16669_v8  ;;  %v16701_v46 = vmin.f32 %v8908_v62, 16.0  ;;  %vm16710_vm2 = vmor %vm8736_vm14, %vm8737_vm0 }
 0xad0   : > { %v8774_v12 = vmul.f32 %v16666_v25, %v8773_v3  ;;  %v16705_v34 = vpop.eup %11092  ;;  %v8783_v15 = vor.u32 1.1754944e-38, %v8782_v37  ;;  %v8837_v60 = vadd.f32 0.18741608, %v8836_v23  ;;  %v8848_v44 = vadd.f32 0.4994258, %v8847_v19 }
 0xad1   : > { %v8872_v24 = vmul.f32 %v8871_v40, %v16669_v8  ;;  %vm8777_vm3 = vweird.f32 %v16666_v25  ;;  %vm16715_vm4 = vcmp.eq.f32.partialorder %v8780_v36, 8.507059e+37  ;;  %v8799_v42 = vadd.f32 1.1283791, %v8798_v29 }
 0xad2   : > { %v8812_v52 = vmul.f32 %v16705_v34, %v16662_v10  ;;  %v16721_v43 = vmul.f32 0.5, %v7604_v6  ;;  %v8739_v26 = vsel %vm16710_vm2, %v16639_v41, %v8735_v61  ;;  %v8849_v49 = vmul.f32 %v8848_v44, %v16613_v63  ;;  %vm16743_vm5 = vmor %vm8776_vm1, %vm8777_vm3  ;;  %v7669_v44 = vpop.f32.mrf.mxu3 }
 0xad3   : > { %v8873_v35 = vadd.f32 0.0036580483, %v8872_v24  ;;  %v8882_v51 = vadd.f32 0.001143296, %v8881_v31  ;;  %v8775_v13 = vadd.f32 %v16666_v25, %v8774_v12  ;;  %v8820_v47 = vand.u32 2147483647, %v16662_v10 }
 0xad4   : > { %v8813_v14 = vsub.f32 1.0, %v8812_v52  ;;  %v8910_v38 = vmul.f32 2.1237322e-06, %v16701_v46  ;;  %v8838_v6 = vmul.f32 %v8837_v60, %v16613_v63  ;;  %v16731_v16 = vadd.f32 1.0, %v8849_v49 }
 0xad5   : > { %v8874_v18 = vmul.f32 %v8873_v35, %v16669_v8  ;;  %v8883_v41 = vmul.f32 %v8882_v51, %v16669_v8  ;;  %v8744_v48 = vsel %vm16683_vm15, %v8743_v20, %v8739_v26  ;;  %v8921_v23 = vmul.f32 3.8918573e-05, %v16701_v46  ;;  %v7608_v20 = vpop.f32.mrf.mxu1 }
 0xad6   : > { %v8814_v7 = vmul.f32 %v16705_v34, %v8813_v14  ;;  %v8911_v37 = vadd.f32 0.00028619796, %v8910_v38  ;;  %v8800_v3 = vmul.f32 %v8799_v42, %v16579_v57  ;;  %v8822_v45 = vand.u32 2147483648, %v16662_v10 }
 0xad7   : > { %11094 = vrcp.f32 %v16731_v16  ;;  %v7637_v55 = vadd.f32 %v7636_v53, %v15314_v11  ;;  %v8779_v0 = vsel %vm16743_vm5, %v16666_v25, %v8775_v13  ;;  %vm8816_vm6 = vweird.f32 %v16662_v10 }
 0xad8   : > { %v8875_v62 = vadd.f32 0.05243302, %v8874_v18  ;;  %v8884_v22 = vadd.f32 0.014752088, %v8883_v41  ;;  %v8745_v36 = vmul.f32 %v8744_v48, %v8720_v5  ;;  %v8839_v29 = vadd.f32 1.1283791, %v8838_v6 }
 0xad9   : > { %v8912_v61 = vmul.f32 %v8911_v37, %v16701_v46  ;;  %v8922_v57 = vadd.f32 0.001143296, %v8921_v23  ;;  %v8815_v19 = vadd.f32 %v16705_v34, %v8814_v7  ;;  %vm8817_vm7 = vweird.f32 %v16705_v34 }
 0xada   : > { %vm16758_vm8 = vcmp.eq.f32.partialorder %v8820_v47, 8.507059e+37  ;;  %v8885_v25 = vmul.f32 %v8884_v22, %v16669_v8  ;;  %v8784_v12 = vsel %vm16715_vm4, %v8783_v15, %v8779_v0  ;;  %v8823_v31 = vor.u32 1.1754944e-38, %v8822_v45  ;;  %vm16773_vm9 = vmor %vm8816_vm6, %vm8817_vm7  ;;  %v16818_v40 = vpop.f32.mrf.mxu3 }
 0xadb   : > { %v8913_v60 = vadd.f32 0.0036580483, %v8912_v61  ;;  %v8923_v5 = vmul.f32 %v8922_v57, %v16701_v46  ;;  %v8876_v24 = vmul.f32 %v8875_v62, %v16669_v8  ;;  %v16767_v42 = vmul.f32 0.5, %v7637_v55  ;;  %v16813_v57 = vpop.f32.mrf.mxu2 }
 0xadc   : > { %v8886_v27 = vadd.f32 0.112945676, %v8885_v25  ;;  %v16769_v52 = vmul.f32 0.70710677, %v7637_v55  ;;  %v10469_v49 = vclamps-f32 %v8745_v36, 1.0  ;;  %v16778_v15 = vmul.f32 %v8839_v29, %v16597_v28 }
 0xadd   : > { %v11095_v26 = vpop.eup %11094  ;;  %v8914_v32 = vmul.f32 %v8913_v60, %v16701_v46  ;;  %v8924_v51 = vadd.f32 0.014752088, %v8923_v5  ;;  %v8785_v13 = vmul.f32 %v8784_v12, %v16691_v50  ;;  %v8819_v14 = vsel %vm16773_vm9, %v16705_v34, %v8815_v19 }
 0xade   : > { %v8852_v47 = vmul.f32 %v11095_v26, %v16731_v16  ;;  %v16787_v10 = vadd.f32 %v7669_v44, %v15336_v17  ;;  %v8887_v38 = vmul.f32 %v8886_v27, %v16669_v8  ;;  %v8948_v39 = vmul.f32 %v16769_v52, %v16769_v52 }
 0xadf   : > { %v8915_v53 = vadd.f32 0.05243302, %v8914_v32  ;;  %v8925_v28 = vmul.f32 %v8924_v51, %v16701_v46  ;;  %v8860_v50 = vand.u32 2147483647, %v16731_v16  ;;  %v8862_v18 = vand.u32 2147483648, %v16731_v16 }
 0xae0   : > { %v8853_v6 = vsub.f32 1.0, %v8852_v47  ;;  %v8877_v41 = vadd.f32 0.18741608, %v8876_v24  ;;  %v8824_v34 = vsel %vm16758_vm8, %v8823_v31, %v8819_v14  ;;  %v8888_v48 = vadd.f32 0.4994258, %v8887_v38 }
 0xae1   : > { %v8926_v7 = vadd.f32 0.112945676, %v8925_v28  ;;  %v16797_v37 = vmin.f32 %v8948_v39, 16.0  ;;  %v8916_v63 = vmul.f32 %v8915_v53, %v16701_v46  ;;  %v16801_v45 = vmul.f32 0.70710677, %v16787_v10 }
 0xae2   : > { %v8854_v23 = vmul.f32 %v11095_v26, %v8853_v6  ;;  %v16805_v55 = vadd.f32 %v16681_v30, %v15302_v58  ;;  %vm8857_vm10 = vweird.f32 %v11095_v26  ;;  %v8889_v0 = vmul.f32 %v8888_v48, %v16669_v8 }
 0xae3   : > { %v8927_v62 = vmul.f32 %v8926_v7, %v16701_v46  ;;  %v8950_v22 = vmul.f32 2.1237322e-06, %v16797_v37  ;;  %v8825_v20 = vmul.f32 %v8824_v34, %v8800_v3  ;;  %v8961_v29 = vmul.f32 3.8918573e-05, %v16797_v37 }
 0xae4   : > { %v8855_v36 = vadd.f32 %v11095_v26, %v8854_v23  ;;  %v8988_v61 = vmul.f32 %v16801_v45, %v16801_v45  ;;  %vm8856_vm11 = vweird.f32 %v16731_v16  ;;  %v16816_v58 = vadd.f32 1.0, %v8889_v0 }
 0xae5   : > { %v8928_v30 = vadd.f32 0.4994258, %v8927_v62  ;;  %v8951_v19 = vadd.f32 0.00028619796, %v8950_v22  ;;  %vm16820_vm12 = vmor %vm8856_vm11, %vm8857_vm10  ;;  %v8878_v3 = vmul.f32 %v8877_v41, %v16669_v8  ;;  %v8917_v12 = vadd.f32 0.18741608, %v8916_v63  ;;  %v7641_v41 = vpop.f32.mrf.mxu2  ;;  %v7674_v63 = vpop.f32.mrf.mxu3 }
 0xae6   : > { %v8962_v31 = vadd.f32 0.001143296, %v8961_v29  ;;  %v16825_v60 = vmin.f32 %v8988_v61, 16.0  ;;  %v9212_v5 = vadd.f32 1.0, %v10469_v49  ;;  %v8859_v16 = vsel %vm16820_vm12, %v11095_v26, %v8855_v36 }
 0xae7   : > { %11096 = vrcp.f32 %v16816_v58  ;;  %v16831_v44 = vmul.f32 0.70710677, %v16805_v55  ;;  %v10470_v24 = vclamps-f32 %v8785_v13, 1.0  ;;  %v10471_v27 = vclamps-f32 %v8825_v20, 1.0 }
 0xae8   : > { %v8863_v35 = vor.u32 1.1754944e-38, %v8862_v18  ;;  %v8929_v32 = vmul.f32 %v8928_v30, %v16701_v46  ;;  %vm8861_vm13 = vcmp.eq.f32.partialorder %v8860_v50, 8.507059e+37  ;;  %v8952_v8 = vmul.f32 %v8951_v19, %v16797_v37 }
 0xae9   : > { %v8963_v51 = vmul.f32 %v8962_v31, %v16797_v37  ;;  %v8990_v49 = vmul.f32 2.1237322e-06, %v16825_v60  ;;  %v8879_v47 = vadd.f32 1.1283791, %v8878_v3  ;;  %v8918_v26 = vmul.f32 %v8917_v12, %v16701_v46 }
 0xaea   : > { %v8864_v14 = vsel %vm8861_vm13, %v8863_v35, %v8859_v16  ;;  %v16838_v38 = vadd.f32 1.0, %v8929_v32  ;;  %v8953_v53 = vadd.f32 0.0036580483, %v8952_v8  ;;  %v9028_v39 = vmul.f32 %v16831_v44, %v16831_v44 }
 0xaeb   : > { %v8964_v28 = vadd.f32 0.014752088, %v8963_v51  ;;  %v8991_v13 = vadd.f32 0.00028619796, %v8990_v49  ;;  %v16843_v6 = vmul.f32 %v9212_v5, %v16634_v1  ;;  %v16845_v50 = vadd.f32 1.0, %v10470_v24 }
 0xaec   : > { %v16847_v18 = vadd.f32 1.0, %v10471_v27  ;;  %11098 = vrcp.f32 %v16838_v38  ;;  %v8900_v46 = vand.u32 2147483647, %v16816_v58  ;;  %v8954_v48 = vmul.f32 %v8953_v53, %v16797_v37 }
 0xaed   : > { %v11097_v34 = vpop.eup %11096  ;;  %v8965_v7 = vmul.f32 %v8964_v28, %v16797_v37  ;;  %v8992_v23 = vmul.f32 %v8991_v13, %v16825_v60  ;;  %v16855_v1 = vmul.f32 %v8864_v14, %v16778_v15  ;;  %v8880_v0 = vmul.f32 %v8879_v47, %v16637_v21 }
 0xaee   : > { %v8892_v62 = vmul.f32 %v11097_v34, %v16816_v58  ;;  %v8919_v22 = vadd.f32 1.1283791, %v8918_v26  ;;  %vm8896_vm14 = vweird.f32 %v16816_v58  ;;  %v8955_v20 = vadd.f32 0.05243302, %v8954_v48 }
 0xaef   : > { %v8966_v36 = vadd.f32 0.112945676, %v8965_v7  ;;  %v16860_v29 = vmin.f32 %v9028_v39, 16.0  ;;  %v8902_v30 = vand.u32 2147483648, %v16816_v58  ;;  %v8993_v19 = vadd.f32 0.0036580483, %v8992_v23 }
 0xaf0   : > { %v8893_v61 = vsub.f32 1.0, %v8892_v62  ;;  %v9001_v25 = vmul.f32 3.8918573e-05, %v16825_v60  ;;  %vm16864_vm15 = vcmp.eq.f32.partialorder %v8900_v46, 8.507059e+37  ;;  %v8956_v21 = vmul.f32 %v8955_v20, %v16797_v37 }
 0xaf1   : > { %v8967_v3 = vmul.f32 %v8966_v36, %v16797_v37  ;;  %v9030_v12 = vmul.f32 2.1237322e-06, %v16860_v29  ;;  %v10472_v5 = vclamps-f32 %v16855_v1, 1.0  ;;  %v8994_v24 = vmul.f32 %v8993_v19, %v16825_v60 }
 0xaf2   : > { %v11099_v31 = vpop.eup %11098  ;;  %v8894_v16 = vmul.f32 %v11097_v34, %v8893_v61  ;;  %v9002_v27 = vadd.f32 0.001143296, %v9001_v25  ;;  %vm8897_vm0 = vweird.f32 %v11097_v34  ;;  %v9041_v8 = vmul.f32 3.8918573e-05, %v16860_v29 }
 0xaf3   : > { %v8932_v35 = vmul.f32 %v11099_v31, %v16838_v38  ;;  %v8968_v32 = vadd.f32 0.4994258, %v8967_v3  ;;  %v8957_v49 = vadd.f32 0.18741608, %v8956_v21  ;;  %v9031_v47 = vadd.f32 0.00028619796, %v9030_v12  ;;  %vm16880_vm1 = vmor %vm8896_vm14, %vm8897_vm0 }
 0xaf4   : > { %v8895_v51 = vadd.f32 %v11097_v34, %v8894_v16  ;;  %v9003_v14 = vmul.f32 %v9002_v27, %v16825_v60  ;;  %v8940_v53 = vand.u32 2147483647, %v16838_v38  ;;  %v8995_v13 = vadd.f32 0.05243302, %v8994_v24 }
 0xaf5   : > { %v8933_v26 = vsub.f32 1.0, %v8932_v35  ;;  %v8969_v28 = vmul.f32 %v8968_v32, %v16797_v37  ;;  %vm8937_vm2 = vweird.f32 %v11099_v31  ;;  %v8942_v41 = vand.u32 2147483648, %v16838_v38 }
 0xaf6   : > { %v9004_v46 = vadd.f32 0.014752088, %v9003_v14  ;;  %v9032_v48 = vmul.f32 %v9031_v47, %v16860_v29  ;;  %v8899_v7 = vsel %vm16880_vm1, %v11097_v34, %v8895_v51  ;;  %v9042_v1 = vadd.f32 0.001143296, %v9041_v8 }
 0xaf7   : > { %v8934_v23 = vmul.f32 %v11099_v31, %v8933_v26  ;;  %v16888_v63 = vadd.f32 1.0, %v8969_v28  ;;  %v8903_v62 = vor.u32 1.1754944e-38, %v8902_v30  ;;  %v8958_v58 = vmul.f32 %v8957_v49, %v16797_v37 }
 0xaf8   : > { %v9005_v20 = vmul.f32 %v9004_v46, %v16825_v60  ;;  %v9033_v36 = vadd.f32 0.0036580483, %v9032_v48  ;;  %vm8936_vm3 = vweird.f32 %v16838_v38  ;;  %v8996_v19 = vmul.f32 %v8995_v13, %v16825_v60 }
 0xaf9   : > { %v8935_v61 = vadd.f32 %v11099_v31, %v8934_v23  ;;  %11100 = vrcp.f32 %v16888_v63  ;;  %v8904_v34 = vsel %vm16864_vm15, %v8903_v62, %v8899_v7  ;;  %vm8938_vm4 = vmor %vm8936_vm3, %vm8937_vm2  ;;  %vm8941_vm5 = vcmp.eq.f32.partialorder %v8940_v53, 8.507059e+37 }
 0xafa   : > { %v8943_v25 = vor.u32 1.1754944e-38, %v8942_v41  ;;  %v16900_v37 = vadd.f32 %v16703_v59, %v15312_v2  ;;  %v9006_v21 = vadd.f32 0.112945676, %v9005_v20  ;;  %v9034_v3 = vmul.f32 %v9033_v36, %v16860_v29 }
 0xafb   : > { %v8939_v30 = vsel %vm8938_vm4, %v11099_v31, %v8935_v61  ;;  %v9043_v38 = vmul.f32 %v9042_v1, %v16860_v29  ;;  %v16906_v12 = vmul.f32 %v16845_v50, %v16642_v56  ;;  %v8959_v16 = vadd.f32 1.1283791, %v8958_v58 }
 0xafc   : > { %v8944_v15 = vsel %vm8941_vm5, %v8943_v25, %v8939_v30  ;;  %v16909_v24 = vmul.f32 0.5, %v16787_v10  ;;  %v8905_v27 = vmul.f32 %v8904_v34, %v8880_v0  ;;  %v8920_v35 = vmul.f32 %v8919_v22, %v16664_v4 }
 0xafd   : > { %v8997_v2 = vadd.f32 0.18741608, %v8996_v19  ;;  %v9007_v59 = vmul.f32 %v9006_v21, %v16825_v60  ;;  %v16915_v31 = vmul.f32 %v16847_v18, %v16652_v54  ;;  %v9035_v32 = vadd.f32 0.05243302, %v9034_v3 }
 0xafe   : > { %v9044_v8 = vadd.f32 0.014752088, %v9043_v38  ;;  %v16918_v56 = vmul.f32 0.70710677, %v16900_v37  ;;  %v16920_v51 = vadd.f32 1.0, %v10472_v5  ;;  %v8945_v10 = vmul.f32 %v8944_v15, %v8920_v35 }
 0xaff   : > { %v11101_v50 = vpop.eup %11100  ;;  %v9008_v49 = vadd.f32 0.4994258, %v9007_v59  ;;  %v16924_v4 = vadd.f32 %v16813_v57, %v15314_v11  ;;  %v8960_v0 = vmul.f32 %v8959_v16, %v16769_v52  ;;  %v10473_v14 = vclamps-f32 %v8905_v27, 1.0 }
 0xb00   : > { %v8972_v22 = vmul.f32 %v11101_v50, %v16888_v63  ;;  %v9045_v54 = vmul.f32 %v9044_v8, %v16860_v29  ;;  %v9068_v18 = vmul.f32 %v16918_v56, %v16918_v56  ;;  %v8980_v47 = vand.u32 2147483647, %v16888_v63 }
 0xb01   : > { %v8998_v5 = vmul.f32 %v8997_v2, %v16825_v60  ;;  %v9009_v26 = vmul.f32 %v9008_v49, %v16825_v60  ;;  %v9036_v11 = vmul.f32 %v9035_v32, %v16860_v29  ;;  %v10474_v52 = vclamps-f32 %v8945_v10, 1.0 }
 0xb02   : > { %v8973_v53 = vsub.f32 1.0, %v8972_v22  ;;  %v9046_v57 = vadd.f32 0.112945676, %v9045_v54  ;;  %v16935_v28 = vmin.f32 %v9068_v18, 16.0  ;;  %vm8977_vm6 = vweird.f32 %v11101_v50 }
 0xb03   : > { %v16937_v13 = vadd.f32 1.0, %v9009_v26  ;;  %v16940_v39 = vmul.f32 0.70710677, %v16924_v4  ;;  %v9216_v7 = vadd.f32 1.0, %v10473_v14  ;;  %vm8976_vm7 = vweird.f32 %v16888_v63 }
 0xb04   : > { %v8974_v41 = vmul.f32 %v11101_v50, %v8973_v53  ;;  %v9047_v46 = vmul.f32 %v9046_v57, %v16860_v29  ;;  %v9070_v48 = vmul.f32 2.1237322e-06, %v16935_v28  ;;  %v9081_v60 = vmul.f32 3.8918573e-05, %v16935_v28  ;;  %vm16949_vm8 = vmor %vm8976_vm7, %vm8977_vm6 }
 0xb05   : > { %v8982_v23 = vand.u32 2147483648, %v16888_v63  ;;  %11102 = vrcp.f32 %v16937_v13  ;;  %v9037_v62 = vadd.f32 0.18741608, %v9036_v11  ;;  %vm16953_vm9 = vcmp.eq.f32.partialorder %v8980_v47, 8.507059e+37 }
 0xb06   : > { %v8975_v1 = vadd.f32 %v11101_v50, %v8974_v41  ;;  %v9048_v58 = vadd.f32 0.4994258, %v9047_v46  ;;  %v9071_v20 = vadd.f32 0.00028619796, %v9070_v48  ;;  %v8999_v19 = vadd.f32 1.1283791, %v8998_v5 }
 0xb07   : > { %v9082_v34 = vadd.f32 0.001143296, %v9081_v60  ;;  %v9108_v63 = vmul.f32 %v16940_v39, %v16940_v39  ;;  %v9217_v25 = vadd.f32 1.0, %v10474_v52  ;;  %v8983_v38 = vor.u32 1.1754944e-38, %v8982_v23 }
 0xb08   : > { %v8979_v30 = vsel %vm16949_vm8, %v11101_v50, %v8975_v1  ;;  %v9049_v21 = vmul.f32 %v9048_v58, %v16860_v29  ;;  %v9072_v3 = vmul.f32 %v9071_v20, %v16935_v28  ;;  %v16968_v27 = vadd.f32 %v16818_v40, %v15336_v17 }
 0xb09   : > { %v9083_v15 = vmul.f32 %v9082_v34, %v16935_v28  ;;  %v16964_v16 = vmin.f32 %v9108_v63, 16.0  ;;  %v16971_v35 = vmul.f32 %v9216_v7, %v16675_v33  ;;  %v9038_v2 = vmul.f32 %v9037_v62, %v16860_v29 }
 0xb0a   : > { %v16974_v59 = vadd.f32 1.0, %v9049_v21  ;;  %v9073_v32 = vadd.f32 0.0036580483, %v9072_v3  ;;  %v8984_v50 = vsel %vm16953_vm9, %v8983_v38, %v8979_v30  ;;  %v16981_v17 = vmul.f32 %v9217_v25, %v16721_v43 }
 0xb0b   : > { %v11103_v8 = vpop.eup %11102  ;;  %v9084_v10 = vadd.f32 0.014752088, %v9083_v15  ;;  %v9110_v49 = vmul.f32 2.1237322e-06, %v16964_v16  ;;  %v9121_v22 = vmul.f32 3.8918573e-05, %v16964_v16  ;;  %v9000_v33 = vmul.f32 %v8999_v19, %v16801_v45 }
 0xb0c   : > { %v9012_v40 = vmul.f32 %v11103_v8, %v16937_v13  ;;  %11104 = vrcp.f32 %v16974_v59  ;;  %v9020_v29 = vand.u32 2147483647, %v16937_v13  ;;  %v9022_v54 = vand.u32 2147483648, %v16937_v13 }
 0xb0d   : > { %v9074_v18 = vmul.f32 %v9073_v32, %v16935_v28  ;;  %v16990_v14 = vmul.f32 0.70710677, %v16968_v27  ;;  %v8985_v47 = vmul.f32 %v8984_v50, %v8960_v0  ;;  %v9085_v43 = vmul.f32 %v9084_v10, %v16935_v28 }
 0xb0e   : > { %v9013_v5 = vsub.f32 1.0, %v9012_v40  ;;  %v9111_v26 = vadd.f32 0.00028619796, %v9110_v49  ;;  %vm9016_vm10 = vweird.f32 %v16937_v13  ;;  %vm9017_vm11 = vweird.f32 %v11103_v8 }
 0xb0f   : > { %v9039_v45 = vadd.f32 1.1283791, %v9038_v2  ;;  %v9122_v53 = vadd.f32 0.001143296, %v9121_v22  ;;  %v9075_v57 = vadd.f32 0.05243302, %v9074_v18  ;;  %v9148_v60 = vmul.f32 %v16990_v14, %v16990_v14  ;;  %vm9018_vm13 = vmor %vm9016_vm10, %vm9017_vm11 }
 0xb10   : > { %v9014_v11 = vmul.f32 %v11103_v8, %v9013_v5  ;;  %v9086_v52 = vadd.f32 0.112945676, %v9085_v43  ;;  %v9112_v41 = vmul.f32 %v9111_v26, %v16964_v16  ;;  %vm16995_vm12 = vcmp.eq.f32.partialorder %v9020_v29, 8.507059e+37 }
 0xb11   : > { %v9023_v48 = vor.u32 1.1754944e-38, %v9022_v54  ;;  %v9123_v0 = vmul.f32 %v9122_v53, %v16964_v16  ;;  %v10475_v23 = vclamps-f32 %v8985_v47, 1.0  ;;  %v9060_v36 = vand.u32 2147483647, %v16974_v59 }
 0xb12   : > { %v11105_v7 = vpop.eup %11104  ;;  %v9015_v1 = vadd.f32 %v11103_v8, %v9014_v11  ;;  %v9087_v62 = vmul.f32 %v9086_v52, %v16935_v28  ;;  %v9113_v58 = vadd.f32 0.0036580483, %v9112_v41  ;;  %v9062_v61 = vand.u32 2147483648, %v16974_v59 }
 0xb13   : > { %v9052_v20 = vmul.f32 %v11105_v7, %v16974_v59  ;;  %v9124_v19 = vadd.f32 0.014752088, %v9123_v0  ;;  %v9076_v63 = vmul.f32 %v9075_v57, %v16935_v28  ;;  %v17010_v30 = vmin.f32 %v9148_v60, 16.0 }
 0xb14   : > { %v9019_v34 = vsel %vm9018_vm13, %v11103_v8, %v9015_v1  ;;  %v9088_v25 = vadd.f32 0.4994258, %v9087_v62  ;;  %v9114_v13 = vmul.f32 %v9113_v58, %v16964_v16  ;;  %v9218_v15 = vadd.f32 1.0, %v10475_v23 }
 0xb15   : > { %v9024_v21 = vsel %vm16995_vm12, %v9023_v48, %v9019_v34  ;;  %v9053_v3 = vsub.f32 1.0, %v9052_v20  ;;  %v9125_v38 = vmul.f32 %v9124_v19, %v16964_v16  ;;  %v9150_v50 = vmul.f32 2.1237322e-06, %v17010_v30  ;;  %v17033_v48 = vld [vmem:[%s753_s28] ss:$0 sm:$0xff]  ;;  %v9615_v19 = vpop.f32.mrf.mxu2  ;;  %v9648_v34 = vpop.f32.mrf.mxu3 }
 0xb16   : > { %v9025_v2 = vmul.f32 %v9024_v21, %v9000_v33  ;;  %v9089_v32 = vmul.f32 %v9088_v25, %v16935_v28  ;;  %vm9057_vm14 = vweird.f32 %v11105_v7  ;;  %v9161_v49 = vmul.f32 3.8918573e-05, %v17010_v30 }
 0xb17   : > { %v9054_v8 = vmul.f32 %v11105_v7, %v9053_v3  ;;  %v9126_v10 = vadd.f32 0.112945676, %v9125_v38  ;;  %vm9056_vm15 = vweird.f32 %v16974_v59  ;;  %v9151_v29 = vadd.f32 0.00028619796, %v9150_v50 }
 0xb18   : > { %v10476_v22 = vclamps-f32 %v9025_v2, 1.0  ;;  %v17020_v40 = vadd.f32 1.0, %v9089_v32  ;;  %v9077_v18 = vadd.f32 0.18741608, %v9076_v63  ;;  %v9115_v47 = vadd.f32 0.05243302, %v9114_v13  ;;  %vm9058_vm0 = vmor %vm9056_vm15, %vm9057_vm14 }
 0xb19   : > { %v9055_v54 = vadd.f32 %v11105_v7, %v9054_v8  ;;  %v9127_v33 = vmul.f32 %v9126_v10, %v16964_v16  ;;  %v9063_v43 = vor.u32 1.1754944e-38, %v9062_v61  ;;  %v9162_v26 = vadd.f32 0.001143296, %v9161_v49 }
 0xb1a   : > { %v9219_v5 = vadd.f32 1.0, %v10476_v22  ;;  %11106 = vrcp.f32 %v17020_v40  ;;  %v9254_v53 = vmul.f32 %v9218_v15, %v16767_v42  ;;  %vm9061_vm1 = vcmp.eq.f32.partialorder %v9060_v36, 8.507059e+37 }
 0xb1b   : > { %v9059_v11 = vsel %vm9058_vm0, %v11105_v7, %v9055_v54  ;;  %v9128_v59 = vadd.f32 0.4994258, %v9127_v33  ;;  %v9040_v52 = vmul.f32 %v9039_v45, %v16831_v44  ;;  %v9152_v46 = vmul.f32 %v9151_v29, %v17010_v30  ;;  %v9549_v7 = vpop.f32.mrf.mxu0  ;;  %v9582_v44 = vpop.f32.mrf.mxu1 }
 0xb1c   : > { %v9255_v57 = vmul.f32 %v9219_v5, %v16909_v24  ;;  %v9064_v41 = vsel %vm9061_vm1, %v9063_v43, %v9059_v11  ;;  %v9251_v0 = vmul.f32 %v16920_v51, %v16656_v9  ;;  %v9078_v42 = vmul.f32 %v9077_v18, %v16935_v28 }
 0xb1d   : > { %v9116_v60 = vmul.f32 %v9115_v47, %v16964_v16  ;;  %v9129_v24 = vmul.f32 %v9128_v59, %v16964_v16  ;;  %v9065_v45 = vmul.f32 %v9064_v41, %v9040_v52  ;;  %v9163_v23 = vmul.f32 %v9162_v26, %v17010_v30 }
 0xb1e   : > { %v9272_v1 = vpack.c.bf16 %v16971_v35, %v16843_v6  ;;  %v9273_v62 = vpack.c.bf16 %v16981_v17, %v16906_v12  ;;  %v9550_v9 = vadd.f32 %v17033_v48, %v9549_v7  ;;  %v9274_v51 = vpack.c.bf16 %v9254_v53, %v16915_v31 }
 0xb1f   : > { %v17045_v58 = vadd.f32 1.0, %v9129_v24  ;;  %v9153_v20 = vadd.f32 0.0036580483, %v9152_v46  ;;  %v9164_v36 = vadd.f32 0.014752088, %v9163_v23  ;;  %v9275_v61 = vpack.c.bf16 %v9255_v57, %v9251_v0  ;;  %v9650_v46 = vpop.f32.mrf.mxu3 }
 0xb20   : > { %v11107_v28 = vpop.eup %11106  ;;  %9563 = vmatmul.bf16.gmra.mxu0 %v9272_v1  ;;  %9596 = vmatmul.bf16.gmra.mxu1 %v9273_v62  ;;  %v9079_v6 = vadd.f32 1.1283791, %v9078_v42  ;;  %v9117_v12 = vadd.f32 0.18741608, %v9116_v60  ;;  %v10477_v35 = vclamps-f32 %v9065_v45, 1.0  ;;  %v9583_v25 = vadd.f32 %v9582_v44, %v9550_v9 }
 0xb21   : > { %v9092_v63 = vmul.f32 %v11107_v28, %v17020_v40  ;;  %11108 = vrcp.f32 %v17045_v58  ;;  %9629 = vmatmul.bf16.gmra.mxu2 %v9274_v51  ;;  %9662 = vmatmul.bf16.gmra.mxu3 %v9275_v61  ;;  %v9165_v31 = vmul.f32 %v9164_v36, %v17010_v30  ;;  %v7708_v21 = vmul.f32 0.5, %v16805_v55 }
 0xb22   : > { %v9100_v3 = vand.u32 2147483647, %v17020_v40  ;;  %v9102_v13 = vand.u32 2147483648, %v17020_v40  ;;  %v9154_v38 = vmul.f32 %v9153_v20, %v17010_v30  ;;  %vm9097_vm2 = vweird.f32 %v11107_v28 }
 0xb23   : > { %v9093_v17 = vsub.f32 1.0, %v9092_v63  ;;  %v9166_v2 = vadd.f32 0.112945676, %v9165_v31  ;;  %v9551_v32 = vpop.f32.mrf.mxu0  ;;  %v9584_v50 = vpop.f32.mrf.mxu1  ;;  %v9616_v8 = vadd.f32 %v9615_v19, %v9583_v25  ;;  %v9080_v10 = vmul.f32 %v9079_v6, %v16918_v56 }
 0xb24   : > { %v9118_v49 = vmul.f32 %v9117_v12, %v16964_v16  ;;  %v9552_v22 = vadd.f32 %v17033_v48, %v9551_v32  ;;  %v9220_v29 = vadd.f32 1.0, %v10477_v35  ;;  %vm9096_vm3 = vweird.f32 %v17020_v40  ;;  %v17937_v16 = vld [vmem:[#allocation13_spill] sm:$0xff]  ;;  %v9617_v40 = vpop.f32.mrf.mxu2  ;;  %v17938_v12 = vld [vmem:[#allocation60_spill] sm:$0xff] }
 0xb25   : > { %v9094_v15 = vmul.f32 %v11107_v28, %v9093_v17  ;;  %v9167_v18 = vmul.f32 %v9166_v2, %v17010_v30  ;;  %v9649_v47 = vadd.f32 %v9648_v34, %v9616_v8  ;;  %vm9098_vm4 = vmor %vm9096_vm3, %vm9097_vm2  ;;  %vm9101_vm5 = vcmp.eq.f32.partialorder %v9100_v3, 8.507059e+37 }
 0xb26   : > { %v9103_v33 = vor.u32 1.1754944e-38, %v9102_v13  ;;  %v9155_v43 = vadd.f32 0.05243302, %v9154_v38  ;;  %v9585_v53 = vadd.f32 %v9584_v50, %v9552_v22  ;;  %v9119_v57 = vadd.f32 1.1283791, %v9118_v49 }
 0xb27   : > { %v11109_v55 = vpop.eup %11108  ;;  %v9095_v54 = vadd.f32 %v11107_v28, %v9094_v15  ;;  %v9168_v56 = vadd.f32 0.4994258, %v9167_v18  ;;  %v17063_v11 = vadd.f32 %v9649_v47, %v17937_v16  ;;  %v9256_v41 = vmul.f32 %v9220_v29, %v7708_v21 }
 0xb28   : > { %v9132_v5 = vmul.f32 %v11109_v55, %v17045_v58  ;;  %v9142_v42 = vand.u32 2147483648, %v17045_v58  ;;  %v9618_v24 = vadd.f32 %v9617_v40, %v9585_v53  ;;  %vm9137_vm6 = vweird.f32 %v11109_v55 }
 0xb29   : > { %v9099_v26 = vsel %vm9098_vm4, %v11107_v28, %v9095_v54  ;;  %v9169_v60 = vmul.f32 %v9168_v56, %v17010_v30  ;;  %9681 = vst [vmem:[#allocation2 + $0x30] sm:$0xff] %v17063_v11  ;;  %v9140_v44 = vand.u32 2147483647, %v17045_v58  ;;  %v9156_v45 = vmul.f32 %v9155_v43, %v17010_v30 }
 0xb2a   : > { %v9104_v59 = vsel %vm9101_vm5, %v9103_v33, %v9099_v26  ;;  %v9133_v52 = vsub.f32 1.0, %v9132_v5  ;;  %v9651_v62 = vadd.f32 %v9650_v46, %v9618_v24  ;;  %vm9136_vm7 = vweird.f32 %v17045_v58  ;;  %v17940_v24 = vld [vmem:[#allocation64_spill] sm:$0xff] }
 0xb2b   : > { %v9105_v0 = vmul.f32 %v9104_v59, %v9080_v10  ;;  %v17070_v23 = vadd.f32 1.0, %v9169_v60  ;;  %v9554_v9 = vpop.f32.mrf.mxu0  ;;  %v9587_v51 = vpop.f32.mrf.mxu1  ;;  %v9276_v20 = vpack.c.bf16 %v9256_v41, %v9256_v41  ;;  %v7709_v61 = vmul.f32 0.5, %v16900_v37  ;;  %vm9138_vm8 = vmor %vm9136_vm7, %vm9137_vm6 }
 0xb2c   : > { %v9134_v7 = vmul.f32 %v11109_v55, %v9133_v52  ;;  %v9555_v36 = vadd.f32 %v17033_v48, %v9554_v9  ;;  %v9120_v19 = vmul.f32 %v9119_v57, %v16940_v39  ;;  %v9143_v34 = vor.u32 1.1754944e-38, %v9142_v42  ;;  %v9620_v37 = vpop.f32.mrf.mxu2  ;;  %v9653_v39 = vpop.f32.mrf.mxu3 }
 0xb2d   : > { %v10478_v1 = vclamps-f32 %v9105_v0, 1.0  ;;  %11110 = vrcp.f32 %v17070_v23  ;;  %vm9141_vm9 = vcmp.eq.f32.partialorder %v9140_v44, 8.507059e+37  ;;  %v17078_v35 = vadd.f32 %v9651_v62, %v17938_v12 }
 0xb2e   : > { %v9135_v28 = vadd.f32 %v11109_v55, %v9134_v7  ;;  %v9157_v58 = vadd.f32 0.18741608, %v9156_v45  ;;  %v9588_v31 = vadd.f32 %v9587_v51, %v9555_v36  ;;  %v7710_v10 = vmul.f32 0.5, %v16924_v4 }
 0xb2f   : > { %v9221_v6 = vadd.f32 1.0, %v10478_v1  ;;  %9682 = vst [vmem:[#allocation2] sm:$0xff] %v17078_v35  ;;  %v9182_v5 = vand.u32 2147483648, %v17070_v23  ;;  %v9180_v4 = vand.u32 2147483647, %v17070_v23  ;;  %vm9176_vm11 = vweird.f32 %v17070_v23 }
 0xb30   : > { %v9139_v63 = vsel %vm9138_vm8, %v11109_v55, %v9135_v28  ;;  %9568 = vmatmul.bf16.gmra.mxu0 %v9276_v20  ;;  %v9621_v3 = vadd.f32 %v9620_v37, %v9588_v31  ;;  %v9158_v2 = vmul.f32 %v9157_v58, %v17010_v30  ;;  %v17939_v55 = vld [vmem:[#allocation62_spill] sm:$0xff]  ;;  %v7711_v51 = vmul.f32 0.5, %v16968_v27  ;;  %v17942_v27 = vld [vmem:[#allocation61_spill] sm:$0xff] }
 0xb31   : > { %v9144_v17 = vsel %vm9141_vm9, %v9143_v34, %v9139_v63  ;;  %v9257_v21 = vmul.f32 %v9221_v6, %v7709_v61  ;;  %v9183_v57 = vor.u32 1.1754944e-38, %v9182_v5  ;;  %vm9181_vm13 = vcmp.eq.f32.partialorder %v9180_v4, 8.507059e+37 }
 0xb32   : > { %v9145_v25 = vmul.f32 %v9144_v17, %v9120_v19  ;;  %v9654_v8 = vadd.f32 %v9653_v39, %v9621_v3  ;;  %v9159_v33 = vadd.f32 1.1283791, %v9158_v2  ;;  %v17941_v19 = vld [vmem:[#allocation65_spill] sm:$0xff] }
 0xb33   : > { %v9277_v13 = vpack.c.bf16 %v9257_v21, %v9257_v21  ;;  %v11111_v15 = vpop.eup %11110  ;;  %v9556_v32 = vpop.f32.mrf.mxu0 }
 0xb34   : > { %v10479_v38 = vclamps-f32 %v9145_v25, 1.0  ;;  %v9589_v50 = vpop.f32.mrf.mxu1  ;;  %v9172_v49 = vmul.f32 %v11111_v15, %v17070_v23  ;;  %v9557_v29 = vadd.f32 %v17033_v48, %v9556_v32  ;;  %v17086_v54 = vadd.f32 %v9654_v8, %v17939_v55  ;;  %v9622_v56 = vpop.f32.mrf.mxu2 }
 0xb35   : > { %9601 = vmatmul.bf16.gmra.mxu1 %v9277_v13  ;;  %vm9177_vm10 = vweird.f32 %v11111_v15  ;;  %v9655_v53 = vpop.f32.mrf.mxu3  ;;  %v9160_v40 = vmul.f32 %v9159_v33, %v16990_v14 }
 0xb36   : > { %v9222_v22 = vadd.f32 1.0, %v10479_v38  ;;  %v9173_v18 = vsub.f32 1.0, %v9172_v49  ;;  %v9590_v30 = vadd.f32 %v9589_v50, %v9557_v29  ;;  %9683 = vst [vmem:[#allocation2 + $0x18] sm:$0xff] %v17086_v54  ;;  %vm9178_vm12 = vmor %vm9176_vm11, %vm9177_vm10  ;;  %v17943_v49 = vld [vmem:[#allocation63_spill] sm:$0xff] }
 0xb38   : > { %v9258_v47 = vmul.f32 %v9222_v22, %v7710_v10  ;;  %v9174_v43 = vmul.f32 %v11111_v15, %v9173_v18  ;;  %v9623_v16 = vadd.f32 %v9622_v56, %v9590_v30  ;;  %v17944_v30 = vld [vmem:[#allocation67_spill] sm:$0xff] }
 0xb3a   : > { %v9278_v26 = vpack.c.bf16 %v9258_v47, %v9258_v47  ;;  %v9175_v59 = vadd.f32 %v11111_v15, %v9174_v43  ;;  %v9656_v41 = vadd.f32 %v9655_v53, %v9623_v16 }
 0xb3b   : > { %v9559_v52 = vpop.f32.mrf.mxu0 }
 0xb3c   : > { %9634 = vmatmul.bf16.gmra.mxu2 %v9278_v26  ;;  %v9179_v46 = vsel %vm9178_vm12, %v11111_v15, %v9175_v59  ;;  %v9560_v0 = vadd.f32 %v17033_v48, %v9559_v52  ;;  %v9592_v42 = vpop.f32.mrf.mxu1  ;;  %v17095_v7 = vadd.f32 %v9656_v41, %v17940_v24  ;;  %v9625_v1 = vpop.f32.mrf.mxu2 }
 0xb3d   : > { %v9184_v60 = vsel %vm9181_vm13, %v9183_v57, %v9179_v46  ;;  %v17945_v46 = vld [vmem:[#allocation68_spill] sm:$0xff] }
 0xb3e   : > { %v9185_v44 = vmul.f32 %v9184_v60, %v9160_v40  ;;  %v9593_v45 = vadd.f32 %v9592_v42, %v9560_v0  ;;  %9684 = vst [vmem:[#allocation2 + $0x10] sm:$0xff] %v17095_v7 }
 0xb40   : > { %v10480_v23 = vclamps-f32 %v9185_v44, 1.0  ;;  %v9626_v62 = vadd.f32 %v9625_v1, %v9593_v45 }
 0xb42   : > { %v9223_v14 = vadd.f32 1.0, %v10480_v23 }
 0xb43   : > { %v9561_v28 = vpop.f32.mrf.mxu0 }
 0xb44   : > { %v9259_v36 = vmul.f32 %v9223_v14, %v7711_v51  ;;  %v9562_v61 = vadd.f32 %v17033_v48, %v9561_v28  ;;  %v9594_v6 = vpop.f32.mrf.mxu1  ;;  %v9627_v17 = vpop.f32.mrf.mxu2 }
 0xb45   : > { %v9658_v9 = vpop.f32.mrf.mxu3 }
 0xb46   : > { %v9659_v20 = vadd.f32 %v9658_v9, %v9626_v62  ;;  %v9279_v63 = vpack.c.bf16 %v9259_v36, %v9259_v36  ;;  %v9595_v12 = vadd.f32 %v9594_v6, %v9562_v61 }
 0xb48   : > { %v17101_v34 = vadd.f32 %v9659_v20, %v17941_v19  ;;  %9667 = vmatmul.bf16.gmra.mxu3 %v9279_v63  ;;  %v9628_v58 = vadd.f32 %v9627_v17, %v9595_v12 }
 0xb4a   : > { %9685 = vst [vmem:[#allocation2 + $0x20] sm:$0xff] %v17101_v34 }
 0xb4d   : > { %v9660_v31 = vpop.f32.mrf.mxu3 }
 0xb4e   : > { %v9661_v25 = vadd.f32 %v9660_v31, %v9628_v58 }
 0xb50   : > { %v17105_v21 = vadd.f32 %v9661_v25, %v17942_v27 }
 0xb52   : > { %9686 = vst [vmem:[#allocation2 + $0x28] sm:$0xff] %v17105_v21 }
 0xb9d   : > { %v9564_v37 = vpop.f32.mrf.mxu0  ;;  %v9597_v3 = vpop.f32.mrf.mxu1 }
 0xb9e   : > { %v9565_v39 = vadd.f32 %v17033_v48, %v9564_v37 }
 0xba0   : > { %v9598_v13 = vadd.f32 %v9597_v3, %v9565_v39 }
 0xba4   : > { %v9630_v38 = vpop.f32.mrf.mxu2  ;;  %v9663_v32 = vpop.f32.mrf.mxu3 }
 0xba5   : > { %v9566_v15 = vpop.f32.mrf.mxu0  ;;  %v9631_v2 = vadd.f32 %v9630_v38, %v9598_v13  ;;  %v9599_v10 = vpop.f32.mrf.mxu1 }
 0xba6   : > { %v9567_v50 = vadd.f32 %v17033_v48, %v9566_v15 }
 0xba7   : > { %v9664_v8 = vadd.f32 %v9663_v32, %v9631_v2 }
 0xba8   : > { %v9600_v29 = vadd.f32 %v9599_v10, %v9567_v50 }
 0xba9   : > { %v17111_v22 = vadd.f32 %v9664_v8, %v17943_v49 }
 0xbab   : > { %9687 = vst [vmem:[#allocation2 + $0x40] sm:$0xff] %v17111_v22 }
 0xbac   : > { %v9632_v55 = vpop.f32.mrf.mxu2  ;;  %v9665_v33 = vpop.f32.mrf.mxu3 }
 0xbad   : > { %v9569_v18 = vpop.f32.mrf.mxu0  ;;  %v9633_v47 = vadd.f32 %v9632_v55, %v9600_v29 }
 0xbae   : > { %v9570_v16 = vadd.f32 %v17033_v48, %v9569_v18 }
 0xbaf   : > { %v9666_v5 = vadd.f32 %v9665_v33, %v9633_v47 }
 0xbb1   : > { %v17115_v43 = vadd.f32 %v9666_v5, %v17944_v30 }
 0xbb2   : > { %v9602_v4 = vpop.f32.mrf.mxu1 }
 0xbb3   : > { %9688 = vst [vmem:[#allocation2 + $0x38] sm:$0xff] %v17115_v43  ;;  %v9603_v57 = vadd.f32 %v9602_v4, %v9570_v16 }
 0xbb5   : > { %v9571_v26 = vpop.f32.mrf.mxu0 }
 0xbba   : > { %v9604_v56 = vpop.f32.mrf.mxu1 }
 0xbbf   : > { %v9635_v53 = vpop.f32.mrf.mxu2 }
 0xbc0   : > { %v9636_v52 = vadd.f32 %v9635_v53, %v9603_v57 }
 0xbc7   : > { %v9637_v59 = vpop.f32.mrf.mxu2 }
 0xbcb   : > { %v9668_v41 = vpop.f32.mrf.mxu3 }
 0xbcc   : > { %v9669_v40 = vadd.f32 %v9668_v41, %v9636_v52 }
 0xbce   : > { %v9680_v0 = vadd.f32 %v9669_v40, %v17945_v46 }
 0xbcf   : > { %9693 = sbr.rel (%p10609_p8) target bundleno = 3321 (0xcf9), region = 96 }
 0xbd0   : > { %9689 = vst [vmem:[#allocation2 + $0x8] sm:$0xff] %v9680_v0 }
 0xbd3   : > { %v9670_v42 = vpop.f32.mrf.mxu3 }
 0xbd4   : > { %9704 = vadd.xlane.f32.xlu2 %v17101_v34  ;;  %9700 = vadd.xlane.f32.xlu1 %v17086_v54  ;;  %v17947_v24 = vld [vmem:[#allocation9_spill] sm:$0xff] }
 0xbd5   : > { %9696 = vadd.xlane.f32.xlu0 %v17063_v11 }
 0xbdc   : > { %9706 = vadd.xlane.f32.xlu2 %v17105_v21  ;;  %9702 = vadd.xlane.f32.xlu1 %v17095_v7 }
 0xbdd   : > { %9698 = vadd.xlane.f32.xlu0 %v17078_v35 }
 0xbe4   : > { %9712 = vadd.xlane.f32.xlu2 %v9680_v0  ;;  %9710 = vadd.xlane.f32.xlu1 %v17115_v43 }
 0xbe5   : > { %9708 = vadd.xlane.f32.xlu0 %v17111_v22 }
 0xc47   : > { %v9705_v48 = vpop.xlane.xlu2 %9704  ;;  %v9701_v60 = vpop.xlane.xlu1 %9700 }
 0xc48   : > { %v9716_v44 = vmul.f32 %v9701_v60, %v17947_v24  ;;  %v9697_v45 = vpop.xlane.xlu0 %9696  ;;  %v9718_v17 = vmul.f32 %v9705_v48, %v17947_v24 }
 0xc49   : > { %v9714_v23 = vmul.f32 %v9697_v45, %v17947_v24 }
 0xc4a   : > { %v17132_v1 = vsub.f32 %v17086_v54, %v9716_v44  ;;  %v17162_v27 = vsub.f32 %v17101_v34, %v9718_v17 }
 0xc4b   : > { %v17135_v62 = vsub.f32 %v17063_v11, %v9714_v23 }
 0xc4c   : > { %v9734_v9 = vmul.f32 %v17132_v1, %v17132_v1  ;;  %v9736_v38 = vmul.f32 %v17162_v27, %v17162_v27 }
 0xc4d   : > { %v9732_v51 = vmul.f32 %v17135_v62, %v17135_v62 }
 0xc4e   : > { %9745 = vadd.xlane.f32.xlu2 %v9734_v9 }
 0xc4f   : > { %9741 = vadd.xlane.f32.xlu0 %v9732_v51  ;;  %v9707_v14 = vpop.xlane.xlu2 %9706  ;;  %v9703_v28 = vpop.xlane.xlu1 %9702 }
 0xc50   : > { %v9719_v20 = vmul.f32 %v9707_v14, %v17947_v24  ;;  %v9717_v36 = vmul.f32 %v9703_v28, %v17947_v24  ;;  %v9699_v61 = vpop.xlane.xlu0 %9698 }
 0xc51   : > { %v9715_v54 = vmul.f32 %v9699_v61, %v17947_v24 }
 0xc52   : > { %v17145_v11 = vsub.f32 %v17105_v21, %v9719_v20  ;;  %v17148_v19 = vsub.f32 %v17095_v7, %v9717_v36  ;;  %v17208_v36 = vld [vmem:[%s17948_s18] ss:$0 sm:$0xff] }
 0xc53   : > { %v17151_v63 = vsub.f32 %v17078_v35, %v9715_v54 }
 0xc54   : > { %v9737_v6 = vmul.f32 %v17145_v11, %v17145_v11  ;;  %v9735_v12 = vmul.f32 %v17148_v19, %v17148_v19 }
 0xc55   : > { %v9733_v58 = vmul.f32 %v17151_v63, %v17151_v63 }
 0xc56   : > { %9751 = vadd.xlane.f32.xlu2 %v9737_v6 }
 0xc57   : > { %9747 = vadd.xlane.f32.xlu0 %v9735_v12  ;;  %9743 = vadd.xlane.f32.xlu1 %v9733_v58  ;;  %v9713_v31 = vpop.xlane.xlu2 %9712  ;;  %v9711_v35 = vpop.xlane.xlu1 %9710 }
 0xc58   : > { %v9722_v7 = vmul.f32 %v9713_v31, %v17947_v24  ;;  %v9709_v25 = vpop.xlane.xlu0 %9708  ;;  %v9721_v3 = vmul.f32 %v9711_v35, %v17947_v24 }
 0xc59   : > { %v9720_v21 = vmul.f32 %v9709_v25, %v17947_v24 }
 0xc5a   : > { %v17165_v37 = vsub.f32 %v9680_v0, %v9722_v7  ;;  %v17178_v34 = vsub.f32 %v17115_v43, %v9721_v3  ;;  %v17221_v7 = vld [vmem:[%s17949_s24] ss:$0 sm:$0xff] }
 0xc5b   : > { %v17168_v39 = vsub.f32 %v17111_v22, %v9720_v21 }
 0xc5c   : > { %v9740_v13 = vmul.f32 %v17165_v37, %v17165_v37  ;;  %v9739_v2 = vmul.f32 %v17178_v34, %v17178_v34 }
 0xc5d   : > { %v9738_v15 = vmul.f32 %v17168_v39, %v17168_v39 }
 0xc5e   : > { %9757 = vadd.xlane.f32.xlu2 %v9740_v13 }
 0xc5f   : > { %9749 = vadd.xlane.f32.xlu1 %v9736_v38  ;;  %9753 = vadd.xlane.f32.xlu0 %v9738_v15 }
 0xc67   : > { %9755 = vadd.xlane.f32.xlu1 %v9739_v2 }
 0xcc1   : > { %v9746_v32 = vpop.xlane.xlu2 %9745 }
 0xcc2   : > { %v9761_v50 = vmul.f32 %v9746_v32, %v17947_v24  ;;  %v9742_v8 = vpop.xlane.xlu0 %9741 }
 0xcc3   : > { %v9759_v10 = vmul.f32 %v9742_v8, %v17947_v24 }
 0xcc4   : > { %v9770_v49 = vadd.f32 1e-06, %v9761_v50 }
 0xcc5   : > { %v9768_v22 = vadd.f32 1e-06, %v9759_v10 }
 0xcc6   : > { %11123 = vrsqrt.f32 %v9770_v49  ;;  %vm9803_vm14 = vweird.f32 %v9770_v49 }
 0xcc7   : > { %11125 = vrsqrt.f32 %v9768_v22  ;;  %vm9783_vm0 = vweird.f32 %v9768_v22 }
 0xcc9   : > { %v9752_v29 = vpop.xlane.xlu2 %9751 }
 0xcca   : > { %v9764_v55 = vmul.f32 %v9752_v29, %v17947_v24  ;;  %v9744_v18 = vpop.xlane.xlu1 %9743  ;;  %v9748_v47 = vpop.xlane.xlu0 %9747 }
 0xccb   : > { %v9760_v33 = vmul.f32 %v9744_v18, %v17947_v24  ;;  %v9762_v5 = vmul.f32 %v9748_v47, %v17947_v24 }
 0xccc   : > { %v11124_v30 = vpop.eup %11123  ;;  %v17187_v43 = vadd.f32 1e-06, %v9764_v55 }
 0xccd   : > { %v11126_v4 = vpop.eup %11125  ;;  %v9798_v26 = vmul.f32 %v11124_v30, %v9770_v49  ;;  %v17189_v56 = vadd.f32 1e-06, %v9760_v33  ;;  %v17191_v53 = vadd.f32 1e-06, %v9762_v5  ;;  %vm9804_vm15 = vweird.f32 %v11124_v30 }
 0xcce   : > { %v9778_v16 = vmul.f32 %v11126_v4, %v9768_v22  ;;  %11127 = vrsqrt.f32 %v17187_v43  ;;  %vm9784_vm1 = vweird.f32 %v11126_v4  ;;  %vm9833_vm2 = vweird.f32 %v17187_v43  ;;  %vm9805_vm3 = vmor %vm9803_vm14, %vm9804_vm15 }
 0xccf   : > { %v9799_v59 = vmul.f32 %v11124_v30, %v9798_v26  ;;  %11129 = vrsqrt.f32 %v17189_v56  ;;  %vm9785_vm4 = vmor %vm9783_vm0, %vm9784_vm1  ;;  %vm9813_vm5 = vweird.f32 %v17191_v53  ;;  %vm9793_vm10 = vweird.f32 %v17189_v56 }
 0xcd0   : > { %v9779_v57 = vmul.f32 %v11126_v4, %v9778_v16  ;;  %11131 = vrsqrt.f32 %v17191_v53 }
 0xcd1   : > { %v9800_v52 = vmul.f32 0.5, %v9799_v59  ;;  %v9758_v41 = vpop.xlane.xlu2 %9757 }
 0xcd2   : > { %v9780_v40 = vmul.f32 0.5, %v9779_v57  ;;  %v9767_v46 = vmul.f32 %v9758_v41, %v17947_v24  ;;  %v9750_v0 = vpop.xlane.xlu1 %9749  ;;  %v9754_v60 = vpop.xlane.xlu0 %9753 }
 0xcd3   : > { %v9801_v42 = vsub.f32 1.5, %v9800_v52  ;;  %v9763_v48 = vmul.f32 %v9750_v0, %v17947_v24  ;;  %v9765_v6 = vmul.f32 %v9754_v60, %v17947_v24 }
 0xcd4   : > { %v11128_v44 = vpop.eup %11127  ;;  %v9781_v45 = vsub.f32 1.5, %v9780_v40  ;;  %v17198_v23 = vadd.f32 1e-06, %v9767_v46 }
 0xcd5   : > { %v11130_v9 = vpop.eup %11129  ;;  %v9802_v51 = vmul.f32 %v11124_v30, %v9801_v42  ;;  %v9828_v14 = vmul.f32 %v11128_v44, %v17187_v43  ;;  %v17202_v28 = vadd.f32 1e-06, %v9763_v48  ;;  %vm9834_vm6 = vweird.f32 %v11128_v44 }
 0xcd6   : > { %v11132_v20 = vpop.eup %11131  ;;  %v9782_v61 = vmul.f32 %v11126_v4, %v9781_v45  ;;  %v9788_v54 = vmul.f32 %v11130_v9, %v17189_v56  ;;  %11133 = vrsqrt.f32 %v17198_v23  ;;  %vm9794_vm7 = vweird.f32 %v11130_v9  ;;  %vm9835_vm9 = vmor %vm9833_vm2, %vm9834_vm6 }
 0xcd7   : > { %v9806_v12 = vsel %vm9805_vm3, %v11124_v30, %v9802_v51  ;;  %v9829_v17 = vmul.f32 %v11128_v44, %v9828_v14  ;;  %v9808_v58 = vmul.f32 %v11132_v20, %v17191_v53  ;;  %11135 = vrsqrt.f32 %v17202_v28  ;;  %vm9795_vm11 = vmor %vm9793_vm10, %vm9794_vm7 }
 0xcd8   : > { %v9869_v31 = vmul.f32 %v9806_v12, %v17132_v1  ;;  %v9786_v25 = vsel %vm9785_vm4, %v11126_v4, %v9782_v61  ;;  %v9789_v35 = vmul.f32 %v11130_v9, %v9788_v54  ;;  %v17226_v1 = vadd.f32 1e-06, %v9765_v6 }
 0xcd9   : > { %v9867_v21 = vmul.f32 %v9786_v25, %v17135_v62  ;;  %v9830_v3 = vmul.f32 0.5, %v9829_v17  ;;  %v9809_v13 = vmul.f32 %v11132_v20, %v9808_v58  ;;  %vm9814_vm8 = vweird.f32 %v11132_v20 }
 0xcda   : > { %v9881_v38 = vmul.f32 %v17208_v36, %v9869_v31  ;;  %v9790_v15 = vmul.f32 0.5, %v9789_v35  ;;  %v9756_v2 = vpop.xlane.xlu1 %9755  ;;  %11137 = vrsqrt.f32 %v17226_v1  ;;  %vm9815_vm12 = vmor %vm9813_vm5, %vm9814_vm8  ;;  %vm9863_vm13 = vweird.f32 %v17198_v23 }
 0xcdb   : > { %v9879_v32 = vmul.f32 %v17208_v36, %v9867_v21  ;;  %v9831_v50 = vsub.f32 1.5, %v9830_v3  ;;  %v9810_v8 = vmul.f32 0.5, %v9809_v13  ;;  %v9766_v10 = vmul.f32 %v9756_v2, %v17947_v24 }
 0xcdc   : > { %v11134_v62 = vpop.eup %11133  ;;  %v9893_v49 = vadd.f32 %v17221_v7, %v9881_v38  ;;  %v9791_v22 = vsub.f32 1.5, %v9790_v15  ;;  %vm9823_vm1 = vweird.f32 %v17202_v28  ;;  %vm9843_vm3 = vweird.f32 %v17226_v1 }
 0xcdd   : > { %v9891_v29 = vadd.f32 %v17221_v7, %v9879_v32  ;;  %v9832_v55 = vmul.f32 %v11128_v44, %v9831_v50  ;;  %v9811_v18 = vsub.f32 1.5, %v9810_v8  ;;  %v9858_v47 = vmul.f32 %v11134_v62, %v17198_v23  ;;  %v11136_v5 = vpop.eup %11135 }
 0xcde   : > { %9902 = vst [vmem:[%s11380_s7 + $0x10] sm:$0xff] %v9893_v49  ;;  %v9792_v24 = vmul.f32 %v11130_v9, %v9791_v22  ;;  %v17239_v33 = vadd.f32 1e-06, %v9766_v10  ;;  %v9818_v43 = vmul.f32 %v11136_v5, %v17202_v28  ;;  %vm9864_vm14 = vweird.f32 %v11134_v62 }
 0xcdf   : > { %9900 = vst [vmem:[%s11380_s7] sm:$0xff] %v9891_v29  ;;  %v9836_v30 = vsel %vm9835_vm9, %v11128_v44, %v9832_v55  ;;  %v9812_v4 = vmul.f32 %v11132_v20, %v9811_v18  ;;  %v9859_v26 = vmul.f32 %v11134_v62, %v9858_v47  ;;  %vm9865_vm15 = vmor %vm9863_vm13, %vm9864_vm14  ;;  %vm9824_vm0 = vweird.f32 %v11136_v5 }
 0xce0   : > { %v9872_v16 = vmul.f32 %v9836_v30, %v17145_v11  ;;  %v9796_v59 = vsel %vm9795_vm11, %v11130_v9, %v9792_v24  ;;  %11139 = vrsqrt.f32 %v17239_v33  ;;  %v11138_v41 = vpop.eup %11137  ;;  %v9819_v11 = vmul.f32 %v11136_v5, %v9818_v43  ;;  %vm9825_vm2 = vmor %vm9823_vm1, %vm9824_vm0 }
 0xce1   : > { %v9868_v56 = vmul.f32 %v9796_v59, %v17151_v63  ;;  %v9816_v57 = vsel %vm9815_vm12, %v11132_v20, %v9812_v4  ;;  %v9860_v52 = vmul.f32 0.5, %v9859_v26  ;;  %v9838_v63 = vmul.f32 %v11138_v41, %v17226_v1 }
 0xce2   : > { %v9884_v40 = vmul.f32 %v17208_v36, %v9872_v16  ;;  %v9870_v46 = vmul.f32 %v9816_v57, %v17148_v19  ;;  %v9820_v60 = vmul.f32 0.5, %v9819_v11  ;;  %vm9844_vm4 = vweird.f32 %v11138_v41 }
 0xce3   : > { %v9880_v53 = vmul.f32 %v17208_v36, %v9868_v56  ;;  %v9861_v0 = vsub.f32 1.5, %v9860_v52  ;;  %v9839_v19 = vmul.f32 %v11138_v41, %v9838_v63  ;;  %vm9845_vm5 = vmor %vm9843_vm3, %vm9844_vm4  ;;  %vm9853_vm7 = vweird.f32 %v17239_v33 }
 0xce4   : > { %v9896_v42 = vadd.f32 %v17221_v7, %v9884_v40  ;;  %v9882_v48 = vmul.f32 %v17208_v36, %v9870_v46  ;;  %v9821_v9 = vsub.f32 1.5, %v9820_v60 }
 0xce5   : > { %v9892_v44 = vadd.f32 %v17221_v7, %v9880_v53  ;;  %v9862_v45 = vmul.f32 %v11134_v62, %v9861_v0  ;;  %v9840_v20 = vmul.f32 0.5, %v9839_v19 }
 0xce6   : > { %9905 = vst [vmem:[%s11380_s7 + $0x28] sm:$0xff] %v9896_v42  ;;  %v9894_v23 = vadd.f32 %v17221_v7, %v9882_v48  ;;  %v11140_v51 = vpop.eup %11139  ;;  %v9822_v54 = vmul.f32 %v11136_v5, %v9821_v9 }
 0xce7   : > { %9901 = vst [vmem:[%s11380_s7 + $0x8] sm:$0xff] %v9892_v44  ;;  %v9866_v14 = vsel %vm9865_vm15, %v11134_v62, %v9862_v45  ;;  %v9848_v6 = vmul.f32 %v11140_v51, %v17239_v33  ;;  %v9841_v12 = vsub.f32 1.5, %v9840_v20  ;;  %vm9854_vm6 = vweird.f32 %v11140_v51 }
 0xce8   : > { %9903 = vst [vmem:[%s11380_s7 + $0x18] sm:$0xff] %v9894_v23  ;;  %v9875_v61 = vmul.f32 %v9866_v14, %v17165_v37  ;;  %v9826_v58 = vsel %vm9825_vm2, %v11136_v5, %v9822_v54  ;;  %vm9855_vm8 = vmor %vm9853_vm7, %vm9854_vm6 }
 0xce9   : > { %v9849_v31 = vmul.f32 %v11140_v51, %v9848_v6  ;;  %v9871_v25 = vmul.f32 %v9826_v58, %v17162_v27  ;;  %v9842_v35 = vmul.f32 %v11138_v41, %v9841_v12 }
 0xcea   : > { %v9887_v17 = vmul.f32 %v17208_v36, %v9875_v61 }
 0xceb   : > { %v9850_v28 = vmul.f32 0.5, %v9849_v31  ;;  %v9883_v21 = vmul.f32 %v17208_v36, %v9871_v25  ;;  %v9846_v3 = vsel %vm9845_vm5, %v11138_v41, %v9842_v35 }
 0xcec   : > { %v9899_v37 = vadd.f32 %v17221_v7, %v9887_v17  ;;  %v9873_v13 = vmul.f32 %v9846_v3, %v17168_v39 }
 0xced   : > { %v9851_v38 = vsub.f32 1.5, %v9850_v28  ;;  %v9895_v15 = vadd.f32 %v17221_v7, %v9883_v21 }
 0xcee   : > { %9908 = vst [vmem:[%s11380_s7 + $0x40] sm:$0xff] %v9899_v37  ;;  %v9885_v1 = vmul.f32 %v17208_v36, %v9873_v13 }
 0xcef   : > { %v9852_v27 = vmul.f32 %v11140_v51, %v9851_v38  ;;  %9904 = vst [vmem:[%s11380_s7 + $0x20] sm:$0xff] %v9895_v15 }
 0xcf0   : > { %v9897_v2 = vadd.f32 %v17221_v7, %v9885_v1 }
 0xcf1   : > { %v9856_v32 = vsel %vm9855_vm8, %v11140_v51, %v9852_v27 }
 0xcf2   : > { %v9874_v50 = vmul.f32 %v9856_v32, %v17178_v34  ;;  %9906 = vst [vmem:[%s11380_s7 + $0x30] sm:$0xff] %v9897_v2 }
 0xcf4   : > { %v9886_v8 = vmul.f32 %v17208_v36, %v9874_v50 }
 0xcf6   : > { %v9898_v39 = vadd.f32 %v17221_v7, %v9886_v8 }
 0xcf8   : > { %9907 = vst [vmem:[%s11380_s7 + $0x38] sm:$0xff] %v9898_v39 }
 0xcf9 PF: > { %s17950_s1 = sld [smem:[#allocation6_spill]] }
 0xcfa   : > { %s17951_s24 = sld [smem:[#allocation4_spill]] }
 0xcfb   : > { %s17952_s25 = sld [smem:[#allocation5_spill]] }
 0xcfc   : > { %s17953_s26 = sld [smem:[#allocation7_spill]] }
 0xcfd   : > { %s17954_s27 = sld [smem:[#allocation8_spill]] }
 0xcff   : > { %s27_s28 = sadd.s32 1, %s17950_s1  }
 0xd00   : > { %p24_p9 = scmp.ge.s32.totalorder %s27_s28, 8  }
 0xd02   :  { %26 = sbr.rel (!%p24_p9) target bundleno = 10 (0xa), region = 162 }

</bundles_post_ra>
